<compile_context>
chip_gen: v5e
topology: v5e:2x2
jax: 0.10.0
libtpu: 0.0.40
codegen_flags: <defaults>
</compile_context>

<pallas_src>
import jax
import jax.numpy as jnp
from jax.experimental import pallas as pl
from jax.experimental.pallas import tpu as pltpu


def _softplus(x):
    # Numerically stable softplus using only exp/log (EUP) + max/abs (VPU).
    return jnp.maximum(x, 0.0) + jnp.log(1.0 + jnp.exp(-jnp.abs(x)))


def dann_kernel(fs_ref, ft_ref, w1_ref, b1_ref, w2_ref, b2_ref, w3_ref, b3_ref,
                ds_ref, dt_ref, bce_s_ref, bce_t_ref):
    """One row-tile of BOTH domains per grid step. No cross-tile state."""
    w1 = w1_ref[...]            # (F, H)  bf16, VMEM-resident (single-buffered)
    w2 = w2_ref[...]            # (H, H)  bf16, VMEM-resident
    b1 = b1_ref[...]            # (1, H)  f32
    b2 = b2_ref[...]            # (1, H)  f32
    w3 = w3_ref[...]            # (1, H)  f32 (final Linear(H,1) as a row vector)
    b3 = b3_ref[0, 0]           # scalar from SMEM

    def discriminator_logits(x_f32):
        # In-kernel f32->bf16 cast: features were DMA'd once as f32; the cast
        # is VPU work hidden under the feature DMA / MXU.
        x = x_f32.astype(jnp.bfloat16)
        h1 = jnp.dot(x, w1, preferred_element_type=jnp.float32) + b1
        h1 = jnp.maximum(h1, 0.0).astype(jnp.bfloat16)        # next MXU input
        h2 = jnp.dot(h1, w2, preferred_element_type=jnp.float32) + b2
        h2 = jnp.maximum(h2, 0.0)                              # f32 epilogue
        # Linear(H, 1): lane-dense VPU multiply + XLU lane reduction, then a
        # single sublane->lane relayout so the whole epilogue is lane-dense.
        logit = jnp.sum(h2 * w3, axis=-1) + b3                 # (tile_rows,)
        return logit.reshape(1, -1)                            # (1, tile_rows)

    logit_s = discriminator_logits(fs_ref[...])
    logit_t = discriminator_logits(ft_ref[...])

    # d = sigmoid(logits), emitted lane-dense (rows mapped to lanes).
    ds_ref[...] = jax.nn.sigmoid(logit_s).reshape(ds_ref.shape)
    dt_ref[...] = jax.nn.sigmoid(logit_t).reshape(dt_ref.shape)

    # BCE from logits: label 1 -> softplus(-x), label 0 -> softplus(x).
    # Clamp at 100 mirrors PyTorch BCELoss' log clamp at -100.  Per-row values
    # are emitted lane-dense; the final mean is a tiny wrapper reduction, so
    # the row grid carries no accumulator and can run "parallel" (v7x 2xTC).
    bce_s_ref[...] = jnp.minimum(_softplus(-logit_s), 100.0).reshape(bce_s_ref.shape)
    bce_t_ref[...] = jnp.minimum(_softplus(logit_t), 100.0).reshape(bce_t_ref.shape)


def _vmem_limit_bytes(tile_rows, feat, hidden):
    """Shape-derived VMEM budget instead of a hard-coded constant."""
    feat_bufs = 2 * 2 * tile_rows * feat * 4                    # 2 domains x 2 buffers, f32
    weights = (feat * hidden + hidden * hidden) * 2 + 3 * hidden * 4   # single-buffered
    interm = 2 * tile_rows * (feat * 2 + hidden * 10)           # x bf16 + h1 f32/bf16 + h2 f32
    outs = 4 * 2 * tile_rows * 4                                # lane-dense outputs, 2 buffers
    need = feat_bufs + weights + interm + outs
    # 1.5x headroom; clamp to [32 MiB, 48 MiB] to stay safe under v7x's 64 MiB
    # physical VMEM.  On v5e/v6e (128 MiB) raise toward ~96 MiB when sweeping
    # tile_rows up to 1024-2048.
    return int(min(max(need * 3 // 2, 32 << 20), 48 << 20))


def domain_adversarial_loss(f_s, f_t, params, *, tile_rows=None):
    """Returns (loss_scalar, accuracy_scalar, d) matching the PyTorch forward."""
    assert f_s.shape == f_t.shape
    n, feat = f_s.shape
    w1, b1, w2, b2, w3, b3 = params
    hidden = w1.shape[1]

    if tile_rows is None:
        # 512 keeps the working set comfortable on v7x (64 MiB VMEM);
        # sweep up to 1024-2048 on v5e/v6e (128 MiB VMEM).
        tile_rows = n if n <= 512 else 512
    assert n % tile_rows == 0, "batch must be divisible by tile_rows"
    num_tiles = n // tile_rows

    # Features stay f32 in HBM (cast to bf16 inside the kernel).  Only the
    # small, VMEM-resident weight matrices are pre-cast to bf16.
    w1b = w1.astype(jnp.bfloat16)
    w2b = w2.astype(jnp.bfloat16)
    b1f = b1.astype(jnp.float32).reshape(1, hidden)
    b2f = b2.astype(jnp.float32).reshape(1, hidden)
    w3f = w3.astype(jnp.float32).reshape(1, hidden)
    b3f = b3.astype(jnp.float32).reshape(1, 1)

    flops = 2 * (2 * n) * (feat * hidden + hidden * hidden + hidden)
    bytes_accessed = (2 * n * feat * 4                          # f32 features (read once)
                      + (feat * hidden + hidden * hidden) * 2   # bf16 weights
                      + 3 * hidden * 4 + 4                      # biases + w3 + b3
                      + 4 * n * 4)                              # d_s, d_t, bce_s, bce_t
    cost = pl.CostEstimate(flops=flops, transcendentals=4 * 2 * n,
                           bytes_accessed=bytes_accessed)

    out_shape = tuple(jax.ShapeDtypeStruct((num_tiles, 1, tile_rows), jnp.float32)
                      for _ in range(4))
    row_block = pl.BlockSpec((1, 1, tile_rows), lambda i: (i, 0, 0))

    def _resident(shape, mode):
        # Constant-index (VMEM-resident) operand; single-buffer when supported.
        idx = lambda i: (0,) * len(shape)
        if mode is None:
            return pl.BlockSpec(shape, idx)
        return pl.BlockSpec(shape, idx, pipeline_mode=mode)

    def _call(weight_mode):
        return pl.pallas_call(
            dann_kernel,
            out_shape=out_shape,
            grid_spec=pltpu.PrefetchScalarGridSpec(
                num_scalar_prefetch=0,
                grid=(num_tiles,),
                in_specs=[
                    pl.BlockSpec((tile_rows, feat), lambda i: (i, 0)),   # f_s tile (f32)
                    pl.BlockSpec((tile_rows, feat), lambda i: (i, 0)),   # f_t tile (f32)
                    _resident((feat, hidden), weight_mode),              # w1 (resident)
                    _resident((1, hidden), weight_mode),                 # b1
                    _resident((hidden, hidden), weight_mode),            # w2 (resident)
                    _resident((1, hidden), weight_mode),                 # b2
                    _resident((1, hidden), weight_mode),                 # w3 row
                    pl.BlockSpec(memory_space=pltpu.MemorySpace.SMEM),   # b3 scalar
                ],
                out_specs=(row_block, row_block, row_block, row_block),
            ),
            compiler_params=pltpu.CompilerParams(
                # No cross-tile state -> row tiles can shard across both
                # TensorCores on v7x.
                dimension_semantics=("parallel",),
                vmem_limit_bytes=_vmem_limit_bytes(tile_rows, feat, hidden),
            ),
            cost_estimate=cost,
        )(f_s, f_t, w1b, b1f, w2b, b2f, w3f, b3f)

    try:
        # Single-buffer the constant-index weight blocks to reclaim VMEM.
        d_s_t, d_t_t, bce_s_t, bce_t_t = _call(pl.Buffered(1))
    except Exception:  # pragma: no cover - jax without BlockSpec pipeline_mode
        d_s_t, d_t_t, bce_s_t, bce_t_t = _call(None)

    d_s = d_s_t.reshape(n, 1)
    d_t = d_t_t.reshape(n, 1)
    d = jnp.concatenate([d_s, d_t], axis=0)

    # Tiny wrapper-side reductions (keeps the row grid carry-free / parallel).
    loss = 0.5 * (jnp.mean(bce_s_t) + jnp.mean(bce_t_t))
    # binary_accuracy: pred = (d >= 0.5); source label 1, target label 0.
    acc = 50.0 * (jnp.mean((d_s >= 0.5).astype(jnp.float32))
                  + jnp.mean((d_t < 0.5).astype(jnp.float32)))
    return loss, acc, d


def init_discriminator_params(key, in_feature, hidden):
    """Deterministic init of a DomainDiscriminator-style MLP:
       Linear(F,H) -> ReLU -> Linear(H,H) -> ReLU -> Linear(H,1) -> Sigmoid.
       Weights stored as (in, out); the last layer is stored as a (1, H) row."""
    k1, k2, k3 = jax.random.split(key, 3)
    s1 = 1.0 / jnp.sqrt(in_feature)
    s2 = 1.0 / jnp.sqrt(hidden)
    w1 = jax.random.uniform(k1, (in_feature, hidden), jnp.float32, -s1, s1)
    b1 = jnp.zeros((1, hidden), jnp.float32)
    w2 = jax.random.uniform(k2, (hidden, hidden), jnp.float32, -s2, s2)
    b2 = jnp.zeros((1, hidden), jnp.float32)
    w3 = jax.random.uniform(k3, (1, hidden), jnp.float32, -s2, s2)
    b3 = jnp.zeros((1, 1), jnp.float32)
    return (w1, b1, w2, b2, w3, b3)


if __name__ == "__main__":
    # Lane-aligned small shapes (multiples of 128); grid of 2 row tiles.
    N, F, H = 256, 256, 128
    key = jax.random.PRNGKey(0)
    k_s, k_t, k_p = jax.random.split(key, 3)

    f_s = jax.random.normal(k_s, (N, F), jnp.float32)
    f_t = jax.random.normal(k_t, (N, F), jnp.float32)
    params = init_discriminator_params(k_p, F, H)

    loss, acc, d = domain_adversarial_loss(f_s, f_t, params, tile_rows=128)
    jax.block_until_ready((loss, acc, d))

    # Pure-JAX reference (same bf16 MXU path so tolerances stay tight).
    w1, b1, w2, b2, w3, b3 = params
    f = jnp.concatenate([f_s, f_t], axis=0)
    h1 = jnp.maximum(jnp.dot(f.astype(jnp.bfloat16), w1.astype(jnp.bfloat16),
                             preferred_element_type=jnp.float32) + b1, 0.0)
    h2 = jnp.maximum(jnp.dot(h1.astype(jnp.bfloat16), w2.astype(jnp.bfloat16),
                             preferred_element_type=jnp.float32) + b2, 0.0)
    logits = jnp.sum(h2 * w3, axis=-1, keepdims=True) + b3[0, 0]
    d_ref = jax.nn.sigmoid(logits)                     # (2N, 1)
    d_s_ref, d_t_ref = d_ref[:N], d_ref[N:]
    loss_ref = 0.5 * (jnp.mean(-jnp.maximum(jnp.log(d_s_ref), -100.0))
                      + jnp.mean(-jnp.maximum(jnp.log(1.0 - d_t_ref), -100.0)))
    acc_ref = 0.5 * (jnp.mean((d_s_ref >= 0.5).astype(jnp.float32)) * 100.0
                     + jnp.mean((d_t_ref < 0.5).astype(jnp.float32)) * 100.0)

    assert jnp.allclose(d, d_ref, atol=2e-3, rtol=1e-2), (d[:4], d_ref[:4])
    assert jnp.allclose(loss, loss_ref, atol=2e-3, rtol=1e-3), (loss, loss_ref)
    # Accuracy is a step function: allow one borderline prediction to flip.
    assert abs(float(acc) - float(acc_ref)) <= 100.0 / (2 * N) + 1e-3, (acc, acc_ref)

    print("KERNEL_OK")
</pallas_src>

<mosaic_0001>
module attributes {stable_mosaic.version = 11 : i64} {
  func.func @dann_kernel(%arg0: i32, %arg1: memref<128x256xf32, #tpu.memory_space<vmem>>, %arg2: memref<128x256xf32, #tpu.memory_space<vmem>>, %arg3: memref<256x128xbf16, #tpu.memory_space<vmem>>, %arg4: memref<1x128xf32, #tpu.memory_space<vmem>>, %arg5: memref<128x128xbf16, #tpu.memory_space<vmem>>, %arg6: memref<1x128xf32, #tpu.memory_space<vmem>>, %arg7: memref<1x128xf32, #tpu.memory_space<vmem>>, %arg8: memref<1x1xf32, #tpu.memory_space<smem>>, %arg9: memref<1x1x128xf32, #tpu.memory_space<vmem>>, %arg10: memref<1x1x128xf32, #tpu.memory_space<vmem>>, %arg11: memref<1x1x128xf32, #tpu.memory_space<vmem>>, %arg12: memref<1x1x128xf32, #tpu.memory_space<vmem>>) attributes {dimension_semantics = [#tpu.dimension_semantics<parallel>], iteration_bounds = array<i64: 2>, scalar_prefetch = 0 : i64, scratch_operands = 0 : i64, tpu.core_type = #tpu.core_type<tc>, window_params = [{transform_indices = @transform_0, window_bounds = array<i64: 128, 256>}, {transform_indices = @transform_1, window_bounds = array<i64: 128, 256>}, {pipeline_mode = #tpu.pipeline_mode<synchronous>, transform_indices = @transform_2, window_bounds = array<i64: 256, 128>}, {pipeline_mode = #tpu.pipeline_mode<synchronous>, transform_indices = @transform_3, window_bounds = array<i64: 1, 128>}, {pipeline_mode = #tpu.pipeline_mode<synchronous>, transform_indices = @transform_4, window_bounds = array<i64: 128, 128>}, {pipeline_mode = #tpu.pipeline_mode<synchronous>, transform_indices = @transform_5, window_bounds = array<i64: 1, 128>}, {pipeline_mode = #tpu.pipeline_mode<synchronous>, transform_indices = @transform_6, window_bounds = array<i64: 1, 128>}, {transform_indices = @transform_7, window_bounds = array<i64: 1, 1>}, {transform_indices = @transform_8, window_bounds = array<i64: 1, 1, 128>}, {transform_indices = @transform_9, window_bounds = array<i64: 1, 1, 128>}, {transform_indices = @transform_10, window_bounds = array<i64: 1, 1, 128>}, {transform_indices = @transform_11, window_bounds = array<i64: 1, 1, 128>}]} {
    %c0 = arith.constant 0 : index
    %c0_0 = arith.constant 0 : index
    %0 = vector.load %arg3[%c0, %c0_0] : memref<256x128xbf16, #tpu.memory_space<vmem>>, vector<256x128xbf16>
    %c0_1 = arith.constant 0 : index
    %c0_2 = arith.constant 0 : index
    %1 = vector.load %arg5[%c0_1, %c0_2] : memref<128x128xbf16, #tpu.memory_space<vmem>>, vector<128x128xbf16>
    %c0_3 = arith.constant 0 : index
    %c0_4 = arith.constant 0 : index
    %2 = vector.load %arg4[%c0_3, %c0_4] : memref<1x128xf32, #tpu.memory_space<vmem>>, vector<1x128xf32>
    %c0_5 = arith.constant 0 : index
    %c0_6 = arith.constant 0 : index
    %3 = vector.load %arg6[%c0_5, %c0_6] : memref<1x128xf32, #tpu.memory_space<vmem>>, vector<1x128xf32>
    %c0_7 = arith.constant 0 : index
    %c0_8 = arith.constant 0 : index
    %4 = vector.load %arg7[%c0_7, %c0_8] : memref<1x128xf32, #tpu.memory_space<vmem>>, vector<1x128xf32>
    %c0_9 = arith.constant 0 : index
    %c0_10 = arith.constant 0 : index
    %5 = memref.load %arg8[%c0_9, %c0_10] : memref<1x1xf32, #tpu.memory_space<smem>>
    %c0_11 = arith.constant 0 : index
    %c0_12 = arith.constant 0 : index
    %6 = vector.load %arg1[%c0_11, %c0_12] : memref<128x256xf32, #tpu.memory_space<vmem>>, vector<128x256xf32>
    %7 = arith.truncf %6 : vector<128x256xf32> to vector<128x256xbf16>
    %cst = arith.constant dense<0.000000e+00> : vector<128x128xf32>
    %8 = tpu.matmul %7, %0, %cst {dimension_numbers = #tpu.dot_dimension_numbers<[1], [0], [0], [1], [0, 0, 1, 1], [], []>} : vector<128x256xbf16>, vector<256x128xbf16>, vector<128x128xf32> -> vector<128x128xf32>
    %9 = vector.broadcast %2 : vector<1x128xf32> to vector<128x128xf32>
    %10 = arith.addf %8, %9 : vector<128x128xf32>
    %cst_13 = arith.constant 0.000000e+00 : f32
    %11 = vector.broadcast %cst_13 : f32 to vector<128x128xf32>
    %12 = arith.maximumf %10, %11 : vector<128x128xf32>
    %13 = arith.truncf %12 : vector<128x128xf32> to vector<128x128xbf16>
    %cst_14 = arith.constant dense<0.000000e+00> : vector<128x128xf32>
    %14 = tpu.matmul %13, %1, %cst_14 {dimension_numbers = #tpu.dot_dimension_numbers<[1], [0], [0], [1], [0, 0, 1, 1], [], []>} : vector<128x128xbf16>, vector<128x128xbf16>, vector<128x128xf32> -> vector<128x128xf32>
    %15 = vector.broadcast %3 : vector<1x128xf32> to vector<128x128xf32>
    %16 = arith.addf %14, %15 : vector<128x128xf32>
    %cst_15 = arith.constant 0.000000e+00 : f32
    %17 = vector.broadcast %cst_15 : f32 to vector<128x128xf32>
    %18 = arith.maximumf %16, %17 : vector<128x128xf32>
    %19 = vector.broadcast %4 : vector<1x128xf32> to vector<128x128xf32>
    %20 = arith.mulf %18, %19 : vector<128x128xf32>
    %cst_16 = arith.constant dense<0.000000e+00> : vector<128xf32>
    %21 = vector.multi_reduction <add>, %20, %cst_16 [1] : vector<128x128xf32> to vector<128xf32>
    %22 = vector.broadcast %5 : f32 to vector<128xf32>
    %23 = arith.addf %21, %22 : vector<128xf32>
    %24 = vector.shape_cast %23 : vector<128xf32> to vector<1x128xf32>
    %c0_17 = arith.constant 0 : index
    %c0_18 = arith.constant 0 : index
    %25 = vector.load %arg2[%c0_17, %c0_18] : memref<128x256xf32, #tpu.memory_space<vmem>>, vector<128x256xf32>
    %26 = arith.truncf %25 : vector<128x256xf32> to vector<128x256xbf16>
    %cst_19 = arith.constant dense<0.000000e+00> : vector<128x128xf32>
    %27 = tpu.matmul %26, %0, %cst_19 {dimension_numbers = #tpu.dot_dimension_numbers<[1], [0], [0], [1], [0, 0, 1, 1], [], []>} : vector<128x256xbf16>, vector<256x128xbf16>, vector<128x128xf32> -> vector<128x128xf32>
    %28 = vector.broadcast %2 : vector<1x128xf32> to vector<128x128xf32>
    %29 = arith.addf %27, %28 : vector<128x128xf32>
    %cst_20 = arith.constant 0.000000e+00 : f32
    %30 = vector.broadcast %cst_20 : f32 to vector<128x128xf32>
    %31 = arith.maximumf %29, %30 : vector<128x128xf32>
    %32 = arith.truncf %31 : vector<128x128xf32> to vector<128x128xbf16>
    %cst_21 = arith.constant dense<0.000000e+00> : vector<128x128xf32>
    %33 = tpu.matmul %32, %1, %cst_21 {dimension_numbers = #tpu.dot_dimension_numbers<[1], [0], [0], [1], [0, 0, 1, 1], [], []>} : vector<128x128xbf16>, vector<128x128xbf16>, vector<128x128xf32> -> vector<128x128xf32>
    %34 = vector.broadcast %3 : vector<1x128xf32> to vector<128x128xf32>
    %35 = arith.addf %33, %34 : vector<128x128xf32>
    %cst_22 = arith.constant 0.000000e+00 : f32
    %36 = vector.broadcast %cst_22 : f32 to vector<128x128xf32>
    %37 = arith.maximumf %35, %36 : vector<128x128xf32>
    %38 = vector.broadcast %4 : vector<1x128xf32> to vector<128x128xf32>
    %39 = arith.mulf %37, %38 : vector<128x128xf32>
    %cst_23 = arith.constant dense<0.000000e+00> : vector<128xf32>
    %40 = vector.multi_reduction <add>, %39, %cst_23 [1] : vector<128x128xf32> to vector<128xf32>
    %41 = vector.broadcast %5 : f32 to vector<128xf32>
    %42 = arith.addf %40, %41 : vector<128xf32>
    %43 = vector.shape_cast %42 : vector<128xf32> to vector<1x128xf32>
    %44 = arith.negf %24 : vector<1x128xf32>
    %45 = math.exp %44 : vector<1x128xf32>
    %cst_24 = arith.constant 1.000000e+00 : f32
    %46 = vector.broadcast %cst_24 : f32 to vector<1x128xf32>
    %47 = arith.addf %46, %45 : vector<1x128xf32>
    %48 = arith.divf %46, %47 : vector<1x128xf32>
    %49 = vector.shape_cast %48 : vector<1x128xf32> to vector<1x1x128xf32>
    %c0_25 = arith.constant 0 : index
    %c0_26 = arith.constant 0 : index
    %c0_27 = arith.constant 0 : index
    %50 = vector.load %arg9[%c0_25, %c0_26, %c0_27] : memref<1x1x128xf32, #tpu.memory_space<vmem>>, vector<1x1x128xf32>
    tpu.vector_store %arg9[%c0_25, %c0_26, %c0_27], %49 {strides = array<i32>} : memref<1x1x128xf32, #tpu.memory_space<vmem>>, vector<1x1x128xf32>,
    %51 = arith.negf %43 : vector<1x128xf32>
    %52 = math.exp %51 : vector<1x128xf32>
    %cst_28 = arith.constant 1.000000e+00 : f32
    %53 = vector.broadcast %cst_28 : f32 to vector<1x128xf32>
    %54 = arith.addf %53, %52 : vector<1x128xf32>
    %55 = arith.divf %53, %54 : vector<1x128xf32>
    %56 = vector.shape_cast %55 : vector<1x128xf32> to vector<1x1x128xf32>
    %c0_29 = arith.constant 0 : index
    %c0_30 = arith.constant 0 : index
    %c0_31 = arith.constant 0 : index
    %57 = vector.load %arg10[%c0_29, %c0_30, %c0_31] : memref<1x1x128xf32, #tpu.memory_space<vmem>>, vector<1x1x128xf32>
    tpu.vector_store %arg10[%c0_29, %c0_30, %c0_31], %56 {strides = array<i32>} : memref<1x1x128xf32, #tpu.memory_space<vmem>>, vector<1x1x128xf32>,
    %cst_32 = arith.constant 0.000000e+00 : f32
    %58 = vector.broadcast %cst_32 : f32 to vector<1x128xf32>
    %59 = arith.subf %58, %24 : vector<1x128xf32>
    %cst_33 = arith.constant 0.000000e+00 : f32
    %60 = vector.broadcast %cst_33 : f32 to vector<1x128xf32>
    %61 = arith.maximumf %59, %60 : vector<1x128xf32>
    %62 = math.absf %59 : vector<1x128xf32>
    %cst_34 = arith.constant 0.000000e+00 : f32
    %63 = vector.broadcast %cst_34 : f32 to vector<1x128xf32>
    %64 = arith.subf %63, %62 : vector<1x128xf32>
    %65 = math.exp %64 : vector<1x128xf32>
    %cst_35 = arith.constant 1.000000e+00 : f32
    %66 = vector.broadcast %cst_35 : f32 to vector<1x128xf32>
    %67 = arith.addf %66, %65 : vector<1x128xf32>
    %68 = math.log %67 : vector<1x128xf32>
    %69 = arith.addf %61, %68 : vector<1x128xf32>
    %cst_36 = arith.constant 1.000000e+02 : f32
    %70 = vector.broadcast %cst_36 : f32 to vector<1x128xf32>
    %71 = arith.minimumf %69, %70 : vector<1x128xf32>
    %72 = vector.shape_cast %71 : vector<1x128xf32> to vector<1x1x128xf32>
    %c0_37 = arith.constant 0 : index
    %c0_38 = arith.constant 0 : index
    %c0_39 = arith.constant 0 : index
    %73 = vector.load %arg11[%c0_37, %c0_38, %c0_39] : memref<1x1x128xf32, #tpu.memory_space<vmem>>, vector<1x1x128xf32>
    tpu.vector_store %arg11[%c0_37, %c0_38, %c0_39], %72 {strides = array<i32>} : memref<1x1x128xf32, #tpu.memory_space<vmem>>, vector<1x1x128xf32>,
    %cst_40 = arith.constant 0.000000e+00 : f32
    %74 = vector.broadcast %cst_40 : f32 to vector<1x128xf32>
    %75 = arith.maximumf %43, %74 : vector<1x128xf32>
    %76 = math.absf %43 : vector<1x128xf32>
    %cst_41 = arith.constant 0.000000e+00 : f32
    %77 = vector.broadcast %cst_41 : f32 to vector<1x128xf32>
    %78 = arith.subf %77, %76 : vector<1x128xf32>
    %79 = math.exp %78 : vector<1x128xf32>
    %cst_42 = arith.constant 1.000000e+00 : f32
    %80 = vector.broadcast %cst_42 : f32 to vector<1x128xf32>
    %81 = arith.addf %80, %79 : vector<1x128xf32>
    %82 = math.log %81 : vector<1x128xf32>
    %83 = arith.addf %75, %82 : vector<1x128xf32>
    %cst_43 = arith.constant 1.000000e+02 : f32
    %84 = vector.broadcast %cst_43 : f32 to vector<1x128xf32>
    %85 = arith.minimumf %83, %84 : vector<1x128xf32>
    %86 = vector.shape_cast %85 : vector<1x128xf32> to vector<1x1x128xf32>
    %c0_44 = arith.constant 0 : index
    %c0_45 = arith.constant 0 : index
    %c0_46 = arith.constant 0 : index
    %87 = vector.load %arg12[%c0_44, %c0_45, %c0_46] : memref<1x1x128xf32, #tpu.memory_space<vmem>>, vector<1x1x128xf32>
    tpu.vector_store %arg12[%c0_44, %c0_45, %c0_46], %86 {strides = array<i32>} : memref<1x1x128xf32, #tpu.memory_space<vmem>>, vector<1x1x128xf32>,
    return
  }
  func.func @transform_0(%arg0: i32) -> (i32, i32) {
    %c0_i32 = arith.constant 0 : i32
    %c0_i32_0 = arith.constant 0 : i32
    return %arg0, %c0_i32 : i32, i32
  }
  func.func @transform_1(%arg0: i32) -> (i32, i32) {
    %c0_i32 = arith.constant 0 : i32
    %c0_i32_0 = arith.constant 0 : i32
    return %arg0, %c0_i32 : i32, i32
  }
  func.func @transform_2(%arg0: i32) -> (i32, i32) {
    %c0_i32 = arith.constant 0 : i32
    %c0_i32_0 = arith.constant 0 : i32
    %c0_i32_1 = arith.constant 0 : i32
    return %c0_i32, %c0_i32_0 : i32, i32
  }
  func.func @transform_3(%arg0: i32) -> (i32, i32) {
    %c0_i32 = arith.constant 0 : i32
    %c0_i32_0 = arith.constant 0 : i32
    %c0_i32_1 = arith.constant 0 : i32
    return %c0_i32, %c0_i32_0 : i32, i32
  }
  func.func @transform_4(%arg0: i32) -> (i32, i32) {
    %c0_i32 = arith.constant 0 : i32
    %c0_i32_0 = arith.constant 0 : i32
    %c0_i32_1 = arith.constant 0 : i32
    return %c0_i32, %c0_i32_0 : i32, i32
  }
  func.func @transform_5(%arg0: i32) -> (i32, i32) {
    %c0_i32 = arith.constant 0 : i32
    %c0_i32_0 = arith.constant 0 : i32
    %c0_i32_1 = arith.constant 0 : i32
    return %c0_i32, %c0_i32_0 : i32, i32
  }
  func.func @transform_6(%arg0: i32) -> (i32, i32) {
    %c0_i32 = arith.constant 0 : i32
    %c0_i32_0 = arith.constant 0 : i32
    %c0_i32_1 = arith.constant 0 : i32
    return %c0_i32, %c0_i32_0 : i32, i32
  }
  func.func @transform_7(%arg0: i32) -> (i32, i32) {
    %c0_i32 = arith.constant 0 : i32
    %c0_i32_0 = arith.constant 0 : i32
    %c0_i32_1 = arith.constant 0 : i32
    return %c0_i32, %c0_i32_0 : i32, i32
  }
  func.func @transform_8(%arg0: i32) -> (i32, i32, i32) {
    %c0_i32 = arith.constant 0 : i32
    %c0_i32_0 = arith.constant 0 : i32
    %c0_i32_1 = arith.constant 0 : i32
    return %arg0, %c0_i32, %c0_i32_0 : i32, i32, i32
  }
  func.func @transform_9(%arg0: i32) -> (i32, i32, i32) {
    %c0_i32 = arith.constant 0 : i32
    %c0_i32_0 = arith.constant 0 : i32
    %c0_i32_1 = arith.constant 0 : i32
    return %arg0, %c0_i32, %c0_i32_0 : i32, i32, i32
  }
  func.func @transform_10(%arg0: i32) -> (i32, i32, i32) {
    %c0_i32 = arith.constant 0 : i32
    %c0_i32_0 = arith.constant 0 : i32
    %c0_i32_1 = arith.constant 0 : i32
    return %arg0, %c0_i32, %c0_i32_0 : i32, i32, i32
  }
  func.func @transform_11(%arg0: i32) -> (i32, i32, i32) {
    %c0_i32 = arith.constant 0 : i32
    %c0_i32_0 = arith.constant 0 : i32
    %c0_i32_1 = arith.constant 0 : i32
    return %arg0, %c0_i32, %c0_i32_0 : i32, i32, i32
  }
}

module attributes {stable_mosaic.version = 11 : i64} {
  func.func @dann_kernel(%arg0: i32, %arg1: memref<128x256xf32, #tpu.memory_space<vmem>>, %arg2: memref<128x256xf32, #tpu.memory_space<vmem>>, %arg3: memref<256x128xbf16, #tpu.memory_space<vmem>>, %arg4: memref<1x128xf32, #tpu.memory_space<vmem>>, %arg5: memref<128x128xbf16, #tpu.memory_space<vmem>>, %arg6: memref<1x128xf32, #tpu.memory_space<vmem>>, %arg7: memref<1x128xf32, #tpu.memory_space<vmem>>, %arg8: memref<1x1xf32, #tpu.memory_space<smem>>, %arg9: memref<1x1x128xf32, #tpu.memory_space<vmem>>, %arg10: memref<1x1x128xf32, #tpu.memory_space<vmem>>, %arg11: memref<1x1x128xf32, #tpu.memory_space<vmem>>, %arg12: memref<1x1x128xf32, #tpu.memory_space<vmem>>) attributes {dimension_semantics = [#tpu.dimension_semantics<parallel>], iteration_bounds = array<i64: 2>, scalar_prefetch = 0 : i64, scratch_operands = 0 : i64, tpu.core_type = #tpu.core_type<tc>, window_params = [{transform_indices = @transform_0, window_bounds = array<i64: 128, 256>}, {transform_indices = @transform_1, window_bounds = array<i64: 128, 256>}, {pipeline_mode = #tpu.pipeline_mode<synchronous>, transform_indices = @transform_2, window_bounds = array<i64: 256, 128>}, {pipeline_mode = #tpu.pipeline_mode<synchronous>, transform_indices = @transform_3, window_bounds = array<i64: 1, 128>}, {pipeline_mode = #tpu.pipeline_mode<synchronous>, transform_indices = @transform_4, window_bounds = array<i64: 128, 128>}, {pipeline_mode = #tpu.pipeline_mode<synchronous>, transform_indices = @transform_5, window_bounds = array<i64: 1, 128>}, {pipeline_mode = #tpu.pipeline_mode<synchronous>, transform_indices = @transform_6, window_bounds = array<i64: 1, 128>}, {transform_indices = @transform_7, window_bounds = array<i64: 1, 1>}, {transform_indices = @transform_8, window_bounds = array<i64: 1, 1, 128>}, {transform_indices = @transform_9, window_bounds = array<i64: 1, 1, 128>}, {transform_indices = @transform_10, window_bounds = array<i64: 1, 1, 128>}, {transform_indices = @transform_11, window_bounds = array<i64: 1, 1, 128>}]} {
    %c0 = arith.constant 0 : index
    %c0_0 = arith.constant 0 : index
    %0 = vector.load %arg3[%c0, %c0_0] : memref<256x128xbf16, #tpu.memory_space<vmem>>, vector<256x128xbf16>
    %c0_1 = arith.constant 0 : index
    %c0_2 = arith.constant 0 : index
    %1 = vector.load %arg5[%c0_1, %c0_2] : memref<128x128xbf16, #tpu.memory_space<vmem>>, vector<128x128xbf16>
    %c0_3 = arith.constant 0 : index
    %c0_4 = arith.constant 0 : index
    %2 = vector.load %arg4[%c0_3, %c0_4] : memref<1x128xf32, #tpu.memory_space<vmem>>, vector<1x128xf32>
    %c0_5 = arith.constant 0 : index
    %c0_6 = arith.constant 0 : index
    %3 = vector.load %arg6[%c0_5, %c0_6] : memref<1x128xf32, #tpu.memory_space<vmem>>, vector<1x128xf32>
    %c0_7 = arith.constant 0 : index
    %c0_8 = arith.constant 0 : index
    %4 = vector.load %arg7[%c0_7, %c0_8] : memref<1x128xf32, #tpu.memory_space<vmem>>, vector<1x128xf32>
    %c0_9 = arith.constant 0 : index
    %c0_10 = arith.constant 0 : index
    %5 = memref.load %arg8[%c0_9, %c0_10] : memref<1x1xf32, #tpu.memory_space<smem>>
    %c0_11 = arith.constant 0 : index
    %c0_12 = arith.constant 0 : index
    %6 = vector.load %arg1[%c0_11, %c0_12] : memref<128x256xf32, #tpu.memory_space<vmem>>, vector<128x256xf32>
    %7 = arith.truncf %6 : vector<128x256xf32> to vector<128x256xbf16>
    %cst = arith.constant dense<0.000000e+00> : vector<128x128xf32>
    %8 = tpu.matmul %7, %0, %cst {dimension_numbers = #tpu.dot_dimension_numbers<[1], [0], [0], [1], [0, 0, 1, 1], [], []>} : vector<128x256xbf16>, vector<256x128xbf16>, vector<128x128xf32> -> vector<128x128xf32>
    %9 = vector.broadcast %2 : vector<1x128xf32> to vector<128x128xf32>
    %10 = arith.addf %8, %9 : vector<128x128xf32>
    %cst_13 = arith.constant 0.000000e+00 : f32
    %11 = vector.broadcast %cst_13 : f32 to vector<128x128xf32>
    %12 = arith.maximumf %10, %11 : vector<128x128xf32>
    %13 = arith.truncf %12 : vector<128x128xf32> to vector<128x128xbf16>
    %cst_14 = arith.constant dense<0.000000e+00> : vector<128x128xf32>
    %14 = tpu.matmul %13, %1, %cst_14 {dimension_numbers = #tpu.dot_dimension_numbers<[1], [0], [0], [1], [0, 0, 1, 1], [], []>} : vector<128x128xbf16>, vector<128x128xbf16>, vector<128x128xf32> -> vector<128x128xf32>
    %15 = vector.broadcast %3 : vector<1x128xf32> to vector<128x128xf32>
    %16 = arith.addf %14, %15 : vector<128x128xf32>
    %cst_15 = arith.constant 0.000000e+00 : f32
    %17 = vector.broadcast %cst_15 : f32 to vector<128x128xf32>
    %18 = arith.maximumf %16, %17 : vector<128x128xf32>
    %19 = vector.broadcast %4 : vector<1x128xf32> to vector<128x128xf32>
    %20 = arith.mulf %18, %19 : vector<128x128xf32>
    %cst_16 = arith.constant dense<0.000000e+00> : vector<128xf32>
    %21 = vector.multi_reduction <add>, %20, %cst_16 [1] : vector<128x128xf32> to vector<128xf32>
    %22 = vector.broadcast %5 : f32 to vector<128xf32>
    %23 = arith.addf %21, %22 : vector<128xf32>
    %24 = vector.shape_cast %23 : vector<128xf32> to vector<1x128xf32>
    %c0_17 = arith.constant 0 : index
    %c0_18 = arith.constant 0 : index
    %25 = vector.load %arg2[%c0_17, %c0_18] : memref<128x256xf32, #tpu.memory_space<vmem>>, vector<128x256xf32>
    %26 = arith.truncf %25 : vector<128x256xf32> to vector<128x256xbf16>
    %cst_19 = arith.constant dense<0.000000e+00> : vector<128x128xf32>
    %27 = tpu.matmul %26, %0, %cst_19 {dimension_numbers = #tpu.dot_dimension_numbers<[1], [0], [0], [1], [0, 0, 1, 1], [], []>} : vector<128x256xbf16>, vector<256x128xbf16>, vector<128x128xf32> -> vector<128x128xf32>
    %28 = vector.broadcast %2 : vector<1x128xf32> to vector<128x128xf32>
    %29 = arith.addf %27, %28 : vector<128x128xf32>
    %cst_20 = arith.constant 0.000000e+00 : f32
    %30 = vector.broadcast %cst_20 : f32 to vector<128x128xf32>
    %31 = arith.maximumf %29, %30 : vector<128x128xf32>
    %32 = arith.truncf %31 : vector<128x128xf32> to vector<128x128xbf16>
    %cst_21 = arith.constant dense<0.000000e+00> : vector<128x128xf32>
    %33 = tpu.matmul %32, %1, %cst_21 {dimension_numbers = #tpu.dot_dimension_numbers<[1], [0], [0], [1], [0, 0, 1, 1], [], []>} : vector<128x128xbf16>, vector<128x128xbf16>, vector<128x128xf32> -> vector<128x128xf32>
    %34 = vector.broadcast %3 : vector<1x128xf32> to vector<128x128xf32>
    %35 = arith.addf %33, %34 : vector<128x128xf32>
    %cst_22 = arith.constant 0.000000e+00 : f32
    %36 = vector.broadcast %cst_22 : f32 to vector<128x128xf32>
    %37 = arith.maximumf %35, %36 : vector<128x128xf32>
    %38 = vector.broadcast %4 : vector<1x128xf32> to vector<128x128xf32>
    %39 = arith.mulf %37, %38 : vector<128x128xf32>
    %cst_23 = arith.constant dense<0.000000e+00> : vector<128xf32>
    %40 = vector.multi_reduction <add>, %39, %cst_23 [1] : vector<128x128xf32> to vector<128xf32>
    %41 = vector.broadcast %5 : f32 to vector<128xf32>
    %42 = arith.addf %40, %41 : vector<128xf32>
    %43 = vector.shape_cast %42 : vector<128xf32> to vector<1x128xf32>
    %44 = arith.negf %24 : vector<1x128xf32>
    %45 = math.exp %44 : vector<1x128xf32>
    %cst_24 = arith.constant 1.000000e+00 : f32
    %46 = vector.broadcast %cst_24 : f32 to vector<1x128xf32>
    %47 = arith.addf %46, %45 : vector<1x128xf32>
    %48 = arith.divf %46, %47 : vector<1x128xf32>
    %49 = vector.shape_cast %48 : vector<1x128xf32> to vector<1x1x128xf32>
    %c0_25 = arith.constant 0 : index
    %c0_26 = arith.constant 0 : index
    %c0_27 = arith.constant 0 : index
    %50 = vector.load %arg9[%c0_25, %c0_26, %c0_27] : memref<1x1x128xf32, #tpu.memory_space<vmem>>, vector<1x1x128xf32>
    tpu.vector_store %arg9[%c0_25, %c0_26, %c0_27], %49 {strides = array<i32>} : memref<1x1x128xf32, #tpu.memory_space<vmem>>, vector<1x1x128xf32>,
    %51 = arith.negf %43 : vector<1x128xf32>
    %52 = math.exp %51 : vector<1x128xf32>
    %cst_28 = arith.constant 1.000000e+00 : f32
    %53 = vector.broadcast %cst_28 : f32 to vector<1x128xf32>
    %54 = arith.addf %53, %52 : vector<1x128xf32>
    %55 = arith.divf %53, %54 : vector<1x128xf32>
    %56 = vector.shape_cast %55 : vector<1x128xf32> to vector<1x1x128xf32>
    %c0_29 = arith.constant 0 : index
    %c0_30 = arith.constant 0 : index
    %c0_31 = arith.constant 0 : index
    %57 = vector.load %arg10[%c0_29, %c0_30, %c0_31] : memref<1x1x128xf32, #tpu.memory_space<vmem>>, vector<1x1x128xf32>
    tpu.vector_store %arg10[%c0_29, %c0_30, %c0_31], %56 {strides = array<i32>} : memref<1x1x128xf32, #tpu.memory_space<vmem>>, vector<1x1x128xf32>,
    %cst_32 = arith.constant 0.000000e+00 : f32
    %58 = vector.broadcast %cst_32 : f32 to vector<1x128xf32>
    %59 = arith.subf %58, %24 : vector<1x128xf32>
    %cst_33 = arith.constant 0.000000e+00 : f32
    %60 = vector.broadcast %cst_33 : f32 to vector<1x128xf32>
    %61 = arith.maximumf %59, %60 : vector<1x128xf32>
    %62 = math.absf %59 : vector<1x128xf32>
    %cst_34 = arith.constant 0.000000e+00 : f32
    %63 = vector.broadcast %cst_34 : f32 to vector<1x128xf32>
    %64 = arith.subf %63, %62 : vector<1x128xf32>
    %65 = math.exp %64 : vector<1x128xf32>
    %cst_35 = arith.constant 1.000000e+00 : f32
    %66 = vector.broadcast %cst_35 : f32 to vector<1x128xf32>
    %67 = arith.addf %66, %65 : vector<1x128xf32>
    %68 = math.log %67 : vector<1x128xf32>
    %69 = arith.addf %61, %68 : vector<1x128xf32>
    %cst_36 = arith.constant 1.000000e+02 : f32
    %70 = vector.broadcast %cst_36 : f32 to vector<1x128xf32>
    %71 = arith.minimumf %69, %70 : vector<1x128xf32>
    %72 = vector.shape_cast %71 : vector<1x128xf32> to vector<1x1x128xf32>
    %c0_37 = arith.constant 0 : index
    %c0_38 = arith.constant 0 : index
    %c0_39 = arith.constant 0 : index
    %73 = vector.load %arg11[%c0_37, %c0_38, %c0_39] : memref<1x1x128xf32, #tpu.memory_space<vmem>>, vector<1x1x128xf32>
    tpu.vector_store %arg11[%c0_37, %c0_38, %c0_39], %72 {strides = array<i32>} : memref<1x1x128xf32, #tpu.memory_space<vmem>>, vector<1x1x128xf32>,
    %cst_40 = arith.constant 0.000000e+00 : f32
    %74 = vector.broadcast %cst_40 : f32 to vector<1x128xf32>
    %75 = arith.maximumf %43, %74 : vector<1x128xf32>
    %76 = math.absf %43 : vector<1x128xf32>
    %cst_41 = arith.constant 0.000000e+00 : f32
    %77 = vector.broadcast %cst_41 : f32 to vector<1x128xf32>
    %78 = arith.subf %77, %76 : vector<1x128xf32>
    %79 = math.exp %78 : vector<1x128xf32>
    %cst_42 = arith.constant 1.000000e+00 : f32
    %80 = vector.broadcast %cst_42 : f32 to vector<1x128xf32>
    %81 = arith.addf %80, %79 : vector<1x128xf32>
    %82 = math.log %81 : vector<1x128xf32>
    %83 = arith.addf %75, %82 : vector<1x128xf32>
    %cst_43 = arith.constant 1.000000e+02 : f32
    %84 = vector.broadcast %cst_43 : f32 to vector<1x128xf32>
    %85 = arith.minimumf %83, %84 : vector<1x128xf32>
    %86 = vector.shape_cast %85 : vector<1x128xf32> to vector<1x1x128xf32>
    %c0_44 = arith.constant 0 : index
    %c0_45 = arith.constant 0 : index
    %c0_46 = arith.constant 0 : index
    %87 = vector.load %arg12[%c0_44, %c0_45, %c0_46] : memref<1x1x128xf32, #tpu.memory_space<vmem>>, vector<1x1x128xf32>
    tpu.vector_store %arg12[%c0_44, %c0_45, %c0_46], %86 {strides = array<i32>} : memref<1x1x128xf32, #tpu.memory_space<vmem>>, vector<1x1x128xf32>,
    return
  }
  func.func @transform_0(%arg0: i32) -> (i32, i32) {
    %c0_i32 = arith.constant 0 : i32
    %c0_i32_0 = arith.constant 0 : i32
    return %arg0, %c0_i32 : i32, i32
  }
  func.func @transform_1(%arg0: i32) -> (i32, i32) {
    %c0_i32 = arith.constant 0 : i32
    %c0_i32_0 = arith.constant 0 : i32
    return %arg0, %c0_i32 : i32, i32
  }
  func.func @transform_2(%arg0: i32) -> (i32, i32) {
    %c0_i32 = arith.constant 0 : i32
    %c0_i32_0 = arith.constant 0 : i32
    %c0_i32_1 = arith.constant 0 : i32
    return %c0_i32, %c0_i32_0 : i32, i32
  }
  func.func @transform_3(%arg0: i32) -> (i32, i32) {
    %c0_i32 = arith.constant 0 : i32
    %c0_i32_0 = arith.constant 0 : i32
    %c0_i32_1 = arith.constant 0 : i32
    return %c0_i32, %c0_i32_0 : i32, i32
  }
  func.func @transform_4(%arg0: i32) -> (i32, i32) {
    %c0_i32 = arith.constant 0 : i32
    %c0_i32_0 = arith.constant 0 : i32
    %c0_i32_1 = arith.constant 0 : i32
    return %c0_i32, %c0_i32_0 : i32, i32
  }
  func.func @transform_5(%arg0: i32) -> (i32, i32) {
    %c0_i32 = arith.constant 0 : i32
    %c0_i32_0 = arith.constant 0 : i32
    %c0_i32_1 = arith.constant 0 : i32
    return %c0_i32, %c0_i32_0 : i32, i32
  }
  func.func @transform_6(%arg0: i32) -> (i32, i32) {
    %c0_i32 = arith.constant 0 : i32
    %c0_i32_0 = arith.constant 0 : i32
    %c0_i32_1 = arith.constant 0 : i32
    return %c0_i32, %c0_i32_0 : i32, i32
  }
  func.func @transform_7(%arg0: i32) -> (i32, i32) {
    %c0_i32 = arith.constant 0 : i32
    %c0_i32_0 = arith.constant 0 : i32
    %c0_i32_1 = arith.constant 0 : i32
    return %c0_i32, %c0_i32_0 : i32, i32
  }
  func.func @transform_8(%arg0: i32) -> (i32, i32, i32) {
    %c0_i32 = arith.constant 0 : i32
    %c0_i32_0 = arith.constant 0 : i32
    %c0_i32_1 = arith.constant 0 : i32
    return %arg0, %c0_i32, %c0_i32_0 : i32, i32, i32
  }
  func.func @transform_9(%arg0: i32) -> (i32, i32, i32) {
    %c0_i32 = arith.constant 0 : i32
    %c0_i32_0 = arith.constant 0 : i32
    %c0_i32_1 = arith.constant 0 : i32
    return %arg0, %c0_i32, %c0_i32_0 : i32, i32, i32
  }
  func.func @transform_10(%arg0: i32) -> (i32, i32, i32) {
    %c0_i32 = arith.constant 0 : i32
    %c0_i32_0 = arith.constant 0 : i32
    %c0_i32_1 = arith.constant 0 : i32
    return %arg0, %c0_i32, %c0_i32_0 : i32, i32, i32
  }
  func.func @transform_11(%arg0: i32) -> (i32, i32, i32) {
    %c0_i32 = arith.constant 0 : i32
    %c0_i32_0 = arith.constant 0 : i32
    %c0_i32_1 = arith.constant 0 : i32
    return %arg0, %c0_i32, %c0_i32_0 : i32, i32, i32
  }
}

</mosaic_0001>

<bundles_post_ra>
// kernel: tpu_custom_call.1
= control target key start
LH: loop header
LB: loop body
LE: loop exit
PB: predicated region body
PF: predicated region fallthrough
CT: control target
= control target key end

     0   :  { %s5658_s0 = inlined_call_operand.hbm [shape: f32[256,256], index: 0, kind: input, shape index: {}]   ;;  %s5659_s1 = inlined_call_operand.hbm [shape: f32[256,256], index: 1, kind: input, shape index: {}]   ;;  %s5660_s2 = inlined_call_operand.hbm [shape: bf16[256,128], index: 2, kind: input, shape index: {}]   ;;  %s5661_s3 = inlined_call_operand.vmem [shape: f32[1,128], index: 3, kind: input, shape index: {}]   ;;  %s5662_s4 = inlined_call_operand.hbm [shape: bf16[128,128], index: 4, kind: input, shape index: {}]   ;;  %s5663_s5 = inlined_call_operand.vmem [shape: f32[1,128], index: 5, kind: input, shape index: {}]   ;;  %s5664_s6 = inlined_call_operand.vmem [shape: f32[1,128], index: 6, kind: input, shape index: {}]   ;;  %s5665_s7 = inlined_call_operand.<no memory space> [shape: f32[1,1], index: 7, kind: input, shape index: {}]   ;;  %s5666_s8 = inlined_call_operand.hbm [shape: f32[2,1,128], index: 8, kind: output, shape index: {0}]   ;;  %s5667_s9 = inlined_call_operand.hbm [shape: f32[2,1,128], index: 9, kind: output, shape index: {1}]   ;;  %s5668_s10 = inlined_call_operand.hbm [shape: f32[2,1,128], index: 10, kind: output, shape index: {2}]   ;;  %s5669_s11 = inlined_call_operand.hbm [shape: f32[2,1,128], index: 11, kind: output, shape index: {3}]  }
   0x1   :  { %5684 = sst [smem:[#allocation31_spill]] %s5658_s0 }
   0x2   :  { %5685 = sst [smem:[#allocation32_spill]] %s5660_s2 }
   0x3   :  { %5686 = sst [smem:[#allocation33_spill]] %s5662_s4 }
   0x4   :  { %17 = sst [smem:[#allocation2]] %s5665_s7 }
   0x5   :  { %18 = vsyncpa [#allocation4], 0 }
   0x6   :  { %20 = vsyncpa [#allocation4 + $0x1], 0 }
   0x7   :  { %21 = vsyncpa [#allocation7], 0 }
   0x8   :  { %23 = vsyncpa [#allocation7 + $0x1], 0 }
   0x9   :  { %24 = vsyncpa [#allocation10], 0 }
   0xa   :  { %25 = vsyncpa [#allocation5], 0 }
   0xb   :  { %27 = vsyncpa [#allocation5 + $0x1], 0 }
   0xc   :  { %28 = vsyncpa [#allocation13], 0 }
   0xd   :  { %30 = vsyncpa [#allocation13 + $0x1], 0 }
   0xe   :  { %31 = vsyncpa [#allocation16], 0 }
   0xf   :  { %33 = vsyncpa [#allocation16 + $0x1], 0  ;;  %s3643_s19 = smov 0   ;;  %s3645_s20 = smov 0  }
  0x10   :  { %s3647_s21 = smov 0   ;;  %s3649_s22 = smov 0  }
  0x11 LB: > { %5687 = sst [smem:[#allocation24_spill]] %s3560_s19  ;;  %s3664_s7 = sadd.s32 4294967295, %s3572_s22   ;;  %s3572_s22 = sphi %s3649_s22, %s5855_s22   ;;  %s3568_s21 = sphi %s3647_s21, %s5857_s21   ;;  %s3564_s20 = sphi %s3645_s20, %s5859_s20   ;;  %s3560_s19 = sphi %s3643_s19, %s5858_s19  }
  0x12   : > { %5688 = sst [smem:[#allocation25_spill]] %s3568_s21  ;;  %s5670_s23 = sadd.s32 4294967294, %s3572_s22  }
  0x13   : > { %p59_p0 = scmp.ne.s32.totalorder %s3564_s20, %s3560_s19  ;;  %p60_p1 = scmp.eq.s32.totalorder %s3664_s7, 0 }
  0x14   : > { %p235_p2 = scmp.eq.s32.totalorder %s3664_s7, 1  ;;  %p241_p3 = scmp.eq.s32.totalorder %s5670_s23, 1 }
  0x15   : > { %p3675_p4 = por %p60_p1, %p59_p0  ;;  %p2741_p5 = scmp.ge.s32.totalorder %s3572_s22, 1 }
  0x16   : > { %p3680_p6 = por %p241_p3, %p59_p0  ;;  %p326_p7 = scmp.lt.s32.totalorder %s3572_s22, 3 }
  0x17   : > { %s5692_s2 = sld [smem:[#allocation32_spill]]  ;;  %s3574_s30 = smov [#allocation8]  }
  0x18   : > { %s5690_s25 = scalar_select %p3680_p6, 1, 0 }
  0x19   : > { %p3688_p8 = pnand %p2741_p5, %p326_p7  ;;  %s339_s12 = sshll.u32 %s3574_s30, 4  ;;  %s340_s12 = int_to_ptr.vmem [resolvable:$true] %s339_s12 }
  0x1a   : > { %5691 = sst [smem:[#allocation26_spill]] %s5690_s25  ;;  %s3575_s16 = smov 64  }
  0x1b   : > { %p2952_p9 = pneg %p3688_p8  ;;  %s5694_s4 = sld [smem:[#allocation33_spill]] }
  0x1c   : > { %s3576_s17 = smov 4   ;;  %s3577_s18 = smov [#allocation9]  }
  0x1d   : > { %s337_s28 = sshll.u32 %s5692_s2, 4  ;;  %p2953_p10 = pnand %p2952_p9, %p60_p1  ;;  %s338_s28 = int_to_ptr.hbm [resolvable:$true] %s337_s28 }
  0x1e   : > { %s356_s26 = sshll.u32 %s3577_s18, 4  ;;  %s3701_s27 = sadd.s32 1, %s3572_s22   ;;  %s357_s26 = int_to_ptr.vmem [resolvable:$true] %s356_s26 }
  0x1f   : > { %2955 = dma.hbm_to_vmem [thread:$0]  (!%p2953_p10), %s338_s28, 2048, %s340_s12, [#allocation7], %s3575_s16, %s3575_s16, %s3576_s17  }
  0x20   : > { %5695 = sst [smem:[#allocation27_spill]] %s3701_s27  ;;  %s46_s30 = sadd.s32 1, %s3568_s21 }
  0x21   : > { %s354_s15 = sshll.u32 %s5694_s4, 4  ;;  %s43_s13 = ssub.s32 %s3572_s22, %s3701_s27  ;;  %s355_s15 = int_to_ptr.hbm [resolvable:$true] %s354_s15 }
  0x22   : > { %2958 = dma.hbm_to_vmem [thread:$0]  (!%p2953_p10), %s355_s15, 1024, %s357_s26, [#allocation10], %s3575_s16, %s3575_s16, %s3576_s17  }
  0x23   : > { %p53_p12 = scmp.ne.s32.totalorder %s3568_s21, %s3564_s20  ;;  %p44_p13 = scmp.eq.s32.totalorder %s43_s13, 0 }
  0x24   : > { %p54_p0 = scmp.eq.s32.totalorder %s3572_s22, 0  ;;  %p2981_p5 = scmp.lt.s32.totalorder %s3572_s22, 2 }
  0x25   : > { %p3711_p3 = por %p235_p2, %p53_p12  ;;  %s379_s12 = sand.u32 1, %s3568_s21  }
  0x26   : > { %s3717_s28 = scalar_select %p44_p13, %s3568_s21, %s46_s30  }
  0x27   : > { %s5696_s14 = scalar_select %p3711_p3, 1, 0 }
  0x28   : > { %5698 = sst [smem:[#allocation29_spill]] %s3717_s28  ;;  %p55_p7 = por %p54_p0, %p53_p12 }
  0x29   : > { %5697 = sst [smem:[#allocation28_spill]] %s5696_s14  ;;  %s3720_s18 = sshll.u32 %s379_s12, 8 }
  0x2a   : > { %s5672_s15 = sshll.u32 %s3572_s22, 8  ;;  %s5699_s0 = sld [smem:[#allocation31_spill]] }
  0x2b   : > { %s383_s13 = scalar_lea.vmem [#allocation3], %s3720_s18  ;;  %p3729_p2 = pnand %p2981_p5, %p55_p7 }
  0x2c   : > { %s392_s23 = sshll.u32 %s383_s13, 4  ;;  %s380_s30 = scalar_lea.sflag [#allocation4], %s379_s12  ;;  %s393_s23 = int_to_ptr.vmem [resolvable:$true] %s392_s23 }
  0x2d   : > { %p3346_p10 = pneg %p3729_p2 }
  0x30   : > { %s389_s26 = scalar_lea.hbm %s5699_s0, %s5672_s15 }
  0x31   : > { %s390_s2 = sshll.u32 %s389_s26, 4  ;;  %s3349_s26 = scalar_lea.hbm %s5699_s0, 512  ;;  %s391_s2 = int_to_ptr.hbm [resolvable:$true] %s390_s2 }
  0x32   : > { %s3342_s28 = sshra.s32 %s391_s2, 4  ;;  %s3343_s28 = int_to_ptr.hbm [resolvable:$true] %s3342_s28 }
  0x33   : > { %s3344_s21 = scalar_lea.hbm %s3343_s28, 256  ;;  %p3350_p0 = scmp.lt.s32.totalorder %s3343_s28, %s5699_s0 }
  0x34   : > { %p3345_p9 = scmp.ne.s32.totalorder %s3343_s28, %s3344_s21  ;;  %p3351_p5 = scmp.lt.s32.totalorder %s3349_s26, %s3344_s21 }
  0x36   : > { %p3347_p12 = pnand %p3346_p10, %p3345_p9  ;;  %p3352_p7 = por %p3351_p5, %p3350_p0 }
  0x38   : > { %p3348_p13 = pneg %p3347_p12 }
  0x3a   : > { %p3353_p11 = pnand %p3352_p7, %p3348_p13 }
  0x3c   : > { %3356 = shalt.err (!%p3353_p11)
}
  0x3d   : > { %s3578_s12 = smov 256   ;;  %s3579_s27 = smov 16  }
  0x3e   : > { %2962 = dma.hbm_to_vmem [thread:$0]  (!%p3729_p2), %s391_s2, 4096, %s393_s23, %s380_s30, %s3578_s12, %s3578_s12, %s3579_s27  }
  0x3f   : > { %s5701_s25 = sshll.u32 %s3572_s22, 8  ;;  %s406_s15 = scalar_lea.vmem [#allocation6], %s3720_s18 }
  0x40   : > { %s412_s19 = scalar_lea.hbm %s5659_s1, %s5701_s25  ;;  %s415_s28 = sshll.u32 %s406_s15, 4  ;;  %s416_s28 = int_to_ptr.vmem [resolvable:$true] %s415_s28 }
  0x41   : > { %s413_s21 = sshll.u32 %s412_s19, 4  ;;  %s402_s26 = sand.u32 1, %s3572_s22   ;;  %s414_s21 = int_to_ptr.hbm [resolvable:$true] %s413_s21 }
  0x42   : > { %s403_s13 = scalar_lea.sflag [#allocation7], %s402_s26  ;;  %s3372_s0 = sshra.s32 %s414_s21, 4  ;;  %s3373_s0 = int_to_ptr.hbm [resolvable:$true] %s3372_s0 }
  0x43   : > { %s3374_s14 = scalar_lea.hbm %s3373_s0, 256  ;;  %s3379_s30 = scalar_lea.hbm %s5659_s1, 512 }
  0x44   : > { %p3375_p11 = scmp.ne.s32.totalorder %s3373_s0, %s3374_s14  ;;  %p3380_p13 = scmp.lt.s32.totalorder %s3373_s0, %s5659_s1 }
  0x45   : > { %p3381_p0 = scmp.lt.s32.totalorder %s3379_s30, %s3374_s14 }
  0x46   : > { %p3377_p9 = pnand %p3375_p11, %p3346_p10 }
  0x47   : > { %p3382_p5 = por %p3381_p0, %p3380_p13 }
  0x48   : > { %p3378_p12 = pneg %p3377_p9 }
  0x4a   : > { %p3383_p7 = pnand %p3382_p5, %p3378_p12 }
  0x4c   : > { %3386 = shalt.err (!%p3383_p7)
}
  0x4d   : > { %2965 = dma.hbm_to_vmem [thread:$0]  (!%p3729_p2), %s414_s21, 4096, %s416_s28, %s403_s13, %s3578_s12, %s3578_s12, %s3579_s27  }
  0x4e   : > { %427 = sbr.rel (%p3688_p8) target bundleno = 842 (0x34a), region = 52 }
  0x53   : > { %s3767_s19 = sand.u32 1, %s3564_s20  }
  0x54   : > { %s2754_s16 = sshll.u32 %s3767_s19, 8  ;;  %s430_s17 = scalar_lea.sflag [#allocation4], %s3767_s19 }
  0x55   : > { %s3771_s15 = scalar_lea.vmem [#allocation3], %s2754_s16 }
  0x56   : > { %3531 = dma.done.wait (%p3675_p4), %s430_s17, 4096  }
  0x57   : > { %3533 = vsyncadd (%p3675_p4), %s430_s17, 4294963200  ;;  %s439_s0 = sand.u32 1, %s3664_s7   ;;  %s3780_s29 = scalar_lea.vmem [#allocation6], %s2754_s16 }
  0x58   : > { %s440_s4 = scalar_lea.sflag [#allocation7], %s439_s0 }
  0x59   : > { %3535 = dma.done.wait (%p3675_p4), %s440_s4, 4096  }
  0x5a   : > { %3537 = vsyncadd (%p3675_p4), %s440_s4, 4294963200 }
  0x5b   : > { %3539 = dma.done.wait (%p60_p1), [#allocation7], 2048  }
  0x5c   : > { %3541 = vsyncadd (%p60_p1), [#allocation7], 4294965248 }
  0x5d   : > { %3543 = dma.done.wait (%p60_p1), [#allocation10], 1024  }
  0x5e   : > { %3545 = vsyncadd (%p60_p1), [#allocation10], 4294966272  ;;  %v2899_v0 = vld [vmem:[#allocation8 + $0x38] sm:$0xff]  ;;  %v2898_v2 = vld [vmem:[#allocation8 + $0x30] sm:$0xff]  ;;  %s562_s26 = sld [smem:[#allocation2]]  ;;  %vm1640_vm5 = vcmask 130112   ;;  %s2521_s23 = scalar_lea.hbm %s5667_s9, %s3664_s7 }
  0x5f   : > { %v2907_v1 = vld [vmem:[#allocation8 + $0x78] sm:$0xff]  ;;  %710 = vmatpush.bf16.msra.mxu0 %v2899_v0  ;;  %2916 = vmatpush.bf16.msra.mxu2 %v2899_v0  ;;  %v2906_v3 = vld [vmem:[#allocation8 + $0x70] sm:$0xff]  ;;  %v2897_v4 = vld [vmem:[#allocation8 + $0x28] sm:$0xff]  ;;  %vm1644_vm11 = vcmask 195712   ;;  %s496_s30 = scalar_lea.vmem [#allocation12], %s3767_s19  ;;  %s5415_s18 = sshll.u32 %s2521_s23, 4  ;;  %s2526_s18 = int_to_ptr.hbm [resolvable:$true] %s5415_s18 }
  0x60   : > { %2924 = vmatpush.bf16.msra.mxu3 %v2907_v1  ;;  %759 = vmatpush.bf16.msra.mxu1 %v2907_v1  ;;  %v2905_v5 = vld [vmem:[#allocation8 + $0x68] sm:$0xff]  ;;  %v2896_v6 = vld [vmem:[#allocation8 + $0x20] sm:$0xff]  ;;  %v2895_v8 = vld [vmem:[#allocation8 + $0x18] sm:$0xff]  ;;  %s5413_s25 = sshll.u32 %s496_s30, 4  ;;  %s490_s4 = scalar_lea.vmem [#allocation11], %s3767_s19  ;;  %s2524_s25 = int_to_ptr.vmem [resolvable:$true] %s5413_s25 }
  0x61   : > { %v2904_v7 = vld [vmem:[#allocation8 + $0x60] sm:$0xff]  ;;  %v2903_v9 = vld [vmem:[#allocation8 + $0x58] sm:$0xff]  ;;  %v2894_v10 = vld [vmem:[#allocation8 + $0x10] sm:$0xff]  ;;  %s2534_s14 = scalar_lea.hbm %s5668_s10, %s3664_s7  ;;  %s2547_s21 = scalar_lea.hbm %s5669_s11, %s3664_s7 }
  0x62   : > { %v2902_v11 = vld [vmem:[#allocation8 + $0x50] sm:$0xff]  ;;  %v2893_v12 = vld [vmem:[#allocation8 + $0x8] sm:$0xff]  ;;  %v3794_v14 = vld [vmem:[#allocation8] sm:$0xff]  ;;  %s502_s13 = scalar_lea.vmem [#allocation14], %s3767_s19  ;;  %s5530_s23 = sshll.u32 %s2534_s14, 4  ;;  %s2539_s23 = int_to_ptr.hbm [resolvable:$true] %s5530_s23 }
  0x63   : > { %711 = vmatpush.bf16.msra.mxu0 %v2898_v2  ;;  %2917 = vmatpush.bf16.msra.mxu2 %v2898_v2  ;;  %v2901_v13 = vld [vmem:[#allocation8 + $0x48] sm:$0xff]  ;;  %v3796_v15 = vld [vmem:[#allocation8 + $0x40] sm:$0xff]  ;;  %v565_v17 = vld [vmem:[%s3771_s15 + $0x10] sm:$0xff]  ;;  %s5524_s2 = sshll.u32 %s502_s13, 4  ;;  %s5682_s16 = scalar_lea.vmem [#allocation15], %s3767_s19 }
  0x64   : > { %2925 = vmatpush.bf16.msra.mxu3 %v2906_v3  ;;  %760 = vmatpush.bf16.msra.mxu1 %v2906_v3  ;;  %v563_v16 = vld [vmem:[%s3771_s15] sm:$0xff]  ;;  %v581_v19 = vld [vmem:[%s3771_s15 + $0x90] sm:$0xff]  ;;  %v580_v20 = vld [vmem:[%s3771_s15 + $0x88] sm:$0xff]  ;;  %5839 = sst [smem:[#allocation30_spill]] %s5524_s2  ;;  %s5541_s17 = sshll.u32 %s5682_s16, 4  ;;  %s2550_s17 = int_to_ptr.vmem [resolvable:$true] %s5541_s17 }
  0x65   : > { %v579_v18 = vld [vmem:[%s3771_s15 + $0x80] sm:$0xff]  ;;  %v582_v21 = vld [vmem:[%s3771_s15 + $0x98] sm:$0xff]  ;;  %v564_v22 = vld [vmem:[%s3771_s15 + $0x8] sm:$0xff]  ;;  %v595_v24 = vpack.c.bf16 %v565_v17, %v563_v16  ;;  %s2488_s27 = scalar_lea.sflag [#allocation5], %s3767_s19  ;;  %s3422_s16 = scalar_lea.hbm %s5666_s8, 2 }
  0x66   : > { %v566_v23 = vld [vmem:[%s3771_s15 + $0x18] sm:$0xff]  ;;  %v603_v25 = vpack.c.bf16 %v581_v19, %v579_v18  ;;  %v604_v26 = vpack.c.bf16 %v582_v21, %v580_v20  ;;  %v567_v28 = vld [vmem:[%s3771_s15 + $0x20] sm:$0xff]  ;;  %v569_v29 = vld [vmem:[%s3771_s15 + $0x30] sm:$0xff] }
  0x67   : > { %712 = vmatpush.bf16.msra.mxu0 %v2897_v4  ;;  %2918 = vmatpush.bf16.msra.mxu2 %v2897_v4  ;;  %v596_v27 = vpack.c.bf16 %v566_v23, %v564_v22  ;;  %v583_v30 = vld [vmem:[%s3771_s15 + $0xa0] sm:$0xff]  ;;  %v585_v31 = vld [vmem:[%s3771_s15 + $0xb0] sm:$0xff]  ;;  %v584_v32 = vld [vmem:[%s3771_s15 + $0xa8] sm:$0xff]  ;;  %v597_v36 = vpack.c.bf16 %v569_v29, %v567_v28 }
  0x68   : > { %2926 = vmatpush.bf16.msra.mxu3 %v2905_v5  ;;  %761 = vmatpush.bf16.msra.mxu1 %v2905_v5  ;;  %v586_v33 = vld [vmem:[%s3771_s15 + $0xb8] sm:$0xff]  ;;  %v568_v34 = vld [vmem:[%s3771_s15 + $0x28] sm:$0xff]  ;;  %v605_v37 = vpack.c.bf16 %v585_v31, %v583_v30  ;;  %v571_v40 = vld [vmem:[%s3771_s15 + $0x40] sm:$0xff] }
  0x69   : > { %v570_v35 = vld [vmem:[%s3771_s15 + $0x38] sm:$0xff]  ;;  %v606_v38 = vpack.c.bf16 %v586_v33, %v584_v32  ;;  %v573_v41 = vld [vmem:[%s3771_s15 + $0x50] sm:$0xff]  ;;  %v587_v42 = vld [vmem:[%s3771_s15 + $0xc0] sm:$0xff] }
  0x6a   : > { %v598_v39 = vpack.c.bf16 %v570_v35, %v568_v34  ;;  %v589_v43 = vld [vmem:[%s3771_s15 + $0xd0] sm:$0xff]  ;;  %v588_v44 = vld [vmem:[%s3771_s15 + $0xc8] sm:$0xff]  ;;  %v590_v45 = vld [vmem:[%s3771_s15 + $0xd8] sm:$0xff]  ;;  %v599_v48 = vpack.c.bf16 %v573_v41, %v571_v40 }
  0x6b   : > { %713 = vmatpush.bf16.msra.mxu0 %v2896_v6  ;;  %2919 = vmatpush.bf16.msra.mxu2 %v2896_v6  ;;  %v572_v46 = vld [vmem:[%s3771_s15 + $0x48] sm:$0xff]  ;;  %v574_v47 = vld [vmem:[%s3771_s15 + $0x58] sm:$0xff]  ;;  %v607_v49 = vpack.c.bf16 %v589_v43, %v587_v42  ;;  %v608_v50 = vpack.c.bf16 %v590_v45, %v588_v44  ;;  %v575_v52 = vld [vmem:[%s3771_s15 + $0x60] sm:$0xff] }
  0x6c   : > { %2927 = vmatpush.bf16.msra.mxu3 %v2904_v7  ;;  %762 = vmatpush.bf16.msra.mxu1 %v2904_v7  ;;  %v600_v51 = vpack.c.bf16 %v574_v47, %v572_v46  ;;  %v577_v53 = vld [vmem:[%s3771_s15 + $0x70] sm:$0xff]  ;;  %v591_v54 = vld [vmem:[%s3771_s15 + $0xe0] sm:$0xff]  ;;  %v592_v56 = vld [vmem:[%s3771_s15 + $0xe8] sm:$0xff] }
  0x6d   : > { %v593_v55 = vld [vmem:[%s3771_s15 + $0xf0] sm:$0xff]  ;;  %v594_v57 = vld [vmem:[%s3771_s15 + $0xf8] sm:$0xff]  ;;  %v576_v58 = vld [vmem:[%s3771_s15 + $0x68] sm:$0xff]  ;;  %v601_v60 = vpack.c.bf16 %v577_v53, %v575_v52 }
  0x6e   : > { %v578_v59 = vld [vmem:[%s3771_s15 + $0x78] sm:$0xff]  ;;  %v609_v61 = vpack.c.bf16 %v593_v55, %v591_v54  ;;  %v610_v62 = vpack.c.bf16 %v594_v57, %v592_v56  ;;  %v1025_v16 = vld [vmem:[%s3780_s29 + $0x48] sm:$0xff]  ;;  %v1024_v18 = vld [vmem:[%s3780_s29 + $0x40] sm:$0xff]  ;;  %s2508_s15 = scalar_lea.hbm %s5666_s8, %s3664_s7 }
  0x6f   : > { %714 = vmatpush.bf16.msra.mxu0 %v2895_v8  ;;  %2920 = vmatpush.bf16.msra.mxu2 %v2895_v8  ;;  %v602_v63 = vpack.c.bf16 %v578_v59, %v576_v58  ;;  %v1027_v17 = vld [vmem:[%s3780_s29 + $0x58] sm:$0xff]  ;;  %v1026_v19 = vld [vmem:[%s3780_s29 + $0x50] sm:$0xff]  ;;  %v2908_v29 = vld [vmem:[#allocation9] sm:$0xff] }
  0x70   : > { %2928 = vmatpush.bf16.msra.mxu3 %v2903_v9  ;;  %763 = vmatpush.bf16.msra.mxu1 %v2903_v9  ;;  %v1053_v20 = vpack.c.bf16 %v1027_v17, %v1025_v16  ;;  %v1052_v21 = vpack.c.bf16 %v1026_v19, %v1024_v18  ;;  %v2911_v22 = vld [vmem:[#allocation9 + $0x18] sm:$0xff]  ;;  %v2910_v23 = vld [vmem:[#allocation9 + $0x10] sm:$0xff]  ;;  %v1033_v32 = vld [vmem:[%s3780_s29 + $0x88] sm:$0xff] }
  0x71   : > { %v1030_v28 = vld [vmem:[%s3780_s29 + $0x70] sm:$0xff]  ;;  %v1035_v33 = vld [vmem:[%s3780_s29 + $0x98] sm:$0xff]  ;;  %v1032_v34 = vld [vmem:[%s3780_s29 + $0x80] sm:$0xff] }
  0x72   : > { %v1034_v35 = vld [vmem:[%s3780_s29 + $0x90] sm:$0xff]  ;;  %v1036_v52 = vld [vmem:[%s3780_s29 + $0xa0] sm:$0xff] }
  0x73   : > { %715 = vmatpush.bf16.msra.mxu0 %v2894_v10  ;;  %2921 = vmatpush.bf16.msra.mxu2 %v2894_v10  ;;  %v1038_v53 = vld [vmem:[%s3780_s29 + $0xb0] sm:$0xff] }
  0x74   : > { %2929 = vmatpush.bf16.msra.mxu3 %v2902_v11  ;;  %764 = vmatpush.bf16.msra.mxu1 %v2902_v11  ;;  %v1058_v58 = vpack.c.bf16 %v1038_v53, %v1036_v52 }
  0x77   : > { %716 = vmatpush.bf16.msra.mxu0 %v2893_v12  ;;  %2922 = vmatpush.bf16.msra.mxu2 %v2893_v12 }
  0x78   : > { %2930 = vmatpush.bf16.msra.mxu3 %v2901_v13  ;;  %765 = vmatpush.bf16.msra.mxu1 %v2901_v13 }
  0x7b   : > { %717 = vmatpush.bf16.msra.mxu0 %v3794_v14  ;;  %2923 = vmatpush.bf16.msra.mxu2 %v3794_v14 }
  0x7c   : > { %2931 = vmatpush.bf16.msra.mxu3 %v3796_v15  ;;  %766 = vmatpush.bf16.msra.mxu1 %v3796_v15 }
  0x7e   : > { %718 = vmatmul.bf16.vlgmr.msra.gmra.mxu0 %v595_v24  ;;  %738 = vmatmul.bf16.vlgmr.msra.gmra.mxu2 %v603_v25  ;;  %v2909_v24 = vld [vmem:[#allocation9 + $0x8] sm:$0xff] }
  0x7f   : > { %1113 = vmatpush.bf16.msrb.mxu0 %v2907_v1  ;;  %787 = vmatmul.bf16.vlgmr.msra.gmra.mxu3 %v604_v26  ;;  %v1019_v1 = vld [vmem:[%s3780_s29 + $0x18] sm:$0xff]  ;;  %v1029_v25 = vld [vmem:[%s3780_s29 + $0x68] sm:$0xff] }
  0x80   : > { %1064 = vmatpush.bf16.msrb.mxu3 %v2899_v0  ;;  %767 = vmatmul.bf16.vlgmr.msra.gmra.mxu1 %v596_v27  ;;  %v1017_v0 = vld [vmem:[%s3780_s29 + $0x8] sm:$0xff]  ;;  %v1031_v26 = vld [vmem:[%s3780_s29 + $0x78] sm:$0xff]  ;;  %v1028_v27 = vld [vmem:[%s3780_s29 + $0x60] sm:$0xff] }
  0x81   : > { %v1055_v30 = vpack.c.bf16 %v1031_v26, %v1029_v25  ;;  %v1054_v31 = vpack.c.bf16 %v1030_v28, %v1028_v27  ;;  %v1047_v25 = vld [vmem:[%s3780_s29 + $0xf8] sm:$0xff]  ;;  %v1044_v27 = vld [vmem:[%s3780_s29 + $0xe0] sm:$0xff]  ;;  %v1046_v28 = vld [vmem:[%s3780_s29 + $0xf0] sm:$0xff] }
  0x83   : > { %1114 = vmatpush.bf16.msrb.mxu0 %v2906_v3  ;;  %v1018_v3 = vld [vmem:[%s3780_s29 + $0x10] sm:$0xff] }
  0x84   : > { %1065 = vmatpush.bf16.msrb.mxu3 %v2898_v2  ;;  %v1016_v2 = vld [vmem:[%s3780_s29] sm:$0xff] }
  0x87   : > { %1115 = vmatpush.bf16.msrb.mxu0 %v2905_v5  ;;  %v1048_v5 = vpack.c.bf16 %v1018_v3, %v1016_v2 }
  0x88   : > { %1066 = vmatpush.bf16.msrb.mxu3 %v2897_v4  ;;  %v1049_v4 = vpack.c.bf16 %v1019_v1, %v1017_v0 }
  0x8b   : > { %1116 = vmatpush.bf16.msrb.mxu0 %v2904_v7  ;;  %v1021_v7 = vld [vmem:[%s3780_s29 + $0x28] sm:$0xff] }
  0x8c   : > { %1067 = vmatpush.bf16.msrb.mxu3 %v2896_v6  ;;  %v2915_v6 = vld [vmem:[#allocation9 + $0x38] sm:$0xff] }
  0x8d   : > { %883 = vmatpush.bf16.msrb.mxu2 %v2915_v6  ;;  %1186 = vmatpush.bf16.msrb.mxu1 %v2915_v6 }
  0x8e   : > { %723 = vmatmul.bf16.gmra.mxu0 %v597_v36  ;;  %743 = vmatmul.bf16.gmra.mxu2 %v605_v37  ;;  %v1057_v36 = vpack.c.bf16 %v1035_v33, %v1033_v32  ;;  %v1062_v33 = vpack.c.bf16 %v1046_v28, %v1044_v27 }
  0x8f   : > { %1117 = vmatpush.bf16.msrb.mxu0 %v2903_v9  ;;  %792 = vmatmul.bf16.gmra.mxu3 %v606_v38  ;;  %v1020_v9 = vld [vmem:[%s3780_s29 + $0x20] sm:$0xff]  ;;  %v1056_v38 = vpack.c.bf16 %v1034_v35, %v1032_v34 }
  0x90   : > { %1068 = vmatpush.bf16.msrb.mxu3 %v2895_v8  ;;  %772 = vmatmul.bf16.gmra.mxu1 %v598_v39  ;;  %v1023_v8 = vld [vmem:[%s3780_s29 + $0x38] sm:$0xff]  ;;  %v3859_v39 = vld [vmem:[%s5661_s3] ss:$0 sm:$0xff] }
  0x93   : > { %1118 = vmatpush.bf16.msrb.mxu0 %v2902_v11  ;;  %v1051_v11 = vpack.c.bf16 %v1023_v8, %v1021_v7  ;;  %v1040_v7 = vld [vmem:[%s3780_s29 + $0xc0] sm:$0xff]  ;;  %v1042_v8 = vld [vmem:[%s3780_s29 + $0xd0] sm:$0xff] }
  0x94   : > { %1069 = vmatpush.bf16.msrb.mxu3 %v2894_v10  ;;  %v1022_v10 = vld [vmem:[%s3780_s29 + $0x30] sm:$0xff] }
  0x97   : > { %1119 = vmatpush.bf16.msrb.mxu0 %v2901_v13  ;;  %v2914_v13 = vld [vmem:[#allocation9 + $0x30] sm:$0xff] }
  0x98   : > { %1070 = vmatpush.bf16.msrb.mxu3 %v2893_v12  ;;  %v1050_v12 = vpack.c.bf16 %v1022_v10, %v1020_v9  ;;  %884 = vmatpush.bf16.msrb.mxu2 %v2914_v13 }
  0x99   : > { %1187 = vmatpush.bf16.msrb.mxu1 %v2914_v13  ;;  %v1060_v13 = vpack.c.bf16 %v1042_v8, %v1040_v7 }
  0x9b   : > { %1120 = vmatpush.bf16.msrb.mxu0 %v3796_v15  ;;  %v2912_v15 = vld [vmem:[#allocation9 + $0x20] sm:$0xff] }
  0x9c   : > { %1071 = vmatpush.bf16.msrb.mxu3 %v3794_v14  ;;  %v2913_v14 = vld [vmem:[#allocation9 + $0x28] sm:$0xff] }
  0x9d   : > { %885 = vmatpush.bf16.msrb.mxu2 %v2913_v14  ;;  %1188 = vmatpush.bf16.msrb.mxu1 %v2913_v14 }
  0x9e   : > { %728 = vmatmul.bf16.gmra.mxu0 %v599_v48  ;;  %748 = vmatmul.bf16.gmra.mxu2 %v607_v49  ;;  %v1037_v49 = vld [vmem:[%s3780_s29 + $0xa8] sm:$0xff] }
  0x9f   : > { %797 = vmatmul.bf16.gmra.mxu3 %v608_v50  ;;  %v1039_v50 = vld [vmem:[%s3780_s29 + $0xb8] sm:$0xff] }
  0xa0   : > { %777 = vmatmul.bf16.gmra.mxu1 %v600_v51  ;;  %v1059_v56 = vpack.c.bf16 %v1039_v50, %v1037_v49 }
  0xa1   : > { %886 = vmatpush.bf16.msrb.mxu2 %v2912_v15  ;;  %1189 = vmatpush.bf16.msrb.mxu1 %v2912_v15 }
  0xa5   : > { %887 = vmatpush.bf16.msrb.mxu2 %v2911_v22  ;;  %1190 = vmatpush.bf16.msrb.mxu1 %v2911_v22 }
  0xa9   : > { %888 = vmatpush.bf16.msrb.mxu2 %v2910_v23  ;;  %1191 = vmatpush.bf16.msrb.mxu1 %v2910_v23 }
  0xad   : > { %889 = vmatpush.bf16.msrb.mxu2 %v2909_v24  ;;  %1192 = vmatpush.bf16.msrb.mxu1 %v2909_v24  ;;  %v1045_v24 = vld [vmem:[%s3780_s29 + $0xe8] sm:$0xff] }
  0xae   : > { %733 = vmatmul.bf16.gmra.mxu0 %v601_v60  ;;  %753 = vmatmul.bf16.gmra.mxu2 %v609_v61 }
  0xaf   : > { %802 = vmatmul.bf16.gmra.mxu3 %v610_v62 }
  0xb0   : > { %782 = vmatmul.bf16.gmra.mxu1 %v602_v63 }
  0xb1   : > { %890 = vmatpush.bf16.msrb.mxu2 %v2908_v29  ;;  %1193 = vmatpush.bf16.msrb.mxu1 %v2908_v29 }
  0xbe   : > { %1121 = vmatmul.bf16.vlgmr.msrb.gmra.mxu0 %v1049_v4  ;;  %v1041_v4 = vld [vmem:[%s3780_s29 + $0xc8] sm:$0xff] }
  0xbf   : > { %1072 = vmatmul.bf16.vlgmr.msrb.gmra.mxu3 %v1048_v5  ;;  %v1043_v5 = vld [vmem:[%s3780_s29 + $0xd8] sm:$0xff]  ;;  %s5485_s29 = sshll.u32 %s490_s4, 4  ;;  %s2511_s29 = int_to_ptr.vmem [resolvable:$true] %s5485_s29 }
  0xce   : > { %1126 = vmatmul.bf16.gmra.mxu0 %v1051_v11  ;;  %v1061_v11 = vpack.c.bf16 %v1043_v5, %v1041_v4 }
  0xcf   : > { %1077 = vmatmul.bf16.gmra.mxu3 %v1050_v12 }
  0xde   : > { %1131 = vmatmul.bf16.gmra.mxu0 %v1053_v20 }
  0xdf   : > { %1082 = vmatmul.bf16.gmra.mxu3 %v1052_v21 }
  0xee   : > { %1136 = vmatmul.bf16.gmra.mxu0 %v1055_v30 }
  0xef   : > { %1087 = vmatmul.bf16.gmra.mxu3 %v1054_v31  ;;  %v1063_v31 = vpack.c.bf16 %v1047_v25, %v1045_v24 }
  0xfb   : > { %v719_v37 = vpop.f32.mrf.mxu0 }
  0xfc   : > { %v720_v41 = vadd.f32 %v3859_v39, %v719_v37 }
  0xfd   : > { %v768_v40 = vpop.f32.mrf.mxu1 }
  0xfe   : > { %1141 = vmatmul.bf16.gmra.mxu0 %v1057_v36  ;;  %v769_v42 = vadd.f32 %v768_v40, %v720_v41 }
  0xff   : > { %1092 = vmatmul.bf16.gmra.mxu3 %v1056_v38 }
 0x100   : > { %v808_v47 = vmax.f32 %v769_v42, 0.0 }
 0x101   : > { %v739_v21 = vpop.f32.mrf.mxu2 }
 0x102   : > { %v3862_v43 = vpop.f32.mrf.mxu3  ;;  %v740_v52 = vadd.f32 %v3859_v39, %v739_v21 }
 0x103   : > { %v721_v44 = vpop.f32.mrf.mxu0 }
 0x104   : > { %v722_v45 = vadd.f32 %v3859_v39, %v721_v44 }
 0x105   : > { %v770_v46 = vpop.f32.mrf.mxu1 }
 0x106   : > { %v771_v48 = vadd.f32 %v770_v46, %v722_v45 }
 0x108   : > { %v809_v51 = vmax.f32 %v771_v48, 0.0 }
 0x109   : > { %v741_v36 = vpop.f32.mrf.mxu2 }
 0x10a   : > { %v824_v54 = vpack.c.bf16 %v809_v51, %v808_v47  ;;  %v3869_v55 = vpop.f32.mrf.mxu3  ;;  %v742_v51 = vadd.f32 %v3859_v39, %v741_v36 }
 0x10b   : > { %v724_v57 = vpop.f32.mrf.mxu0 }
 0x10c   : > { %891 = vmatmul.bf16.vlgmr.msrb.gmra.mxu2 %v824_v54  ;;  %v725_v60 = vadd.f32 %v3859_v39, %v724_v57  ;;  %v791_v53 = vadd.f32 %v3869_v55, %v742_v51 }
 0x10d   : > { %v773_v59 = vpop.f32.mrf.mxu1 }
 0x10e   : > { %1146 = vmatmul.bf16.gmra.mxu0 %v1059_v56  ;;  %v774_v61 = vadd.f32 %v773_v59, %v725_v60  ;;  %v817_v59 = vmax.f32 %v791_v53, 0.0 }
 0x10f   : > { %1097 = vmatmul.bf16.gmra.mxu3 %v1058_v58  ;;  %v789_v58 = vadd.f32 %v3862_v43, %v740_v52 }
 0x110   : > { %v810_v2 = vmax.f32 %v774_v61, 0.0 }
 0x111   : > { %v744_v47 = vpop.f32.mrf.mxu2  ;;  %v816_v61 = vmax.f32 %v789_v58, 0.0 }
 0x112   : > { %v3872_v62 = vpop.f32.mrf.mxu3  ;;  %v745_v8 = vadd.f32 %v3859_v39, %v744_v47 }
 0x113   : > { %v726_v63 = vpop.f32.mrf.mxu0 }
 0x114   : > { %v727_v0 = vadd.f32 %v3859_v39, %v726_v63 }
 0x115   : > { %v775_v1 = vpop.f32.mrf.mxu1 }
 0x116   : > { %v776_v3 = vadd.f32 %v775_v1, %v727_v0  ;;  %v828_v0 = vpack.c.bf16 %v817_v59, %v816_v61 }
 0x118   : > { %v811_v6 = vmax.f32 %v776_v3, 0.0 }
 0x119   : > { %v746_v56 = vpop.f32.mrf.mxu2 }
 0x11a   : > { %v3879_v9 = vpop.f32.mrf.mxu3  ;;  %v825_v10 = vpack.c.bf16 %v811_v6, %v810_v2  ;;  %v747_v55 = vadd.f32 %v3859_v39, %v746_v56 }
 0x11b   : > { %v729_v12 = vpop.f32.mrf.mxu0 }
 0x11c   : > { %896 = vmatmul.bf16.gmra.mxu2 %v825_v10  ;;  %v730_v15 = vadd.f32 %v3859_v39, %v729_v12  ;;  %v796_v10 = vadd.f32 %v3879_v9, %v747_v55 }
 0x11d   : > { %v778_v14 = vpop.f32.mrf.mxu1 }
 0x11e   : > { %1151 = vmatmul.bf16.gmra.mxu0 %v1061_v11  ;;  %v779_v16 = vadd.f32 %v778_v14, %v730_v15  ;;  %v819_v14 = vmax.f32 %v796_v10, 0.0 }
 0x11f   : > { %1102 = vmatmul.bf16.gmra.mxu3 %v1060_v13  ;;  %v794_v13 = vadd.f32 %v3872_v62, %v745_v8 }
 0x120   : > { %v812_v22 = vmax.f32 %v779_v16, 0.0 }
 0x121   : > { %v749_v4 = vpop.f32.mrf.mxu2 }
 0x122   : > { %v3882_v17 = vpop.f32.mrf.mxu3  ;;  %v750_v27 = vadd.f32 %v3859_v39, %v749_v4 }
 0x123   : > { %v731_v18 = vpop.f32.mrf.mxu0 }
 0x124   : > { %v732_v19 = vadd.f32 %v3859_v39, %v731_v18  ;;  %v818_v18 = vmax.f32 %v794_v13, 0.0 }
 0x125   : > { %v780_v20 = vpop.f32.mrf.mxu1 }
 0x126   : > { %v781_v23 = vadd.f32 %v780_v20, %v732_v19  ;;  %v829_v20 = vpack.c.bf16 %v819_v14, %v818_v18 }
 0x128   : > { %v813_v26 = vmax.f32 %v781_v23, 0.0 }
 0x129   : > { %v751_v15 = vpop.f32.mrf.mxu2 }
 0x12a   : > { %v3889_v29 = vpop.f32.mrf.mxu3  ;;  %v826_v30 = vpack.c.bf16 %v813_v26, %v812_v22  ;;  %v752_v9 = vadd.f32 %v3859_v39, %v751_v15  ;;  %v3932_v15 = vld [vmem:[%s5664_s6] ss:$0 sm:$0xff] }
 0x12b   : > { %v734_v32 = vpop.f32.mrf.mxu0 }
 0x12c   : > { %901 = vmatmul.bf16.gmra.mxu2 %v826_v30  ;;  %v735_v35 = vadd.f32 %v3859_v39, %v734_v32  ;;  %v801_v30 = vadd.f32 %v3889_v29, %v752_v9 }
 0x12d   : > { %v783_v34 = vpop.f32.mrf.mxu1 }
 0x12e   : > { %1156 = vmatmul.bf16.gmra.mxu0 %v1063_v31  ;;  %v784_v37 = vadd.f32 %v783_v34, %v735_v35  ;;  %v821_v34 = vmax.f32 %v801_v30, 0.0 }
 0x12f   : > { %1107 = vmatmul.bf16.gmra.mxu3 %v1062_v33  ;;  %v799_v33 = vadd.f32 %v3882_v17, %v750_v27 }
 0x130   : > { %v814_v44 = vmax.f32 %v784_v37, 0.0 }
 0x131   : > { %v754_v62 = vpop.f32.mrf.mxu2  ;;  %v820_v36 = vmax.f32 %v799_v33, 0.0 }
 0x132   : > { %v3892_v38 = vpop.f32.mrf.mxu3 }
 0x133   : > { %v736_v40 = vpop.f32.mrf.mxu0 }
 0x134   : > { %v737_v41 = vadd.f32 %v3859_v39, %v736_v40  ;;  %v830_v40 = vpack.c.bf16 %v821_v34, %v820_v36 }
 0x135   : > { %v785_v42 = vpop.f32.mrf.mxu1 }
 0x136   : > { %v786_v45 = vadd.f32 %v785_v42, %v737_v41 }
 0x138   : > { %v815_v46 = vmax.f32 %v786_v45, 0.0 }
 0x139   : > { %v756_v41 = vpop.f32.mrf.mxu2 }
 0x13a   : > { %v3895_v48 = vpop.f32.mrf.mxu3  ;;  %v827_v49 = vpack.c.bf16 %v815_v46, %v814_v44  ;;  %v757_v29 = vadd.f32 %v3859_v39, %v756_v41 }
 0x13b   : > { %v1122_v50 = vpop.f32.mrf.mxu0 }
 0x13c   : > { %906 = vmatmul.bf16.gmra.mxu2 %v827_v49  ;;  %v806_v51 = vadd.f32 %v3895_v48, %v757_v29 }
 0x13e   : > { %v823_v56 = vmax.f32 %v806_v51, 0.0 }
 0x142   : > { %v1073_v54 = vpop.f32.mrf.mxu3 }
 0x143   : > { %v1124_v57 = vpop.f32.mrf.mxu0  ;;  %v1074_v60 = vadd.f32 %v3859_v39, %v1073_v54 }
 0x145   : > { %v1123_v1 = vadd.f32 %v1122_v50, %v1074_v60  ;;  %v755_v50 = vadd.f32 %v3859_v39, %v754_v62 }
 0x147   : > { %v1162_v6 = vmax.f32 %v1123_v1, 0.0  ;;  %v804_v54 = vadd.f32 %v3892_v38, %v755_v50 }
 0x149   : > { %v822_v58 = vmax.f32 %v804_v54, 0.0 }
 0x14a   : > { %v1075_v63 = vpop.f32.mrf.mxu3 }
 0x14b   : > { %v1076_v2 = vadd.f32 %v3859_v39, %v1075_v63  ;;  %v1127_v3 = vpop.f32.mrf.mxu0  ;;  %v831_v60 = vpack.c.bf16 %v823_v56, %v822_v58 }
 0x14c   : > { %911 = vmatmul.bf16.gmra.mxu2 %v828_v0 }
 0x14d   : > { %v1125_v5 = vadd.f32 %v1124_v57, %v1076_v2 }
 0x14f   : > { %v1163_v7 = vmax.f32 %v1125_v5, 0.0 }
 0x151   : > { %v1178_v43 = vpack.c.bf16 %v1163_v7, %v1162_v6 }
 0x152   : > { %v1078_v11 = vpop.f32.mrf.mxu3 }
 0x153   : > { %1194 = vmatmul.bf16.vlgmr.msrb.gmra.mxu1 %v1178_v43  ;;  %v1129_v12 = vpop.f32.mrf.mxu0  ;;  %v1079_v16 = vadd.f32 %v3859_v39, %v1078_v11  ;;  %v3926_v43 = vld [vmem:[%s5663_s5] ss:$0 sm:$0xff] }
 0x155   : > { %v1128_v21 = vadd.f32 %v1127_v3, %v1079_v16 }
 0x157   : > { %v1164_v25 = vmax.f32 %v1128_v21, 0.0 }
 0x15a   : > { %v1080_v19 = vpop.f32.mrf.mxu3 }
 0x15b   : > { %v1081_v22 = vadd.f32 %v3859_v39, %v1080_v19  ;;  %v1132_v23 = vpop.f32.mrf.mxu0 }
 0x15c   : > { %916 = vmatmul.bf16.gmra.mxu2 %v829_v20 }
 0x15d   : > { %v1130_v24 = vadd.f32 %v1129_v12, %v1081_v22 }
 0x15f   : > { %v1165_v26 = vmax.f32 %v1130_v24, 0.0 }
 0x161   : > { %v1179_v28 = vpack.c.bf16 %v1165_v26, %v1164_v25 }
 0x162   : > { %v1083_v31 = vpop.f32.mrf.mxu3 }
 0x163   : > { %1199 = vmatmul.bf16.gmra.mxu1 %v1179_v28  ;;  %v1134_v32 = vpop.f32.mrf.mxu0  ;;  %v1084_v35 = vadd.f32 %v3859_v39, %v1083_v31 }
 0x165   : > { %v1133_v42 = vadd.f32 %v1132_v23, %v1084_v35 }
 0x167   : > { %v1166_v47 = vmax.f32 %v1133_v42, 0.0 }
 0x16a   : > { %v1085_v37 = vpop.f32.mrf.mxu3 }
 0x16b   : > { %v1086_v44 = vadd.f32 %v3859_v39, %v1085_v37  ;;  %v1137_v45 = vpop.f32.mrf.mxu0 }
 0x16c   : > { %921 = vmatmul.bf16.gmra.mxu2 %v830_v40 }
 0x16d   : > { %v1135_v46 = vadd.f32 %v1134_v32, %v1086_v44 }
 0x16f   : > { %v1167_v49 = vmax.f32 %v1135_v46, 0.0 }
 0x171   : > { %v1180_v17 = vpack.c.bf16 %v1167_v49, %v1166_v47 }
 0x172   : > { %v1088_v52 = vpop.f32.mrf.mxu3 }
 0x173   : > { %1204 = vmatmul.bf16.gmra.mxu1 %v1180_v17  ;;  %v1139_v53 = vpop.f32.mrf.mxu0  ;;  %v1089_v57 = vadd.f32 %v3859_v39, %v1088_v52 }
 0x175   : > { %v1138_v61 = vadd.f32 %v1137_v45, %v1089_v57 }
 0x177   : > { %v1168_v2 = vmax.f32 %v1138_v61, 0.0 }
 0x17a   : > { %v1090_v59 = vpop.f32.mrf.mxu3 }
 0x17b   : > { %v1091_v63 = vadd.f32 %v3859_v39, %v1090_v59  ;;  %v1142_v0 = vpop.f32.mrf.mxu0 }
 0x17c   : > { %926 = vmatmul.bf16.gmra.mxu2 %v831_v60 }
 0x17d   : > { %v1140_v1 = vadd.f32 %v1139_v53, %v1091_v63 }
 0x17f   : > { %v1169_v3 = vmax.f32 %v1140_v1, 0.0 }
 0x181   : > { %v1181_v48 = vpack.c.bf16 %v1169_v3, %v1168_v2 }
 0x182   : > { %v1093_v4 = vpop.f32.mrf.mxu3 }
 0x183   : > { %1209 = vmatmul.bf16.gmra.mxu1 %v1181_v48  ;;  %v1144_v5 = vpop.f32.mrf.mxu0  ;;  %v1094_v38 = vadd.f32 %v3859_v39, %v1093_v4 }
 0x185   : > { %v1143_v6 = vadd.f32 %v1142_v0, %v1094_v38 }
 0x187   : > { %v1170_v11 = vmax.f32 %v1143_v6, 0.0 }
 0x18a   : > { %v1095_v55 = vpop.f32.mrf.mxu3 }
 0x18b   : > { %v1096_v7 = vadd.f32 %v3859_v39, %v1095_v55  ;;  %v1147_v8 = vpop.f32.mrf.mxu0 }
 0x18d   : > { %v1145_v10 = vadd.f32 %v1144_v5, %v1096_v7 }
 0x18f   : > { %v1171_v12 = vmax.f32 %v1145_v10, 0.0  ;;  %v892_v13 = vpop.f32.mrf.mxu2 }
 0x190   : > { %v893_v14 = vadd.f32 %v3926_v43, %v892_v13 }
 0x191   : > { %v1182_v16 = vpack.c.bf16 %v1171_v12, %v1170_v11 }
 0x192   : > { %v932_v18 = vmax.f32 %v893_v14, 0.0  ;;  %v1098_v19 = vpop.f32.mrf.mxu3 }
 0x193   : > { %1214 = vmatmul.bf16.gmra.mxu1 %v1182_v16  ;;  %v1149_v20 = vpop.f32.mrf.mxu0  ;;  %v1099_v22 = vadd.f32 %v3859_v39, %v1098_v19 }
 0x194   : > { %v951_v21 = vmul.f32 %v3932_v15, %v932_v18 }
 0x195   : > { %v1148_v26 = vadd.f32 %v1147_v8, %v1099_v22 }
 0x196   : > { %967 = vadd.xlane.f32.xlu0 %v951_v21 }
 0x197   : > { %v894_v23 = vpop.f32.mrf.mxu2  ;;  %v1172_v31 = vmax.f32 %v1148_v26, 0.0 }
 0x198   : > { %v895_v24 = vadd.f32 %v3926_v43, %v894_v23 }
 0x19a   : > { %v933_v9 = vmax.f32 %v895_v24, 0.0  ;;  %v1100_v25 = vpop.f32.mrf.mxu3 }
 0x19b   : > { %v1101_v27 = vadd.f32 %v3859_v39, %v1100_v25  ;;  %v1152_v30 = vpop.f32.mrf.mxu0 }
 0x19c   : > { %v952_v62 = vmul.f32 %v3932_v15, %v933_v9 }
 0x19d   : > { %v1150_v28 = vadd.f32 %v1149_v20, %v1101_v27 }
 0x19e   : > { %969 = vadd.xlane.f32.xlu0 %v952_v62 }
 0x19f   : > { %v1173_v32 = vmax.f32 %v1150_v28, 0.0  ;;  %v897_v33 = vpop.f32.mrf.mxu2 }
 0x1a0   : > { %v898_v34 = vadd.f32 %v3926_v43, %v897_v33 }
 0x1a1   : > { %v1183_v35 = vpack.c.bf16 %v1173_v32, %v1172_v31 }
 0x1a2   : > { %v934_v36 = vmax.f32 %v898_v34, 0.0  ;;  %v1103_v37 = vpop.f32.mrf.mxu3 }
 0x1a3   : > { %1219 = vmatmul.bf16.gmra.mxu1 %v1183_v35  ;;  %v1104_v41 = vadd.f32 %v3859_v39, %v1103_v37  ;;  %v1154_v44 = vpop.f32.mrf.mxu0 }
 0x1a4   : > { %v953_v40 = vmul.f32 %v3932_v15, %v934_v36 }
 0x1a5   : > { %v1153_v47 = vadd.f32 %v1152_v30, %v1104_v41 }
 0x1a6   : > { %971 = vadd.xlane.f32.xlu1 %v953_v40 }
 0x1a7   : > { %v899_v42 = vpop.f32.mrf.mxu2  ;;  %v1174_v51 = vmax.f32 %v1153_v47, 0.0 }
 0x1a8   : > { %v900_v45 = vadd.f32 %v3926_v43, %v899_v42 }
 0x1aa   : > { %v935_v46 = vmax.f32 %v900_v45, 0.0  ;;  %v1105_v29 = vpop.f32.mrf.mxu3 }
 0x1ab   : > { %v1106_v49 = vadd.f32 %v3859_v39, %v1105_v29  ;;  %v1157_v57 = vpop.f32.mrf.mxu0 }
 0x1ac   : > { %v954_v50 = vmul.f32 %v3932_v15, %v935_v46 }
 0x1ad   : > { %v1155_v17 = vadd.f32 %v1154_v44, %v1106_v49 }
 0x1ae   : > { %973 = vadd.xlane.f32.xlu2 %v954_v50 }
 0x1af   : > { %v1175_v52 = vmax.f32 %v1155_v17, 0.0  ;;  %v902_v53 = vpop.f32.mrf.mxu2 }
 0x1b0   : > { %v903_v54 = vadd.f32 %v3926_v43, %v902_v53 }
 0x1b1   : > { %v1184_v56 = vpack.c.bf16 %v1175_v52, %v1174_v51 }
 0x1b2   : > { %v936_v58 = vmax.f32 %v903_v54, 0.0  ;;  %v1108_v59 = vpop.f32.mrf.mxu3 }
 0x1b3   : > { %1224 = vmatmul.bf16.gmra.mxu1 %v1184_v56  ;;  %v1109_v61 = vadd.f32 %v3859_v39, %v1108_v59  ;;  %v1159_v4 = vpop.f32.mrf.mxu0 }
 0x1b4   : > { %v955_v60 = vmul.f32 %v3932_v15, %v936_v58 }
 0x1b5   : > { %v1158_v3 = vadd.f32 %v1157_v57, %v1109_v61 }
 0x1b6   : > { %975 = vadd.xlane.f32.xlu1 %v955_v60 }
 0x1b7   : > { %v904_v63 = vpop.f32.mrf.mxu2  ;;  %v1176_v55 = vmax.f32 %v1158_v3, 0.0 }
 0x1b8   : > { %v905_v0 = vadd.f32 %v3926_v43, %v904_v63 }
 0x1ba   : > { %v937_v1 = vmax.f32 %v905_v0, 0.0  ;;  %v1110_v2 = vpop.f32.mrf.mxu3 }
 0x1bb   : > { %v1111_v48 = vadd.f32 %v3859_v39, %v1110_v2 }
 0x1bc   : > { %v956_v5 = vmul.f32 %v3932_v15, %v937_v1 }
 0x1bd   : > { %v1160_v38 = vadd.f32 %v1159_v4, %v1111_v48 }
 0x1be   : > { %977 = vadd.xlane.f32.xlu0 %v956_v5 }
 0x1bf   : > { %v1177_v6 = vmax.f32 %v1160_v38, 0.0  ;;  %v907_v7 = vpop.f32.mrf.mxu2 }
 0x1c0   : > { %v908_v8 = vadd.f32 %v3926_v43, %v907_v7 }
 0x1c1   : > { %v1185_v10 = vpack.c.bf16 %v1177_v6, %v1176_v55 }
 0x1c2   : > { %v938_v11 = vmax.f32 %v908_v8, 0.0 }
 0x1c3   : > { %1229 = vmatmul.bf16.gmra.mxu1 %v1185_v10 }
 0x1c4   : > { %v957_v12 = vmul.f32 %v3932_v15, %v938_v11  ;;  %v3983_v11 = vstv %s562_s26  ;;  %s5519_s26 = sshll.u32 %s2508_s15, 4  ;;  %s5543_s15 = sshll.u32 %s2547_s21, 4  ;;  %s2513_s26 = int_to_ptr.hbm [resolvable:$true] %s5519_s26  ;;  %s2552_s15 = int_to_ptr.hbm [resolvable:$true] %s5543_s15 }
 0x1c5   : > { %s3416_s14 = sshra.s32 %s2513_s26, 4  ;;  %s3417_s14 = int_to_ptr.hbm [resolvable:$true] %s3416_s14 }
 0x1c6   : > { %979 = vadd.xlane.f32.xlu2 %v957_v12  ;;  %s3418_s12 = scalar_lea.hbm %s3417_s14, 1  ;;  %p3423_p2 = scmp.lt.s32.totalorder %s3417_s14, %s5666_s8 }
 0x1c7   : > { %v909_v13 = vpop.f32.mrf.mxu2  ;;  %p3419_p1 = scmp.ne.s32.totalorder %s3417_s14, %s3418_s12  ;;  %p3424_p10 = scmp.lt.s32.totalorder %s3422_s16, %s3418_s12 }
 0x1c8   : > { %v910_v14 = vadd.f32 %v3926_v43, %v909_v13 }
 0x1c9   : > { %p3420_p4 = pnand %p3419_p1, %p3711_p3  ;;  %p3425_p11 = por %p3424_p10, %p3423_p2 }
 0x1ca   : > { %v939_v39 = vmax.f32 %v910_v14, 0.0 }
 0x1cb   : > { %p3421_p8 = pneg %p3420_p4 }
 0x1cc   : > { %v958_v16 = vmul.f32 %v3932_v15, %v939_v39 }
 0x1cd   : > { %p3426_p9 = pnand %p3425_p11, %p3421_p8 }
 0x1ce   : > { %981 = vadd.xlane.f32.xlu1 %v958_v16 }
 0x1cf   : > { %v912_v18 = vpop.f32.mrf.mxu2 }
 0x1d0   : > { %v913_v19 = vadd.f32 %v3926_v43, %v912_v18  ;;  %v1195_v20 = vpop.f32.mrf.mxu1 }
 0x1d1   : > { %v1196_v21 = vadd.f32 %v3926_v43, %v1195_v20 }
 0x1d2   : > { %v940_v22 = vmax.f32 %v913_v19, 0.0 }
 0x1d3   : > { %v1235_v23 = vmax.f32 %v1196_v21, 0.0 }
 0x1d4   : > { %v959_v24 = vmul.f32 %v3932_v15, %v940_v22 }
 0x1d5   : > { %v1251_v9 = vmul.f32 %v3932_v15, %v1235_v23 }
 0x1d6   : > { %983 = vadd.xlane.f32.xlu0 %v959_v24 }
 0x1d7   : > { %1267 = vadd.xlane.f32.xlu1 %v1251_v9  ;;  %v914_v25 = vpop.f32.mrf.mxu2 }
 0x1d8   : > { %v1197_v26 = vpop.f32.mrf.mxu1  ;;  %v915_v28 = vadd.f32 %v3926_v43, %v914_v25 }
 0x1d9   : > { %v1198_v27 = vadd.f32 %v3926_v43, %v1197_v26 }
 0x1da   : > { %v941_v34 = vmax.f32 %v915_v28, 0.0 }
 0x1db   : > { %v1236_v62 = vmax.f32 %v1198_v27, 0.0 }
 0x1dc   : > { %v960_v41 = vmul.f32 %v3932_v15, %v941_v34 }
 0x1dd   : > { %v1252_v30 = vmul.f32 %v3932_v15, %v1236_v62 }
 0x1df   : > { %1269 = vadd.xlane.f32.xlu2 %v1252_v30  ;;  %v917_v31 = vpop.f32.mrf.mxu2 }
 0x1e0   : > { %v918_v32 = vadd.f32 %v3926_v43, %v917_v31  ;;  %v1200_v33 = vpop.f32.mrf.mxu1 }
 0x1e1   : > { %v1201_v35 = vadd.f32 %v3926_v43, %v1200_v33 }
 0x1e2   : > { %v942_v36 = vmax.f32 %v918_v32, 0.0 }
 0x1e3   : > { %v1237_v37 = vmax.f32 %v1201_v35, 0.0 }
 0x1e4   : > { %v961_v40 = vmul.f32 %v3932_v15, %v942_v36 }
 0x1e5   : > { %v1253_v42 = vmul.f32 %v3932_v15, %v1237_v37 }
 0x1e6   : > { %987 = vadd.xlane.f32.xlu1 %v961_v40 }
 0x1e7   : > { %985 = vadd.xlane.f32.xlu2 %v960_v41  ;;  %1271 = vadd.xlane.f32.xlu0 %v1253_v42  ;;  %v919_v44 = vpop.f32.mrf.mxu2 }
 0x1e8   : > { %v920_v45 = vadd.f32 %v3926_v43, %v919_v44  ;;  %v1202_v46 = vpop.f32.mrf.mxu1 }
 0x1e9   : > { %v1203_v29 = vadd.f32 %v3926_v43, %v1202_v46 }
 0x1ea   : > { %v943_v47 = vmax.f32 %v920_v45, 0.0 }
 0x1eb   : > { %v1238_v49 = vmax.f32 %v1203_v29, 0.0 }
 0x1ec   : > { %v962_v50 = vmul.f32 %v3932_v15, %v943_v47 }
 0x1ed   : > { %v1254_v17 = vmul.f32 %v3932_v15, %v1238_v49 }
 0x1ef   : > { %1273 = vadd.xlane.f32.xlu2 %v1254_v17  ;;  %989 = vadd.xlane.f32.xlu0 %v962_v50  ;;  %v922_v51 = vpop.f32.mrf.mxu2 }
 0x1f0   : > { %v923_v52 = vadd.f32 %v3926_v43, %v922_v51  ;;  %v1205_v53 = vpop.f32.mrf.mxu1  ;;  %v1635_v51 = vlaneseq }
 0x1f1   : > { %v1206_v54 = vadd.f32 %v3926_v43, %v1205_v53 }
 0x1f2   : > { %v944_v56 = vmax.f32 %v923_v52, 0.0 }
 0x1f3   : > { %v1239_v57 = vmax.f32 %v1206_v54, 0.0 }
 0x1f4   : > { %v963_v58 = vmul.f32 %v3932_v15, %v944_v56 }
 0x1f5   : > { %v1255_v59 = vmul.f32 %v3932_v15, %v1239_v57 }
 0x1f7   : > { %991 = vadd.xlane.f32.xlu2 %v963_v58  ;;  %1275 = vadd.xlane.f32.xlu1 %v1255_v59  ;;  %v924_v60 = vpop.f32.mrf.mxu2 }
 0x1f8   : > { %v925_v61 = vadd.f32 %v3926_v43, %v924_v60  ;;  %v1207_v63 = vpop.f32.mrf.mxu1 }
 0x1f9   : > { %v1208_v0 = vadd.f32 %v3926_v43, %v1207_v63 }
 0x1fa   : > { %v945_v1 = vmax.f32 %v925_v61, 0.0 }
 0x1fb   : > { %v1240_v2 = vmax.f32 %v1208_v0, 0.0 }
 0x1fc   : > { %v964_v3 = vmul.f32 %v3932_v15, %v945_v1 }
 0x1fd   : > { %v1256_v48 = vmul.f32 %v3932_v15, %v1240_v2  ;;  %v4026_v2 = vand.u32 127, %v1635_v51 }
 0x1ff   : > { %993 = vadd.xlane.f32.xlu1 %v964_v3  ;;  %1277 = vadd.xlane.f32.xlu0 %v1256_v48  ;;  %v927_v4 = vpop.f32.mrf.mxu2 }
 0x200   : > { %v928_v5 = vadd.f32 %v3926_v43, %v927_v4  ;;  %v1210_v38 = vpop.f32.mrf.mxu1 }
 0x201   : > { %v1211_v55 = vadd.f32 %v3926_v43, %v1210_v38 }
 0x202   : > { %v946_v6 = vmax.f32 %v928_v5, 0.0 }
 0x203   : > { %v1241_v7 = vmax.f32 %v1211_v55, 0.0 }
 0x204   : > { %v965_v8 = vmul.f32 %v3932_v15, %v946_v6 }
 0x205   : > { %v1257_v10 = vmul.f32 %v3932_v15, %v1241_v7 }
 0x207   : > { %1279 = vadd.xlane.f32.xlu2 %v1257_v10  ;;  %995 = vadd.xlane.f32.xlu0 %v965_v8  ;;  %v4040_v10 = vadd.s32 4294967288, %v4026_v2 }
 0x208   : > { %v1212_v12 = vpop.f32.mrf.mxu1 }
 0x209   : > { %v1213_v13 = vadd.f32 %v3926_v43, %v1212_v12  ;;  %v968_v14 = vpop.xlane.xlu0 %967 }
 0x20a   : > { %v3987_v39 = vadd.f32 %v3983_v11, %v968_v14 }
 0x20b   : > { %v1242_v16 = vmax.f32 %v1213_v13, 0.0 }
 0x20c   : > { %v2854_v18 = vmul.f32 -1.442695, %v3987_v39  ;;  %v2053_v19 = vsub.f32 0.0, %v3987_v39 }
 0x20d   : > { %v1258_v20 = vmul.f32 %v3932_v15, %v1242_v16  ;;  %v4046_v16 = vadd.s32 4294967280, %v4026_v2 }
 0x20e   : > { %3026 = vpow2.f32 %v2854_v18  ;;  %v2085_v21 = vand.u32 2147483647, %v2053_v19  ;;  %v4037_v8 = vmax.f32 %v2053_v19, 0.0 }
 0x20f   : > { %1281 = vadd.xlane.f32.xlu1 %v1258_v20 }
 0x210   : > { %v2101_v22 = vsub.f32 0.0, %v2085_v21  ;;  %v1215_v23 = vpop.f32.mrf.mxu1 }
 0x211   : > { %v1216_v24 = vadd.f32 %v3926_v43, %v1215_v23  ;;  %v970_v9 = vpop.xlane.xlu0 %969 }
 0x212   : > { %v2117_v25 = vmul.f32 1.442695, %v2101_v22  ;;  %v3996_v26 = vadd.f32 %v3983_v11, %v970_v9 }
 0x213   : > { %v1243_v27 = vmax.f32 %v1216_v24, 0.0 }
 0x214   : > { %v3027_v62 = vpop.eup %3026  ;;  %v2855_v28 = vmul.f32 -1.442695, %v3996_v26  ;;  %v2054_v30 = vsub.f32 0.0, %v3996_v26  ;;  %3028 = vpow2.f32 %v2117_v25 }
 0x215   : > { %v4000_v31 = vadd.f32 1.0, %v3027_v62  ;;  %v1259_v32 = vmul.f32 %v3932_v15, %v1243_v27 }
 0x216   : > { %3030 = vpow2.f32 %v2855_v28  ;;  %v2086_v33 = vand.u32 2147483647, %v2054_v30  ;;  %v2070_v24 = vmax.f32 %v2054_v30, 0.0 }
 0x217   : > { %3032 = vrcp.f32 %v4000_v31  ;;  %1283 = vadd.xlane.f32.xlu0 %v1259_v32  ;;  %v1388_v12 = vand.u32 2147483647, %v4000_v31  ;;  %v1390_v13 = vand.u32 2147483648, %v4000_v31  ;;  %vm1384_vm1 = vweird.f32 %v4000_v31 }
 0x218   : > { %v2102_v34 = vsub.f32 0.0, %v2086_v33  ;;  %v1217_v35 = vpop.f32.mrf.mxu1 }
 0x219   : > { %v1218_v36 = vadd.f32 %v3926_v43, %v1217_v35  ;;  %v972_v37 = vpop.xlane.xlu1 %971  ;;  %vm4062_vm4 = vcmp.eq.f32.partialorder %v1388_v12, 8.507059e+37  ;;  %v1391_v30 = vor.u32 1.1754944e-38, %v1390_v13 }
 0x21a   : > { %v2119_v40 = vmul.f32 1.442695, %v2102_v34  ;;  %v4008_v41 = vadd.f32 %v3983_v11, %v972_v37  ;;  %v3029_v42 = vpop.eup %3028 }
 0x21b   : > { %v1244_v44 = vmax.f32 %v1218_v36, 0.0  ;;  %v2149_v52 = vadd.f32 1.0, %v3029_v42 }
 0x21c   : > { %v3031_v45 = vpop.eup %3030  ;;  %3034 = vpow2.f32 %v2119_v40  ;;  %v2856_v46 = vmul.f32 -1.442695, %v4008_v41  ;;  %v2055_v29 = vsub.f32 0.0, %v4008_v41  ;;  %v929_v41 = vpop.f32.mrf.mxu2 }
 0x21d   : > { %v4012_v47 = vpop.eup %3032  ;;  %v4014_v49 = vadd.f32 1.0, %v3031_v45  ;;  %v1260_v50 = vmul.f32 %v3932_v15, %v1244_v44 }
 0x21e   : > { %3036 = vpow2.f32 %v2856_v46  ;;  %v1380_v17 = vmul.f32 %v4012_v47, %v4000_v31  ;;  %v2087_v53 = vand.u32 2147483647, %v2055_v29  ;;  %vm1385_vm2 = vweird.f32 %v4012_v47 }
 0x21f   : > { %3038 = vrcp.f32 %v4014_v49  ;;  %1285 = vadd.xlane.f32.xlu2 %v1260_v50  ;;  %v1403_v20 = vand.u32 2147483647, %v4014_v49  ;;  %v1405_v39 = vand.u32 2147483648, %v4014_v49  ;;  %vm1399_vm3 = vweird.f32 %v4014_v49  ;;  %vm4075_vm8 = vmor %vm1384_vm1, %vm1385_vm2 }
 0x220   : > { %v1220_v54 = vpop.f32.mrf.mxu1  ;;  %v2103_v59 = vsub.f32 0.0, %v2087_v53  ;;  %v1381_v61 = vsub.f32 1.0, %v1380_v17  ;;  %3040 = vlog2.f32 %v2149_v52  ;;  %vm1648_vm2 = vcmask 261312  }
 0x221   : > { %v1221_v56 = vadd.f32 %v3926_v43, %v1220_v54  ;;  %v974_v57 = vpop.xlane.xlu2 %973  ;;  %vm4071_vm7 = vcmp.eq.f32.partialorder %v1403_v20, 8.507059e+37  ;;  %v1406_v35 = vor.u32 1.1754944e-38, %v1405_v39 }
 0x222   : > { %v3035_v58 = vpop.eup %3034  ;;  %v4024_v60 = vadd.f32 %v3983_v11, %v974_v57  ;;  %v2121_v3 = vmul.f32 1.442695, %v2103_v59  ;;  %v1382_v7 = vmul.f32 %v4012_v47, %v1381_v61 }
 0x223   : > { %v2150_v63 = vadd.f32 1.0, %v3035_v58  ;;  %v1245_v0 = vmax.f32 %v1221_v56, 0.0 }
 0x224   : > { %v3037_v1 = vpop.eup %3036  ;;  %v2056_v5 = vsub.f32 0.0, %v4024_v60  ;;  %v2857_v6 = vmul.f32 -1.442695, %v4024_v60  ;;  %v1383_v25 = vadd.f32 %v4012_v47, %v1382_v7 }
 0x225   : > { %v3039_v48 = vpop.eup %3038  ;;  %3042 = vlog2.f32 %v2150_v63  ;;  %v4028_v4 = vadd.f32 1.0, %v3037_v1  ;;  %v1261_v38 = vmul.f32 %v3932_v15, %v1245_v0 }
 0x226   : > { %v1395_v55 = vmul.f32 %v3039_v48, %v4014_v49  ;;  %v2088_v19 = vand.u32 2147483647, %v2056_v5  ;;  %v3041_v22 = vpop.eup %3040  ;;  %vm1400_vm0 = vweird.f32 %v3039_v48  ;;  %v1387_v46 = vsel %vm4075_vm8, %v4012_v47, %v1383_v25 }
 0x227   : > { %3044 = vrcp.f32 %v4028_v4  ;;  %1287 = vadd.xlane.f32.xlu1 %v1261_v38  ;;  %vm4067_vm6 = vmor %vm1399_vm3, %vm1400_vm0  ;;  %v2166_v37 = vmul.f32 0.6931472, %v3041_v22  ;;  %v1420_v53 = vand.u32 2147483648, %v4028_v4  ;;  %v1418_v63 = vand.u32 2147483647, %v4028_v4 }
 0x228   : > { %v1396_v14 = vsub.f32 1.0, %v1395_v55  ;;  %v1222_v18 = vpop.f32.mrf.mxu1  ;;  %3046 = vpow2.f32 %v2121_v3  ;;  %v2104_v27 = vsub.f32 0.0, %v2088_v19  ;;  %v1392_v0 = vsel %vm4062_vm4, %v1391_v30, %v1387_v46 }
 0x229   : > { %v976_v21 = vpop.xlane.xlu1 %975  ;;  %3048 = vpow2.f32 %v2857_v6  ;;  %v1223_v28 = vadd.f32 %v3926_v43, %v1222_v18  ;;  %vm1414_vm10 = vweird.f32 %v4028_v4  ;;  %v1421_v7 = vor.u32 1.1754944e-38, %v1420_v53 }
 0x22a   : > { %v1397_v23 = vmul.f32 %v3039_v48, %v1396_v14  ;;  %v4060_v32 = vadd.f32 %v3983_v11, %v976_v21  ;;  %v2123_v49 = vmul.f32 1.442695, %v2104_v27  ;;  %v1637_v13 = vperm.slane %v1392_v0, %v4026_v2 }
 0x22b   : > { %v3043_v9 = vpop.eup %3042  ;;  %v1246_v56 = vmax.f32 %v1223_v28, 0.0  ;;  %v2197_v14 = vadd.f32 %v2166_v37, %v4037_v8  ;;  %vm1419_vm13 = vcmp.eq.f32.partialorder %v1418_v63, 8.507059e+37  ;;  %v2071_v19 = vmax.f32 %v2055_v29, 0.0 }
 0x22c   : > { %v1398_v62 = vadd.f32 %v3039_v48, %v1397_v23  ;;  %v2168_v42 = vmul.f32 0.6931472, %v3043_v9  ;;  %v2858_v50 = vmul.f32 -1.442695, %v4060_v32  ;;  %v2057_v17 = vsub.f32 0.0, %v4060_v32 }
 0x22d   : > { %v3045_v33 = vpop.eup %3044  ;;  %v1262_v55 = vmul.f32 %v3932_v15, %v1246_v56  ;;  %v2213_v29 = vmin.f32 %v2197_v14, 100.0 }
 0x22e   : > { %v1402_v40 = vsel %vm4067_vm6, %v3039_v48, %v1398_v62  ;;  %v1410_v44 = vmul.f32 %v3045_v33, %v4028_v4  ;;  %v3047_v45 = vpop.eup %3046  ;;  %3050 = vpow2.f32 %v2858_v50  ;;  %v2089_v47 = vand.u32 2147483647, %v2057_v17 }
 0x22f   : > { %v3049_v51 = vpop.eup %3048  ;;  %v2151_v54 = vadd.f32 1.0, %v3047_v45  ;;  %v1407_v57 = vsel %vm4071_vm7, %v1406_v35, %v1402_v40  ;;  %vm1415_vm9 = vweird.f32 %v3045_v33  ;;  %v2198_v1 = vadd.f32 %v2168_v42, %v2070_v24  ;;  %1289 = vadd.xlane.f32.xlu0 %v1262_v55 }
 0x230   : > { %v1411_v52 = vsub.f32 1.0, %v1410_v44  ;;  %v4090_v58 = vadd.f32 1.0, %v3049_v51  ;;  %v1225_v59 = vpop.f32.mrf.mxu1  ;;  %v1639_v3 = vperm.slane %v1407_v57, %v4040_v10  ;;  %v2105_v38 = vsub.f32 0.0, %v2089_v47  ;;  %vm1416_vm12 = vmor %vm1414_vm10, %vm1415_vm9 }
 0x231   : > { %3052 = vlog2.f32 %v2151_v54  ;;  %v978_v6 = vpop.xlane.xlu0 %977  ;;  %v1226_v12 = vadd.f32 %v3926_v43, %v1225_v59  ;;  %v2214_v20 = vmin.f32 %v2198_v1, 100.0  ;;  %v930_v40 = vadd.f32 %v3926_v43, %v929_v41 }
 0x232   : > { %v1412_v61 = vmul.f32 %v3045_v33, %v1411_v52  ;;  %3054 = vpow2.f32 %v2123_v49  ;;  %v4107_v21 = vadd.f32 %v3983_v11, %v978_v6  ;;  %v1641_v23 = vsel %vm1640_vm5, %v1639_v3, %v1637_v13 }
 0x233   : > { %3056 = vrcp.f32 %v4090_v58  ;;  %v2125_v8 = vmul.f32 1.442695, %v2105_v38  ;;  %v1247_v62 = vmax.f32 %v1226_v12, 0.0  ;;  %v2246_v35 = vperm.slane %v2214_v20, %v4040_v10 }
 0x234   : > { %v1413_v48 = vadd.f32 %v3045_v33, %v1412_v61  ;;  %v3051_v18 = vpop.eup %3050  ;;  %v2859_v28 = vmul.f32 -1.442695, %v4107_v21  ;;  %v2245_v45 = vperm.slane %v2213_v29, %v4026_v2  ;;  %v947_v57 = vmax.f32 %v930_v40, 0.0 }
 0x235   : > { %v4111_v9 = vadd.f32 1.0, %v3051_v18  ;;  %v1263_v44 = vmul.f32 %v3932_v15, %v1247_v62  ;;  %vm1429_vm15 = vweird.f32 %v4090_v58  ;;  %v4167_v41 = vadd.s32 4294967264, %v4026_v2 }
 0x236   : > { %v1417_v4 = vsel %vm1416_vm12, %v3045_v33, %v1413_v48  ;;  %v2058_v33 = vsub.f32 0.0, %v4107_v21  ;;  %v2247_v54 = vsel %vm1640_vm5, %v2246_v35, %v2245_v45  ;;  %v966_v12 = vmul.f32 %v3932_v15, %v947_v57 }
 0x237   : > { %v1422_v39 = vsel %vm1419_vm13, %v1421_v7, %v1417_v4  ;;  %v3053_v22 = vpop.eup %3052  ;;  %3058 = vrcp.f32 %v4111_v9  ;;  %1291 = vadd.xlane.f32.xlu2 %v1263_v44  ;;  %v1450_v32 = vand.u32 2147483648, %v4111_v9  ;;  %vm1444_vm4 = vweird.f32 %v4111_v9 }
 0x238   : > { %v1643_v24 = vperm.slane %v1422_v39, %v4046_v16  ;;  %v3055_v25 = vpop.eup %3054  ;;  %v2170_v27 = vmul.f32 0.6931472, %v3053_v22  ;;  %v1227_v34 = vpop.f32.mrf.mxu1  ;;  %3060 = vpow2.f32 %v2859_v28  ;;  %v2090_v36 = vand.u32 2147483647, %v2058_v33 }
 0x239   : > { %v4118_v30 = vpop.eup %3056  ;;  %v980_v37 = vpop.xlane.xlu2 %979  ;;  %3062 = vpow2.f32 %v2125_v8  ;;  %v2152_v49 = vadd.f32 1.0, %v3055_v25  ;;  %v1228_v52 = vadd.f32 %v3926_v43, %v1227_v34  ;;  %v4152_v39 = vadd.s32 4294967272, %v4026_v2 }
 0x23a   : > { %v4116_v26 = vsel %vm1644_vm11, %v1643_v24, %v1641_v23  ;;  %v2199_v31 = vadd.f32 %v2170_v27, %v2071_v19  ;;  %v1425_v46 = vmul.f32 %v4118_v30, %v4090_v58  ;;  %v2106_v51 = vsub.f32 0.0, %v2090_v36 }
 0x23b   : > { %v4132_v53 = vadd.f32 %v3983_v11, %v980_v37  ;;  %3064 = vlog2.f32 %v2152_v49  ;;  %v1248_v48 = vmax.f32 %v1228_v52, 0.0  ;;  %v1433_v19 = vand.u32 2147483647, %v4090_v58 }
 0x23c   : > { %v2215_v42 = vmin.f32 %v2199_v31, 100.0  ;;  %v1426_v61 = vsub.f32 1.0, %v1425_v46  ;;  %v2127_v3 = vmul.f32 1.442695, %v2106_v51  ;;  %v1435_v24 = vand.u32 2147483648, %v4090_v58 }
 0x23d   : > { %v4135_v56 = vpop.eup %3058  ;;  %v2860_v63 = vmul.f32 -1.442695, %v4132_v53  ;;  %v2059_v0 = vsub.f32 0.0, %v4132_v53  ;;  %v1264_v20 = vmul.f32 %v3932_v15, %v1248_v48  ;;  %vm1430_vm14 = vweird.f32 %v4118_v30 }
 0x23e   : > { %v2248_v50 = vperm.slane %v2215_v42, %v4046_v16  ;;  %v3061_v59 = vpop.eup %3060  ;;  %v1440_v6 = vmul.f32 %v4135_v56, %v4111_v9  ;;  %v1427_v14 = vmul.f32 %v4118_v30, %v1426_v61  ;;  %v2072_v28 = vmax.f32 %v2056_v5, 0.0  ;;  %vm4171_vm0 = vmor %vm1429_vm15, %vm1430_vm14 }
 0x23f   : > { %v3063_v1 = vpop.eup %3062  ;;  %v2091_v38 = vand.u32 2147483647, %v2059_v0  ;;  %v4146_v7 = vadd.f32 1.0, %v3061_v59  ;;  %3066 = vpow2.f32 %v2860_v63  ;;  %997 = vadd.xlane.f32.xlu2 %v966_v12  ;;  %1293 = vadd.xlane.f32.xlu1 %v1264_v20  ;;  %vm4175_vm1 = vcmp.eq.f32.partialorder %v1433_v19, 8.507059e+37 }
 0x240   : > { %v4138_v47 = vsel %vm1644_vm11, %v2248_v50, %v2247_v54  ;;  %v1230_v13 = vpop.f32.mrf.mxu1  ;;  %v2153_v4 = vadd.f32 1.0, %v3063_v1  ;;  %3068 = vpow2.f32 %v2127_v3  ;;  %v1441_v8 = vsub.f32 1.0, %v1440_v6 }
 0x241   : > { %v982_v55 = vpop.xlane.xlu1 %981  ;;  %v2107_v18 = vsub.f32 0.0, %v2091_v38  ;;  %v1231_v22 = vadd.f32 %v3926_v43, %v1230_v13  ;;  %v3065_v23 = vpop.eup %3064  ;;  %3070 = vrcp.f32 %v4146_v7  ;;  %v1428_v27 = vadd.f32 %v4118_v30, %v1427_v14 }
 0x242   : > { %3072 = vlog2.f32 %v2153_v4  ;;  %v4161_v62 = vadd.f32 %v3983_v11, %v982_v55  ;;  %v2172_v31 = vmul.f32 0.6931472, %v3065_v23  ;;  %v1442_v60 = vmul.f32 %v4135_v56, %v1441_v8 }
 0x243   : > { %v2129_v25 = vmul.f32 1.442695, %v2107_v18  ;;  %v1249_v34 = vmax.f32 %v1231_v22, 0.0  ;;  %v2073_v5 = vmax.f32 %v2057_v17, 0.0  ;;  %v1432_v44 = vsel %vm4171_vm0, %v4118_v30, %v1428_v27 }
 0x244   : > { %v2861_v35 = vmul.f32 -1.442695, %v4161_v62  ;;  %v2060_v36 = vsub.f32 0.0, %v4161_v62  ;;  %v1436_v45 = vor.u32 1.1754944e-38, %v1435_v24  ;;  %v1448_v51 = vand.u32 2147483647, %v4111_v9 }
 0x245   : > { %3074 = vpow2.f32 %v2129_v25  ;;  %v3067_v29 = vpop.eup %3066  ;;  %v4194_v17 = vadd.s32 4294967256, %v4026_v2  ;;  %v2200_v30 = vadd.f32 %v2172_v31, %v2072_v28  ;;  %v1265_v61 = vmul.f32 %v3932_v15, %v1249_v34 }
 0x246   : > { %v3069_v37 = vpop.eup %3068  ;;  %v4182_v42 = vadd.f32 1.0, %v3067_v29  ;;  %3076 = vpow2.f32 %v2861_v35  ;;  %v2092_v46 = vand.u32 2147483647, %v2060_v36  ;;  %v1437_v1 = vsel %vm4175_vm1, %v1436_v45, %v1432_v44 }
 0x247   : > { %v4189_v50 = vpop.eup %3070  ;;  %v2154_v57 = vadd.f32 1.0, %v3069_v37  ;;  %v1443_v3 = vadd.f32 %v4135_v56, %v1442_v60  ;;  %vm1445_vm3 = vweird.f32 %v4135_v56  ;;  %1295 = vadd.xlane.f32.xlu0 %v1265_v61  ;;  %vm4209_vm6 = vcmp.eq.f32.partialorder %v1448_v51, 8.507059e+37 }
 0x248   : > { %3078 = vrcp.f32 %v4182_v42  ;;  %v1232_v52 = vpop.f32.mrf.mxu1  ;;  %v3073_v54 = vpop.eup %3072  ;;  %v2108_v59 = vsub.f32 0.0, %v2092_v46  ;;  %v1455_v38 = vmul.f32 %v4189_v50, %v4146_v7  ;;  %v1451_v14 = vor.u32 1.1754944e-38, %v1450_v32  ;;  %vm4223_vm8 = vmor %vm1444_vm4, %vm1445_vm3 }
 0x249   : > { %v1233_v12 = vadd.f32 %v3926_v43, %v1232_v52  ;;  %v4215_v4 = vmax.f32 %v2058_v33, 0.0  ;;  %v2216_v20 = vmin.f32 %v2200_v30, 100.0  ;;  %v2174_v19 = vmul.f32 0.6931472, %v3073_v54  ;;  %v984_v27 = vpop.xlane.xlu0 %983 }
 0x24a   : > { %v1268_v49 = vpop.xlane.xlu1 %1267  ;;  %v2131_v6 = vmul.f32 1.442695, %v2108_v59  ;;  %3080 = vlog2.f32 %v2154_v57  ;;  %v1647_v43 = vperm.slane %v1437_v1, %v4152_v39  ;;  %vm1652_vm7 = vcmask 326912  }
 0x24b   : > { %v3075_v63 = vpop.eup %3074  ;;  %v4203_v48 = vadd.f32 %v1268_v49, %v3983_v11  ;;  %v1447_v24 = vsel %vm4223_vm8, %v4135_v56, %v1443_v3  ;;  %v1456_v8 = vsub.f32 1.0, %v1455_v38  ;;  %v1250_v25 = vmax.f32 %v1233_v12, 0.0 }
 0x24c   : > { %v2155_v55 = vadd.f32 1.0, %v3075_v63  ;;  %v3077_v18 = vpop.eup %3076  ;;  %v4234_v28 = vadd.s32 4294967248, %v4026_v2  ;;  %v4240_v31 = vmax.f32 %v2059_v0, 0.0  ;;  %v2250_v35 = vperm.slane %v2216_v20, %v4152_v39 }
 0x24d   : > { %v2870_v22 = vmul.f32 -1.442695, %v4203_v48  ;;  %v4227_v21 = vadd.f32 1.0, %v3077_v18  ;;  %v2294_v33 = vand.u32 2147483647, %v4203_v48  ;;  %v2201_v56 = vadd.f32 %v2174_v19, %v2073_v5 }
 0x24e   : > { %v4218_v23 = vpop.eup %3078  ;;  %3082 = vlog2.f32 %v2155_v55  ;;  %vm1459_vm9 = vweird.f32 %v4146_v7  ;;  %v1649_v37 = vsel %vm1648_vm2, %v1647_v43, %v4116_v26  ;;  %v1452_v40 = vsel %vm4209_vm6, %v1451_v14, %v1447_v24 }
 0x24f   : > { %3084 = vpow2.f32 %v2131_v6  ;;  %v1470_v29 = vmul.f32 %v4218_v23, %v4182_v42  ;;  %v2310_v58 = vsub.f32 0.0, %v2294_v33  ;;  %v4250_v53 = vadd.f32 %v3983_v11, %v984_v27 }
 0x250   : > { %3086 = vrcp.f32 %v4227_v21  ;;  %v3081_v0 = vpop.eup %3080  ;;  %v1457_v60 = vmul.f32 %v4189_v50, %v1456_v8  ;;  %v1463_v44 = vand.u32 2147483647, %v4146_v7  ;;  %v1266_v5 = vmul.f32 %v3932_v15, %v1250_v25 }
 0x251   : > { %3088 = vpow2.f32 %v2870_v22  ;;  %v1465_v26 = vand.u32 2147483648, %v4146_v7  ;;  %v1471_v49 = vsub.f32 1.0, %v1470_v29  ;;  %v2862_v51 = vmul.f32 -1.442695, %v4250_v53 }
 0x252   : > { %v1270_v34 = vpop.xlane.xlu2 %1269  ;;  %v2061_v32 = vsub.f32 0.0, %v4250_v53  ;;  %v2251_v54 = vsel %vm1648_vm2, %v2250_v35, %v4138_v47  ;;  %v1651_v30 = vperm.slane %v1452_v40, %v4167_v41  ;;  %v2217_v57 = vmin.f32 %v2201_v56, 100.0  ;;  %1297 = vadd.xlane.f32.xlu1 %v1266_v5 }
 0x253   : > { %v4256_v45 = vadd.f32 %v1270_v34, %v3983_v11  ;;  %v2176_v61 = vmul.f32 0.6931472, %v3081_v0  ;;  %v2326_v63 = vmul.f32 1.442695, %v2310_v58  ;;  %3090 = vpow2.f32 %v2862_v51 }
 0x254   : > { %v3083_v46 = vpop.eup %3082  ;;  %v2093_v1 = vand.u32 2147483647, %v2061_v32  ;;  %v1458_v38 = vadd.f32 %v4189_v50, %v1457_v60  ;;  %vm1460_vm10 = vweird.f32 %v4189_v50  ;;  %vm4271_vm12 = vcmp.eq.f32.partialorder %v1463_v44, 8.507059e+37 }
 0x255   : > { %v3085_v52 = vpop.eup %3084  ;;  %v2871_v15 = vmul.f32 -1.442695, %v4256_v45  ;;  %v1466_v6 = vor.u32 1.1754944e-38, %v1465_v26  ;;  %v1472_v12 = vmul.f32 %v4218_v23, %v1471_v49  ;;  %v4279_v13 = vadd.s32 4294967240, %v4026_v2  ;;  %vm4287_vm14 = vmor %vm1459_vm9, %vm1460_vm10 }
 0x256   : > { %v4265_v59 = vpop.eup %3086  ;;  %v1653_v18 = vsel %vm1652_vm7, %v1651_v30, %v1649_v37  ;;  %v2252_v20 = vperm.slane %v2217_v57, %v4167_v41  ;;  %v2109_v19 = vsub.f32 0.0, %v2093_v1  ;;  %vm1656_vm13 = vcmask 392512  }
 0x257   : > { %v3089_v3 = vpop.eup %3088  ;;  %v1485_v55 = vmul.f32 %v4265_v59, %v4227_v21  ;;  %3092 = vpow2.f32 %v2871_v15  ;;  %v2202_v43 = vadd.f32 %v2176_v61, %v4215_v4  ;;  %v2178_v9 = vmul.f32 0.6931472, %v3083_v46 }
 0x258   : > { %v4281_v14 = vadd.f32 1.0, %v3089_v3  ;;  %v2156_v33 = vadd.f32 1.0, %v3085_v52  ;;  %3094 = vpow2.f32 %v2326_v63  ;;  %v1462_v24 = vsel %vm4287_vm14, %v4189_v50, %v1458_v38 }
 0x259   : > { %v1478_v8 = vand.u32 2147483647, %v4182_v42  ;;  %v1480_v25 = vand.u32 2147483648, %v4182_v42  ;;  %v1486_v27 = vsub.f32 1.0, %v1485_v55  ;;  %v3091_v29 = vpop.eup %3090  ;;  %v1473_v7 = vadd.f32 %v4218_v23, %v1472_v12 }
 0x25a   : > { %vm1475_vm15 = vweird.f32 %v4218_v23  ;;  %3096 = vrcp.f32 %v4281_v14  ;;  %v2295_v4 = vand.u32 2147483647, %v4256_v45  ;;  %vm1474_vm0 = vweird.f32 %v4182_v42  ;;  %v986_v26 = vpop.xlane.xlu2 %985 }
 0x25b   : > { %v4304_v34 = vmax.f32 %v2060_v36, 0.0  ;;  %v4306_v50 = vadd.f32 1.0, %v3091_v29  ;;  %v2133_v35 = vmul.f32 1.442695, %v2109_v19  ;;  %v1467_v56 = vsel %vm4271_vm12, %v1466_v6, %v1462_v24  ;;  %vm4312_vm3 = vmor %vm1474_vm0, %vm1475_vm15 }
 0x25c   : > { %v2218_v37 = vmin.f32 %v2202_v43, 100.0  ;;  %v2203_v40 = vadd.f32 %v2178_v9, %v4240_v31  ;;  %3098 = vlog2.f32 %v2156_v33  ;;  %v2253_v0 = vsel %vm1652_vm7, %v2252_v20, %v2251_v54 }
 0x25d   : > { %v3093_v58 = vpop.eup %3092  ;;  %vm1660_vm1 = vcmask 458112   ;;  %vm4316_vm4 = vcmp.eq.f32.partialorder %v1478_v8, 8.507059e+37  ;;  %v1487_v36 = vmul.f32 %v4265_v59, %v1486_v27  ;;  %3100 = vrcp.f32 %v4306_v50 }
 0x25e   : > { %v3095_v60 = vpop.eup %3094  ;;  %v1477_v31 = vsel %vm4312_vm3, %v4218_v23, %v1473_v7  ;;  %v1481_v44 = vor.u32 1.1754944e-38, %v1480_v25  ;;  %v4325_v5 = vadd.f32 1.0, %v3093_v58  ;;  %v2311_v46 = vsub.f32 0.0, %v2295_v4 }
 0x25f   : > { %v1655_v49 = vperm.slane %v1467_v56, %v4194_v17  ;;  %v1493_v51 = vand.u32 2147483647, %v4227_v21  ;;  %v1495_v52 = vand.u32 2147483648, %v4227_v21  ;;  %3102 = vpow2.f32 %v2133_v35 }
 0x260   : > { %v4330_v54 = vpop.eup %3096  ;;  %v2254_v30 = vperm.slane %v2218_v37, %v4194_v17  ;;  %v2219_v57 = vmin.f32 %v2203_v40, 100.0  ;;  %vm1490_vm6 = vweird.f32 %v4265_v59  ;;  %3104 = vrcp.f32 %v4325_v5  ;;  %v988_v37 = vpop.xlane.xlu1 %987 }
 0x261   : > { %v1482_v23 = vsel %vm4316_vm4, %v1481_v44, %v1477_v31  ;;  %v1488_v15 = vadd.f32 %v4265_v59, %v1487_v36  ;;  %v2358_v61 = vadd.f32 1.0, %v3095_v60  ;;  %v4339_v63 = vadd.f32 %v3983_v11, %v986_v26 }
 0x262   : > { %v3099_v1 = vpop.eup %3098  ;;  %vm1489_vm8 = vweird.f32 %v4227_v21  ;;  %v2278_v3 = vmax.f32 %v4203_v48, 0.0  ;;  %v4344_v38 = vadd.s32 4294967232, %v4026_v2  ;;  %v2328_v47 = vmul.f32 1.442695, %v2311_v46 }
 0x263   : > { %v4346_v55 = vpop.eup %3100  ;;  %v1657_v6 = vsel %vm1656_vm13, %v1655_v49, %v1653_v18  ;;  %vm4349_vm9 = vcmp.eq.f32.partialorder %v1493_v51, 8.507059e+37  ;;  %v1496_v20 = vor.u32 1.1754944e-38, %v1495_v52  ;;  %v1765_v19 = vmul.f32 %v4330_v54, %v4281_v14  ;;  %vm4360_vm10 = vmor %vm1489_vm8, %vm1490_vm6  ;;  %v1272_v52 = vpop.xlane.xlu0 %1271 }
 0x264   : > { %v2255_v21 = vsel %vm1656_vm13, %v2254_v30, %v2253_v0  ;;  %v1659_v22 = vperm.slane %v1482_v23, %v4234_v28  ;;  %v2256_v43 = vperm.slane %v2219_v57, %v4234_v28  ;;  %v1500_v18 = vmul.f32 %v4346_v55, %v4306_v50 }
 0x265   : > { %v3103_v33 = vpop.eup %3102  ;;  %v1492_v24 = vsel %vm4360_vm10, %v4265_v59, %v1488_v15  ;;  %v2180_v8 = vmul.f32 0.6931472, %v3099_v1  ;;  %3106 = vlog2.f32 %v2358_v61  ;;  %v2863_v25 = vmul.f32 -1.442695, %v4339_v63 }
 0x266   : > { %v4370_v27 = vpop.eup %3104  ;;  %vm1664_vm12 = vcmask 523712   ;;  %v1775_v29 = vand.u32 2147483648, %v4281_v14  ;;  %v4375_v7 = vmax.f32 %v2061_v32, 0.0  ;;  %3108 = vpow2.f32 %v2328_v47 }
 0x267   : > { %v2062_v4 = vsub.f32 0.0, %v4339_v63  ;;  %v1766_v35 = vsub.f32 1.0, %v1765_v19  ;;  %v1773_v56 = vand.u32 2147483647, %v4281_v14  ;;  %v2279_v59 = vmax.f32 %v4256_v45, 0.0 }
 0x268   : > { %3110 = vpow2.f32 %v2863_v25  ;;  %v1661_v40 = vsel %vm1660_vm1, %v1659_v22, %v1657_v6  ;;  %v4382_v58 = vsel %vm1660_vm1, %v2256_v43, %v2255_v21  ;;  %v1497_v53 = vsel %vm4349_vm9, %v1496_v20, %v1492_v24  ;;  %v1274_v21 = vpop.xlane.xlu2 %1273 }
 0x269   : > { %v1501_v32 = vsub.f32 1.0, %v1500_v18  ;;  %v4387_v0 = vadd.f32 %v2180_v8, %v4304_v34  ;;  %vm1769_vm14 = vweird.f32 %v4281_v14  ;;  %v2157_v42 = vadd.f32 1.0, %v3103_v33 }
 0x26a   : > { %v1780_v62 = vmul.f32 %v4370_v27, %v4325_v5  ;;  %v2094_v36 = vand.u32 2147483647, %v2062_v4  ;;  %v4394_v60 = vor.u32 1.1754944e-38, %v1775_v29  ;;  %vm1504_vm15 = vweird.f32 %v4306_v50 }
 0x26b   : > { %v1508_v31 = vand.u32 2147483647, %v4306_v50  ;;  %v4399_v44 = vadd.f32 %v3983_v11, %v988_v37  ;;  %v3107_v34 = vpop.eup %3106  ;;  %v1663_v46 = vperm.slane %v1497_v53, %v4279_v13  ;;  %v1767_v26 = vmul.f32 %v4330_v54, %v1766_v35 }
 0x26c   : > { %v1510_v49 = vand.u32 2147483648, %v4306_v50  ;;  %v2110_v51 = vsub.f32 0.0, %v2094_v36  ;;  %v3109_v30 = vpop.eup %3108  ;;  %vm1770_vm0 = vweird.f32 %v4330_v54  ;;  %v1502_v57 = vmul.f32 %v4346_v55, %v1501_v32 }
 0x26d   : > { %v2864_v23 = vmul.f32 -1.442695, %v4399_v44  ;;  %v2063_v15 = vsub.f32 0.0, %v4399_v44  ;;  %v2220_v1 = vmin.f32 %v4387_v0, 100.0  ;;  %3112 = vlog2.f32 %v2157_v42  ;;  %vm4440_vm9 = vmor %vm1769_vm14, %vm1770_vm0 }
 0x26e   : > { %v3111_v61 = vpop.eup %3110  ;;  %v1781_v47 = vsub.f32 1.0, %v1780_v62  ;;  %v2359_v6 = vadd.f32 1.0, %v3109_v30  ;;  %v2135_v20 = vmul.f32 1.442695, %v2110_v51  ;;  %v4412_v19 = vadd.f32 %v1272_v52, %v3983_v11 }
 0x26f   : > { %v4409_v12 = vadd.f32 1.0, %v3111_v61  ;;  %3114 = vpow2.f32 %v2864_v23  ;;  %v1768_v22 = vadd.f32 %v4330_v54, %v1767_v26  ;;  %vm4415_vm3 = vcmp.eq.f32.partialorder %v1773_v56, 8.507059e+37 }
 0x270   : > { %v2375_v9 = vmul.f32 0.6931472, %v3107_v34  ;;  %vm4419_vm4 = vcmp.eq.f32.partialorder %v1508_v31, 8.507059e+37  ;;  %v1511_v33 = vor.u32 1.1754944e-38, %v1510_v49  ;;  %v2095_v24 = vand.u32 2147483647, %v2063_v15 }
 0x271   : > { %v1503_v8 = vadd.f32 %v4346_v55, %v1502_v57  ;;  %vm1505_vm6 = vweird.f32 %v4346_v55  ;;  %vm1784_vm8 = vweird.f32 %v4325_v5  ;;  %3116 = vlog2.f32 %v2359_v6 }
 0x272   : > { %v4429_v25 = vsel %vm1664_vm12, %v1663_v46, %v1661_v40  ;;  %v1782_v29 = vmul.f32 %v4370_v27, %v1781_v47  ;;  %3118 = vrcp.f32 %v4409_v12  ;;  %v4434_v35 = vadd.f32 %v1274_v21, %v3983_v11  ;;  %vm4455_vm10 = vmor %vm1504_vm15, %vm1505_vm6 }
 0x273   : > { %v1788_v37 = vand.u32 2147483647, %v4325_v5  ;;  %3120 = vpow2.f32 %v2135_v20  ;;  %v2111_v40 = vsub.f32 0.0, %v2095_v24  ;;  %v2872_v53 = vmul.f32 -1.442695, %v4412_v19  ;;  %v3113_v32 = vpop.eup %3112 }
 0x274   : > { %v1772_v0 = vsel %vm4440_vm9, %v4330_v54, %v1768_v22  ;;  %v2406_v42 = vadd.f32 %v2375_v9, %v2278_v3  ;;  %vm1785_vm14 = vweird.f32 %v4370_v27  ;;  %v1790_v62 = vand.u32 2147483648, %v4325_v5  ;;  %v990_v22 = vpop.xlane.xlu0 %989 }
 0x275   : > { %v3115_v36 = vpop.eup %3114  ;;  %v1507_v54 = vsel %vm4455_vm10, %v4346_v55, %v1503_v8  ;;  %v2137_v31 = vmul.f32 1.442695, %v2111_v40  ;;  %3122 = vpow2.f32 %v2872_v53  ;;  %v2296_v48 = vand.u32 2147483647, %v4412_v19  ;;  %vm4490_vm6 = vmor %vm1784_vm8, %vm1785_vm14 }
 0x276   : > { %v1783_v3 = vadd.f32 %v4370_v27, %v1782_v29  ;;  %v4466_v50 = vadd.f32 1.0, %v3115_v36  ;;  %v2873_v34 = vmul.f32 -1.442695, %v4434_v35  ;;  %v2297_v46 = vand.u32 2147483647, %v4434_v35 }
 0x277   : > { %v3117_v26 = vpop.eup %3116  ;;  %v2258_v49 = vperm.slane %v2220_v1, %v4279_v13  ;;  %vm5679_vm15 = vcmask 589312   ;;  %v2182_v51 = vmul.f32 0.6931472, %v3113_v32  ;;  %3124 = vpow2.f32 %v2137_v31 }
 0x278   : > { %v2312_v52 = vsub.f32 0.0, %v2296_v48  ;;  %v4471_v55 = vpop.eup %3118  ;;  %v2422_v30 = vmin.f32 %v2406_v42, 100.0  ;;  %vm4473_vm0 = vcmp.eq.f32.partialorder %v1788_v37, 8.507059e+37  ;;  %v4478_v23 = vadd.s32 4294967224, %v4026_v2 }
 0x279   : > { %3126 = vrcp.f32 %v4466_v50  ;;  %v3121_v61 = vpop.eup %3120  ;;  %v1777_v1 = vsel %vm4415_vm3, %v4394_v60, %v1772_v0  ;;  %v1512_v47 = vsel %vm4419_vm4, %v1511_v33, %v1507_v54  ;;  %v1791_v20 = vor.u32 1.1754944e-38, %v1790_v62 }
 0x27a   : > { %v2330_v21 = vmul.f32 1.442695, %v2312_v52  ;;  %v1787_v9 = vsel %vm4490_vm6, %v4370_v27, %v1783_v3  ;;  %v2158_v43 = vadd.f32 1.0, %v3121_v61  ;;  %3128 = vpow2.f32 %v2873_v34 }
 0x27b   : > { %v2313_v60 = vsub.f32 0.0, %v2297_v46  ;;  %v3123_v18 = vpop.eup %3122  ;;  %v2205_v33 = vadd.f32 %v2182_v51, %v4375_v7  ;;  %v2377_v24 = vmul.f32 0.6931472, %v3117_v26  ;;  %v1515_v5 = vmul.f32 %v4471_v55, %v4409_v12 }
 0x27c   : > { %3130 = vpow2.f32 %v2330_v21  ;;  %v2259_v8 = vsel %vm1664_vm12, %v2258_v49, %v4382_v58  ;;  %v4503_v29 = vperm.slane %v2422_v30, %v4026_v2  ;;  %v4505_v56 = vadd.f32 1.0, %v3123_v18 }
 0x27d   : > { %v4508_v27 = vadd.f32 %v3983_v11, %v990_v22  ;;  %v3125_v37 = vpop.eup %3124  ;;  %v2020_v40 = vperm.slane %v1777_v1, %v4026_v2  ;;  %v1792_v7 = vsel %vm4473_vm0, %v1791_v20, %v1787_v9  ;;  %v2078_v53 = vmax.f32 %v2062_v4, 0.0 }
 0x27e   : > { %3132 = vlog2.f32 %v2158_v43  ;;  %v1667_v58 = vperm.slane %v1512_v47, %v4344_v38  ;;  %v2159_v0 = vadd.f32 1.0, %v3125_v37  ;;  %v2332_v42 = vmul.f32 1.442695, %v2313_v60 }
 0x27f   : > { %v4515_v32 = vpop.eup %3126  ;;  %3134 = vrcp.f32 %v4505_v56  ;;  %v2221_v14 = vmin.f32 %v2205_v33, 100.0  ;;  %v2407_v62 = vadd.f32 %v2377_v24, %v2279_v59  ;;  %v1516_v36 = vsub.f32 1.0, %v1515_v5 }
 0x280   : > { %v4522_v54 = vadd.s32 4294967216, %v4026_v2  ;;  %v3129_v31 = vpop.eup %3128  ;;  %v2021_v63 = vperm.slane %v1792_v7, %v4040_v10  ;;  %v1530_v4 = vmul.f32 %v4515_v32, %v4466_v50  ;;  %v4529_v48 = vmax.f32 %v2063_v15, 0.0 }
 0x281   : > { %v2064_v3 = vsub.f32 0.0, %v4508_v27  ;;  %v1523_v45 = vand.u32 2147483647, %v4409_v12  ;;  %v1525_v59 = vand.u32 2147483648, %v4409_v12  ;;  %3136 = vlog2.f32 %v2159_v0 }
 0x282   : > { %v3131_v34 = vpop.eup %3130  ;;  %v4534_v46 = vadd.f32 1.0, %v3129_v31  ;;  %v4538_v26 = vsel %vm5679_vm15, %v1667_v58, %v4429_v25  ;;  %vm1519_vm3 = vweird.f32 %v4409_v12  ;;  %3138 = vpow2.f32 %v2332_v42 }
 0x283   : > { %v2865_v44 = vmul.f32 -1.442695, %v4508_v27  ;;  %v2260_v49 = vperm.slane %v2221_v14, %v4344_v38  ;;  %v2423_v51 = vmin.f32 %v2407_v62, 100.0  ;;  %v1517_v52 = vmul.f32 %v4471_v55, %v1516_v36 }
 0x284   : > { %v3133_v15 = vpop.eup %3132  ;;  %3140 = vrcp.f32 %v4534_v46  ;;  %v4548_v57 = vsel %vm1640_vm5, %v2021_v63, %v2020_v40  ;;  %v1531_v25 = vsub.f32 1.0, %v1530_v4  ;;  %v2360_v61 = vadd.f32 1.0, %v3131_v34  ;;  %v1276_v34 = vpop.xlane.xlu1 %1275 }
 0x285   : > { %v4545_v30 = vpop.eup %3134  ;;  %v2096_v1 = vand.u32 2147483647, %v2064_v3  ;;  %vm4552_vm4 = vcmp.eq.f32.partialorder %v1523_v45, 8.507059e+37  ;;  %v1526_v6 = vor.u32 1.1754944e-38, %v1525_v59  ;;  %v1540_v20 = vand.u32 2147483648, %v4466_v50 }
 0x286   : > { %v1795_v21 = vmul.f32 %v4545_v30, %v4505_v56  ;;  %v2280_v22 = vmax.f32 %v4412_v19, 0.0  ;;  %v2184_v9 = vmul.f32 0.6931472, %v3133_v15  ;;  %v1538_v43 = vand.u32 2147483647, %v4466_v50  ;;  %v1278_v19 = vpop.xlane.xlu0 %1277 }
 0x287   : > { %3142 = vpow2.f32 %v2865_v44  ;;  %v2112_v60 = vsub.f32 0.0, %v2096_v1  ;;  %v3137_v18 = vpop.eup %3136  ;;  %v4562_v33 = vsel %vm5679_vm15, %v2260_v49, %v2259_v8  ;;  %v2455_v24 = vperm.slane %v2423_v51, %v4040_v10  ;;  %v992_v10 = vpop.xlane.xlu2 %991 }
 0x288   : > { %v1518_v5 = vadd.f32 %v4471_v55, %v1517_v52  ;;  %vm1520_vm8 = vweird.f32 %v4471_v55  ;;  %v3139_v37 = vpop.eup %3138  ;;  %v1532_v40 = vmul.f32 %v4515_v32, %v1531_v25  ;;  %3144 = vlog2.f32 %v2360_v61 }
 0x289   : > { %v2281_v7 = vmax.f32 %v4434_v35, 0.0  ;;  %v2139_v58 = vmul.f32 1.442695, %v2112_v60  ;;  %vm1534_vm9 = vweird.f32 %v4466_v50  ;;  %v1541_v42 = vor.u32 1.1754944e-38, %v1540_v20  ;;  %vm4577_vm10 = vmor %vm1519_vm3, %vm1520_vm8 }
 0x28a   : > { %v4569_v0 = vpop.eup %3140  ;;  %v1796_v8 = vsub.f32 1.0, %v1795_v21  ;;  %v4573_v14 = vadd.s32 4294967208, %v4026_v2  ;;  %v2206_v36 = vadd.f32 %v2184_v9, %v2078_v53  ;;  %vm4581_vm14 = vcmp.eq.f32.partialorder %v1538_v43, 8.507059e+37 }
 0x28b   : > { %v1810_v63 = vmul.f32 %v4569_v0, %v4534_v46  ;;  %v2361_v4 = vadd.f32 1.0, %v3139_v37  ;;  %3146 = vpow2.f32 %v2139_v58  ;;  %v4589_v45 = vsel %vm1640_vm5, %v2455_v24, %v4503_v29 }
 0x28c   : > { %v1522_v12 = vsel %vm4577_vm10, %v4471_v55, %v1518_v5  ;;  %vm1535_vm0 = vweird.f32 %v4515_v32  ;;  %vm1799_vm6 = vweird.f32 %v4505_v56  ;;  %v1803_v53 = vand.u32 2147483647, %v4505_v56 }
 0x28d   : > { %v3143_v59 = vpop.eup %3142  ;;  %v1533_v44 = vadd.f32 %v4515_v32, %v1532_v40  ;;  %v2186_v15 = vmul.f32 0.6931472, %v3137_v18  ;;  %v1805_v49 = vand.u32 2147483648, %v4505_v56  ;;  %v4600_v51 = vadd.f32 %v3983_v11, %v992_v10  ;;  %vm4618_vm3 = vmor %vm1534_vm9, %vm1535_vm0 }
 0x28e   : > { %vm1672_vm5 = vcmask 654912   ;;  %v1797_v29 = vmul.f32 %v4545_v30, %v1796_v8  ;;  %3148 = vlog2.f32 %v2361_v4  ;;  %v4603_v55 = vadd.f32 1.0, %v3143_v59  ;;  %v3145_v25 = vpop.eup %3144 }
 0x28f   : > { %v4607_v52 = vmax.f32 %v2064_v3, 0.0  ;;  %v4611_v61 = vsel %vm4552_vm4, %v1526_v6, %v1522_v12  ;;  %v2222_v1 = vmin.f32 %v2206_v36, 100.0  ;;  %v1811_v20 = vsub.f32 1.0, %v1810_v63  ;;  %v994_v12 = vpop.xlane.xlu1 %993 }
 0x290   : > { %v2866_v21 = vmul.f32 -1.442695, %v4600_v51  ;;  %vm1800_vm8 = vweird.f32 %v4545_v30  ;;  %vm4623_vm10 = vcmp.eq.f32.partialorder %v1803_v53, 8.507059e+37  ;;  %v1818_v3 = vand.u32 2147483647, %v4534_v46 }
 0x291   : > { %v1820_v47 = vand.u32 2147483648, %v4534_v46  ;;  %3150 = vrcp.f32 %v4603_v55  ;;  %v3147_v6 = vpop.eup %3146  ;;  %v1537_v50 = vsel %vm4618_vm3, %v4515_v32, %v1533_v44  ;;  %v2207_v43 = vadd.f32 %v2186_v15, %v4529_v48  ;;  %vm4655_vm0 = vmor %vm1799_vm6, %vm1800_vm8 }
 0x292   : > { %v2065_v60 = vsub.f32 0.0, %v4600_v51  ;;  %v4636_v18 = vadd.f32 %v1276_v34, %v3983_v11  ;;  %v1798_v24 = vadd.f32 %v4545_v30, %v1797_v29  ;;  %v2379_v5 = vmul.f32 0.6931472, %v3145_v25 }
 0x293   : > { %v2160_v37 = vadd.f32 1.0, %v3147_v6  ;;  %3152 = vpow2.f32 %v2866_v21  ;;  %v2262_v58 = vperm.slane %v2222_v1, %v4478_v23  ;;  %v1806_v8 = vor.u32 1.1754944e-38, %v1805_v49 }
 0x294   : > { %v1812_v32 = vmul.f32 %v4569_v0, %v1811_v20  ;;  %v3149_v10 = vpop.eup %3148  ;;  %vm1676_vm4 = vcmask 720512   ;;  %v4645_v48 = vsel %vm4581_vm14, %v1541_v42, %v1537_v50  ;;  %vm1814_vm9 = vweird.f32 %v4534_v46 }
 0x295   : > { %v1821_v62 = vor.u32 1.1754944e-38, %v1820_v47  ;;  %v4649_v36 = vadd.s32 4294967200, %v4026_v2  ;;  %v2223_v63 = vmin.f32 %v2207_v43, 100.0  ;;  %vm1815_vm3 = vweird.f32 %v4569_v0 }
 0x296   : > { %vm4660_vm15 = vcmp.eq.f32.partialorder %v1818_v3, 8.507059e+37  ;;  %v2097_v31 = vand.u32 2147483647, %v2065_v60  ;;  %v2874_v34 = vmul.f32 -1.442695, %v4636_v18  ;;  %v1802_v56 = vsel %vm4655_vm0, %v4545_v30, %v1798_v24  ;;  %vm4692_vm14 = vmor %vm1814_vm9, %vm1815_vm3 }
 0x297   : > { %v4667_v53 = vpop.eup %3150  ;;  %v2408_v59 = vadd.f32 %v2379_v5, %v2280_v22  ;;  %3154 = vlog2.f32 %v2160_v37  ;;  %v2298_v44 = vand.u32 2147483647, %v4636_v18  ;;  %v2263_v15 = vsel %vm1672_vm5, %v2262_v58, %v4562_v33 }
 0x298   : > { %v1813_v49 = vadd.f32 %v4569_v0, %v1812_v32  ;;  %v2381_v29 = vmul.f32 0.6931472, %v3149_v10  ;;  %v2113_v25 = vsub.f32 0.0, %v2097_v31  ;;  %v1545_v20 = vmul.f32 %v4667_v53, %v4603_v55 }
 0x299   : > { %v3153_v1 = vpop.eup %3152  ;;  %3156 = vpow2.f32 %v2874_v34  ;;  %v2314_v21 = vsub.f32 0.0, %v2298_v44  ;;  %v4681_v30 = vadd.f32 %v3983_v11, %v994_v12  ;;  %v2264_v22 = vperm.slane %v2223_v63, %v4522_v54 }
 0x29a   : > { %v1807_v9 = vsel %vm4623_vm10, %v1806_v8, %v1802_v56  ;;  %v4686_v33 = vadd.f32 1.0, %v3153_v1  ;;  %v2141_v3 = vmul.f32 1.442695, %v2113_v25  ;;  %v2424_v47 = vmin.f32 %v2408_v59, 100.0 }
 0x29b   : > { %v2334_v50 = vmul.f32 1.442695, %v2314_v21  ;;  %v2867_v43 = vmul.f32 -1.442695, %v4681_v30  ;;  %v2066_v24 = vsub.f32 0.0, %v4681_v30  ;;  %v1817_v27 = vsel %vm4692_vm14, %v4569_v0, %v1813_v49 }
 0x29c   : > { %v2409_v5 = vadd.f32 %v2381_v29, %v2281_v7  ;;  %3158 = vrcp.f32 %v4686_v33  ;;  %v4705_v46 = vadd.f32 %v1278_v19, %v3983_v11  ;;  %v2023_v8 = vperm.slane %v1807_v9, %v4046_v16 }
 0x29d   : > { %v3155_v37 = vpop.eup %3154  ;;  %v1546_v32 = vsub.f32 1.0, %v1545_v20  ;;  %3160 = vpow2.f32 %v2141_v3  ;;  %v4711_v10 = vsel %vm1676_vm4, %v2264_v22, %v2263_v15  ;;  %v1553_v0 = vand.u32 2147483647, %v4603_v55 }
 0x29e   : > { %v1555_v35 = vand.u32 2147483648, %v4603_v55  ;;  %3162 = vpow2.f32 %v2334_v50  ;;  %v2457_v63 = vperm.slane %v2424_v47, %v4046_v16  ;;  %v1822_v4 = vsel %vm4660_vm15, %v1821_v62, %v1817_v27 }
 0x29f   : > { %v3157_v7 = vpop.eup %3156  ;;  %3164 = vpow2.f32 %v2867_v43  ;;  %v2098_v31 = vand.u32 2147483647, %v2066_v24  ;;  %v2425_v34 = vmin.f32 %v2409_v5, 100.0  ;;  %v2188_v12 = vmul.f32 0.6931472, %v3155_v37 }
 0x2a0   : > { %v4720_v56 = vadd.f32 1.0, %v3157_v7  ;;  %v2875_v59 = vmul.f32 -1.442695, %v4705_v46  ;;  %v2024_v44 = vsel %vm1644_vm11, %v2023_v8, %v4548_v57  ;;  %v1547_v15 = vmul.f32 %v4667_v53, %v1546_v32 }
 0x2a1   : > { %vm1549_vm6 = vweird.f32 %v4603_v55  ;;  %v2114_v16 = vsub.f32 0.0, %v2098_v31  ;;  %v1556_v62 = vor.u32 1.1754944e-38, %v1555_v35  ;;  %v4731_v49 = vmax.f32 %v2065_v60, 0.0  ;;  %v1280_v60 = vpop.xlane.xlu2 %1279 }
 0x2a2   : > { %v4727_v42 = vpop.eup %3158  ;;  %3166 = vrcp.f32 %v4720_v56  ;;  %v2299_v29 = vand.u32 2147483647, %v4705_v46  ;;  %v2458_v57 = vsel %vm1644_vm11, %v2457_v63, %v4589_v45  ;;  %v2025_v1 = vperm.slane %v1822_v4, %v4152_v39 }
 0x2a3   : > { %v3161_v25 = vpop.eup %3160  ;;  %vm4738_vm15 = vcmp.eq.f32.partialorder %v1553_v0, 8.507059e+37  ;;  %v1560_v21 = vmul.f32 %v4727_v42, %v4686_v33  ;;  %v2282_v51 = vmax.f32 %v4636_v18, 0.0  ;;  %v2459_v22 = vperm.slane %v2425_v34, %v4152_v39 }
 0x2a4   : > { %v3163_v19 = vpop.eup %3162  ;;  %v2208_v9 = vadd.f32 %v2188_v12, %v4607_v52  ;;  %v2161_v3 = vadd.f32 1.0, %v3161_v25  ;;  %3168 = vpow2.f32 %v2875_v59  ;;  %v1548_v47 = vadd.f32 %v4667_v53, %v1547_v15 }
 0x2a5   : > { %v3165_v45 = vpop.eup %3164  ;;  %vm1550_vm11 = vweird.f32 %v4667_v53  ;;  %v4750_v6 = vadd.s32 4294967192, %v4026_v2  ;;  %v2143_v50 = vmul.f32 1.442695, %v2114_v16  ;;  %v1561_v43 = vsub.f32 1.0, %v1560_v21 }
 0x2a6   : > { %v2362_v27 = vadd.f32 1.0, %v3163_v19  ;;  %v2315_v5 = vsub.f32 0.0, %v2299_v29  ;;  %v4753_v37 = vadd.f32 %v1280_v60, %v3983_v11  ;;  %v4756_v39 = vsel %vm1648_vm2, %v2025_v1, %v2024_v44  ;;  %vm4768_vm10 = vmor %vm1549_vm6, %vm1550_vm11 }
 0x2a7   : > { %vm1680_vm8 = vcmask 786112   ;;  %v1570_v52 = vand.u32 2147483648, %v4686_v33  ;;  %3170 = vlog2.f32 %v2161_v3  ;;  %v4759_v8 = vadd.f32 1.0, %v3165_v45 }
 0x2a8   : > { %v4761_v32 = vpop.eup %3166  ;;  %v4764_v0 = vsel %vm1648_vm2, %v2459_v22, %v2458_v57  ;;  %v2224_v7 = vmin.f32 %v2208_v9, 100.0  ;;  %vm1564_vm9 = vweird.f32 %v4686_v33  ;;  %v1568_v63 = vand.u32 2147483647, %v4686_v33  ;;  %v996_v57 = vpop.xlane.xlu0 %995 }
 0x2a9   : > { %v1552_v4 = vsel %vm4768_vm10, %v4667_v53, %v1548_v47  ;;  %v1825_v31 = vmul.f32 %v4761_v32, %v4720_v56  ;;  %v4781_v34 = vmax.f32 %v2066_v24, 0.0  ;;  %3172 = vpow2.f32 %v2143_v50  ;;  %v1282_v22 = vpop.xlane.xlu1 %1281 }
 0x2aa   : > { %v3169_v55 = vpop.eup %3168  ;;  %v1562_v12 = vmul.f32 %v4727_v42, %v1561_v43  ;;  %3174 = vlog2.f32 %v2362_v27  ;;  %v2336_v59 = vmul.f32 1.442695, %v2315_v5  ;;  %v2876_v44 = vmul.f32 -1.442695, %v4753_v37 }
 0x2ab   : > { %v1571_v15 = vor.u32 1.1754944e-38, %v1570_v52  ;;  %v1826_v16 = vsub.f32 1.0, %v1825_v31  ;;  %3176 = vrcp.f32 %v4759_v8  ;;  %v4786_v53 = vadd.f32 1.0, %v3169_v55 }
 0x2ac   : > { %v4790_v29 = vsel %vm4738_vm15, %v1556_v62, %v1552_v4  ;;  %v2266_v30 = vperm.slane %v2224_v7, %v4573_v14  ;;  %vm4793_vm2 = vcmp.eq.f32.partialorder %v1568_v63, 8.507059e+37  ;;  %v1833_v25 = vand.u32 2147483647, %v4720_v56 }
 0x2ad   : > { %3178 = vpow2.f32 %v2336_v59  ;;  %v3171_v1 = vpop.eup %3170  ;;  %v1835_v21 = vand.u32 2147483648, %v4720_v56  ;;  %v2283_v60 = vmax.f32 %v4705_v46, 0.0  ;;  %v2300_v62 = vand.u32 2147483647, %v4753_v37 }
 0x2ae   : > { %3180 = vrcp.f32 %v4786_v53  ;;  %v1563_v20 = vadd.f32 %v4727_v42, %v1562_v12  ;;  %vm1565_vm0 = vweird.f32 %v4727_v42  ;;  %v1827_v19 = vmul.f32 %v4761_v32, %v1826_v16 }
 0x2af   : > { %3182 = vpow2.f32 %v2876_v44  ;;  %v3173_v9 = vpop.eup %3172  ;;  %vm1829_vm3 = vweird.f32 %v4720_v56  ;;  %v1585_v45 = vand.u32 2147483648, %v4759_v8  ;;  %v4810_v47 = vadd.f32 %v3983_v11, %v996_v57  ;;  %vm4826_vm6 = vmor %vm1564_vm9, %vm1565_vm0 }
 0x2b0   : > { %v3175_v50 = vpop.eup %3174  ;;  %v4814_v43 = vsel %vm1680_vm8, %v2266_v30, %v4711_v10  ;;  %v2190_v27 = vmul.f32 0.6931472, %v3171_v1  ;;  %vm4816_vm14 = vcmp.eq.f32.partialorder %v1833_v25, 8.507059e+37  ;;  %v2162_v52 = vadd.f32 1.0, %v3173_v9 }
 0x2b1   : > { %v4820_v35 = vpop.eup %3176  ;;  %v1836_v63 = vor.u32 1.1754944e-38, %v1835_v21  ;;  %v2316_v4 = vsub.f32 0.0, %v2300_v62  ;;  %v4832_v31 = vadd.f32 %v1282_v22, %v3983_v11  ;;  %v1567_v12 = vsel %vm4826_vm6, %v4727_v42, %v1563_v20 }
 0x2b2   : > { %v1828_v59 = vadd.f32 %v4761_v32, %v1827_v19  ;;  %vm1830_vm15 = vweird.f32 %v4761_v32  ;;  %3184 = vlog2.f32 %v2162_v52  ;;  %v4841_v44 = vor.u32 1.1754944e-38, %v1585_v45 }
 0x2b3   : > { %v3179_v55 = vpop.eup %3178  ;;  %v2284_v30 = vmax.f32 %v4753_v37, 0.0  ;;  %v2868_v25 = vmul.f32 -1.442695, %v4810_v47  ;;  %v2209_v1 = vadd.f32 %v2190_v27, %v4731_v49  ;;  %v2383_v21 = vmul.f32 0.6931472, %v3175_v50  ;;  %vm4854_vm11 = vmor %vm1829_vm3, %vm1830_vm15 }
 0x2b4   : > { %v4839_v33 = vpop.eup %3180  ;;  %v2363_v16 = vadd.f32 1.0, %v3179_v55  ;;  %v2338_v62 = vmul.f32 1.442695, %v2316_v4  ;;  %v4850_v20 = vsel %vm4793_vm2, %v1571_v15, %v1567_v12  ;;  %v1575_v22 = vmul.f32 %v4820_v35, %v4759_v8 }
 0x2b5   : > { %v3183_v57 = vpop.eup %3182  ;;  %v1840_v42 = vmul.f32 %v4839_v33, %v4786_v53  ;;  %v1848_v49 = vand.u32 2147483647, %v4786_v53  ;;  %v1832_v9 = vsel %vm4854_vm11, %v4761_v32, %v1828_v59  ;;  %vm1684_vm10 = vcmask 851712  }
 0x2b6   : > { %3186 = vlog2.f32 %v2363_v16  ;;  %v4864_v24 = vadd.f32 1.0, %v3183_v57  ;;  %v1850_v56 = vand.u32 2147483648, %v4786_v53  ;;  %v2067_v15 = vsub.f32 0.0, %v4810_v47  ;;  %v1284_v57 = vpop.xlane.xlu0 %1283 }
 0x2b7   : > { %v1841_v45 = vsub.f32 1.0, %v1840_v42  ;;  %3188 = vpow2.f32 %v2338_v62  ;;  %v2877_v50 = vmul.f32 -1.442695, %v4832_v31  ;;  %v2225_v52 = vmin.f32 %v2209_v1, 100.0 }
 0x2b8   : > { %3190 = vpow2.f32 %v2868_v25  ;;  %v3185_v27 = vpop.eup %3184  ;;  %v2410_v7 = vadd.f32 %v2383_v21, %v2282_v51  ;;  %v1837_v32 = vsel %vm4816_vm14, %v1836_v63, %v1832_v9  ;;  %v1576_v55 = vsub.f32 1.0, %v1575_v22 }
 0x2b9   : > { %v1842_v4 = vmul.f32 %v4839_v33, %v1841_v45  ;;  %3192 = vrcp.f32 %v4864_v24  ;;  %v2192_v12 = vmul.f32 0.6931472, %v3185_v27  ;;  %v2099_v59 = vand.u32 2147483647, %v2067_v15 }
 0x2ba   : > { %vm1845_vm9 = vweird.f32 %v4839_v33  ;;  %3194 = vpow2.f32 %v2877_v50  ;;  %v2301_v18 = vand.u32 2147483647, %v4832_v31  ;;  %vm1844_vm2 = vweird.f32 %v4786_v53 }
 0x2bb   : > { %v1843_v16 = vadd.f32 %v4839_v33, %v1842_v4  ;;  %vm4881_vm0 = vcmp.eq.f32.partialorder %v1848_v49, 8.507059e+37  ;;  %v4886_v5 = vadd.s32 4294967184, %v4026_v2  ;;  %v2115_v63 = vsub.f32 0.0, %v2099_v59  ;;  %vm4894_vm3 = vmor %vm1844_vm2, %vm1845_vm9 }
 0x2bc   : > { %v3187_v51 = vpop.eup %3186  ;;  %v2268_v21 = vperm.slane %v2225_v52, %v4649_v36  ;;  %v2027_v42 = vperm.slane %v1837_v32, %v4167_v41  ;;  %v2426_v62 = vmin.f32 %v2410_v7, 100.0  ;;  %v2317_v19 = vsub.f32 0.0, %v2301_v18 }
 0x2bd   : > { %v3189_v1 = vpop.eup %3188  ;;  %v1577_v9 = vmul.f32 %v4820_v35, %v1576_v55  ;;  %v2210_v53 = vadd.f32 %v2192_v12, %v4781_v34  ;;  %v1851_v45 = vor.u32 1.1754944e-38, %v1850_v56  ;;  %v1847_v52 = vsel %vm4894_vm3, %v4839_v33, %v1843_v16 }
 0x2be   : > { %v3191_v22 = vpop.eup %3190  ;;  %v2364_v50 = vadd.f32 1.0, %v3189_v1  ;;  %v2145_v4 = vmul.f32 1.442695, %v2115_v63  ;;  %v4906_v32 = vadd.f32 %v1284_v57, %v3983_v11  ;;  %v2385_v34 = vmul.f32 0.6931472, %v3187_v51  ;;  %v1286_v1 = vpop.xlane.xlu2 %1285 }
 0x2bf   : > { %v4898_v27 = vpop.eup %3192  ;;  %v4903_v7 = vadd.f32 1.0, %v3191_v22  ;;  %v2340_v12 = vmul.f32 1.442695, %v2317_v19  ;;  %v2269_v59 = vsel %vm1684_vm10, %v2268_v21, %v4814_v43  ;;  %v2028_v18 = vsel %vm1652_vm7, %v2027_v42, %v4756_v39 }
 0x2c0   : > { %v1855_v55 = vmul.f32 %v4898_v27, %v4864_v24  ;;  %3196 = vlog2.f32 %v2364_v50  ;;  %v3195_v56 = vpop.eup %3194  ;;  %v2461_v33 = vperm.slane %v2426_v62, %v4167_v41  ;;  %vm5681_vm14 = vcmask 917312  }
 0x2c1   : > { %3198 = vrcp.f32 %v4903_v7  ;;  %v4917_v16 = vadd.f32 %v4820_v35, %v1577_v9  ;;  %v1852_v51 = vsel %vm4881_vm0, %v1851_v45, %v1847_v52  ;;  %v1863_v57 = vand.u32 2147483647, %v4864_v24 }
 0x2c2   : > { %v1856_v63 = vsub.f32 1.0, %v1855_v55  ;;  %v2226_v19 = vmin.f32 %v2210_v53, 100.0  ;;  %3200 = vpow2.f32 %v2145_v4  ;;  %v4922_v43 = vadd.f32 1.0, %v3195_v56 }
 0x2c3   : > { %v2878_v39 = vmul.f32 -1.442695, %v4906_v32  ;;  %v2411_v41 = vadd.f32 %v2385_v34, %v2283_v60  ;;  %v1865_v42 = vand.u32 2147483648, %v4864_v24  ;;  %3202 = vpow2.f32 %v2340_v12 }
 0x2c4   : > { %v1857_v21 = vmul.f32 %v4898_v27, %v1856_v63  ;;  %v2462_v25 = vsel %vm1652_vm7, %v2461_v33, %v4764_v0  ;;  %v2029_v62 = vperm.slane %v1852_v51, %v4194_v17  ;;  %3204 = vrcp.f32 %v4922_v43 }
 0x2c5   : > { %v4934_v22 = vadd.f32 %v1286_v1, %v3983_v11  ;;  %vm1860_vm6 = vweird.f32 %v4898_v27  ;;  %v2285_v46 = vmax.f32 %v4832_v31, 0.0  ;;  %3206 = vpow2.f32 %v2878_v39 }
 0x2c6   : > { %v3197_v9 = vpop.eup %3196  ;;  %v1858_v53 = vadd.f32 %v4898_v27, %v1857_v21  ;;  %v2270_v49 = vperm.slane %v2226_v19, %v4750_v6  ;;  %vm1859_vm7 = vweird.f32 %v4864_v24  ;;  %v2302_v45 = vand.u32 2147483647, %v4906_v32  ;;  %v1292_v1 = vpop.xlane.xlu2 %1291 }
 0x2c7   : > { %v4939_v60 = vpop.eup %3198  ;;  %v2387_v0 = vmul.f32 0.6931472, %v3197_v9  ;;  %v2427_v50 = vmin.f32 %v2411_v41, 100.0  ;;  %vm4944_vm15 = vcmp.eq.f32.partialorder %v1863_v57, 8.507059e+37  ;;  %v1866_v4 = vor.u32 1.1754944e-38, %v1865_v42  ;;  %vm4953_vm11 = vmor %vm1859_vm7, %vm1860_vm6 }
 0x2c8   : > { %v4950_v34 = vmax.f32 %v2067_v15, 0.0  ;;  %v3201_v55 = vpop.eup %3200  ;;  %v2030_v12 = vsel %vm1656_vm13, %v2029_v62, %v2028_v18  ;;  %v1590_v24 = vmul.f32 %v4939_v60, %v4903_v7  ;;  %v2318_v33 = vsub.f32 0.0, %v2302_v45 }
 0x2c9   : > { %v2879_v51 = vmul.f32 -1.442695, %v4934_v22  ;;  %v3203_v63 = vpop.eup %3202  ;;  %v1862_v47 = vsel %vm4953_vm11, %v4898_v27, %v1858_v53  ;;  %v2412_v15 = vadd.f32 %v2387_v0, %v2284_v30  ;;  %v2163_v57 = vadd.f32 1.0, %v3201_v55 }
 0x2ca   : > { %v2303_v18 = vand.u32 2147483647, %v4934_v22  ;;  %v4966_v19 = vpop.eup %3204  ;;  %v4969_v39 = vsel %vm5681_vm14, %v2270_v49, %v2269_v59  ;;  %v2365_v41 = vadd.f32 1.0, %v3203_v63  ;;  %v2342_v21 = vmul.f32 1.442695, %v2318_v33  ;;  %v1288_v59 = vpop.xlane.xlu1 %1287 }
 0x2cb   : > { %3208 = vpow2.f32 %v2879_v51  ;;  %v3207_v42 = vpop.eup %3206  ;;  %v2463_v62 = vperm.slane %v2427_v50, %v4194_v17  ;;  %v1600_v27 = vand.u32 2147483648, %v4903_v7  ;;  %v1870_v37 = vmul.f32 %v4966_v19, %v4922_v43 }
 0x2cc   : > { %3210 = vlog2.f32 %v2163_v57  ;;  %v1867_v30 = vsel %vm4944_vm15, %v1866_v4, %v1862_v47  ;;  %v1591_v9 = vsub.f32 1.0, %v1590_v24  ;;  %v4977_v53 = vadd.f32 1.0, %v3207_v42 }
 0x2cd   : > { %3212 = vlog2.f32 %v2365_v41  ;;  %v2428_v49 = vmin.f32 %v2412_v15, 100.0  ;;  %v1871_v0 = vsub.f32 1.0, %v1870_v37  ;;  %v2319_v45 = vsub.f32 0.0, %v2303_v18 }
 0x2ce   : > { %3214 = vpow2.f32 %v2342_v21  ;;  %v1878_v50 = vand.u32 2147483647, %v4922_v43  ;;  %v1880_v55 = vand.u32 2147483648, %v4922_v43  ;;  %v2031_v52 = vperm.slane %v1867_v30, %v4234_v28  ;;  %v1290_v21 = vpop.xlane.xlu0 %1289 }
 0x2cf   : > { %3216 = vrcp.f32 %v4977_v53  ;;  %v4984_v4 = vor.u32 1.1754944e-38, %v1600_v27  ;;  %v2344_v56 = vmul.f32 1.442695, %v2319_v45  ;;  %v4987_v24 = vadd.f32 %v1288_v59, %v3983_v11 }
 0x2d0   : > { %v2464_v51 = vsel %vm1656_vm13, %v2463_v62, %v2462_v25  ;;  %v1872_v63 = vmul.f32 %v4966_v19, %v1871_v0  ;;  %vm1874_vm9 = vweird.f32 %v4922_v43  ;;  %v2286_v47 = vmax.f32 %v4906_v32, 0.0 }
 0x2d1   : > { %v3209_v33 = vpop.eup %3208  ;;  %v2465_v57 = vperm.slane %v2428_v49, %v4234_v28  ;;  %v1592_v18 = vmul.f32 %v4939_v60, %v1591_v9  ;;  %3218 = vpow2.f32 %v2344_v56  ;;  %vm4997_vm2 = vcmp.eq.f32.partialorder %v1878_v50, 8.507059e+37  ;;  %v998_v9 = vpop.xlane.xlu2 %997 }
 0x2d2   : > { %v3211_v15 = vpop.eup %3210  ;;  %v4995_v41 = vadd.f32 1.0, %v3209_v33  ;;  %v1881_v25 = vor.u32 1.1754944e-38, %v1880_v55  ;;  %v1895_v62 = vand.u32 2147483648, %v4977_v53  ;;  %v2287_v37 = vmax.f32 %v4934_v22, 0.0 }
 0x2d3   : > { %v3213_v42 = vpop.eup %3212  ;;  %v5004_v59 = vsel %vm1660_vm1, %v2031_v52, %v2030_v12  ;;  %vm1875_vm13 = vweird.f32 %v4966_v19  ;;  %v2880_v28 = vmul.f32 -1.442695, %v4987_v24  ;;  %v1873_v0 = vadd.f32 %v4966_v19, %v1872_v63 }
 0x2d4   : > { %v3215_v30 = vpop.eup %3214  ;;  %3220 = vrcp.f32 %v4995_v41  ;;  %v2389_v45 = vmul.f32 0.6931472, %v3213_v42  ;;  %v5013_v55 = vadd.f32 %v1290_v21, %v3983_v11  ;;  %v5016_v56 = vsel %vm1660_vm1, %v2465_v57, %v2464_v51  ;;  %vm5036_vm1 = vmor %vm1874_vm9, %vm1875_vm13 }
 0x2d5   : > { %v5009_v49 = vpop.eup %3216  ;;  %v2366_v50 = vadd.f32 1.0, %v3215_v30  ;;  %v5019_v12 = vadd.f32 %v4939_v60, %v1592_v18  ;;  %v1893_v33 = vand.u32 2147483647, %v4977_v53  ;;  %v5024_v3 = vor.u32 1.1754944e-38, %v1895_v62 }
 0x2d6   : > { %v1885_v52 = vmul.f32 %v5009_v49, %v4977_v53  ;;  %v5027_v63 = vadd.f32 %v1292_v1, %v3983_v11  ;;  %v5030_v21 = vadd.f32 %v3983_v11, %v998_v9  ;;  %v2194_v51 = vmul.f32 0.6931472, %v3211_v15 }
 0x2d7   : > { %3222 = vlog2.f32 %v2366_v50  ;;  %v3219_v42 = vpop.eup %3218  ;;  %vm1889_vm0 = vweird.f32 %v4977_v53  ;;  %v2304_v1 = vand.u32 2147483647, %v4987_v24  ;;  %v1877_v62 = vsel %vm5036_vm1, %v4966_v19, %v1873_v0 }
 0x2d8   : > { %v1886_v18 = vsub.f32 1.0, %v1885_v52  ;;  %3224 = vpow2.f32 %v2880_v28  ;;  %v2413_v15 = vadd.f32 %v2389_v45, %v2285_v46  ;;  %v2367_v30 = vadd.f32 1.0, %v3219_v42 }
 0x2d9   : > { %v2881_v43 = vmul.f32 -1.442695, %v5013_v55  ;;  %v2288_v52 = vmax.f32 %v4987_v24, 0.0  ;;  %v2320_v58 = vsub.f32 0.0, %v2304_v1  ;;  %v2305_v28 = vand.u32 2147483647, %v5013_v55 }
 0x2da   : > { %v5048_v9 = vpop.eup %3220  ;;  %v1887_v50 = vmul.f32 %v5009_v49, %v1886_v18  ;;  %vm1904_vm3 = vweird.f32 %v4995_v41  ;;  %3226 = vlog2.f32 %v2367_v30  ;;  %v2882_v31 = vmul.f32 -1.442695, %v5027_v63 }
 0x2db   : > { %v1900_v40 = vmul.f32 %v5048_v9, %v4995_v41  ;;  %v2211_v46 = vadd.f32 %v2194_v51, %v4950_v34  ;;  %v5060_v19 = vsel %vm4997_vm2, %v1881_v25, %v1877_v62  ;;  %vm5062_vm6 = vcmp.eq.f32.partialorder %v1893_v33, 8.507059e+37 }
 0x2dc   : > { %v2346_v45 = vmul.f32 1.442695, %v2320_v58  ;;  %3228 = vpow2.f32 %v2881_v43  ;;  %v2429_v57 = vmin.f32 %v2413_v15, 100.0  ;;  %v2321_v1 = vsub.f32 0.0, %v2305_v28 }
 0x2dd   : > { %v3223_v42 = vpop.eup %3222  ;;  %v1901_v18 = vsub.f32 1.0, %v1900_v40  ;;  %3230 = vpow2.f32 %v2882_v31  ;;  %v1888_v17 = vadd.f32 %v5009_v49, %v1887_v50  ;;  %vm1890_vm7 = vweird.f32 %v5009_v49 }
 0x2de   : > { %v3225_v30 = vpop.eup %3224  ;;  %v2391_v34 = vmul.f32 0.6931472, %v3223_v42  ;;  %3232 = vpow2.f32 %v2346_v45  ;;  %v1908_v25 = vand.u32 2147483647, %v4995_v41  ;;  %v2348_v58 = vmul.f32 1.442695, %v2321_v1  ;;  %vm5079_vm11 = vmor %vm1889_vm0, %vm1890_vm7 }
 0x2df   : > { %v1902_v27 = vmul.f32 %v5048_v9, %v1901_v18  ;;  %v5070_v33 = vadd.f32 1.0, %v3225_v30  ;;  %v2227_v51 = vmin.f32 %v2211_v46, 100.0  ;;  %vm1905_vm15 = vweird.f32 %v5048_v9 }
 0x2e0   : > { %v2414_v40 = vadd.f32 %v2391_v34, %v2286_v47  ;;  %v1910_v62 = vand.u32 2147483648, %v4995_v41  ;;  %v3227_v15 = vpop.eup %3226  ;;  %v2467_v43 = vperm.slane %v2429_v57, %v4279_v13  ;;  %v2306_v32 = vand.u32 2147483647, %v5027_v63  ;;  %vm5095_vm9 = vmor %vm1904_vm3, %vm1905_vm15 }
 0x2e1   : > { %v1903_v28 = vadd.f32 %v5048_v9, %v1902_v27  ;;  %3234 = vrcp.f32 %v5070_v33  ;;  %v1892_v31 = vsel %vm5079_vm11, %v5009_v49, %v1888_v17  ;;  %v2393_v45 = vmul.f32 0.6931472, %v3227_v15 }
 0x2e2   : > { %v3229_v47 = vpop.eup %3228  ;;  %v2430_v46 = vmin.f32 %v2414_v40, 100.0  ;;  %3236 = vpow2.f32 %v2348_v58  ;;  %vm5099_vm2 = vcmp.eq.f32.partialorder %v1908_v25, 8.507059e+37  ;;  %v5107_v30 = vperm.slane %v2227_v51, %v4886_v5 }
 0x2e3   : > { %v3231_v42 = vpop.eup %3230  ;;  %v5103_v17 = vadd.f32 1.0, %v3229_v47  ;;  %v1907_v41 = vsel %vm5095_vm9, %v5048_v9, %v1903_v28  ;;  %v1911_v34 = vor.u32 1.1754944e-38, %v1910_v62  ;;  %v2415_v27 = vadd.f32 %v2393_v45, %v2287_v37  ;;  %v1294_v47 = vpop.xlane.xlu1 %1293 }
 0x2e4   : > { %v3233_v1 = vpop.eup %3232  ;;  %v5117_v25 = vsel %vm5062_vm6, %v5024_v3, %v1892_v31  ;;  %v2322_v40 = vsub.f32 0.0, %v2306_v32  ;;  %v2468_v51 = vsel %vm1664_vm12, %v2467_v43, %v5016_v56  ;;  %v2469_v15 = vperm.slane %v2430_v46, %v4344_v38 }
 0x2e5   : > { %v2368_v58 = vadd.f32 1.0, %v3233_v1  ;;  %3238 = vrcp.f32 %v5103_v17  ;;  %v1925_v9 = vand.u32 2147483648, %v5070_v33  ;;  %v5129_v37 = vsel %vm5099_vm2, %v1911_v34, %v1907_v41 }
 0x2e6   : > { %v5131_v3 = vadd.f32 1.0, %v3231_v42  ;;  %v5680_v0 = vsub.f32 0.0, %v5030_v21  ;;  %v2431_v43 = vmin.f32 %v2415_v27, 100.0  ;;  %v1923_v32 = vand.u32 2147483647, %v5070_v33 }
 0x2e7   : > { %v5125_v22 = vpop.eup %3234  ;;  %3240 = vlog2.f32 %v2368_v58  ;;  %v2350_v46 = vmul.f32 1.442695, %v2322_v40  ;;  %v2869_v45 = vmul.f32 -1.442695, %v5030_v21  ;;  %vm1919_vm13 = vweird.f32 %v5070_v33 }
 0x2e8   : > { %v3237_v50 = vpop.eup %3236  ;;  %v1915_v28 = vmul.f32 %v5125_v22, %v5070_v33  ;;  %3242 = vrcp.f32 %v5131_v3  ;;  %v1926_v18 = vor.u32 1.1754944e-38, %v1925_v9  ;;  %vm5790_vm1 = vcmask 589312  }
 0x2e9   : > { %v2369_v31 = vadd.f32 1.0, %v3237_v50  ;;  %v2470_v41 = vsel %vm5790_vm1, %v2469_v15, %v2468_v51  ;;  %v2100_v34 = vand.u32 2147483647, %v5680_v0  ;;  %v5150_v27 = vadd.f32 %v1294_v47, %v3983_v11 }
 0x2ea   : > { %v1916_v57 = vsub.f32 1.0, %v1915_v28  ;;  %v2471_v58 = vperm.slane %v2431_v43, %v4478_v23  ;;  %vm5154_vm0 = vcmp.eq.f32.partialorder %v1923_v32, 8.507059e+37  ;;  %v1940_v51 = vand.u32 2147483648, %v5103_v17 }
 0x2eb   : > { %v5144_v1 = vpop.eup %3238  ;;  %3244 = vlog2.f32 %v2369_v31  ;;  %vm1920_vm3 = vweird.f32 %v5125_v22  ;;  %v2116_v28 = vsub.f32 0.0, %v2100_v34  ;;  %v2883_v47 = vmul.f32 -1.442695, %v5150_v27 }
 0x2ec   : > { %v1917_v40 = vmul.f32 %v5125_v22, %v1916_v57  ;;  %v1930_v9 = vmul.f32 %v5144_v1, %v5103_v17  ;;  %3246 = vpow2.f32 %v2350_v46  ;;  %v1938_v42 = vand.u32 2147483647, %v5103_v17  ;;  %vm5183_vm7 = vmor %vm1919_vm13, %vm1920_vm3 }
 0x2ed   : > { %v3241_v15 = vpop.eup %3240  ;;  %3248 = vpow2.f32 %v2869_v45  ;;  %v2147_v56 = vmul.f32 1.442695, %v2116_v28  ;;  %v2307_v53 = vand.u32 2147483647, %v5150_v27  ;;  %vm1934_vm6 = vweird.f32 %v5103_v17 }
 0x2ee   : > { %v1918_v43 = vadd.f32 %v5125_v22, %v1917_v40  ;;  %v2395_v31 = vmul.f32 0.6931472, %v3241_v15  ;;  %v1931_v57 = vsub.f32 1.0, %v1930_v9  ;;  %v5164_v32 = vpop.eup %3242  ;;  %3250 = vpow2.f32 %v2883_v47  ;;  %v1296_v40 = vpop.xlane.xlu0 %1295 }
 0x2ef   : > { %v5171_v46 = vor.u32 1.1754944e-38, %v1940_v51  ;;  %v1945_v34 = vmul.f32 %v5164_v32, %v5131_v3  ;;  %v5176_v45 = vadd.s32 4294967176, %v4026_v2  ;;  %v2472_v15 = vsel %vm1672_vm5, %v2471_v58, %v2470_v41 }
 0x2f0   : > { %v2416_v10 = vadd.f32 %v2395_v31, %v2288_v52  ;;  %v1953_v52 = vand.u32 2147483647, %v5131_v3  ;;  %3252 = vpow2.f32 %v2147_v56  ;;  %v2323_v51 = vsub.f32 0.0, %v2307_v53 }
 0x2f1   : > { %v3245_v9 = vpop.eup %3244  ;;  %v1922_v2 = vsel %vm5183_vm7, %v5125_v22, %v1918_v43  ;;  %v1932_v28 = vmul.f32 %v5144_v1, %v1931_v57  ;;  %v1955_v41 = vand.u32 2147483648, %v5131_v3  ;;  %v1946_v33 = vsub.f32 1.0, %v1945_v34  ;;  %v1298_v57 = vpop.xlane.xlu1 %1297 }
 0x2f2   : > { %v2397_v47 = vmul.f32 0.6931472, %v3245_v9  ;;  %v3247_v58 = vpop.eup %3246  ;;  %v2432_v31 = vmin.f32 %v2416_v10, 100.0  ;;  %v2352_v62 = vmul.f32 1.442695, %v2323_v51  ;;  %v5194_v0 = vadd.f32 %v1296_v40, %v3983_v11 }
 0x2f3   : > { %v3249_v49 = vpop.eup %3248  ;;  %vm1935_vm15 = vweird.f32 %v5144_v1  ;;  %v5795_v53 = vmax.f32 %v5013_v55, 0.0  ;;  %v2370_v24 = vadd.f32 1.0, %v3247_v58  ;;  %v5796_v22 = vsub.f32 0.0, %v5030_v21 }
 0x2f4   : > { %v3251_v9 = vpop.eup %3250  ;;  %v5205_v10 = vsel %vm5154_vm0, %v1926_v18, %v1922_v2  ;;  %v5207_v34 = vadd.f32 1.0, %v3249_v49  ;;  %3254 = vpow2.f32 %v2352_v62  ;;  %v2884_v40 = vmul.f32 -1.442695, %v5194_v0  ;;  %vm5232_vm9 = vmor %vm1934_vm6, %vm1935_vm15 }
 0x2f5   : > { %v2417_v56 = vadd.f32 %v2397_v47, %v5795_v53  ;;  %v5201_v43 = vmax.f32 %v5796_v22, 0.0  ;;  %v5211_v51 = vadd.f32 %v5144_v1, %v1932_v28  ;;  %vm1949_vm11 = vweird.f32 %v5131_v3 }
 0x2f6   : > { %3256 = vlog2.f32 %v2370_v24  ;;  %v5214_v21 = vadd.f32 1.0, %v3251_v9  ;;  %v3253_v47 = vpop.eup %3252  ;;  %v2473_v58 = vperm.slane %v2432_v31, %v4522_v54  ;;  %v1947_v18 = vmul.f32 %v5164_v32, %v1946_v33 }
 0x2f7   : > { %v2433_v55 = vmin.f32 %v2417_v56, 100.0  ;;  %3258 = vrcp.f32 %v5207_v34  ;;  %v5220_v49 = vadd.f32 %v1298_v57, %v3983_v11  ;;  %v5222_v62 = vor.u32 1.1754944e-38, %v1955_v41 }
 0x2f8   : > { %v1615_v50 = vand.u32 2147483648, %v5207_v34  ;;  %v2164_v2 = vadd.f32 1.0, %v3253_v47  ;;  %3260 = vrcp.f32 %v5214_v21  ;;  %vm1950_vm2 = vweird.f32 %v5164_v32 }
 0x2f9   : > { %3262 = vpow2.f32 %v2884_v40  ;;  %v1937_v41 = vsel %vm5232_vm9, %v5144_v1, %v5211_v51  ;;  %v2475_v33 = vperm.slane %v2433_v55, %v4573_v14  ;;  %v2308_v53 = vand.u32 2147483647, %v5194_v0  ;;  %vm5273_vm6 = vmor %vm1949_vm11, %vm1950_vm2 }
 0x2fa   : > { %3264 = vlog2.f32 %v2164_v2  ;;  %v3255_v17 = vpop.eup %3254  ;;  %v2474_v56 = vsel %vm1676_vm4, %v2473_v58, %v2472_v15  ;;  %vm5245_vm13 = vcmp.eq.f32.partialorder %v1938_v42, 8.507059e+37  ;;  %v1948_v22 = vadd.f32 %v5164_v32, %v1947_v18 }
 0x2fb   : > { %vm5250_vm1 = vcmp.eq.f32.partialorder %v1953_v52, 8.507059e+37  ;;  %v2885_v1 = vmul.f32 -1.442695, %v5220_v49  ;;  %v2309_v9 = vand.u32 2147483647, %v5220_v49  ;;  %v5256_v51 = vor.u32 1.1754944e-38, %v1615_v50 }
 0x2fc   : > { %v3257_v40 = vpop.eup %3256  ;;  %v1968_v55 = vand.u32 2147483647, %v5214_v21  ;;  %v2371_v15 = vadd.f32 1.0, %v3255_v17  ;;  %v2324_v42 = vsub.f32 0.0, %v2308_v53  ;;  %vm1964_vm0 = vweird.f32 %v5214_v21 }
 0x2fd   : > { %v5259_v47 = vpop.eup %3258  ;;  %v2399_v58 = vmul.f32 0.6931472, %v3257_v40  ;;  %v1970_v52 = vand.u32 2147483648, %v5214_v21  ;;  %3266 = vpow2.f32 %v2885_v1  ;;  %v2325_v18 = vsub.f32 0.0, %v2309_v9 }
 0x2fe   : > { %v5263_v2 = vpop.eup %3260  ;;  %v2476_v31 = vsel %vm1680_vm8, %v2475_v33, %v2474_v56  ;;  %v1605_v50 = vmul.f32 %v5259_v47, %v5207_v34  ;;  %3268 = vlog2.f32 %v2371_v15  ;;  %v2354_v28 = vmul.f32 1.442695, %v2324_v42 }
 0x2ff   : > { %v3263_v17 = vpop.eup %3262  ;;  %vm1580_vm3 = vweird.f32 %v4820_v35  ;;  %v5805_v1 = vmax.f32 %v5027_v63, 0.0  ;;  %v1960_v33 = vmul.f32 %v5263_v2, %v5214_v21  ;;  %v2356_v40 = vmul.f32 1.442695, %v2325_v18 }
 0x300   : > { %v3265_v15 = vpop.eup %3264  ;;  %vm1595_vm7 = vweird.f32 %v4939_v60  ;;  %v1606_v42 = vsub.f32 1.0, %v1605_v50  ;;  %v5283_v11 = vadd.f32 1.0, %v3263_v17  ;;  %3270 = vpow2.f32 %v2354_v28 }
 0x301   : > { %v2418_v9 = vadd.f32 %v2399_v58, %v5805_v1  ;;  %v1952_v3 = vsel %vm5273_vm6, %v5164_v32, %v1948_v22  ;;  %vm1579_vm15 = vweird.f32 %v4759_v8  ;;  %v2196_v58 = vmul.f32 0.6931472, %v3265_v15 }
 0x302   : > { %v1961_v1 = vsub.f32 1.0, %v1960_v33  ;;  %3272 = vpow2.f32 %v2356_v40  ;;  %vm1594_vm11 = vweird.f32 %v4903_v7  ;;  %v1971_v18 = vor.u32 1.1754944e-38, %v1970_v52 }
 0x303   : > { %v2434_v63 = vmin.f32 %v2418_v9, 100.0  ;;  %3274 = vrcp.f32 %v5283_v11  ;;  %v1985_v50 = vand.u32 2147483648, %v5283_v11  ;;  %v2293_v17 = vmax.f32 %v5220_v49, 0.0  ;;  %v3267_v28 = vpop.eup %3266 }
 0x304   : > { %v2212_v32 = vadd.f32 %v2196_v58, %v5201_v43  ;;  %v1962_v22 = vmul.f32 %v5263_v2, %v1961_v1  ;;  %vm1965_vm9 = vweird.f32 %v5263_v2  ;;  %v3269_v53 = vpop.eup %3268  ;;  %v5298_v9 = vmul.f32 %v5259_v47, %v1606_v42 }
 0x305   : > { %v2477_v56 = vperm.slane %v2434_v63, %v4649_v36  ;;  %v5300_v52 = vadd.f32 1.0, %v3267_v28  ;;  %v1942_v33 = vsel %vm5245_vm13, %v5171_v46, %v1937_v41  ;;  %v1957_v40 = vsel %vm5250_vm1, %v5222_v62, %v1952_v3  ;;  %vm5324_vm1 = vmor %vm1964_vm0, %vm1965_vm9 }
 0x306   : > { %v5806_v43 = vand.u32 2147483647, %v4759_v8  ;;  %v2228_v63 = vmin.f32 %v2212_v32, 100.0  ;;  %v1963_v42 = vadd.f32 %v5263_v2, %v1962_v22  ;;  %v2401_v58 = vmul.f32 0.6931472, %v3269_v53  ;;  %v3271_v28 = vpop.eup %3270  ;;  %vm5375_vm9 = vmor %vm1579_vm15, %vm1580_vm3 }
 0x307   : > { %v1983_v1 = vand.u32 2147483647, %v5283_v11  ;;  %v5809_v24 = vand.u32 2147483647, %v4903_v7  ;;  %vm1979_vm6 = vweird.f32 %v5283_v11  ;;  %3276 = vrcp.f32 %v5300_v52  ;;  %vm5389_vm0 = vmor %vm1594_vm11, %vm1595_vm7 }
 0x308   : > { %vm5310_vm2 = vcmp.eq.f32.partialorder %v5806_v43, 8.507059e+37  ;;  %vm5330_vm14 = vcmp.eq.f32.partialorder %v1968_v55, 8.507059e+37  ;;  %v5334_v57 = vor.u32 1.1754944e-38, %v1985_v50  ;;  %v5816_v3 = vperm.slane %v5060_v19, %v4279_v13  ;;  %v3273_v32 = vpop.eup %3272 }
 0x309   : > { %vm5318_vm13 = vcmp.eq.f32.partialorder %v5809_v24, 8.507059e+37  ;;  %v5342_v22 = vsel %vm1684_vm10, %v2477_v56, %v2476_v31  ;;  %v5817_v55 = vmax.f32 %v5150_v27, 0.0  ;;  %v2372_v43 = vadd.f32 1.0, %v3271_v28  ;;  %v5350_v24 = vpop.eup %3274 }
 0x30a   : > { %v2034_v21 = vsel %vm1664_vm12, %v5816_v3, %v5004_v59  ;;  %v1967_v50 = vsel %vm5324_vm1, %v5263_v2, %v1963_v42  ;;  %v5353_v13 = vperm.slane %v2228_v63, %v5176_v45  ;;  %v2373_v59 = vadd.f32 1.0, %v3273_v32 }
 0x30b   : > { %v2419_v53 = vadd.f32 %v2401_v58, %v5817_v55  ;;  %v1998_v19 = vand.u32 2147483647, %v5300_v52  ;;  %v2000_v31 = vand.u32 2147483648, %v5300_v52  ;;  %v1975_v27 = vmul.f32 %v5350_v24, %v5283_v11 }
 0x30c   : > { %3278 = vlog2.f32 %v2372_v43  ;;  %v5361_v58 = vsel %vm5330_vm14, %v1971_v18, %v1967_v50  ;;  %vm5363_vm12 = vcmp.eq.f32.partialorder %v1983_v1, 8.507059e+37  ;;  %vm1980_vm14 = vweird.f32 %v5350_v24 }
 0x30d   : > { %v2435_v56 = vmin.f32 %v2419_v53, 100.0  ;;  %3280 = vlog2.f32 %v2373_v59  ;;  %v5822_v18 = vperm.slane %v5117_v25, %v4344_v38  ;;  %vm5823_vm1 = vcmask 589312   ;;  %v5401_v41 = vpop.eup %3276 }
 0x30e   : > { %v2041_v1 = vperm.slane %v1942_v33, %v4573_v14  ;;  %v1976_v28 = vsub.f32 1.0, %v1975_v27  ;;  %vm1994_vm3 = vweird.f32 %v5300_v52  ;;  %v5394_v62 = vor.u32 1.1754944e-38, %v2000_v31 }
 0x30f   : > { %v2036_v42 = vsel %vm5823_vm1, %v5822_v18, %v2034_v21  ;;  %v5826_v38 = vperm.slane %v5129_v37, %v4478_v23  ;;  %v2043_v33 = vperm.slane %v1957_v40, %v4649_v36  ;;  %v5404_v7 = vperm.slane %v2435_v56, %v4750_v6 }
 0x310   : > { %vm1692_vm7 = vcmask 982912   ;;  %v5827_v3 = vperm.slane %v5205_v10, %v4522_v54  ;;  %v1582_v37 = vsel %vm5375_vm9, %v4820_v35, %v4917_v16  ;;  %v1597_v40 = vsel %vm5389_vm0, %v4939_v60, %v5019_v12  ;;  %vm5447_vm0 = vmor %vm1979_vm6, %vm1980_vm14 }
 0x311   : > { %v2038_v25 = vsel %vm1672_vm5, %v5826_v38, %v2036_v42  ;;  %v1977_v10 = vmul.f32 %v5350_v24, %v1976_v28  ;;  %v1990_v32 = vmul.f32 %v5401_v41, %v5300_v52  ;;  %vm5428_vm11 = vcmp.eq.f32.partialorder %v1998_v19, 8.507059e+37 }
 0x312   : > { %v2040_v21 = vsel %vm1676_vm4, %v5827_v3, %v2038_v25  ;;  %v2045_v35 = vperm.slane %v5361_v58, %v4750_v6  ;;  %vm1995_vm9 = vweird.f32 %v5401_v41  ;;  %v1587_v60 = vsel %vm5310_vm2, %v4841_v44, %v1582_v37  ;;  %v3279_v43 = vpop.eup %3278 }
 0x313   : > { %v2042_v53 = vsel %vm1680_vm8, %v2041_v1, %v2040_v21  ;;  %v1608_v12 = vadd.f32 %v5259_v47, %v5298_v9  ;;  %v1991_v50 = vsub.f32 1.0, %v1990_v32  ;;  %v1978_v59 = vadd.f32 %v5350_v24, %v1977_v10  ;;  %v3281_v9 = vpop.eup %3280 }
 0x314   : > { %v2044_v16 = vsel %vm1684_vm10, %v2043_v33, %v2042_v53  ;;  %v1602_v44 = vsel %vm5318_vm13, %v4984_v4, %v1597_v40  ;;  %vm1610_vm2 = vweird.f32 %v5259_v47  ;;  %v2403_v15 = vmul.f32 0.6931472, %v3279_v43 }
 0x315   : > { %vm5832_vm1 = vweird.f32 %v5207_v34  ;;  %v1613_v31 = vand.u32 2147483647, %v5207_v34  ;;  %v5835_v56 = vperm.slane %v4611_v61, %v4478_v23  ;;  %v1683_v4 = vperm.slane %v4850_v20, %v4649_v36 }
 0x316   : > { %vm5459_vm15 = vmor %vm5832_vm1, %vm1610_vm2  ;;  %v2405_v27 = vmul.f32 0.6931472, %v3281_v9  ;;  %v1982_v58 = vsel %vm5447_vm0, %v5350_v24, %v1978_v59  ;;  %v1992_v63 = vmul.f32 %v5401_v41, %v1991_v50  ;;  %v5836_v23 = vmax.f32 %v5194_v0, 0.0 }
 0x317   : > { %v1673_v46 = vsel %vm1672_vm5, %v5835_v56, %v4538_v26  ;;  %v1612_v34 = vsel %vm5459_vm15, %v5259_v47, %v1608_v12  ;;  %v1987_v61 = vsel %vm5363_vm12, %v5334_v57, %v1982_v58  ;;  %vm1614_vm5 = vcmp.eq.f32.partialorder %v1613_v31, 8.507059e+37 }
 0x318   : > { %v2420_v26 = vadd.f32 %v2403_v15, %v5836_v23  ;;  %v5837_v36 = vperm.slane %v4645_v48, %v4522_v54  ;;  %v2421_v0 = vadd.f32 %v2405_v27, %v2293_v17  ;;  %v1993_v47 = vadd.f32 %v5401_v41, %v1992_v63 }
 0x319   : > { %v2047_v24 = vperm.slane %v1987_v61, %v4886_v5  ;;  %v1617_v57 = vsel %vm1614_vm5, %v5256_v51, %v1612_v34  ;;  %v5838_v48 = vperm.slane %v4790_v29, %v4573_v14  ;;  %v1687_v17 = vperm.slane %v1587_v60, %v4750_v6 }
 0x31a   : > { %v1677_v20 = vsel %vm1676_vm4, %v5837_v36, %v1673_v46  ;;  %v2436_v54 = vmin.f32 %v2420_v26, 100.0  ;;  %vm1996_vm4 = vmor %vm1994_vm3, %vm1995_vm9  ;;  %v1691_v51 = vperm.slane %v1602_v44, %v4886_v5  ;;  %v2437_v2 = vmin.f32 %v2421_v0, 100.0 }
 0x31b   : > { %v1681_v49 = vsel %vm1680_vm8, %v5838_v48, %v1677_v20  ;;  %v1997_v52 = vsel %vm1996_vm4, %v5401_v41, %v1993_v47  ;;  %vm5840_vm13 = vcmask 917312   ;;  %v1695_v1 = vperm.slane %v1617_v57, %v5176_v45 }
 0x31c   : > { %v2046_v14 = vsel %vm5840_vm13, %v2045_v35, %v2044_v16  ;;  %v1685_v29 = vsel %vm1684_vm10, %v1683_v4, %v1681_v49  ;;  %v2481_v6 = vperm.slane %v2436_v54, %v4886_v5  ;;  %v2002_v18 = vsel %vm5428_vm11, %v5394_v62, %v1997_v52  ;;  %vm5841_vm8 = vmmov %vm5840_vm13 }
 0x31d   : > { %v1689_v42 = vsel %vm5841_vm8, %v1687_v17, %v1685_v29  ;;  %v2483_v5 = vperm.slane %v2437_v2, %v5176_v45  ;;  %v2049_v8 = vperm.slane %v2002_v18, %v5176_v45  ;;  %v2273_v62 = vsel %vm1692_vm7, %v5107_v30, %v4969_v39  ;;  %vm5845_vm12 = vmmov %vm5841_vm8 }
 0x31e   : > { %v1693_v28 = vsel %vm1692_vm7, %v1691_v51, %v1689_v42  ;;  %v2048_v38 = vsel %vm1692_vm7, %v2047_v24, %v2046_v14  ;;  %vm5842_vm10 = vcmask 1048512   ;;  %v2480_v45 = vsel %vm5845_vm12, %v5404_v7, %v5342_v22 }
 0x31f   : > { %v1697_v25 = vsel %vm5842_vm10, %v1695_v1, %v1693_v28  ;;  %vm5844_vm6 = vmmov %vm5842_vm10  ;;  %v2482_v39 = vsel %vm1692_vm7, %v2481_v6, %v2480_v45 }
 0x320   : > { %v2275_v33 = vsel %vm5844_vm6, %v5353_v13, %v2273_v62  ;;  %vm5846_vm14 = vmmov %vm5844_vm6  ;;  %1699 = vst [vmem:[%s490_s4] sm:$0x1] %v1697_v25 }
 0x321   : > { %v2050_v41 = vsel %vm5846_vm14, %v2049_v8, %v2048_v38 }
 0x322   : > { %2052 = vst [vmem:[%s496_s30] sm:$0x1] %v2050_v41 }
 0x323   : > { %3429 = shalt.err (!%p3426_p9)
}
 0x324   : > { %2944 = dma.vmem_to_hbm [thread:$0]  (%p3711_p3), %s2511_s29, 16, %s2513_s26, %s2488_s27   ;;  %vm5847_vm3 = vmmov %vm5844_vm6 }
 0x325   : > { %v2484_v30 = vsel %vm5847_vm3, %v2483_v5, %v2482_v39  ;;  %s2492_s30 = scalar_lea.sflag [#allocation13], %s439_s0  ;;  %s3444_s28 = sshra.s32 %s2526_s18, 4  ;;  %s3445_s28 = int_to_ptr.hbm [resolvable:$true] %s3444_s28 }
 0x326   : > { %s3446_s2 = scalar_lea.hbm %s3445_s28, 1  ;;  %s3450_s12 = scalar_lea.hbm %s5667_s9, 2 }
 0x327   : > { %p3447_p12 = scmp.ne.s32.totalorder %s3445_s28, %s3446_s2  ;;  %p3451_p5 = scmp.lt.s32.totalorder %s3445_s28, %s5667_s9 }
 0x328   : > { %p3452_p7 = scmp.lt.s32.totalorder %s3450_s12, %s3446_s2 }
 0x329   : > { %p3448_p13 = pnand %p3447_p12, %p3711_p3 }
 0x32a   : > { %p3453_p1 = por %p3452_p7, %p3451_p5 }
 0x32b   : > { %p3449_p0 = pneg %p3448_p13 }
 0x32d   : > { %p3454_p4 = pnand %p3453_p1, %p3449_p0 }
 0x32f   : > { %3457 = shalt.err (!%p3454_p4)
}
 0x330   : > { %2945 = dma.vmem_to_hbm [thread:$0]  (%p3711_p3), %s2524_s25, 16, %s2526_s18, %s2492_s30   ;;  %2277 = vst [vmem:[%s502_s13] sm:$0x1] %v2275_v33 }
 0x331   : > { %s3472_s7 = sshra.s32 %s2539_s23, 4  ;;  %s3478_s27 = scalar_lea.hbm %s5668_s10, 2  ;;  %s3473_s7 = int_to_ptr.hbm [resolvable:$true] %s3472_s7 }
 0x332   : > { %s3474_s0 = scalar_lea.hbm %s3473_s7, 1  ;;  %p3479_p11 = scmp.lt.s32.totalorder %s3473_s7, %s5668_s10 }
 0x333   : > { %p3475_p8 = scmp.ne.s32.totalorder %s3473_s7, %s3474_s0  ;;  %p3480_p9 = scmp.lt.s32.totalorder %s3478_s27, %s3474_s0 }
 0x335   : > { %p3476_p2 = pnand %p3475_p8, %p3711_p3  ;;  %p3481_p12 = por %p3480_p9, %p3479_p11 }
 0x337   : > { %p3477_p10 = pneg %p3476_p2 }
 0x339   : > { %p3482_p13 = pnand %p3481_p12, %p3477_p10 }
 0x33b   : > { %3485 = shalt.err (!%p3482_p13)
}
 0x33c   : > { %s5848_s25 = sld [smem:[#allocation30_spill]]  ;;  %s5850_s13 = scalar_lea.vmem [#allocation15], %s3767_s19 }
 0x33d   : > { %2486 = vst [vmem:[%s5850_s13] sm:$0x1] %v2484_v30  ;;  %s2500_s16 = scalar_lea.sflag [#allocation16], %s3767_s19  ;;  %s3500_s14 = sshra.s32 %s2552_s15, 4  ;;  %s3501_s14 = int_to_ptr.hbm [resolvable:$true] %s3500_s14 }
 0x33e   : > { %s3502_s12 = scalar_lea.hbm %s3501_s14, 1  ;;  %s3506_s7 = scalar_lea.hbm %s5669_s11, 2 }
 0x33f   : > { %p3503_p0 = scmp.ne.s32.totalorder %s3501_s14, %s3502_s12  ;;  %p3507_p1 = scmp.lt.s32.totalorder %s3501_s14, %s5669_s11 }
 0x340   : > { %p3508_p4 = scmp.lt.s32.totalorder %s3506_s7, %s3502_s12 }
 0x341   : > { %p3504_p5 = pnand %p3503_p0, %p3711_p3 }
 0x342   : > { %s5849_s18 = int_to_ptr.vmem [resolvable:$true] %s5848_s25  ;;  %p3509_p8 = por %p3508_p4, %p3507_p1 }
 0x343   : > { %2946 = dma.vmem_to_hbm [thread:$0]  (%p3711_p3), %s5849_s18, 16, %s2539_s23, %s2492_s30  }
 0x344   : > { %p3505_p7 = pneg %p3504_p5 }
 0x346   : > { %p3510_p2 = pnand %p3509_p8, %p3505_p7 }
 0x348   : > { %3513 = shalt.err (!%p3510_p2)
}
 0x349   : > { %2947 = dma.vmem_to_hbm [thread:$0]  (%p3711_p3), %s2550_s17, 16, %s2552_s15, %s2500_s16  }
 0x34a PF: > { %s5851_s19 = sld [smem:[#allocation24_spill]]  ;;  %p5853_p10 = scmp.ge.s32.totalorder %s3572_s22, 2 }
 0x34c   : > { %p2967_p11 = pnand %p5853_p10, %p3680_p6 }
 0x34e   : > { %p2968_p9 = pneg %p2967_p11 }
 0x350   : > { %s2563_s30 = sand.u32 1, %s5851_s19  }
 0x351   : > { %s2564_s26 = scalar_lea.sflag [#allocation5], %s2563_s30 }
 0x352   : > { %3547 = dma.done.wait (%p2968_p9), %s2564_s26, 16  }
 0x353   : > { %3549 = vsyncadd (%p2968_p9), %s2564_s26, 4294967280  ;;  %s5854_s27 = sadd.s32 4294967294, %s3572_s22  }
 0x354   : > { %s2572_s24 = sand.u32 1, %s5854_s27  }
 0x355   : > { %s2573_s28 = scalar_lea.sflag [#allocation13], %s2572_s24 }
 0x356   : > { %3551 = dma.done.wait (%p2968_p9), %s2573_s28, 32  }
 0x357   : > { %3553 = vsyncadd (%p2968_p9), %s2573_s28, 4294967264  ;;  %s2591_s2 = scalar_lea.sflag [#allocation16], %s2563_s30 }
 0x358   : > { %3555 = dma.done.wait (%p2968_p9), %s2591_s2, 16  }
 0x359   : > { %3557 = vsyncadd (%p2968_p9), %s2591_s2, 4294967280  ;;  %s5855_s22 = sld [smem:[#allocation27_spill]]  ;;  %s5858_s19 = smov %s3564_s20 }
 0x35a   : > { %s5856_s17 = sld [smem:[#allocation25_spill]] }
 0x35b   : > { %s5857_s21 = sld [smem:[#allocation29_spill]] }
 0x35f   : > { %p36_p3 = scmp.ge.s32.totalorder %s5855_s22, 4  }
 0x360   : > { %s5859_s20 = smov %s5856_s17 }
 0x361   :  { %38 = sbr.rel (!%p36_p3) target bundleno = 17 (0x11), region = 167 }
 0x366   :  { %2596 = vsyncpa [#allocation4], 1 }
 0x367   :  { %2598 = vsyncpa [#allocation4 + $0x1], 1 }
 0x368   :  { %2599 = vsyncpa [#allocation7], 1 }
 0x369   :  { %2601 = vsyncpa [#allocation7 + $0x1], 1 }
 0x36a   :  { %2602 = vsyncpa [#allocation10], 1 }
 0x36b   :  { %2603 = vsyncpa [#allocation5], 1 }
 0x36c   :  { %2605 = vsyncpa [#allocation5 + $0x1], 1 }
 0x36d   :  { %2606 = vsyncpa [#allocation13], 1 }
 0x36e   :  { %2608 = vsyncpa [#allocation13 + $0x1], 1 }
 0x36f   :  { %2609 = vsyncpa [#allocation16], 1 }
 0x370   :  { %2611 = vsyncpa [#allocation16 + $0x1], 1 }

// kernel: tpu_custom_call.1
= control target key start
LH: loop header
LB: loop body
LE: loop exit
PB: predicated region body
PF: predicated region fallthrough
CT: control target
= control target key end

     0   :  { %s5658_s0 = inlined_call_operand.hbm [shape: f32[256,256], index: 0, kind: input, shape index: {}]   ;;  %s5659_s1 = inlined_call_operand.hbm [shape: f32[256,256], index: 1, kind: input, shape index: {}]   ;;  %s5660_s2 = inlined_call_operand.hbm [shape: bf16[256,128], index: 2, kind: input, shape index: {}]   ;;  %s5661_s3 = inlined_call_operand.vmem [shape: f32[1,128], index: 3, kind: input, shape index: {}]   ;;  %s5662_s4 = inlined_call_operand.hbm [shape: bf16[128,128], index: 4, kind: input, shape index: {}]   ;;  %s5663_s5 = inlined_call_operand.vmem [shape: f32[1,128], index: 5, kind: input, shape index: {}]   ;;  %s5664_s6 = inlined_call_operand.vmem [shape: f32[1,128], index: 6, kind: input, shape index: {}]   ;;  %s5665_s7 = inlined_call_operand.<no memory space> [shape: f32[1,1], index: 7, kind: input, shape index: {}]   ;;  %s5666_s8 = inlined_call_operand.hbm [shape: f32[2,1,128], index: 8, kind: output, shape index: {0}]   ;;  %s5667_s9 = inlined_call_operand.hbm [shape: f32[2,1,128], index: 9, kind: output, shape index: {1}]   ;;  %s5668_s10 = inlined_call_operand.hbm [shape: f32[2,1,128], index: 10, kind: output, shape index: {2}]   ;;  %s5669_s11 = inlined_call_operand.hbm [shape: f32[2,1,128], index: 11, kind: output, shape index: {3}]  }
   0x1   :  { %5684 = sst [smem:[#allocation31_spill]] %s5658_s0 }
   0x2   :  { %5685 = sst [smem:[#allocation32_spill]] %s5660_s2 }
   0x3   :  { %5686 = sst [smem:[#allocation33_spill]] %s5662_s4 }
   0x4   :  { %17 = sst [smem:[#allocation2]] %s5665_s7 }
   0x5   :  { %18 = vsyncpa [#allocation4], 0 }
   0x6   :  { %20 = vsyncpa [#allocation4 + $0x1], 0 }
   0x7   :  { %21 = vsyncpa [#allocation7], 0 }
   0x8   :  { %23 = vsyncpa [#allocation7 + $0x1], 0 }
   0x9   :  { %24 = vsyncpa [#allocation10], 0 }
   0xa   :  { %25 = vsyncpa [#allocation5], 0 }
   0xb   :  { %27 = vsyncpa [#allocation5 + $0x1], 0 }
   0xc   :  { %28 = vsyncpa [#allocation13], 0 }
   0xd   :  { %30 = vsyncpa [#allocation13 + $0x1], 0 }
   0xe   :  { %31 = vsyncpa [#allocation16], 0 }
   0xf   :  { %33 = vsyncpa [#allocation16 + $0x1], 0  ;;  %s3643_s19 = smov 0   ;;  %s3645_s20 = smov 0  }
  0x10   :  { %s3647_s21 = smov 0   ;;  %s3649_s22 = smov 0  }
  0x11 LB: > { %5687 = sst [smem:[#allocation24_spill]] %s3560_s19  ;;  %s3664_s7 = sadd.s32 4294967295, %s3572_s22   ;;  %s3572_s22 = sphi %s3649_s22, %s5855_s22   ;;  %s3568_s21 = sphi %s3647_s21, %s5857_s21   ;;  %s3564_s20 = sphi %s3645_s20, %s5859_s20   ;;  %s3560_s19 = sphi %s3643_s19, %s5858_s19  }
  0x12   : > { %5688 = sst [smem:[#allocation25_spill]] %s3568_s21  ;;  %s5670_s23 = sadd.s32 4294967294, %s3572_s22  }
  0x13   : > { %p59_p0 = scmp.ne.s32.totalorder %s3564_s20, %s3560_s19  ;;  %p60_p1 = scmp.eq.s32.totalorder %s3664_s7, 0 }
  0x14   : > { %p235_p2 = scmp.eq.s32.totalorder %s3664_s7, 1  ;;  %p241_p3 = scmp.eq.s32.totalorder %s5670_s23, 1 }
  0x15   : > { %p3675_p4 = por %p60_p1, %p59_p0  ;;  %p2741_p5 = scmp.ge.s32.totalorder %s3572_s22, 1 }
  0x16   : > { %p3680_p6 = por %p241_p3, %p59_p0  ;;  %p326_p7 = scmp.lt.s32.totalorder %s3572_s22, 3 }
  0x17   : > { %s5692_s2 = sld [smem:[#allocation32_spill]]  ;;  %s3574_s30 = smov [#allocation8]  }
  0x18   : > { %s5690_s25 = scalar_select %p3680_p6, 1, 0 }
  0x19   : > { %p3688_p8 = pnand %p2741_p5, %p326_p7  ;;  %s339_s12 = sshll.u32 %s3574_s30, 4  ;;  %s340_s12 = int_to_ptr.vmem [resolvable:$true] %s339_s12 }
  0x1a   : > { %5691 = sst [smem:[#allocation26_spill]] %s5690_s25  ;;  %s3575_s16 = smov 64  }
  0x1b   : > { %p2952_p9 = pneg %p3688_p8  ;;  %s5694_s4 = sld [smem:[#allocation33_spill]] }
  0x1c   : > { %s3576_s17 = smov 4   ;;  %s3577_s18 = smov [#allocation9]  }
  0x1d   : > { %s337_s28 = sshll.u32 %s5692_s2, 4  ;;  %p2953_p10 = pnand %p2952_p9, %p60_p1  ;;  %s338_s28 = int_to_ptr.hbm [resolvable:$true] %s337_s28 }
  0x1e   : > { %s356_s26 = sshll.u32 %s3577_s18, 4  ;;  %s3701_s27 = sadd.s32 1, %s3572_s22   ;;  %s357_s26 = int_to_ptr.vmem [resolvable:$true] %s356_s26 }
  0x1f   : > { %2955 = dma.hbm_to_vmem [thread:$0]  (!%p2953_p10), %s338_s28, 2048, %s340_s12, [#allocation7], %s3575_s16, %s3575_s16, %s3576_s17  }
  0x20   : > { %5695 = sst [smem:[#allocation27_spill]] %s3701_s27  ;;  %s46_s30 = sadd.s32 1, %s3568_s21 }
  0x21   : > { %s354_s15 = sshll.u32 %s5694_s4, 4  ;;  %s43_s13 = ssub.s32 %s3572_s22, %s3701_s27  ;;  %s355_s15 = int_to_ptr.hbm [resolvable:$true] %s354_s15 }
  0x22   : > { %2958 = dma.hbm_to_vmem [thread:$0]  (!%p2953_p10), %s355_s15, 1024, %s357_s26, [#allocation10], %s3575_s16, %s3575_s16, %s3576_s17  }
  0x23   : > { %p53_p12 = scmp.ne.s32.totalorder %s3568_s21, %s3564_s20  ;;  %p44_p13 = scmp.eq.s32.totalorder %s43_s13, 0 }
  0x24   : > { %p54_p0 = scmp.eq.s32.totalorder %s3572_s22, 0  ;;  %p2981_p5 = scmp.lt.s32.totalorder %s3572_s22, 2 }
  0x25   : > { %p3711_p3 = por %p235_p2, %p53_p12  ;;  %s379_s12 = sand.u32 1, %s3568_s21  }
  0x26   : > { %s3717_s28 = scalar_select %p44_p13, %s3568_s21, %s46_s30  }
  0x27   : > { %s5696_s14 = scalar_select %p3711_p3, 1, 0 }
  0x28   : > { %5698 = sst [smem:[#allocation29_spill]] %s3717_s28  ;;  %p55_p7 = por %p54_p0, %p53_p12 }
  0x29   : > { %5697 = sst [smem:[#allocation28_spill]] %s5696_s14  ;;  %s3720_s18 = sshll.u32 %s379_s12, 8 }
  0x2a   : > { %s5672_s15 = sshll.u32 %s3572_s22, 8  ;;  %s5699_s0 = sld [smem:[#allocation31_spill]] }
  0x2b   : > { %s383_s13 = scalar_lea.vmem [#allocation3], %s3720_s18  ;;  %p3729_p2 = pnand %p2981_p5, %p55_p7 }
  0x2c   : > { %s392_s23 = sshll.u32 %s383_s13, 4  ;;  %s380_s30 = scalar_lea.sflag [#allocation4], %s379_s12  ;;  %s393_s23 = int_to_ptr.vmem [resolvable:$true] %s392_s23 }
  0x2d   : > { %p3346_p10 = pneg %p3729_p2 }
  0x30   : > { %s389_s26 = scalar_lea.hbm %s5699_s0, %s5672_s15 }
  0x31   : > { %s390_s2 = sshll.u32 %s389_s26, 4  ;;  %s3349_s26 = scalar_lea.hbm %s5699_s0, 512  ;;  %s391_s2 = int_to_ptr.hbm [resolvable:$true] %s390_s2 }
  0x32   : > { %s3342_s28 = sshra.s32 %s391_s2, 4  ;;  %s3343_s28 = int_to_ptr.hbm [resolvable:$true] %s3342_s28 }
  0x33   : > { %s3344_s21 = scalar_lea.hbm %s3343_s28, 256  ;;  %p3350_p0 = scmp.lt.s32.totalorder %s3343_s28, %s5699_s0 }
  0x34   : > { %p3345_p9 = scmp.ne.s32.totalorder %s3343_s28, %s3344_s21  ;;  %p3351_p5 = scmp.lt.s32.totalorder %s3349_s26, %s3344_s21 }
  0x36   : > { %p3347_p12 = pnand %p3346_p10, %p3345_p9  ;;  %p3352_p7 = por %p3351_p5, %p3350_p0 }
  0x38   : > { %p3348_p13 = pneg %p3347_p12 }
  0x3a   : > { %p3353_p11 = pnand %p3352_p7, %p3348_p13 }
  0x3c   : > { %3356 = shalt.err (!%p3353_p11)
}
  0x3d   : > { %s3578_s12 = smov 256   ;;  %s3579_s27 = smov 16  }
  0x3e   : > { %2962 = dma.hbm_to_vmem [thread:$0]  (!%p3729_p2), %s391_s2, 4096, %s393_s23, %s380_s30, %s3578_s12, %s3578_s12, %s3579_s27  }
  0x3f   : > { %s5701_s25 = sshll.u32 %s3572_s22, 8  ;;  %s406_s15 = scalar_lea.vmem [#allocation6], %s3720_s18 }
  0x40   : > { %s412_s19 = scalar_lea.hbm %s5659_s1, %s5701_s25  ;;  %s415_s28 = sshll.u32 %s406_s15, 4  ;;  %s416_s28 = int_to_ptr.vmem [resolvable:$true] %s415_s28 }
  0x41   : > { %s413_s21 = sshll.u32 %s412_s19, 4  ;;  %s402_s26 = sand.u32 1, %s3572_s22   ;;  %s414_s21 = int_to_ptr.hbm [resolvable:$true] %s413_s21 }
  0x42   : > { %s403_s13 = scalar_lea.sflag [#allocation7], %s402_s26  ;;  %s3372_s0 = sshra.s32 %s414_s21, 4  ;;  %s3373_s0 = int_to_ptr.hbm [resolvable:$true] %s3372_s0 }
  0x43   : > { %s3374_s14 = scalar_lea.hbm %s3373_s0, 256  ;;  %s3379_s30 = scalar_lea.hbm %s5659_s1, 512 }
  0x44   : > { %p3375_p11 = scmp.ne.s32.totalorder %s3373_s0, %s3374_s14  ;;  %p3380_p13 = scmp.lt.s32.totalorder %s3373_s0, %s5659_s1 }
  0x45   : > { %p3381_p0 = scmp.lt.s32.totalorder %s3379_s30, %s3374_s14 }
  0x46   : > { %p3377_p9 = pnand %p3375_p11, %p3346_p10 }
  0x47   : > { %p3382_p5 = por %p3381_p0, %p3380_p13 }
  0x48   : > { %p3378_p12 = pneg %p3377_p9 }
  0x4a   : > { %p3383_p7 = pnand %p3382_p5, %p3378_p12 }
  0x4c   : > { %3386 = shalt.err (!%p3383_p7)
}
  0x4d   : > { %2965 = dma.hbm_to_vmem [thread:$0]  (!%p3729_p2), %s414_s21, 4096, %s416_s28, %s403_s13, %s3578_s12, %s3578_s12, %s3579_s27  }
  0x4e   : > { %427 = sbr.rel (%p3688_p8) target bundleno = 842 (0x34a), region = 52 }
  0x53   : > { %s3767_s19 = sand.u32 1, %s3564_s20  }
  0x54   : > { %s2754_s16 = sshll.u32 %s3767_s19, 8  ;;  %s430_s17 = scalar_lea.sflag [#allocation4], %s3767_s19 }
  0x55   : > { %s3771_s15 = scalar_lea.vmem [#allocation3], %s2754_s16 }
  0x56   : > { %3531 = dma.done.wait (%p3675_p4), %s430_s17, 4096  }
  0x57   : > { %3533 = vsyncadd (%p3675_p4), %s430_s17, 4294963200  ;;  %s439_s0 = sand.u32 1, %s3664_s7   ;;  %s3780_s29 = scalar_lea.vmem [#allocation6], %s2754_s16 }
  0x58   : > { %s440_s4 = scalar_lea.sflag [#allocation7], %s439_s0 }
  0x59   : > { %3535 = dma.done.wait (%p3675_p4), %s440_s4, 4096  }
  0x5a   : > { %3537 = vsyncadd (%p3675_p4), %s440_s4, 4294963200 }
  0x5b   : > { %3539 = dma.done.wait (%p60_p1), [#allocation7], 2048  }
  0x5c   : > { %3541 = vsyncadd (%p60_p1), [#allocation7], 4294965248 }
  0x5d   : > { %3543 = dma.done.wait (%p60_p1), [#allocation10], 1024  }
  0x5e   : > { %3545 = vsyncadd (%p60_p1), [#allocation10], 4294966272  ;;  %v2899_v0 = vld [vmem:[#allocation8 + $0x38] sm:$0xff]  ;;  %v2898_v2 = vld [vmem:[#allocation8 + $0x30] sm:$0xff]  ;;  %s562_s26 = sld [smem:[#allocation2]]  ;;  %vm1640_vm5 = vcmask 130112   ;;  %s2521_s23 = scalar_lea.hbm %s5667_s9, %s3664_s7 }
  0x5f   : > { %v2907_v1 = vld [vmem:[#allocation8 + $0x78] sm:$0xff]  ;;  %710 = vmatpush.bf16.msra.mxu0 %v2899_v0  ;;  %2916 = vmatpush.bf16.msra.mxu2 %v2899_v0  ;;  %v2906_v3 = vld [vmem:[#allocation8 + $0x70] sm:$0xff]  ;;  %v2897_v4 = vld [vmem:[#allocation8 + $0x28] sm:$0xff]  ;;  %vm1644_vm11 = vcmask 195712   ;;  %s496_s30 = scalar_lea.vmem [#allocation12], %s3767_s19  ;;  %s5415_s18 = sshll.u32 %s2521_s23, 4  ;;  %s2526_s18 = int_to_ptr.hbm [resolvable:$true] %s5415_s18 }
  0x60   : > { %2924 = vmatpush.bf16.msra.mxu3 %v2907_v1  ;;  %759 = vmatpush.bf16.msra.mxu1 %v2907_v1  ;;  %v2905_v5 = vld [vmem:[#allocation8 + $0x68] sm:$0xff]  ;;  %v2896_v6 = vld [vmem:[#allocation8 + $0x20] sm:$0xff]  ;;  %v2895_v8 = vld [vmem:[#allocation8 + $0x18] sm:$0xff]  ;;  %s5413_s25 = sshll.u32 %s496_s30, 4  ;;  %s490_s4 = scalar_lea.vmem [#allocation11], %s3767_s19  ;;  %s2524_s25 = int_to_ptr.vmem [resolvable:$true] %s5413_s25 }
  0x61   : > { %v2904_v7 = vld [vmem:[#allocation8 + $0x60] sm:$0xff]  ;;  %v2903_v9 = vld [vmem:[#allocation8 + $0x58] sm:$0xff]  ;;  %v2894_v10 = vld [vmem:[#allocation8 + $0x10] sm:$0xff]  ;;  %s2534_s14 = scalar_lea.hbm %s5668_s10, %s3664_s7  ;;  %s2547_s21 = scalar_lea.hbm %s5669_s11, %s3664_s7 }
  0x62   : > { %v2902_v11 = vld [vmem:[#allocation8 + $0x50] sm:$0xff]  ;;  %v2893_v12 = vld [vmem:[#allocation8 + $0x8] sm:$0xff]  ;;  %v3794_v14 = vld [vmem:[#allocation8] sm:$0xff]  ;;  %s502_s13 = scalar_lea.vmem [#allocation14], %s3767_s19  ;;  %s5530_s23 = sshll.u32 %s2534_s14, 4  ;;  %s2539_s23 = int_to_ptr.hbm [resolvable:$true] %s5530_s23 }
  0x63   : > { %711 = vmatpush.bf16.msra.mxu0 %v2898_v2  ;;  %2917 = vmatpush.bf16.msra.mxu2 %v2898_v2  ;;  %v2901_v13 = vld [vmem:[#allocation8 + $0x48] sm:$0xff]  ;;  %v3796_v15 = vld [vmem:[#allocation8 + $0x40] sm:$0xff]  ;;  %v565_v17 = vld [vmem:[%s3771_s15 + $0x10] sm:$0xff]  ;;  %s5524_s2 = sshll.u32 %s502_s13, 4  ;;  %s5682_s16 = scalar_lea.vmem [#allocation15], %s3767_s19 }
  0x64   : > { %2925 = vmatpush.bf16.msra.mxu3 %v2906_v3  ;;  %760 = vmatpush.bf16.msra.mxu1 %v2906_v3  ;;  %v563_v16 = vld [vmem:[%s3771_s15] sm:$0xff]  ;;  %v581_v19 = vld [vmem:[%s3771_s15 + $0x90] sm:$0xff]  ;;  %v580_v20 = vld [vmem:[%s3771_s15 + $0x88] sm:$0xff]  ;;  %5839 = sst [smem:[#allocation30_spill]] %s5524_s2  ;;  %s5541_s17 = sshll.u32 %s5682_s16, 4  ;;  %s2550_s17 = int_to_ptr.vmem [resolvable:$true] %s5541_s17 }
  0x65   : > { %v579_v18 = vld [vmem:[%s3771_s15 + $0x80] sm:$0xff]  ;;  %v582_v21 = vld [vmem:[%s3771_s15 + $0x98] sm:$0xff]  ;;  %v564_v22 = vld [vmem:[%s3771_s15 + $0x8] sm:$0xff]  ;;  %v595_v24 = vpack.c.bf16 %v565_v17, %v563_v16  ;;  %s2488_s27 = scalar_lea.sflag [#allocation5], %s3767_s19  ;;  %s3422_s16 = scalar_lea.hbm %s5666_s8, 2 }
  0x66   : > { %v566_v23 = vld [vmem:[%s3771_s15 + $0x18] sm:$0xff]  ;;  %v603_v25 = vpack.c.bf16 %v581_v19, %v579_v18  ;;  %v604_v26 = vpack.c.bf16 %v582_v21, %v580_v20  ;;  %v567_v28 = vld [vmem:[%s3771_s15 + $0x20] sm:$0xff]  ;;  %v569_v29 = vld [vmem:[%s3771_s15 + $0x30] sm:$0xff] }
  0x67   : > { %712 = vmatpush.bf16.msra.mxu0 %v2897_v4  ;;  %2918 = vmatpush.bf16.msra.mxu2 %v2897_v4  ;;  %v596_v27 = vpack.c.bf16 %v566_v23, %v564_v22  ;;  %v583_v30 = vld [vmem:[%s3771_s15 + $0xa0] sm:$0xff]  ;;  %v585_v31 = vld [vmem:[%s3771_s15 + $0xb0] sm:$0xff]  ;;  %v584_v32 = vld [vmem:[%s3771_s15 + $0xa8] sm:$0xff]  ;;  %v597_v36 = vpack.c.bf16 %v569_v29, %v567_v28 }
  0x68   : > { %2926 = vmatpush.bf16.msra.mxu3 %v2905_v5  ;;  %761 = vmatpush.bf16.msra.mxu1 %v2905_v5  ;;  %v586_v33 = vld [vmem:[%s3771_s15 + $0xb8] sm:$0xff]  ;;  %v568_v34 = vld [vmem:[%s3771_s15 + $0x28] sm:$0xff]  ;;  %v605_v37 = vpack.c.bf16 %v585_v31, %v583_v30  ;;  %v571_v40 = vld [vmem:[%s3771_s15 + $0x40] sm:$0xff] }
  0x69   : > { %v570_v35 = vld [vmem:[%s3771_s15 + $0x38] sm:$0xff]  ;;  %v606_v38 = vpack.c.bf16 %v586_v33, %v584_v32  ;;  %v573_v41 = vld [vmem:[%s3771_s15 + $0x50] sm:$0xff]  ;;  %v587_v42 = vld [vmem:[%s3771_s15 + $0xc0] sm:$0xff] }
  0x6a   : > { %v598_v39 = vpack.c.bf16 %v570_v35, %v568_v34  ;;  %v589_v43 = vld [vmem:[%s3771_s15 + $0xd0] sm:$0xff]  ;;  %v588_v44 = vld [vmem:[%s3771_s15 + $0xc8] sm:$0xff]  ;;  %v590_v45 = vld [vmem:[%s3771_s15 + $0xd8] sm:$0xff]  ;;  %v599_v48 = vpack.c.bf16 %v573_v41, %v571_v40 }
  0x6b   : > { %713 = vmatpush.bf16.msra.mxu0 %v2896_v6  ;;  %2919 = vmatpush.bf16.msra.mxu2 %v2896_v6  ;;  %v572_v46 = vld [vmem:[%s3771_s15 + $0x48] sm:$0xff]  ;;  %v574_v47 = vld [vmem:[%s3771_s15 + $0x58] sm:$0xff]  ;;  %v607_v49 = vpack.c.bf16 %v589_v43, %v587_v42  ;;  %v608_v50 = vpack.c.bf16 %v590_v45, %v588_v44  ;;  %v575_v52 = vld [vmem:[%s3771_s15 + $0x60] sm:$0xff] }
  0x6c   : > { %2927 = vmatpush.bf16.msra.mxu3 %v2904_v7  ;;  %762 = vmatpush.bf16.msra.mxu1 %v2904_v7  ;;  %v600_v51 = vpack.c.bf16 %v574_v47, %v572_v46  ;;  %v577_v53 = vld [vmem:[%s3771_s15 + $0x70] sm:$0xff]  ;;  %v591_v54 = vld [vmem:[%s3771_s15 + $0xe0] sm:$0xff]  ;;  %v592_v56 = vld [vmem:[%s3771_s15 + $0xe8] sm:$0xff] }
  0x6d   : > { %v593_v55 = vld [vmem:[%s3771_s15 + $0xf0] sm:$0xff]  ;;  %v594_v57 = vld [vmem:[%s3771_s15 + $0xf8] sm:$0xff]  ;;  %v576_v58 = vld [vmem:[%s3771_s15 + $0x68] sm:$0xff]  ;;  %v601_v60 = vpack.c.bf16 %v577_v53, %v575_v52 }
  0x6e   : > { %v578_v59 = vld [vmem:[%s3771_s15 + $0x78] sm:$0xff]  ;;  %v609_v61 = vpack.c.bf16 %v593_v55, %v591_v54  ;;  %v610_v62 = vpack.c.bf16 %v594_v57, %v592_v56  ;;  %v1025_v16 = vld [vmem:[%s3780_s29 + $0x48] sm:$0xff]  ;;  %v1024_v18 = vld [vmem:[%s3780_s29 + $0x40] sm:$0xff]  ;;  %s2508_s15 = scalar_lea.hbm %s5666_s8, %s3664_s7 }
  0x6f   : > { %714 = vmatpush.bf16.msra.mxu0 %v2895_v8  ;;  %2920 = vmatpush.bf16.msra.mxu2 %v2895_v8  ;;  %v602_v63 = vpack.c.bf16 %v578_v59, %v576_v58  ;;  %v1027_v17 = vld [vmem:[%s3780_s29 + $0x58] sm:$0xff]  ;;  %v1026_v19 = vld [vmem:[%s3780_s29 + $0x50] sm:$0xff]  ;;  %v2908_v29 = vld [vmem:[#allocation9] sm:$0xff] }
  0x70   : > { %2928 = vmatpush.bf16.msra.mxu3 %v2903_v9  ;;  %763 = vmatpush.bf16.msra.mxu1 %v2903_v9  ;;  %v1053_v20 = vpack.c.bf16 %v1027_v17, %v1025_v16  ;;  %v1052_v21 = vpack.c.bf16 %v1026_v19, %v1024_v18  ;;  %v2911_v22 = vld [vmem:[#allocation9 + $0x18] sm:$0xff]  ;;  %v2910_v23 = vld [vmem:[#allocation9 + $0x10] sm:$0xff]  ;;  %v1033_v32 = vld [vmem:[%s3780_s29 + $0x88] sm:$0xff] }
  0x71   : > { %v1030_v28 = vld [vmem:[%s3780_s29 + $0x70] sm:$0xff]  ;;  %v1035_v33 = vld [vmem:[%s3780_s29 + $0x98] sm:$0xff]  ;;  %v1032_v34 = vld [vmem:[%s3780_s29 + $0x80] sm:$0xff] }
  0x72   : > { %v1034_v35 = vld [vmem:[%s3780_s29 + $0x90] sm:$0xff]  ;;  %v1036_v52 = vld [vmem:[%s3780_s29 + $0xa0] sm:$0xff] }
  0x73   : > { %715 = vmatpush.bf16.msra.mxu0 %v2894_v10  ;;  %2921 = vmatpush.bf16.msra.mxu2 %v2894_v10  ;;  %v1038_v53 = vld [vmem:[%s3780_s29 + $0xb0] sm:$0xff] }
  0x74   : > { %2929 = vmatpush.bf16.msra.mxu3 %v2902_v11  ;;  %764 = vmatpush.bf16.msra.mxu1 %v2902_v11  ;;  %v1058_v58 = vpack.c.bf16 %v1038_v53, %v1036_v52 }
  0x77   : > { %716 = vmatpush.bf16.msra.mxu0 %v2893_v12  ;;  %2922 = vmatpush.bf16.msra.mxu2 %v2893_v12 }
  0x78   : > { %2930 = vmatpush.bf16.msra.mxu3 %v2901_v13  ;;  %765 = vmatpush.bf16.msra.mxu1 %v2901_v13 }
  0x7b   : > { %717 = vmatpush.bf16.msra.mxu0 %v3794_v14  ;;  %2923 = vmatpush.bf16.msra.mxu2 %v3794_v14 }
  0x7c   : > { %2931 = vmatpush.bf16.msra.mxu3 %v3796_v15  ;;  %766 = vmatpush.bf16.msra.mxu1 %v3796_v15 }
  0x7e   : > { %718 = vmatmul.bf16.vlgmr.msra.gmra.mxu0 %v595_v24  ;;  %738 = vmatmul.bf16.vlgmr.msra.gmra.mxu2 %v603_v25  ;;  %v2909_v24 = vld [vmem:[#allocation9 + $0x8] sm:$0xff] }
  0x7f   : > { %1113 = vmatpush.bf16.msrb.mxu0 %v2907_v1  ;;  %787 = vmatmul.bf16.vlgmr.msra.gmra.mxu3 %v604_v26  ;;  %v1019_v1 = vld [vmem:[%s3780_s29 + $0x18] sm:$0xff]  ;;  %v1029_v25 = vld [vmem:[%s3780_s29 + $0x68] sm:$0xff] }
  0x80   : > { %1064 = vmatpush.bf16.msrb.mxu3 %v2899_v0  ;;  %767 = vmatmul.bf16.vlgmr.msra.gmra.mxu1 %v596_v27  ;;  %v1017_v0 = vld [vmem:[%s3780_s29 + $0x8] sm:$0xff]  ;;  %v1031_v26 = vld [vmem:[%s3780_s29 + $0x78] sm:$0xff]  ;;  %v1028_v27 = vld [vmem:[%s3780_s29 + $0x60] sm:$0xff] }
  0x81   : > { %v1055_v30 = vpack.c.bf16 %v1031_v26, %v1029_v25  ;;  %v1054_v31 = vpack.c.bf16 %v1030_v28, %v1028_v27  ;;  %v1047_v25 = vld [vmem:[%s3780_s29 + $0xf8] sm:$0xff]  ;;  %v1044_v27 = vld [vmem:[%s3780_s29 + $0xe0] sm:$0xff]  ;;  %v1046_v28 = vld [vmem:[%s3780_s29 + $0xf0] sm:$0xff] }
  0x83   : > { %1114 = vmatpush.bf16.msrb.mxu0 %v2906_v3  ;;  %v1018_v3 = vld [vmem:[%s3780_s29 + $0x10] sm:$0xff] }
  0x84   : > { %1065 = vmatpush.bf16.msrb.mxu3 %v2898_v2  ;;  %v1016_v2 = vld [vmem:[%s3780_s29] sm:$0xff] }
  0x87   : > { %1115 = vmatpush.bf16.msrb.mxu0 %v2905_v5  ;;  %v1048_v5 = vpack.c.bf16 %v1018_v3, %v1016_v2 }
  0x88   : > { %1066 = vmatpush.bf16.msrb.mxu3 %v2897_v4  ;;  %v1049_v4 = vpack.c.bf16 %v1019_v1, %v1017_v0 }
  0x8b   : > { %1116 = vmatpush.bf16.msrb.mxu0 %v2904_v7  ;;  %v1021_v7 = vld [vmem:[%s3780_s29 + $0x28] sm:$0xff] }
  0x8c   : > { %1067 = vmatpush.bf16.msrb.mxu3 %v2896_v6  ;;  %v2915_v6 = vld [vmem:[#allocation9 + $0x38] sm:$0xff] }
  0x8d   : > { %883 = vmatpush.bf16.msrb.mxu2 %v2915_v6  ;;  %1186 = vmatpush.bf16.msrb.mxu1 %v2915_v6 }
  0x8e   : > { %723 = vmatmul.bf16.gmra.mxu0 %v597_v36  ;;  %743 = vmatmul.bf16.gmra.mxu2 %v605_v37  ;;  %v1057_v36 = vpack.c.bf16 %v1035_v33, %v1033_v32  ;;  %v1062_v33 = vpack.c.bf16 %v1046_v28, %v1044_v27 }
  0x8f   : > { %1117 = vmatpush.bf16.msrb.mxu0 %v2903_v9  ;;  %792 = vmatmul.bf16.gmra.mxu3 %v606_v38  ;;  %v1020_v9 = vld [vmem:[%s3780_s29 + $0x20] sm:$0xff]  ;;  %v1056_v38 = vpack.c.bf16 %v1034_v35, %v1032_v34 }
  0x90   : > { %1068 = vmatpush.bf16.msrb.mxu3 %v2895_v8  ;;  %772 = vmatmul.bf16.gmra.mxu1 %v598_v39  ;;  %v1023_v8 = vld [vmem:[%s3780_s29 + $0x38] sm:$0xff]  ;;  %v3859_v39 = vld [vmem:[%s5661_s3] ss:$0 sm:$0xff] }
  0x93   : > { %1118 = vmatpush.bf16.msrb.mxu0 %v2902_v11  ;;  %v1051_v11 = vpack.c.bf16 %v1023_v8, %v1021_v7  ;;  %v1040_v7 = vld [vmem:[%s3780_s29 + $0xc0] sm:$0xff]  ;;  %v1042_v8 = vld [vmem:[%s3780_s29 + $0xd0] sm:$0xff] }
  0x94   : > { %1069 = vmatpush.bf16.msrb.mxu3 %v2894_v10  ;;  %v1022_v10 = vld [vmem:[%s3780_s29 + $0x30] sm:$0xff] }
  0x97   : > { %1119 = vmatpush.bf16.msrb.mxu0 %v2901_v13  ;;  %v2914_v13 = vld [vmem:[#allocation9 + $0x30] sm:$0xff] }
  0x98   : > { %1070 = vmatpush.bf16.msrb.mxu3 %v2893_v12  ;;  %v1050_v12 = vpack.c.bf16 %v1022_v10, %v1020_v9  ;;  %884 = vmatpush.bf16.msrb.mxu2 %v2914_v13 }
  0x99   : > { %1187 = vmatpush.bf16.msrb.mxu1 %v2914_v13  ;;  %v1060_v13 = vpack.c.bf16 %v1042_v8, %v1040_v7 }
  0x9b   : > { %1120 = vmatpush.bf16.msrb.mxu0 %v3796_v15  ;;  %v2912_v15 = vld [vmem:[#allocation9 + $0x20] sm:$0xff] }
  0x9c   : > { %1071 = vmatpush.bf16.msrb.mxu3 %v3794_v14  ;;  %v2913_v14 = vld [vmem:[#allocation9 + $0x28] sm:$0xff] }
  0x9d   : > { %885 = vmatpush.bf16.msrb.mxu2 %v2913_v14  ;;  %1188 = vmatpush.bf16.msrb.mxu1 %v2913_v14 }
  0x9e   : > { %728 = vmatmul.bf16.gmra.mxu0 %v599_v48  ;;  %748 = vmatmul.bf16.gmra.mxu2 %v607_v49  ;;  %v1037_v49 = vld [vmem:[%s3780_s29 + $0xa8] sm:$0xff] }
  0x9f   : > { %797 = vmatmul.bf16.gmra.mxu3 %v608_v50  ;;  %v1039_v50 = vld [vmem:[%s3780_s29 + $0xb8] sm:$0xff] }
  0xa0   : > { %777 = vmatmul.bf16.gmra.mxu1 %v600_v51  ;;  %v1059_v56 = vpack.c.bf16 %v1039_v50, %v1037_v49 }
  0xa1   : > { %886 = vmatpush.bf16.msrb.mxu2 %v2912_v15  ;;  %1189 = vmatpush.bf16.msrb.mxu1 %v2912_v15 }
  0xa5   : > { %887 = vmatpush.bf16.msrb.mxu2 %v2911_v22  ;;  %1190 = vmatpush.bf16.msrb.mxu1 %v2911_v22 }
  0xa9   : > { %888 = vmatpush.bf16.msrb.mxu2 %v2910_v23  ;;  %1191 = vmatpush.bf16.msrb.mxu1 %v2910_v23 }
  0xad   : > { %889 = vmatpush.bf16.msrb.mxu2 %v2909_v24  ;;  %1192 = vmatpush.bf16.msrb.mxu1 %v2909_v24  ;;  %v1045_v24 = vld [vmem:[%s3780_s29 + $0xe8] sm:$0xff] }
  0xae   : > { %733 = vmatmul.bf16.gmra.mxu0 %v601_v60  ;;  %753 = vmatmul.bf16.gmra.mxu2 %v609_v61 }
  0xaf   : > { %802 = vmatmul.bf16.gmra.mxu3 %v610_v62 }
  0xb0   : > { %782 = vmatmul.bf16.gmra.mxu1 %v602_v63 }
  0xb1   : > { %890 = vmatpush.bf16.msrb.mxu2 %v2908_v29  ;;  %1193 = vmatpush.bf16.msrb.mxu1 %v2908_v29 }
  0xbe   : > { %1121 = vmatmul.bf16.vlgmr.msrb.gmra.mxu0 %v1049_v4  ;;  %v1041_v4 = vld [vmem:[%s3780_s29 + $0xc8] sm:$0xff] }
  0xbf   : > { %1072 = vmatmul.bf16.vlgmr.msrb.gmra.mxu3 %v1048_v5  ;;  %v1043_v5 = vld [vmem:[%s3780_s29 + $0xd8] sm:$0xff]  ;;  %s5485_s29 = sshll.u32 %s490_s4, 4  ;;  %s2511_s29 = int_to_ptr.vmem [resolvable:$true] %s5485_s29 }
  0xce   : > { %1126 = vmatmul.bf16.gmra.mxu0 %v1051_v11  ;;  %v1061_v11 = vpack.c.bf16 %v1043_v5, %v1041_v4 }
  0xcf   : > { %1077 = vmatmul.bf16.gmra.mxu3 %v1050_v12 }
  0xde   : > { %1131 = vmatmul.bf16.gmra.mxu0 %v1053_v20 }
  0xdf   : > { %1082 = vmatmul.bf16.gmra.mxu3 %v1052_v21 }
  0xee   : > { %1136 = vmatmul.bf16.gmra.mxu0 %v1055_v30 }
  0xef   : > { %1087 = vmatmul.bf16.gmra.mxu3 %v1054_v31  ;;  %v1063_v31 = vpack.c.bf16 %v1047_v25, %v1045_v24 }
  0xfb   : > { %v719_v37 = vpop.f32.mrf.mxu0 }
  0xfc   : > { %v720_v41 = vadd.f32 %v3859_v39, %v719_v37 }
  0xfd   : > { %v768_v40 = vpop.f32.mrf.mxu1 }
  0xfe   : > { %1141 = vmatmul.bf16.gmra.mxu0 %v1057_v36  ;;  %v769_v42 = vadd.f32 %v768_v40, %v720_v41 }
  0xff   : > { %1092 = vmatmul.bf16.gmra.mxu3 %v1056_v38 }
 0x100   : > { %v808_v47 = vmax.f32 %v769_v42, 0.0 }
 0x101   : > { %v739_v21 = vpop.f32.mrf.mxu2 }
 0x102   : > { %v3862_v43 = vpop.f32.mrf.mxu3  ;;  %v740_v52 = vadd.f32 %v3859_v39, %v739_v21 }
 0x103   : > { %v721_v44 = vpop.f32.mrf.mxu0 }
 0x104   : > { %v722_v45 = vadd.f32 %v3859_v39, %v721_v44 }
 0x105   : > { %v770_v46 = vpop.f32.mrf.mxu1 }
 0x106   : > { %v771_v48 = vadd.f32 %v770_v46, %v722_v45 }
 0x108   : > { %v809_v51 = vmax.f32 %v771_v48, 0.0 }
 0x109   : > { %v741_v36 = vpop.f32.mrf.mxu2 }
 0x10a   : > { %v824_v54 = vpack.c.bf16 %v809_v51, %v808_v47  ;;  %v3869_v55 = vpop.f32.mrf.mxu3  ;;  %v742_v51 = vadd.f32 %v3859_v39, %v741_v36 }
 0x10b   : > { %v724_v57 = vpop.f32.mrf.mxu0 }
 0x10c   : > { %891 = vmatmul.bf16.vlgmr.msrb.gmra.mxu2 %v824_v54  ;;  %v725_v60 = vadd.f32 %v3859_v39, %v724_v57  ;;  %v791_v53 = vadd.f32 %v3869_v55, %v742_v51 }
 0x10d   : > { %v773_v59 = vpop.f32.mrf.mxu1 }
 0x10e   : > { %1146 = vmatmul.bf16.gmra.mxu0 %v1059_v56  ;;  %v774_v61 = vadd.f32 %v773_v59, %v725_v60  ;;  %v817_v59 = vmax.f32 %v791_v53, 0.0 }
 0x10f   : > { %1097 = vmatmul.bf16.gmra.mxu3 %v1058_v58  ;;  %v789_v58 = vadd.f32 %v3862_v43, %v740_v52 }
 0x110   : > { %v810_v2 = vmax.f32 %v774_v61, 0.0 }
 0x111   : > { %v744_v47 = vpop.f32.mrf.mxu2  ;;  %v816_v61 = vmax.f32 %v789_v58, 0.0 }
 0x112   : > { %v3872_v62 = vpop.f32.mrf.mxu3  ;;  %v745_v8 = vadd.f32 %v3859_v39, %v744_v47 }
 0x113   : > { %v726_v63 = vpop.f32.mrf.mxu0 }
 0x114   : > { %v727_v0 = vadd.f32 %v3859_v39, %v726_v63 }
 0x115   : > { %v775_v1 = vpop.f32.mrf.mxu1 }
 0x116   : > { %v776_v3 = vadd.f32 %v775_v1, %v727_v0  ;;  %v828_v0 = vpack.c.bf16 %v817_v59, %v816_v61 }
 0x118   : > { %v811_v6 = vmax.f32 %v776_v3, 0.0 }
 0x119   : > { %v746_v56 = vpop.f32.mrf.mxu2 }
 0x11a   : > { %v3879_v9 = vpop.f32.mrf.mxu3  ;;  %v825_v10 = vpack.c.bf16 %v811_v6, %v810_v2  ;;  %v747_v55 = vadd.f32 %v3859_v39, %v746_v56 }
 0x11b   : > { %v729_v12 = vpop.f32.mrf.mxu0 }
 0x11c   : > { %896 = vmatmul.bf16.gmra.mxu2 %v825_v10  ;;  %v730_v15 = vadd.f32 %v3859_v39, %v729_v12  ;;  %v796_v10 = vadd.f32 %v3879_v9, %v747_v55 }
 0x11d   : > { %v778_v14 = vpop.f32.mrf.mxu1 }
 0x11e   : > { %1151 = vmatmul.bf16.gmra.mxu0 %v1061_v11  ;;  %v779_v16 = vadd.f32 %v778_v14, %v730_v15  ;;  %v819_v14 = vmax.f32 %v796_v10, 0.0 }
 0x11f   : > { %1102 = vmatmul.bf16.gmra.mxu3 %v1060_v13  ;;  %v794_v13 = vadd.f32 %v3872_v62, %v745_v8 }
 0x120   : > { %v812_v22 = vmax.f32 %v779_v16, 0.0 }
 0x121   : > { %v749_v4 = vpop.f32.mrf.mxu2 }
 0x122   : > { %v3882_v17 = vpop.f32.mrf.mxu3  ;;  %v750_v27 = vadd.f32 %v3859_v39, %v749_v4 }
 0x123   : > { %v731_v18 = vpop.f32.mrf.mxu0 }
 0x124   : > { %v732_v19 = vadd.f32 %v3859_v39, %v731_v18  ;;  %v818_v18 = vmax.f32 %v794_v13, 0.0 }
 0x125   : > { %v780_v20 = vpop.f32.mrf.mxu1 }
 0x126   : > { %v781_v23 = vadd.f32 %v780_v20, %v732_v19  ;;  %v829_v20 = vpack.c.bf16 %v819_v14, %v818_v18 }
 0x128   : > { %v813_v26 = vmax.f32 %v781_v23, 0.0 }
 0x129   : > { %v751_v15 = vpop.f32.mrf.mxu2 }
 0x12a   : > { %v3889_v29 = vpop.f32.mrf.mxu3  ;;  %v826_v30 = vpack.c.bf16 %v813_v26, %v812_v22  ;;  %v752_v9 = vadd.f32 %v3859_v39, %v751_v15  ;;  %v3932_v15 = vld [vmem:[%s5664_s6] ss:$0 sm:$0xff] }
 0x12b   : > { %v734_v32 = vpop.f32.mrf.mxu0 }
 0x12c   : > { %901 = vmatmul.bf16.gmra.mxu2 %v826_v30  ;;  %v735_v35 = vadd.f32 %v3859_v39, %v734_v32  ;;  %v801_v30 = vadd.f32 %v3889_v29, %v752_v9 }
 0x12d   : > { %v783_v34 = vpop.f32.mrf.mxu1 }
 0x12e   : > { %1156 = vmatmul.bf16.gmra.mxu0 %v1063_v31  ;;  %v784_v37 = vadd.f32 %v783_v34, %v735_v35  ;;  %v821_v34 = vmax.f32 %v801_v30, 0.0 }
 0x12f   : > { %1107 = vmatmul.bf16.gmra.mxu3 %v1062_v33  ;;  %v799_v33 = vadd.f32 %v3882_v17, %v750_v27 }
 0x130   : > { %v814_v44 = vmax.f32 %v784_v37, 0.0 }
 0x131   : > { %v754_v62 = vpop.f32.mrf.mxu2  ;;  %v820_v36 = vmax.f32 %v799_v33, 0.0 }
 0x132   : > { %v3892_v38 = vpop.f32.mrf.mxu3 }
 0x133   : > { %v736_v40 = vpop.f32.mrf.mxu0 }
 0x134   : > { %v737_v41 = vadd.f32 %v3859_v39, %v736_v40  ;;  %v830_v40 = vpack.c.bf16 %v821_v34, %v820_v36 }
 0x135   : > { %v785_v42 = vpop.f32.mrf.mxu1 }
 0x136   : > { %v786_v45 = vadd.f32 %v785_v42, %v737_v41 }
 0x138   : > { %v815_v46 = vmax.f32 %v786_v45, 0.0 }
 0x139   : > { %v756_v41 = vpop.f32.mrf.mxu2 }
 0x13a   : > { %v3895_v48 = vpop.f32.mrf.mxu3  ;;  %v827_v49 = vpack.c.bf16 %v815_v46, %v814_v44  ;;  %v757_v29 = vadd.f32 %v3859_v39, %v756_v41 }
 0x13b   : > { %v1122_v50 = vpop.f32.mrf.mxu0 }
 0x13c   : > { %906 = vmatmul.bf16.gmra.mxu2 %v827_v49  ;;  %v806_v51 = vadd.f32 %v3895_v48, %v757_v29 }
 0x13e   : > { %v823_v56 = vmax.f32 %v806_v51, 0.0 }
 0x142   : > { %v1073_v54 = vpop.f32.mrf.mxu3 }
 0x143   : > { %v1124_v57 = vpop.f32.mrf.mxu0  ;;  %v1074_v60 = vadd.f32 %v3859_v39, %v1073_v54 }
 0x145   : > { %v1123_v1 = vadd.f32 %v1122_v50, %v1074_v60  ;;  %v755_v50 = vadd.f32 %v3859_v39, %v754_v62 }
 0x147   : > { %v1162_v6 = vmax.f32 %v1123_v1, 0.0  ;;  %v804_v54 = vadd.f32 %v3892_v38, %v755_v50 }
 0x149   : > { %v822_v58 = vmax.f32 %v804_v54, 0.0 }
 0x14a   : > { %v1075_v63 = vpop.f32.mrf.mxu3 }
 0x14b   : > { %v1076_v2 = vadd.f32 %v3859_v39, %v1075_v63  ;;  %v1127_v3 = vpop.f32.mrf.mxu0  ;;  %v831_v60 = vpack.c.bf16 %v823_v56, %v822_v58 }
 0x14c   : > { %911 = vmatmul.bf16.gmra.mxu2 %v828_v0 }
 0x14d   : > { %v1125_v5 = vadd.f32 %v1124_v57, %v1076_v2 }
 0x14f   : > { %v1163_v7 = vmax.f32 %v1125_v5, 0.0 }
 0x151   : > { %v1178_v43 = vpack.c.bf16 %v1163_v7, %v1162_v6 }
 0x152   : > { %v1078_v11 = vpop.f32.mrf.mxu3 }
 0x153   : > { %1194 = vmatmul.bf16.vlgmr.msrb.gmra.mxu1 %v1178_v43  ;;  %v1129_v12 = vpop.f32.mrf.mxu0  ;;  %v1079_v16 = vadd.f32 %v3859_v39, %v1078_v11  ;;  %v3926_v43 = vld [vmem:[%s5663_s5] ss:$0 sm:$0xff] }
 0x155   : > { %v1128_v21 = vadd.f32 %v1127_v3, %v1079_v16 }
 0x157   : > { %v1164_v25 = vmax.f32 %v1128_v21, 0.0 }
 0x15a   : > { %v1080_v19 = vpop.f32.mrf.mxu3 }
 0x15b   : > { %v1081_v22 = vadd.f32 %v3859_v39, %v1080_v19  ;;  %v1132_v23 = vpop.f32.mrf.mxu0 }
 0x15c   : > { %916 = vmatmul.bf16.gmra.mxu2 %v829_v20 }
 0x15d   : > { %v1130_v24 = vadd.f32 %v1129_v12, %v1081_v22 }
 0x15f   : > { %v1165_v26 = vmax.f32 %v1130_v24, 0.0 }
 0x161   : > { %v1179_v28 = vpack.c.bf16 %v1165_v26, %v1164_v25 }
 0x162   : > { %v1083_v31 = vpop.f32.mrf.mxu3 }
 0x163   : > { %1199 = vmatmul.bf16.gmra.mxu1 %v1179_v28  ;;  %v1134_v32 = vpop.f32.mrf.mxu0  ;;  %v1084_v35 = vadd.f32 %v3859_v39, %v1083_v31 }
 0x165   : > { %v1133_v42 = vadd.f32 %v1132_v23, %v1084_v35 }
 0x167   : > { %v1166_v47 = vmax.f32 %v1133_v42, 0.0 }
 0x16a   : > { %v1085_v37 = vpop.f32.mrf.mxu3 }
 0x16b   : > { %v1086_v44 = vadd.f32 %v3859_v39, %v1085_v37  ;;  %v1137_v45 = vpop.f32.mrf.mxu0 }
 0x16c   : > { %921 = vmatmul.bf16.gmra.mxu2 %v830_v40 }
 0x16d   : > { %v1135_v46 = vadd.f32 %v1134_v32, %v1086_v44 }
 0x16f   : > { %v1167_v49 = vmax.f32 %v1135_v46, 0.0 }
 0x171   : > { %v1180_v17 = vpack.c.bf16 %v1167_v49, %v1166_v47 }
 0x172   : > { %v1088_v52 = vpop.f32.mrf.mxu3 }
 0x173   : > { %1204 = vmatmul.bf16.gmra.mxu1 %v1180_v17  ;;  %v1139_v53 = vpop.f32.mrf.mxu0  ;;  %v1089_v57 = vadd.f32 %v3859_v39, %v1088_v52 }
 0x175   : > { %v1138_v61 = vadd.f32 %v1137_v45, %v1089_v57 }
 0x177   : > { %v1168_v2 = vmax.f32 %v1138_v61, 0.0 }
 0x17a   : > { %v1090_v59 = vpop.f32.mrf.mxu3 }
 0x17b   : > { %v1091_v63 = vadd.f32 %v3859_v39, %v1090_v59  ;;  %v1142_v0 = vpop.f32.mrf.mxu0 }
 0x17c   : > { %926 = vmatmul.bf16.gmra.mxu2 %v831_v60 }
 0x17d   : > { %v1140_v1 = vadd.f32 %v1139_v53, %v1091_v63 }
 0x17f   : > { %v1169_v3 = vmax.f32 %v1140_v1, 0.0 }
 0x181   : > { %v1181_v48 = vpack.c.bf16 %v1169_v3, %v1168_v2 }
 0x182   : > { %v1093_v4 = vpop.f32.mrf.mxu3 }
 0x183   : > { %1209 = vmatmul.bf16.gmra.mxu1 %v1181_v48  ;;  %v1144_v5 = vpop.f32.mrf.mxu0  ;;  %v1094_v38 = vadd.f32 %v3859_v39, %v1093_v4 }
 0x185   : > { %v1143_v6 = vadd.f32 %v1142_v0, %v1094_v38 }
 0x187   : > { %v1170_v11 = vmax.f32 %v1143_v6, 0.0 }
 0x18a   : > { %v1095_v55 = vpop.f32.mrf.mxu3 }
 0x18b   : > { %v1096_v7 = vadd.f32 %v3859_v39, %v1095_v55  ;;  %v1147_v8 = vpop.f32.mrf.mxu0 }
 0x18d   : > { %v1145_v10 = vadd.f32 %v1144_v5, %v1096_v7 }
 0x18f   : > { %v1171_v12 = vmax.f32 %v1145_v10, 0.0  ;;  %v892_v13 = vpop.f32.mrf.mxu2 }
 0x190   : > { %v893_v14 = vadd.f32 %v3926_v43, %v892_v13 }
 0x191   : > { %v1182_v16 = vpack.c.bf16 %v1171_v12, %v1170_v11 }
 0x192   : > { %v932_v18 = vmax.f32 %v893_v14, 0.0  ;;  %v1098_v19 = vpop.f32.mrf.mxu3 }
 0x193   : > { %1214 = vmatmul.bf16.gmra.mxu1 %v1182_v16  ;;  %v1149_v20 = vpop.f32.mrf.mxu0  ;;  %v1099_v22 = vadd.f32 %v3859_v39, %v1098_v19 }
 0x194   : > { %v951_v21 = vmul.f32 %v3932_v15, %v932_v18 }
 0x195   : > { %v1148_v26 = vadd.f32 %v1147_v8, %v1099_v22 }
 0x196   : > { %967 = vadd.xlane.f32.xlu0 %v951_v21 }
 0x197   : > { %v894_v23 = vpop.f32.mrf.mxu2  ;;  %v1172_v31 = vmax.f32 %v1148_v26, 0.0 }
 0x198   : > { %v895_v24 = vadd.f32 %v3926_v43, %v894_v23 }
 0x19a   : > { %v933_v9 = vmax.f32 %v895_v24, 0.0  ;;  %v1100_v25 = vpop.f32.mrf.mxu3 }
 0x19b   : > { %v1101_v27 = vadd.f32 %v3859_v39, %v1100_v25  ;;  %v1152_v30 = vpop.f32.mrf.mxu0 }
 0x19c   : > { %v952_v62 = vmul.f32 %v3932_v15, %v933_v9 }
 0x19d   : > { %v1150_v28 = vadd.f32 %v1149_v20, %v1101_v27 }
 0x19e   : > { %969 = vadd.xlane.f32.xlu0 %v952_v62 }
 0x19f   : > { %v1173_v32 = vmax.f32 %v1150_v28, 0.0  ;;  %v897_v33 = vpop.f32.mrf.mxu2 }
 0x1a0   : > { %v898_v34 = vadd.f32 %v3926_v43, %v897_v33 }
 0x1a1   : > { %v1183_v35 = vpack.c.bf16 %v1173_v32, %v1172_v31 }
 0x1a2   : > { %v934_v36 = vmax.f32 %v898_v34, 0.0  ;;  %v1103_v37 = vpop.f32.mrf.mxu3 }
 0x1a3   : > { %1219 = vmatmul.bf16.gmra.mxu1 %v1183_v35  ;;  %v1104_v41 = vadd.f32 %v3859_v39, %v1103_v37  ;;  %v1154_v44 = vpop.f32.mrf.mxu0 }
 0x1a4   : > { %v953_v40 = vmul.f32 %v3932_v15, %v934_v36 }
 0x1a5   : > { %v1153_v47 = vadd.f32 %v1152_v30, %v1104_v41 }
 0x1a6   : > { %971 = vadd.xlane.f32.xlu1 %v953_v40 }
 0x1a7   : > { %v899_v42 = vpop.f32.mrf.mxu2  ;;  %v1174_v51 = vmax.f32 %v1153_v47, 0.0 }
 0x1a8   : > { %v900_v45 = vadd.f32 %v3926_v43, %v899_v42 }
 0x1aa   : > { %v935_v46 = vmax.f32 %v900_v45, 0.0  ;;  %v1105_v29 = vpop.f32.mrf.mxu3 }
 0x1ab   : > { %v1106_v49 = vadd.f32 %v3859_v39, %v1105_v29  ;;  %v1157_v57 = vpop.f32.mrf.mxu0 }
 0x1ac   : > { %v954_v50 = vmul.f32 %v3932_v15, %v935_v46 }
 0x1ad   : > { %v1155_v17 = vadd.f32 %v1154_v44, %v1106_v49 }
 0x1ae   : > { %973 = vadd.xlane.f32.xlu2 %v954_v50 }
 0x1af   : > { %v1175_v52 = vmax.f32 %v1155_v17, 0.0  ;;  %v902_v53 = vpop.f32.mrf.mxu2 }
 0x1b0   : > { %v903_v54 = vadd.f32 %v3926_v43, %v902_v53 }
 0x1b1   : > { %v1184_v56 = vpack.c.bf16 %v1175_v52, %v1174_v51 }
 0x1b2   : > { %v936_v58 = vmax.f32 %v903_v54, 0.0  ;;  %v1108_v59 = vpop.f32.mrf.mxu3 }
 0x1b3   : > { %1224 = vmatmul.bf16.gmra.mxu1 %v1184_v56  ;;  %v1109_v61 = vadd.f32 %v3859_v39, %v1108_v59  ;;  %v1159_v4 = vpop.f32.mrf.mxu0 }
 0x1b4   : > { %v955_v60 = vmul.f32 %v3932_v15, %v936_v58 }
 0x1b5   : > { %v1158_v3 = vadd.f32 %v1157_v57, %v1109_v61 }
 0x1b6   : > { %975 = vadd.xlane.f32.xlu1 %v955_v60 }
 0x1b7   : > { %v904_v63 = vpop.f32.mrf.mxu2  ;;  %v1176_v55 = vmax.f32 %v1158_v3, 0.0 }
 0x1b8   : > { %v905_v0 = vadd.f32 %v3926_v43, %v904_v63 }
 0x1ba   : > { %v937_v1 = vmax.f32 %v905_v0, 0.0  ;;  %v1110_v2 = vpop.f32.mrf.mxu3 }
 0x1bb   : > { %v1111_v48 = vadd.f32 %v3859_v39, %v1110_v2 }
 0x1bc   : > { %v956_v5 = vmul.f32 %v3932_v15, %v937_v1 }
 0x1bd   : > { %v1160_v38 = vadd.f32 %v1159_v4, %v1111_v48 }
 0x1be   : > { %977 = vadd.xlane.f32.xlu0 %v956_v5 }
 0x1bf   : > { %v1177_v6 = vmax.f32 %v1160_v38, 0.0  ;;  %v907_v7 = vpop.f32.mrf.mxu2 }
 0x1c0   : > { %v908_v8 = vadd.f32 %v3926_v43, %v907_v7 }
 0x1c1   : > { %v1185_v10 = vpack.c.bf16 %v1177_v6, %v1176_v55 }
 0x1c2   : > { %v938_v11 = vmax.f32 %v908_v8, 0.0 }
 0x1c3   : > { %1229 = vmatmul.bf16.gmra.mxu1 %v1185_v10 }
 0x1c4   : > { %v957_v12 = vmul.f32 %v3932_v15, %v938_v11  ;;  %v3983_v11 = vstv %s562_s26  ;;  %s5519_s26 = sshll.u32 %s2508_s15, 4  ;;  %s5543_s15 = sshll.u32 %s2547_s21, 4  ;;  %s2513_s26 = int_to_ptr.hbm [resolvable:$true] %s5519_s26  ;;  %s2552_s15 = int_to_ptr.hbm [resolvable:$true] %s5543_s15 }
 0x1c5   : > { %s3416_s14 = sshra.s32 %s2513_s26, 4  ;;  %s3417_s14 = int_to_ptr.hbm [resolvable:$true] %s3416_s14 }
 0x1c6   : > { %979 = vadd.xlane.f32.xlu2 %v957_v12  ;;  %s3418_s12 = scalar_lea.hbm %s3417_s14, 1  ;;  %p3423_p2 = scmp.lt.s32.totalorder %s3417_s14, %s5666_s8 }
 0x1c7   : > { %v909_v13 = vpop.f32.mrf.mxu2  ;;  %p3419_p1 = scmp.ne.s32.totalorder %s3417_s14, %s3418_s12  ;;  %p3424_p10 = scmp.lt.s32.totalorder %s3422_s16, %s3418_s12 }
 0x1c8   : > { %v910_v14 = vadd.f32 %v3926_v43, %v909_v13 }
 0x1c9   : > { %p3420_p4 = pnand %p3419_p1, %p3711_p3  ;;  %p3425_p11 = por %p3424_p10, %p3423_p2 }
 0x1ca   : > { %v939_v39 = vmax.f32 %v910_v14, 0.0 }
 0x1cb   : > { %p3421_p8 = pneg %p3420_p4 }
 0x1cc   : > { %v958_v16 = vmul.f32 %v3932_v15, %v939_v39 }
 0x1cd   : > { %p3426_p9 = pnand %p3425_p11, %p3421_p8 }
 0x1ce   : > { %981 = vadd.xlane.f32.xlu1 %v958_v16 }
 0x1cf   : > { %v912_v18 = vpop.f32.mrf.mxu2 }
 0x1d0   : > { %v913_v19 = vadd.f32 %v3926_v43, %v912_v18  ;;  %v1195_v20 = vpop.f32.mrf.mxu1 }
 0x1d1   : > { %v1196_v21 = vadd.f32 %v3926_v43, %v1195_v20 }
 0x1d2   : > { %v940_v22 = vmax.f32 %v913_v19, 0.0 }
 0x1d3   : > { %v1235_v23 = vmax.f32 %v1196_v21, 0.0 }
 0x1d4   : > { %v959_v24 = vmul.f32 %v3932_v15, %v940_v22 }
 0x1d5   : > { %v1251_v9 = vmul.f32 %v3932_v15, %v1235_v23 }
 0x1d6   : > { %983 = vadd.xlane.f32.xlu0 %v959_v24 }
 0x1d7   : > { %1267 = vadd.xlane.f32.xlu1 %v1251_v9  ;;  %v914_v25 = vpop.f32.mrf.mxu2 }
 0x1d8   : > { %v1197_v26 = vpop.f32.mrf.mxu1  ;;  %v915_v28 = vadd.f32 %v3926_v43, %v914_v25 }
 0x1d9   : > { %v1198_v27 = vadd.f32 %v3926_v43, %v1197_v26 }
 0x1da   : > { %v941_v34 = vmax.f32 %v915_v28, 0.0 }
 0x1db   : > { %v1236_v62 = vmax.f32 %v1198_v27, 0.0 }
 0x1dc   : > { %v960_v41 = vmul.f32 %v3932_v15, %v941_v34 }
 0x1dd   : > { %v1252_v30 = vmul.f32 %v3932_v15, %v1236_v62 }
 0x1df   : > { %1269 = vadd.xlane.f32.xlu2 %v1252_v30  ;;  %v917_v31 = vpop.f32.mrf.mxu2 }
 0x1e0   : > { %v918_v32 = vadd.f32 %v3926_v43, %v917_v31  ;;  %v1200_v33 = vpop.f32.mrf.mxu1 }
 0x1e1   : > { %v1201_v35 = vadd.f32 %v3926_v43, %v1200_v33 }
 0x1e2   : > { %v942_v36 = vmax.f32 %v918_v32, 0.0 }
 0x1e3   : > { %v1237_v37 = vmax.f32 %v1201_v35, 0.0 }
 0x1e4   : > { %v961_v40 = vmul.f32 %v3932_v15, %v942_v36 }
 0x1e5   : > { %v1253_v42 = vmul.f32 %v3932_v15, %v1237_v37 }
 0x1e6   : > { %987 = vadd.xlane.f32.xlu1 %v961_v40 }
 0x1e7   : > { %985 = vadd.xlane.f32.xlu2 %v960_v41  ;;  %1271 = vadd.xlane.f32.xlu0 %v1253_v42  ;;  %v919_v44 = vpop.f32.mrf.mxu2 }
 0x1e8   : > { %v920_v45 = vadd.f32 %v3926_v43, %v919_v44  ;;  %v1202_v46 = vpop.f32.mrf.mxu1 }
 0x1e9   : > { %v1203_v29 = vadd.f32 %v3926_v43, %v1202_v46 }
 0x1ea   : > { %v943_v47 = vmax.f32 %v920_v45, 0.0 }
 0x1eb   : > { %v1238_v49 = vmax.f32 %v1203_v29, 0.0 }
 0x1ec   : > { %v962_v50 = vmul.f32 %v3932_v15, %v943_v47 }
 0x1ed   : > { %v1254_v17 = vmul.f32 %v3932_v15, %v1238_v49 }
 0x1ef   : > { %1273 = vadd.xlane.f32.xlu2 %v1254_v17  ;;  %989 = vadd.xlane.f32.xlu0 %v962_v50  ;;  %v922_v51 = vpop.f32.mrf.mxu2 }
 0x1f0   : > { %v923_v52 = vadd.f32 %v3926_v43, %v922_v51  ;;  %v1205_v53 = vpop.f32.mrf.mxu1  ;;  %v1635_v51 = vlaneseq }
 0x1f1   : > { %v1206_v54 = vadd.f32 %v3926_v43, %v1205_v53 }
 0x1f2   : > { %v944_v56 = vmax.f32 %v923_v52, 0.0 }
 0x1f3   : > { %v1239_v57 = vmax.f32 %v1206_v54, 0.0 }
 0x1f4   : > { %v963_v58 = vmul.f32 %v3932_v15, %v944_v56 }
 0x1f5   : > { %v1255_v59 = vmul.f32 %v3932_v15, %v1239_v57 }
 0x1f7   : > { %991 = vadd.xlane.f32.xlu2 %v963_v58  ;;  %1275 = vadd.xlane.f32.xlu1 %v1255_v59  ;;  %v924_v60 = vpop.f32.mrf.mxu2 }
 0x1f8   : > { %v925_v61 = vadd.f32 %v3926_v43, %v924_v60  ;;  %v1207_v63 = vpop.f32.mrf.mxu1 }
 0x1f9   : > { %v1208_v0 = vadd.f32 %v3926_v43, %v1207_v63 }
 0x1fa   : > { %v945_v1 = vmax.f32 %v925_v61, 0.0 }
 0x1fb   : > { %v1240_v2 = vmax.f32 %v1208_v0, 0.0 }
 0x1fc   : > { %v964_v3 = vmul.f32 %v3932_v15, %v945_v1 }
 0x1fd   : > { %v1256_v48 = vmul.f32 %v3932_v15, %v1240_v2  ;;  %v4026_v2 = vand.u32 127, %v1635_v51 }
 0x1ff   : > { %993 = vadd.xlane.f32.xlu1 %v964_v3  ;;  %1277 = vadd.xlane.f32.xlu0 %v1256_v48  ;;  %v927_v4 = vpop.f32.mrf.mxu2 }
 0x200   : > { %v928_v5 = vadd.f32 %v3926_v43, %v927_v4  ;;  %v1210_v38 = vpop.f32.mrf.mxu1 }
 0x201   : > { %v1211_v55 = vadd.f32 %v3926_v43, %v1210_v38 }
 0x202   : > { %v946_v6 = vmax.f32 %v928_v5, 0.0 }
 0x203   : > { %v1241_v7 = vmax.f32 %v1211_v55, 0.0 }
 0x204   : > { %v965_v8 = vmul.f32 %v3932_v15, %v946_v6 }
 0x205   : > { %v1257_v10 = vmul.f32 %v3932_v15, %v1241_v7 }
 0x207   : > { %1279 = vadd.xlane.f32.xlu2 %v1257_v10  ;;  %995 = vadd.xlane.f32.xlu0 %v965_v8  ;;  %v4040_v10 = vadd.s32 4294967288, %v4026_v2 }
 0x208   : > { %v1212_v12 = vpop.f32.mrf.mxu1 }
 0x209   : > { %v1213_v13 = vadd.f32 %v3926_v43, %v1212_v12  ;;  %v968_v14 = vpop.xlane.xlu0 %967 }
 0x20a   : > { %v3987_v39 = vadd.f32 %v3983_v11, %v968_v14 }
 0x20b   : > { %v1242_v16 = vmax.f32 %v1213_v13, 0.0 }
 0x20c   : > { %v2854_v18 = vmul.f32 -1.442695, %v3987_v39  ;;  %v2053_v19 = vsub.f32 0.0, %v3987_v39 }
 0x20d   : > { %v1258_v20 = vmul.f32 %v3932_v15, %v1242_v16  ;;  %v4046_v16 = vadd.s32 4294967280, %v4026_v2 }
 0x20e   : > { %3026 = vpow2.f32 %v2854_v18  ;;  %v2085_v21 = vand.u32 2147483647, %v2053_v19  ;;  %v4037_v8 = vmax.f32 %v2053_v19, 0.0 }
 0x20f   : > { %1281 = vadd.xlane.f32.xlu1 %v1258_v20 }
 0x210   : > { %v2101_v22 = vsub.f32 0.0, %v2085_v21  ;;  %v1215_v23 = vpop.f32.mrf.mxu1 }
 0x211   : > { %v1216_v24 = vadd.f32 %v3926_v43, %v1215_v23  ;;  %v970_v9 = vpop.xlane.xlu0 %969 }
 0x212   : > { %v2117_v25 = vmul.f32 1.442695, %v2101_v22  ;;  %v3996_v26 = vadd.f32 %v3983_v11, %v970_v9 }
 0x213   : > { %v1243_v27 = vmax.f32 %v1216_v24, 0.0 }
 0x214   : > { %v3027_v62 = vpop.eup %3026  ;;  %v2855_v28 = vmul.f32 -1.442695, %v3996_v26  ;;  %v2054_v30 = vsub.f32 0.0, %v3996_v26  ;;  %3028 = vpow2.f32 %v2117_v25 }
 0x215   : > { %v4000_v31 = vadd.f32 1.0, %v3027_v62  ;;  %v1259_v32 = vmul.f32 %v3932_v15, %v1243_v27 }
 0x216   : > { %3030 = vpow2.f32 %v2855_v28  ;;  %v2086_v33 = vand.u32 2147483647, %v2054_v30  ;;  %v2070_v24 = vmax.f32 %v2054_v30, 0.0 }
 0x217   : > { %3032 = vrcp.f32 %v4000_v31  ;;  %1283 = vadd.xlane.f32.xlu0 %v1259_v32  ;;  %v1388_v12 = vand.u32 2147483647, %v4000_v31  ;;  %v1390_v13 = vand.u32 2147483648, %v4000_v31  ;;  %vm1384_vm1 = vweird.f32 %v4000_v31 }
 0x218   : > { %v2102_v34 = vsub.f32 0.0, %v2086_v33  ;;  %v1217_v35 = vpop.f32.mrf.mxu1 }
 0x219   : > { %v1218_v36 = vadd.f32 %v3926_v43, %v1217_v35  ;;  %v972_v37 = vpop.xlane.xlu1 %971  ;;  %vm4062_vm4 = vcmp.eq.f32.partialorder %v1388_v12, 8.507059e+37  ;;  %v1391_v30 = vor.u32 1.1754944e-38, %v1390_v13 }
 0x21a   : > { %v2119_v40 = vmul.f32 1.442695, %v2102_v34  ;;  %v4008_v41 = vadd.f32 %v3983_v11, %v972_v37  ;;  %v3029_v42 = vpop.eup %3028 }
 0x21b   : > { %v1244_v44 = vmax.f32 %v1218_v36, 0.0  ;;  %v2149_v52 = vadd.f32 1.0, %v3029_v42 }
 0x21c   : > { %v3031_v45 = vpop.eup %3030  ;;  %3034 = vpow2.f32 %v2119_v40  ;;  %v2856_v46 = vmul.f32 -1.442695, %v4008_v41  ;;  %v2055_v29 = vsub.f32 0.0, %v4008_v41  ;;  %v929_v41 = vpop.f32.mrf.mxu2 }
 0x21d   : > { %v4012_v47 = vpop.eup %3032  ;;  %v4014_v49 = vadd.f32 1.0, %v3031_v45  ;;  %v1260_v50 = vmul.f32 %v3932_v15, %v1244_v44 }
 0x21e   : > { %3036 = vpow2.f32 %v2856_v46  ;;  %v1380_v17 = vmul.f32 %v4012_v47, %v4000_v31  ;;  %v2087_v53 = vand.u32 2147483647, %v2055_v29  ;;  %vm1385_vm2 = vweird.f32 %v4012_v47 }
 0x21f   : > { %3038 = vrcp.f32 %v4014_v49  ;;  %1285 = vadd.xlane.f32.xlu2 %v1260_v50  ;;  %v1403_v20 = vand.u32 2147483647, %v4014_v49  ;;  %v1405_v39 = vand.u32 2147483648, %v4014_v49  ;;  %vm1399_vm3 = vweird.f32 %v4014_v49  ;;  %vm4075_vm8 = vmor %vm1384_vm1, %vm1385_vm2 }
 0x220   : > { %v1220_v54 = vpop.f32.mrf.mxu1  ;;  %v2103_v59 = vsub.f32 0.0, %v2087_v53  ;;  %v1381_v61 = vsub.f32 1.0, %v1380_v17  ;;  %3040 = vlog2.f32 %v2149_v52  ;;  %vm1648_vm2 = vcmask 261312  }
 0x221   : > { %v1221_v56 = vadd.f32 %v3926_v43, %v1220_v54  ;;  %v974_v57 = vpop.xlane.xlu2 %973  ;;  %vm4071_vm7 = vcmp.eq.f32.partialorder %v1403_v20, 8.507059e+37  ;;  %v1406_v35 = vor.u32 1.1754944e-38, %v1405_v39 }
 0x222   : > { %v3035_v58 = vpop.eup %3034  ;;  %v4024_v60 = vadd.f32 %v3983_v11, %v974_v57  ;;  %v2121_v3 = vmul.f32 1.442695, %v2103_v59  ;;  %v1382_v7 = vmul.f32 %v4012_v47, %v1381_v61 }
 0x223   : > { %v2150_v63 = vadd.f32 1.0, %v3035_v58  ;;  %v1245_v0 = vmax.f32 %v1221_v56, 0.0 }
 0x224   : > { %v3037_v1 = vpop.eup %3036  ;;  %v2056_v5 = vsub.f32 0.0, %v4024_v60  ;;  %v2857_v6 = vmul.f32 -1.442695, %v4024_v60  ;;  %v1383_v25 = vadd.f32 %v4012_v47, %v1382_v7 }
 0x225   : > { %v3039_v48 = vpop.eup %3038  ;;  %3042 = vlog2.f32 %v2150_v63  ;;  %v4028_v4 = vadd.f32 1.0, %v3037_v1  ;;  %v1261_v38 = vmul.f32 %v3932_v15, %v1245_v0 }
 0x226   : > { %v1395_v55 = vmul.f32 %v3039_v48, %v4014_v49  ;;  %v2088_v19 = vand.u32 2147483647, %v2056_v5  ;;  %v3041_v22 = vpop.eup %3040  ;;  %vm1400_vm0 = vweird.f32 %v3039_v48  ;;  %v1387_v46 = vsel %vm4075_vm8, %v4012_v47, %v1383_v25 }
 0x227   : > { %3044 = vrcp.f32 %v4028_v4  ;;  %1287 = vadd.xlane.f32.xlu1 %v1261_v38  ;;  %vm4067_vm6 = vmor %vm1399_vm3, %vm1400_vm0  ;;  %v2166_v37 = vmul.f32 0.6931472, %v3041_v22  ;;  %v1420_v53 = vand.u32 2147483648, %v4028_v4  ;;  %v1418_v63 = vand.u32 2147483647, %v4028_v4 }
 0x228   : > { %v1396_v14 = vsub.f32 1.0, %v1395_v55  ;;  %v1222_v18 = vpop.f32.mrf.mxu1  ;;  %3046 = vpow2.f32 %v2121_v3  ;;  %v2104_v27 = vsub.f32 0.0, %v2088_v19  ;;  %v1392_v0 = vsel %vm4062_vm4, %v1391_v30, %v1387_v46 }
 0x229   : > { %v976_v21 = vpop.xlane.xlu1 %975  ;;  %3048 = vpow2.f32 %v2857_v6  ;;  %v1223_v28 = vadd.f32 %v3926_v43, %v1222_v18  ;;  %vm1414_vm10 = vweird.f32 %v4028_v4  ;;  %v1421_v7 = vor.u32 1.1754944e-38, %v1420_v53 }
 0x22a   : > { %v1397_v23 = vmul.f32 %v3039_v48, %v1396_v14  ;;  %v4060_v32 = vadd.f32 %v3983_v11, %v976_v21  ;;  %v2123_v49 = vmul.f32 1.442695, %v2104_v27  ;;  %v1637_v13 = vperm.slane %v1392_v0, %v4026_v2 }
 0x22b   : > { %v3043_v9 = vpop.eup %3042  ;;  %v1246_v56 = vmax.f32 %v1223_v28, 0.0  ;;  %v2197_v14 = vadd.f32 %v2166_v37, %v4037_v8  ;;  %vm1419_vm13 = vcmp.eq.f32.partialorder %v1418_v63, 8.507059e+37  ;;  %v2071_v19 = vmax.f32 %v2055_v29, 0.0 }
 0x22c   : > { %v1398_v62 = vadd.f32 %v3039_v48, %v1397_v23  ;;  %v2168_v42 = vmul.f32 0.6931472, %v3043_v9  ;;  %v2858_v50 = vmul.f32 -1.442695, %v4060_v32  ;;  %v2057_v17 = vsub.f32 0.0, %v4060_v32 }
 0x22d   : > { %v3045_v33 = vpop.eup %3044  ;;  %v1262_v55 = vmul.f32 %v3932_v15, %v1246_v56  ;;  %v2213_v29 = vmin.f32 %v2197_v14, 100.0 }
 0x22e   : > { %v1402_v40 = vsel %vm4067_vm6, %v3039_v48, %v1398_v62  ;;  %v1410_v44 = vmul.f32 %v3045_v33, %v4028_v4  ;;  %v3047_v45 = vpop.eup %3046  ;;  %3050 = vpow2.f32 %v2858_v50  ;;  %v2089_v47 = vand.u32 2147483647, %v2057_v17 }
 0x22f   : > { %v3049_v51 = vpop.eup %3048  ;;  %v2151_v54 = vadd.f32 1.0, %v3047_v45  ;;  %v1407_v57 = vsel %vm4071_vm7, %v1406_v35, %v1402_v40  ;;  %vm1415_vm9 = vweird.f32 %v3045_v33  ;;  %v2198_v1 = vadd.f32 %v2168_v42, %v2070_v24  ;;  %1289 = vadd.xlane.f32.xlu0 %v1262_v55 }
 0x230   : > { %v1411_v52 = vsub.f32 1.0, %v1410_v44  ;;  %v4090_v58 = vadd.f32 1.0, %v3049_v51  ;;  %v1225_v59 = vpop.f32.mrf.mxu1  ;;  %v1639_v3 = vperm.slane %v1407_v57, %v4040_v10  ;;  %v2105_v38 = vsub.f32 0.0, %v2089_v47  ;;  %vm1416_vm12 = vmor %vm1414_vm10, %vm1415_vm9 }
 0x231   : > { %3052 = vlog2.f32 %v2151_v54  ;;  %v978_v6 = vpop.xlane.xlu0 %977  ;;  %v1226_v12 = vadd.f32 %v3926_v43, %v1225_v59  ;;  %v2214_v20 = vmin.f32 %v2198_v1, 100.0  ;;  %v930_v40 = vadd.f32 %v3926_v43, %v929_v41 }
 0x232   : > { %v1412_v61 = vmul.f32 %v3045_v33, %v1411_v52  ;;  %3054 = vpow2.f32 %v2123_v49  ;;  %v4107_v21 = vadd.f32 %v3983_v11, %v978_v6  ;;  %v1641_v23 = vsel %vm1640_vm5, %v1639_v3, %v1637_v13 }
 0x233   : > { %3056 = vrcp.f32 %v4090_v58  ;;  %v2125_v8 = vmul.f32 1.442695, %v2105_v38  ;;  %v1247_v62 = vmax.f32 %v1226_v12, 0.0  ;;  %v2246_v35 = vperm.slane %v2214_v20, %v4040_v10 }
 0x234   : > { %v1413_v48 = vadd.f32 %v3045_v33, %v1412_v61  ;;  %v3051_v18 = vpop.eup %3050  ;;  %v2859_v28 = vmul.f32 -1.442695, %v4107_v21  ;;  %v2245_v45 = vperm.slane %v2213_v29, %v4026_v2  ;;  %v947_v57 = vmax.f32 %v930_v40, 0.0 }
 0x235   : > { %v4111_v9 = vadd.f32 1.0, %v3051_v18  ;;  %v1263_v44 = vmul.f32 %v3932_v15, %v1247_v62  ;;  %vm1429_vm15 = vweird.f32 %v4090_v58  ;;  %v4167_v41 = vadd.s32 4294967264, %v4026_v2 }
 0x236   : > { %v1417_v4 = vsel %vm1416_vm12, %v3045_v33, %v1413_v48  ;;  %v2058_v33 = vsub.f32 0.0, %v4107_v21  ;;  %v2247_v54 = vsel %vm1640_vm5, %v2246_v35, %v2245_v45  ;;  %v966_v12 = vmul.f32 %v3932_v15, %v947_v57 }
 0x237   : > { %v1422_v39 = vsel %vm1419_vm13, %v1421_v7, %v1417_v4  ;;  %v3053_v22 = vpop.eup %3052  ;;  %3058 = vrcp.f32 %v4111_v9  ;;  %1291 = vadd.xlane.f32.xlu2 %v1263_v44  ;;  %v1450_v32 = vand.u32 2147483648, %v4111_v9  ;;  %vm1444_vm4 = vweird.f32 %v4111_v9 }
 0x238   : > { %v1643_v24 = vperm.slane %v1422_v39, %v4046_v16  ;;  %v3055_v25 = vpop.eup %3054  ;;  %v2170_v27 = vmul.f32 0.6931472, %v3053_v22  ;;  %v1227_v34 = vpop.f32.mrf.mxu1  ;;  %3060 = vpow2.f32 %v2859_v28  ;;  %v2090_v36 = vand.u32 2147483647, %v2058_v33 }
 0x239   : > { %v4118_v30 = vpop.eup %3056  ;;  %v980_v37 = vpop.xlane.xlu2 %979  ;;  %3062 = vpow2.f32 %v2125_v8  ;;  %v2152_v49 = vadd.f32 1.0, %v3055_v25  ;;  %v1228_v52 = vadd.f32 %v3926_v43, %v1227_v34  ;;  %v4152_v39 = vadd.s32 4294967272, %v4026_v2 }
 0x23a   : > { %v4116_v26 = vsel %vm1644_vm11, %v1643_v24, %v1641_v23  ;;  %v2199_v31 = vadd.f32 %v2170_v27, %v2071_v19  ;;  %v1425_v46 = vmul.f32 %v4118_v30, %v4090_v58  ;;  %v2106_v51 = vsub.f32 0.0, %v2090_v36 }
 0x23b   : > { %v4132_v53 = vadd.f32 %v3983_v11, %v980_v37  ;;  %3064 = vlog2.f32 %v2152_v49  ;;  %v1248_v48 = vmax.f32 %v1228_v52, 0.0  ;;  %v1433_v19 = vand.u32 2147483647, %v4090_v58 }
 0x23c   : > { %v2215_v42 = vmin.f32 %v2199_v31, 100.0  ;;  %v1426_v61 = vsub.f32 1.0, %v1425_v46  ;;  %v2127_v3 = vmul.f32 1.442695, %v2106_v51  ;;  %v1435_v24 = vand.u32 2147483648, %v4090_v58 }
 0x23d   : > { %v4135_v56 = vpop.eup %3058  ;;  %v2860_v63 = vmul.f32 -1.442695, %v4132_v53  ;;  %v2059_v0 = vsub.f32 0.0, %v4132_v53  ;;  %v1264_v20 = vmul.f32 %v3932_v15, %v1248_v48  ;;  %vm1430_vm14 = vweird.f32 %v4118_v30 }
 0x23e   : > { %v2248_v50 = vperm.slane %v2215_v42, %v4046_v16  ;;  %v3061_v59 = vpop.eup %3060  ;;  %v1440_v6 = vmul.f32 %v4135_v56, %v4111_v9  ;;  %v1427_v14 = vmul.f32 %v4118_v30, %v1426_v61  ;;  %v2072_v28 = vmax.f32 %v2056_v5, 0.0  ;;  %vm4171_vm0 = vmor %vm1429_vm15, %vm1430_vm14 }
 0x23f   : > { %v3063_v1 = vpop.eup %3062  ;;  %v2091_v38 = vand.u32 2147483647, %v2059_v0  ;;  %v4146_v7 = vadd.f32 1.0, %v3061_v59  ;;  %3066 = vpow2.f32 %v2860_v63  ;;  %997 = vadd.xlane.f32.xlu2 %v966_v12  ;;  %1293 = vadd.xlane.f32.xlu1 %v1264_v20  ;;  %vm4175_vm1 = vcmp.eq.f32.partialorder %v1433_v19, 8.507059e+37 }
 0x240   : > { %v4138_v47 = vsel %vm1644_vm11, %v2248_v50, %v2247_v54  ;;  %v1230_v13 = vpop.f32.mrf.mxu1  ;;  %v2153_v4 = vadd.f32 1.0, %v3063_v1  ;;  %3068 = vpow2.f32 %v2127_v3  ;;  %v1441_v8 = vsub.f32 1.0, %v1440_v6 }
 0x241   : > { %v982_v55 = vpop.xlane.xlu1 %981  ;;  %v2107_v18 = vsub.f32 0.0, %v2091_v38  ;;  %v1231_v22 = vadd.f32 %v3926_v43, %v1230_v13  ;;  %v3065_v23 = vpop.eup %3064  ;;  %3070 = vrcp.f32 %v4146_v7  ;;  %v1428_v27 = vadd.f32 %v4118_v30, %v1427_v14 }
 0x242   : > { %3072 = vlog2.f32 %v2153_v4  ;;  %v4161_v62 = vadd.f32 %v3983_v11, %v982_v55  ;;  %v2172_v31 = vmul.f32 0.6931472, %v3065_v23  ;;  %v1442_v60 = vmul.f32 %v4135_v56, %v1441_v8 }
 0x243   : > { %v2129_v25 = vmul.f32 1.442695, %v2107_v18  ;;  %v1249_v34 = vmax.f32 %v1231_v22, 0.0  ;;  %v2073_v5 = vmax.f32 %v2057_v17, 0.0  ;;  %v1432_v44 = vsel %vm4171_vm0, %v4118_v30, %v1428_v27 }
 0x244   : > { %v2861_v35 = vmul.f32 -1.442695, %v4161_v62  ;;  %v2060_v36 = vsub.f32 0.0, %v4161_v62  ;;  %v1436_v45 = vor.u32 1.1754944e-38, %v1435_v24  ;;  %v1448_v51 = vand.u32 2147483647, %v4111_v9 }
 0x245   : > { %3074 = vpow2.f32 %v2129_v25  ;;  %v3067_v29 = vpop.eup %3066  ;;  %v4194_v17 = vadd.s32 4294967256, %v4026_v2  ;;  %v2200_v30 = vadd.f32 %v2172_v31, %v2072_v28  ;;  %v1265_v61 = vmul.f32 %v3932_v15, %v1249_v34 }
 0x246   : > { %v3069_v37 = vpop.eup %3068  ;;  %v4182_v42 = vadd.f32 1.0, %v3067_v29  ;;  %3076 = vpow2.f32 %v2861_v35  ;;  %v2092_v46 = vand.u32 2147483647, %v2060_v36  ;;  %v1437_v1 = vsel %vm4175_vm1, %v1436_v45, %v1432_v44 }
 0x247   : > { %v4189_v50 = vpop.eup %3070  ;;  %v2154_v57 = vadd.f32 1.0, %v3069_v37  ;;  %v1443_v3 = vadd.f32 %v4135_v56, %v1442_v60  ;;  %vm1445_vm3 = vweird.f32 %v4135_v56  ;;  %1295 = vadd.xlane.f32.xlu0 %v1265_v61  ;;  %vm4209_vm6 = vcmp.eq.f32.partialorder %v1448_v51, 8.507059e+37 }
 0x248   : > { %3078 = vrcp.f32 %v4182_v42  ;;  %v1232_v52 = vpop.f32.mrf.mxu1  ;;  %v3073_v54 = vpop.eup %3072  ;;  %v2108_v59 = vsub.f32 0.0, %v2092_v46  ;;  %v1455_v38 = vmul.f32 %v4189_v50, %v4146_v7  ;;  %v1451_v14 = vor.u32 1.1754944e-38, %v1450_v32  ;;  %vm4223_vm8 = vmor %vm1444_vm4, %vm1445_vm3 }
 0x249   : > { %v1233_v12 = vadd.f32 %v3926_v43, %v1232_v52  ;;  %v4215_v4 = vmax.f32 %v2058_v33, 0.0  ;;  %v2216_v20 = vmin.f32 %v2200_v30, 100.0  ;;  %v2174_v19 = vmul.f32 0.6931472, %v3073_v54  ;;  %v984_v27 = vpop.xlane.xlu0 %983 }
 0x24a   : > { %v1268_v49 = vpop.xlane.xlu1 %1267  ;;  %v2131_v6 = vmul.f32 1.442695, %v2108_v59  ;;  %3080 = vlog2.f32 %v2154_v57  ;;  %v1647_v43 = vperm.slane %v1437_v1, %v4152_v39  ;;  %vm1652_vm7 = vcmask 326912  }
 0x24b   : > { %v3075_v63 = vpop.eup %3074  ;;  %v4203_v48 = vadd.f32 %v1268_v49, %v3983_v11  ;;  %v1447_v24 = vsel %vm4223_vm8, %v4135_v56, %v1443_v3  ;;  %v1456_v8 = vsub.f32 1.0, %v1455_v38  ;;  %v1250_v25 = vmax.f32 %v1233_v12, 0.0 }
 0x24c   : > { %v2155_v55 = vadd.f32 1.0, %v3075_v63  ;;  %v3077_v18 = vpop.eup %3076  ;;  %v4234_v28 = vadd.s32 4294967248, %v4026_v2  ;;  %v4240_v31 = vmax.f32 %v2059_v0, 0.0  ;;  %v2250_v35 = vperm.slane %v2216_v20, %v4152_v39 }
 0x24d   : > { %v2870_v22 = vmul.f32 -1.442695, %v4203_v48  ;;  %v4227_v21 = vadd.f32 1.0, %v3077_v18  ;;  %v2294_v33 = vand.u32 2147483647, %v4203_v48  ;;  %v2201_v56 = vadd.f32 %v2174_v19, %v2073_v5 }
 0x24e   : > { %v4218_v23 = vpop.eup %3078  ;;  %3082 = vlog2.f32 %v2155_v55  ;;  %vm1459_vm9 = vweird.f32 %v4146_v7  ;;  %v1649_v37 = vsel %vm1648_vm2, %v1647_v43, %v4116_v26  ;;  %v1452_v40 = vsel %vm4209_vm6, %v1451_v14, %v1447_v24 }
 0x24f   : > { %3084 = vpow2.f32 %v2131_v6  ;;  %v1470_v29 = vmul.f32 %v4218_v23, %v4182_v42  ;;  %v2310_v58 = vsub.f32 0.0, %v2294_v33  ;;  %v4250_v53 = vadd.f32 %v3983_v11, %v984_v27 }
 0x250   : > { %3086 = vrcp.f32 %v4227_v21  ;;  %v3081_v0 = vpop.eup %3080  ;;  %v1457_v60 = vmul.f32 %v4189_v50, %v1456_v8  ;;  %v1463_v44 = vand.u32 2147483647, %v4146_v7  ;;  %v1266_v5 = vmul.f32 %v3932_v15, %v1250_v25 }
 0x251   : > { %3088 = vpow2.f32 %v2870_v22  ;;  %v1465_v26 = vand.u32 2147483648, %v4146_v7  ;;  %v1471_v49 = vsub.f32 1.0, %v1470_v29  ;;  %v2862_v51 = vmul.f32 -1.442695, %v4250_v53 }
 0x252   : > { %v1270_v34 = vpop.xlane.xlu2 %1269  ;;  %v2061_v32 = vsub.f32 0.0, %v4250_v53  ;;  %v2251_v54 = vsel %vm1648_vm2, %v2250_v35, %v4138_v47  ;;  %v1651_v30 = vperm.slane %v1452_v40, %v4167_v41  ;;  %v2217_v57 = vmin.f32 %v2201_v56, 100.0  ;;  %1297 = vadd.xlane.f32.xlu1 %v1266_v5 }
 0x253   : > { %v4256_v45 = vadd.f32 %v1270_v34, %v3983_v11  ;;  %v2176_v61 = vmul.f32 0.6931472, %v3081_v0  ;;  %v2326_v63 = vmul.f32 1.442695, %v2310_v58  ;;  %3090 = vpow2.f32 %v2862_v51 }
 0x254   : > { %v3083_v46 = vpop.eup %3082  ;;  %v2093_v1 = vand.u32 2147483647, %v2061_v32  ;;  %v1458_v38 = vadd.f32 %v4189_v50, %v1457_v60  ;;  %vm1460_vm10 = vweird.f32 %v4189_v50  ;;  %vm4271_vm12 = vcmp.eq.f32.partialorder %v1463_v44, 8.507059e+37 }
 0x255   : > { %v3085_v52 = vpop.eup %3084  ;;  %v2871_v15 = vmul.f32 -1.442695, %v4256_v45  ;;  %v1466_v6 = vor.u32 1.1754944e-38, %v1465_v26  ;;  %v1472_v12 = vmul.f32 %v4218_v23, %v1471_v49  ;;  %v4279_v13 = vadd.s32 4294967240, %v4026_v2  ;;  %vm4287_vm14 = vmor %vm1459_vm9, %vm1460_vm10 }
 0x256   : > { %v4265_v59 = vpop.eup %3086  ;;  %v1653_v18 = vsel %vm1652_vm7, %v1651_v30, %v1649_v37  ;;  %v2252_v20 = vperm.slane %v2217_v57, %v4167_v41  ;;  %v2109_v19 = vsub.f32 0.0, %v2093_v1  ;;  %vm1656_vm13 = vcmask 392512  }
 0x257   : > { %v3089_v3 = vpop.eup %3088  ;;  %v1485_v55 = vmul.f32 %v4265_v59, %v4227_v21  ;;  %3092 = vpow2.f32 %v2871_v15  ;;  %v2202_v43 = vadd.f32 %v2176_v61, %v4215_v4  ;;  %v2178_v9 = vmul.f32 0.6931472, %v3083_v46 }
 0x258   : > { %v4281_v14 = vadd.f32 1.0, %v3089_v3  ;;  %v2156_v33 = vadd.f32 1.0, %v3085_v52  ;;  %3094 = vpow2.f32 %v2326_v63  ;;  %v1462_v24 = vsel %vm4287_vm14, %v4189_v50, %v1458_v38 }
 0x259   : > { %v1478_v8 = vand.u32 2147483647, %v4182_v42  ;;  %v1480_v25 = vand.u32 2147483648, %v4182_v42  ;;  %v1486_v27 = vsub.f32 1.0, %v1485_v55  ;;  %v3091_v29 = vpop.eup %3090  ;;  %v1473_v7 = vadd.f32 %v4218_v23, %v1472_v12 }
 0x25a   : > { %vm1475_vm15 = vweird.f32 %v4218_v23  ;;  %3096 = vrcp.f32 %v4281_v14  ;;  %v2295_v4 = vand.u32 2147483647, %v4256_v45  ;;  %vm1474_vm0 = vweird.f32 %v4182_v42  ;;  %v986_v26 = vpop.xlane.xlu2 %985 }
 0x25b   : > { %v4304_v34 = vmax.f32 %v2060_v36, 0.0  ;;  %v4306_v50 = vadd.f32 1.0, %v3091_v29  ;;  %v2133_v35 = vmul.f32 1.442695, %v2109_v19  ;;  %v1467_v56 = vsel %vm4271_vm12, %v1466_v6, %v1462_v24  ;;  %vm4312_vm3 = vmor %vm1474_vm0, %vm1475_vm15 }
 0x25c   : > { %v2218_v37 = vmin.f32 %v2202_v43, 100.0  ;;  %v2203_v40 = vadd.f32 %v2178_v9, %v4240_v31  ;;  %3098 = vlog2.f32 %v2156_v33  ;;  %v2253_v0 = vsel %vm1652_vm7, %v2252_v20, %v2251_v54 }
 0x25d   : > { %v3093_v58 = vpop.eup %3092  ;;  %vm1660_vm1 = vcmask 458112   ;;  %vm4316_vm4 = vcmp.eq.f32.partialorder %v1478_v8, 8.507059e+37  ;;  %v1487_v36 = vmul.f32 %v4265_v59, %v1486_v27  ;;  %3100 = vrcp.f32 %v4306_v50 }
 0x25e   : > { %v3095_v60 = vpop.eup %3094  ;;  %v1477_v31 = vsel %vm4312_vm3, %v4218_v23, %v1473_v7  ;;  %v1481_v44 = vor.u32 1.1754944e-38, %v1480_v25  ;;  %v4325_v5 = vadd.f32 1.0, %v3093_v58  ;;  %v2311_v46 = vsub.f32 0.0, %v2295_v4 }
 0x25f   : > { %v1655_v49 = vperm.slane %v1467_v56, %v4194_v17  ;;  %v1493_v51 = vand.u32 2147483647, %v4227_v21  ;;  %v1495_v52 = vand.u32 2147483648, %v4227_v21  ;;  %3102 = vpow2.f32 %v2133_v35 }
 0x260   : > { %v4330_v54 = vpop.eup %3096  ;;  %v2254_v30 = vperm.slane %v2218_v37, %v4194_v17  ;;  %v2219_v57 = vmin.f32 %v2203_v40, 100.0  ;;  %vm1490_vm6 = vweird.f32 %v4265_v59  ;;  %3104 = vrcp.f32 %v4325_v5  ;;  %v988_v37 = vpop.xlane.xlu1 %987 }
 0x261   : > { %v1482_v23 = vsel %vm4316_vm4, %v1481_v44, %v1477_v31  ;;  %v1488_v15 = vadd.f32 %v4265_v59, %v1487_v36  ;;  %v2358_v61 = vadd.f32 1.0, %v3095_v60  ;;  %v4339_v63 = vadd.f32 %v3983_v11, %v986_v26 }
 0x262   : > { %v3099_v1 = vpop.eup %3098  ;;  %vm1489_vm8 = vweird.f32 %v4227_v21  ;;  %v2278_v3 = vmax.f32 %v4203_v48, 0.0  ;;  %v4344_v38 = vadd.s32 4294967232, %v4026_v2  ;;  %v2328_v47 = vmul.f32 1.442695, %v2311_v46 }
 0x263   : > { %v4346_v55 = vpop.eup %3100  ;;  %v1657_v6 = vsel %vm1656_vm13, %v1655_v49, %v1653_v18  ;;  %vm4349_vm9 = vcmp.eq.f32.partialorder %v1493_v51, 8.507059e+37  ;;  %v1496_v20 = vor.u32 1.1754944e-38, %v1495_v52  ;;  %v1765_v19 = vmul.f32 %v4330_v54, %v4281_v14  ;;  %vm4360_vm10 = vmor %vm1489_vm8, %vm1490_vm6  ;;  %v1272_v52 = vpop.xlane.xlu0 %1271 }
 0x264   : > { %v2255_v21 = vsel %vm1656_vm13, %v2254_v30, %v2253_v0  ;;  %v1659_v22 = vperm.slane %v1482_v23, %v4234_v28  ;;  %v2256_v43 = vperm.slane %v2219_v57, %v4234_v28  ;;  %v1500_v18 = vmul.f32 %v4346_v55, %v4306_v50 }
 0x265   : > { %v3103_v33 = vpop.eup %3102  ;;  %v1492_v24 = vsel %vm4360_vm10, %v4265_v59, %v1488_v15  ;;  %v2180_v8 = vmul.f32 0.6931472, %v3099_v1  ;;  %3106 = vlog2.f32 %v2358_v61  ;;  %v2863_v25 = vmul.f32 -1.442695, %v4339_v63 }
 0x266   : > { %v4370_v27 = vpop.eup %3104  ;;  %vm1664_vm12 = vcmask 523712   ;;  %v1775_v29 = vand.u32 2147483648, %v4281_v14  ;;  %v4375_v7 = vmax.f32 %v2061_v32, 0.0  ;;  %3108 = vpow2.f32 %v2328_v47 }
 0x267   : > { %v2062_v4 = vsub.f32 0.0, %v4339_v63  ;;  %v1766_v35 = vsub.f32 1.0, %v1765_v19  ;;  %v1773_v56 = vand.u32 2147483647, %v4281_v14  ;;  %v2279_v59 = vmax.f32 %v4256_v45, 0.0 }
 0x268   : > { %3110 = vpow2.f32 %v2863_v25  ;;  %v1661_v40 = vsel %vm1660_vm1, %v1659_v22, %v1657_v6  ;;  %v4382_v58 = vsel %vm1660_vm1, %v2256_v43, %v2255_v21  ;;  %v1497_v53 = vsel %vm4349_vm9, %v1496_v20, %v1492_v24  ;;  %v1274_v21 = vpop.xlane.xlu2 %1273 }
 0x269   : > { %v1501_v32 = vsub.f32 1.0, %v1500_v18  ;;  %v4387_v0 = vadd.f32 %v2180_v8, %v4304_v34  ;;  %vm1769_vm14 = vweird.f32 %v4281_v14  ;;  %v2157_v42 = vadd.f32 1.0, %v3103_v33 }
 0x26a   : > { %v1780_v62 = vmul.f32 %v4370_v27, %v4325_v5  ;;  %v2094_v36 = vand.u32 2147483647, %v2062_v4  ;;  %v4394_v60 = vor.u32 1.1754944e-38, %v1775_v29  ;;  %vm1504_vm15 = vweird.f32 %v4306_v50 }
 0x26b   : > { %v1508_v31 = vand.u32 2147483647, %v4306_v50  ;;  %v4399_v44 = vadd.f32 %v3983_v11, %v988_v37  ;;  %v3107_v34 = vpop.eup %3106  ;;  %v1663_v46 = vperm.slane %v1497_v53, %v4279_v13  ;;  %v1767_v26 = vmul.f32 %v4330_v54, %v1766_v35 }
 0x26c   : > { %v1510_v49 = vand.u32 2147483648, %v4306_v50  ;;  %v2110_v51 = vsub.f32 0.0, %v2094_v36  ;;  %v3109_v30 = vpop.eup %3108  ;;  %vm1770_vm0 = vweird.f32 %v4330_v54  ;;  %v1502_v57 = vmul.f32 %v4346_v55, %v1501_v32 }
 0x26d   : > { %v2864_v23 = vmul.f32 -1.442695, %v4399_v44  ;;  %v2063_v15 = vsub.f32 0.0, %v4399_v44  ;;  %v2220_v1 = vmin.f32 %v4387_v0, 100.0  ;;  %3112 = vlog2.f32 %v2157_v42  ;;  %vm4440_vm9 = vmor %vm1769_vm14, %vm1770_vm0 }
 0x26e   : > { %v3111_v61 = vpop.eup %3110  ;;  %v1781_v47 = vsub.f32 1.0, %v1780_v62  ;;  %v2359_v6 = vadd.f32 1.0, %v3109_v30  ;;  %v2135_v20 = vmul.f32 1.442695, %v2110_v51  ;;  %v4412_v19 = vadd.f32 %v1272_v52, %v3983_v11 }
 0x26f   : > { %v4409_v12 = vadd.f32 1.0, %v3111_v61  ;;  %3114 = vpow2.f32 %v2864_v23  ;;  %v1768_v22 = vadd.f32 %v4330_v54, %v1767_v26  ;;  %vm4415_vm3 = vcmp.eq.f32.partialorder %v1773_v56, 8.507059e+37 }
 0x270   : > { %v2375_v9 = vmul.f32 0.6931472, %v3107_v34  ;;  %vm4419_vm4 = vcmp.eq.f32.partialorder %v1508_v31, 8.507059e+37  ;;  %v1511_v33 = vor.u32 1.1754944e-38, %v1510_v49  ;;  %v2095_v24 = vand.u32 2147483647, %v2063_v15 }
 0x271   : > { %v1503_v8 = vadd.f32 %v4346_v55, %v1502_v57  ;;  %vm1505_vm6 = vweird.f32 %v4346_v55  ;;  %vm1784_vm8 = vweird.f32 %v4325_v5  ;;  %3116 = vlog2.f32 %v2359_v6 }
 0x272   : > { %v4429_v25 = vsel %vm1664_vm12, %v1663_v46, %v1661_v40  ;;  %v1782_v29 = vmul.f32 %v4370_v27, %v1781_v47  ;;  %3118 = vrcp.f32 %v4409_v12  ;;  %v4434_v35 = vadd.f32 %v1274_v21, %v3983_v11  ;;  %vm4455_vm10 = vmor %vm1504_vm15, %vm1505_vm6 }
 0x273   : > { %v1788_v37 = vand.u32 2147483647, %v4325_v5  ;;  %3120 = vpow2.f32 %v2135_v20  ;;  %v2111_v40 = vsub.f32 0.0, %v2095_v24  ;;  %v2872_v53 = vmul.f32 -1.442695, %v4412_v19  ;;  %v3113_v32 = vpop.eup %3112 }
 0x274   : > { %v1772_v0 = vsel %vm4440_vm9, %v4330_v54, %v1768_v22  ;;  %v2406_v42 = vadd.f32 %v2375_v9, %v2278_v3  ;;  %vm1785_vm14 = vweird.f32 %v4370_v27  ;;  %v1790_v62 = vand.u32 2147483648, %v4325_v5  ;;  %v990_v22 = vpop.xlane.xlu0 %989 }
 0x275   : > { %v3115_v36 = vpop.eup %3114  ;;  %v1507_v54 = vsel %vm4455_vm10, %v4346_v55, %v1503_v8  ;;  %v2137_v31 = vmul.f32 1.442695, %v2111_v40  ;;  %3122 = vpow2.f32 %v2872_v53  ;;  %v2296_v48 = vand.u32 2147483647, %v4412_v19  ;;  %vm4490_vm6 = vmor %vm1784_vm8, %vm1785_vm14 }
 0x276   : > { %v1783_v3 = vadd.f32 %v4370_v27, %v1782_v29  ;;  %v4466_v50 = vadd.f32 1.0, %v3115_v36  ;;  %v2873_v34 = vmul.f32 -1.442695, %v4434_v35  ;;  %v2297_v46 = vand.u32 2147483647, %v4434_v35 }
 0x277   : > { %v3117_v26 = vpop.eup %3116  ;;  %v2258_v49 = vperm.slane %v2220_v1, %v4279_v13  ;;  %vm5679_vm15 = vcmask 589312   ;;  %v2182_v51 = vmul.f32 0.6931472, %v3113_v32  ;;  %3124 = vpow2.f32 %v2137_v31 }
 0x278   : > { %v2312_v52 = vsub.f32 0.0, %v2296_v48  ;;  %v4471_v55 = vpop.eup %3118  ;;  %v2422_v30 = vmin.f32 %v2406_v42, 100.0  ;;  %vm4473_vm0 = vcmp.eq.f32.partialorder %v1788_v37, 8.507059e+37  ;;  %v4478_v23 = vadd.s32 4294967224, %v4026_v2 }
 0x279   : > { %3126 = vrcp.f32 %v4466_v50  ;;  %v3121_v61 = vpop.eup %3120  ;;  %v1777_v1 = vsel %vm4415_vm3, %v4394_v60, %v1772_v0  ;;  %v1512_v47 = vsel %vm4419_vm4, %v1511_v33, %v1507_v54  ;;  %v1791_v20 = vor.u32 1.1754944e-38, %v1790_v62 }
 0x27a   : > { %v2330_v21 = vmul.f32 1.442695, %v2312_v52  ;;  %v1787_v9 = vsel %vm4490_vm6, %v4370_v27, %v1783_v3  ;;  %v2158_v43 = vadd.f32 1.0, %v3121_v61  ;;  %3128 = vpow2.f32 %v2873_v34 }
 0x27b   : > { %v2313_v60 = vsub.f32 0.0, %v2297_v46  ;;  %v3123_v18 = vpop.eup %3122  ;;  %v2205_v33 = vadd.f32 %v2182_v51, %v4375_v7  ;;  %v2377_v24 = vmul.f32 0.6931472, %v3117_v26  ;;  %v1515_v5 = vmul.f32 %v4471_v55, %v4409_v12 }
 0x27c   : > { %3130 = vpow2.f32 %v2330_v21  ;;  %v2259_v8 = vsel %vm1664_vm12, %v2258_v49, %v4382_v58  ;;  %v4503_v29 = vperm.slane %v2422_v30, %v4026_v2  ;;  %v4505_v56 = vadd.f32 1.0, %v3123_v18 }
 0x27d   : > { %v4508_v27 = vadd.f32 %v3983_v11, %v990_v22  ;;  %v3125_v37 = vpop.eup %3124  ;;  %v2020_v40 = vperm.slane %v1777_v1, %v4026_v2  ;;  %v1792_v7 = vsel %vm4473_vm0, %v1791_v20, %v1787_v9  ;;  %v2078_v53 = vmax.f32 %v2062_v4, 0.0 }
 0x27e   : > { %3132 = vlog2.f32 %v2158_v43  ;;  %v1667_v58 = vperm.slane %v1512_v47, %v4344_v38  ;;  %v2159_v0 = vadd.f32 1.0, %v3125_v37  ;;  %v2332_v42 = vmul.f32 1.442695, %v2313_v60 }
 0x27f   : > { %v4515_v32 = vpop.eup %3126  ;;  %3134 = vrcp.f32 %v4505_v56  ;;  %v2221_v14 = vmin.f32 %v2205_v33, 100.0  ;;  %v2407_v62 = vadd.f32 %v2377_v24, %v2279_v59  ;;  %v1516_v36 = vsub.f32 1.0, %v1515_v5 }
 0x280   : > { %v4522_v54 = vadd.s32 4294967216, %v4026_v2  ;;  %v3129_v31 = vpop.eup %3128  ;;  %v2021_v63 = vperm.slane %v1792_v7, %v4040_v10  ;;  %v1530_v4 = vmul.f32 %v4515_v32, %v4466_v50  ;;  %v4529_v48 = vmax.f32 %v2063_v15, 0.0 }
 0x281   : > { %v2064_v3 = vsub.f32 0.0, %v4508_v27  ;;  %v1523_v45 = vand.u32 2147483647, %v4409_v12  ;;  %v1525_v59 = vand.u32 2147483648, %v4409_v12  ;;  %3136 = vlog2.f32 %v2159_v0 }
 0x282   : > { %v3131_v34 = vpop.eup %3130  ;;  %v4534_v46 = vadd.f32 1.0, %v3129_v31  ;;  %v4538_v26 = vsel %vm5679_vm15, %v1667_v58, %v4429_v25  ;;  %vm1519_vm3 = vweird.f32 %v4409_v12  ;;  %3138 = vpow2.f32 %v2332_v42 }
 0x283   : > { %v2865_v44 = vmul.f32 -1.442695, %v4508_v27  ;;  %v2260_v49 = vperm.slane %v2221_v14, %v4344_v38  ;;  %v2423_v51 = vmin.f32 %v2407_v62, 100.0  ;;  %v1517_v52 = vmul.f32 %v4471_v55, %v1516_v36 }
 0x284   : > { %v3133_v15 = vpop.eup %3132  ;;  %3140 = vrcp.f32 %v4534_v46  ;;  %v4548_v57 = vsel %vm1640_vm5, %v2021_v63, %v2020_v40  ;;  %v1531_v25 = vsub.f32 1.0, %v1530_v4  ;;  %v2360_v61 = vadd.f32 1.0, %v3131_v34  ;;  %v1276_v34 = vpop.xlane.xlu1 %1275 }
 0x285   : > { %v4545_v30 = vpop.eup %3134  ;;  %v2096_v1 = vand.u32 2147483647, %v2064_v3  ;;  %vm4552_vm4 = vcmp.eq.f32.partialorder %v1523_v45, 8.507059e+37  ;;  %v1526_v6 = vor.u32 1.1754944e-38, %v1525_v59  ;;  %v1540_v20 = vand.u32 2147483648, %v4466_v50 }
 0x286   : > { %v1795_v21 = vmul.f32 %v4545_v30, %v4505_v56  ;;  %v2280_v22 = vmax.f32 %v4412_v19, 0.0  ;;  %v2184_v9 = vmul.f32 0.6931472, %v3133_v15  ;;  %v1538_v43 = vand.u32 2147483647, %v4466_v50  ;;  %v1278_v19 = vpop.xlane.xlu0 %1277 }
 0x287   : > { %3142 = vpow2.f32 %v2865_v44  ;;  %v2112_v60 = vsub.f32 0.0, %v2096_v1  ;;  %v3137_v18 = vpop.eup %3136  ;;  %v4562_v33 = vsel %vm5679_vm15, %v2260_v49, %v2259_v8  ;;  %v2455_v24 = vperm.slane %v2423_v51, %v4040_v10  ;;  %v992_v10 = vpop.xlane.xlu2 %991 }
 0x288   : > { %v1518_v5 = vadd.f32 %v4471_v55, %v1517_v52  ;;  %vm1520_vm8 = vweird.f32 %v4471_v55  ;;  %v3139_v37 = vpop.eup %3138  ;;  %v1532_v40 = vmul.f32 %v4515_v32, %v1531_v25  ;;  %3144 = vlog2.f32 %v2360_v61 }
 0x289   : > { %v2281_v7 = vmax.f32 %v4434_v35, 0.0  ;;  %v2139_v58 = vmul.f32 1.442695, %v2112_v60  ;;  %vm1534_vm9 = vweird.f32 %v4466_v50  ;;  %v1541_v42 = vor.u32 1.1754944e-38, %v1540_v20  ;;  %vm4577_vm10 = vmor %vm1519_vm3, %vm1520_vm8 }
 0x28a   : > { %v4569_v0 = vpop.eup %3140  ;;  %v1796_v8 = vsub.f32 1.0, %v1795_v21  ;;  %v4573_v14 = vadd.s32 4294967208, %v4026_v2  ;;  %v2206_v36 = vadd.f32 %v2184_v9, %v2078_v53  ;;  %vm4581_vm14 = vcmp.eq.f32.partialorder %v1538_v43, 8.507059e+37 }
 0x28b   : > { %v1810_v63 = vmul.f32 %v4569_v0, %v4534_v46  ;;  %v2361_v4 = vadd.f32 1.0, %v3139_v37  ;;  %3146 = vpow2.f32 %v2139_v58  ;;  %v4589_v45 = vsel %vm1640_vm5, %v2455_v24, %v4503_v29 }
 0x28c   : > { %v1522_v12 = vsel %vm4577_vm10, %v4471_v55, %v1518_v5  ;;  %vm1535_vm0 = vweird.f32 %v4515_v32  ;;  %vm1799_vm6 = vweird.f32 %v4505_v56  ;;  %v1803_v53 = vand.u32 2147483647, %v4505_v56 }
 0x28d   : > { %v3143_v59 = vpop.eup %3142  ;;  %v1533_v44 = vadd.f32 %v4515_v32, %v1532_v40  ;;  %v2186_v15 = vmul.f32 0.6931472, %v3137_v18  ;;  %v1805_v49 = vand.u32 2147483648, %v4505_v56  ;;  %v4600_v51 = vadd.f32 %v3983_v11, %v992_v10  ;;  %vm4618_vm3 = vmor %vm1534_vm9, %vm1535_vm0 }
 0x28e   : > { %vm1672_vm5 = vcmask 654912   ;;  %v1797_v29 = vmul.f32 %v4545_v30, %v1796_v8  ;;  %3148 = vlog2.f32 %v2361_v4  ;;  %v4603_v55 = vadd.f32 1.0, %v3143_v59  ;;  %v3145_v25 = vpop.eup %3144 }
 0x28f   : > { %v4607_v52 = vmax.f32 %v2064_v3, 0.0  ;;  %v4611_v61 = vsel %vm4552_vm4, %v1526_v6, %v1522_v12  ;;  %v2222_v1 = vmin.f32 %v2206_v36, 100.0  ;;  %v1811_v20 = vsub.f32 1.0, %v1810_v63  ;;  %v994_v12 = vpop.xlane.xlu1 %993 }
 0x290   : > { %v2866_v21 = vmul.f32 -1.442695, %v4600_v51  ;;  %vm1800_vm8 = vweird.f32 %v4545_v30  ;;  %vm4623_vm10 = vcmp.eq.f32.partialorder %v1803_v53, 8.507059e+37  ;;  %v1818_v3 = vand.u32 2147483647, %v4534_v46 }
 0x291   : > { %v1820_v47 = vand.u32 2147483648, %v4534_v46  ;;  %3150 = vrcp.f32 %v4603_v55  ;;  %v3147_v6 = vpop.eup %3146  ;;  %v1537_v50 = vsel %vm4618_vm3, %v4515_v32, %v1533_v44  ;;  %v2207_v43 = vadd.f32 %v2186_v15, %v4529_v48  ;;  %vm4655_vm0 = vmor %vm1799_vm6, %vm1800_vm8 }
 0x292   : > { %v2065_v60 = vsub.f32 0.0, %v4600_v51  ;;  %v4636_v18 = vadd.f32 %v1276_v34, %v3983_v11  ;;  %v1798_v24 = vadd.f32 %v4545_v30, %v1797_v29  ;;  %v2379_v5 = vmul.f32 0.6931472, %v3145_v25 }
 0x293   : > { %v2160_v37 = vadd.f32 1.0, %v3147_v6  ;;  %3152 = vpow2.f32 %v2866_v21  ;;  %v2262_v58 = vperm.slane %v2222_v1, %v4478_v23  ;;  %v1806_v8 = vor.u32 1.1754944e-38, %v1805_v49 }
 0x294   : > { %v1812_v32 = vmul.f32 %v4569_v0, %v1811_v20  ;;  %v3149_v10 = vpop.eup %3148  ;;  %vm1676_vm4 = vcmask 720512   ;;  %v4645_v48 = vsel %vm4581_vm14, %v1541_v42, %v1537_v50  ;;  %vm1814_vm9 = vweird.f32 %v4534_v46 }
 0x295   : > { %v1821_v62 = vor.u32 1.1754944e-38, %v1820_v47  ;;  %v4649_v36 = vadd.s32 4294967200, %v4026_v2  ;;  %v2223_v63 = vmin.f32 %v2207_v43, 100.0  ;;  %vm1815_vm3 = vweird.f32 %v4569_v0 }
 0x296   : > { %vm4660_vm15 = vcmp.eq.f32.partialorder %v1818_v3, 8.507059e+37  ;;  %v2097_v31 = vand.u32 2147483647, %v2065_v60  ;;  %v2874_v34 = vmul.f32 -1.442695, %v4636_v18  ;;  %v1802_v56 = vsel %vm4655_vm0, %v4545_v30, %v1798_v24  ;;  %vm4692_vm14 = vmor %vm1814_vm9, %vm1815_vm3 }
 0x297   : > { %v4667_v53 = vpop.eup %3150  ;;  %v2408_v59 = vadd.f32 %v2379_v5, %v2280_v22  ;;  %3154 = vlog2.f32 %v2160_v37  ;;  %v2298_v44 = vand.u32 2147483647, %v4636_v18  ;;  %v2263_v15 = vsel %vm1672_vm5, %v2262_v58, %v4562_v33 }
 0x298   : > { %v1813_v49 = vadd.f32 %v4569_v0, %v1812_v32  ;;  %v2381_v29 = vmul.f32 0.6931472, %v3149_v10  ;;  %v2113_v25 = vsub.f32 0.0, %v2097_v31  ;;  %v1545_v20 = vmul.f32 %v4667_v53, %v4603_v55 }
 0x299   : > { %v3153_v1 = vpop.eup %3152  ;;  %3156 = vpow2.f32 %v2874_v34  ;;  %v2314_v21 = vsub.f32 0.0, %v2298_v44  ;;  %v4681_v30 = vadd.f32 %v3983_v11, %v994_v12  ;;  %v2264_v22 = vperm.slane %v2223_v63, %v4522_v54 }
 0x29a   : > { %v1807_v9 = vsel %vm4623_vm10, %v1806_v8, %v1802_v56  ;;  %v4686_v33 = vadd.f32 1.0, %v3153_v1  ;;  %v2141_v3 = vmul.f32 1.442695, %v2113_v25  ;;  %v2424_v47 = vmin.f32 %v2408_v59, 100.0 }
 0x29b   : > { %v2334_v50 = vmul.f32 1.442695, %v2314_v21  ;;  %v2867_v43 = vmul.f32 -1.442695, %v4681_v30  ;;  %v2066_v24 = vsub.f32 0.0, %v4681_v30  ;;  %v1817_v27 = vsel %vm4692_vm14, %v4569_v0, %v1813_v49 }
 0x29c   : > { %v2409_v5 = vadd.f32 %v2381_v29, %v2281_v7  ;;  %3158 = vrcp.f32 %v4686_v33  ;;  %v4705_v46 = vadd.f32 %v1278_v19, %v3983_v11  ;;  %v2023_v8 = vperm.slane %v1807_v9, %v4046_v16 }
 0x29d   : > { %v3155_v37 = vpop.eup %3154  ;;  %v1546_v32 = vsub.f32 1.0, %v1545_v20  ;;  %3160 = vpow2.f32 %v2141_v3  ;;  %v4711_v10 = vsel %vm1676_vm4, %v2264_v22, %v2263_v15  ;;  %v1553_v0 = vand.u32 2147483647, %v4603_v55 }
 0x29e   : > { %v1555_v35 = vand.u32 2147483648, %v4603_v55  ;;  %3162 = vpow2.f32 %v2334_v50  ;;  %v2457_v63 = vperm.slane %v2424_v47, %v4046_v16  ;;  %v1822_v4 = vsel %vm4660_vm15, %v1821_v62, %v1817_v27 }
 0x29f   : > { %v3157_v7 = vpop.eup %3156  ;;  %3164 = vpow2.f32 %v2867_v43  ;;  %v2098_v31 = vand.u32 2147483647, %v2066_v24  ;;  %v2425_v34 = vmin.f32 %v2409_v5, 100.0  ;;  %v2188_v12 = vmul.f32 0.6931472, %v3155_v37 }
 0x2a0   : > { %v4720_v56 = vadd.f32 1.0, %v3157_v7  ;;  %v2875_v59 = vmul.f32 -1.442695, %v4705_v46  ;;  %v2024_v44 = vsel %vm1644_vm11, %v2023_v8, %v4548_v57  ;;  %v1547_v15 = vmul.f32 %v4667_v53, %v1546_v32 }
 0x2a1   : > { %vm1549_vm6 = vweird.f32 %v4603_v55  ;;  %v2114_v16 = vsub.f32 0.0, %v2098_v31  ;;  %v1556_v62 = vor.u32 1.1754944e-38, %v1555_v35  ;;  %v4731_v49 = vmax.f32 %v2065_v60, 0.0  ;;  %v1280_v60 = vpop.xlane.xlu2 %1279 }
 0x2a2   : > { %v4727_v42 = vpop.eup %3158  ;;  %3166 = vrcp.f32 %v4720_v56  ;;  %v2299_v29 = vand.u32 2147483647, %v4705_v46  ;;  %v2458_v57 = vsel %vm1644_vm11, %v2457_v63, %v4589_v45  ;;  %v2025_v1 = vperm.slane %v1822_v4, %v4152_v39 }
 0x2a3   : > { %v3161_v25 = vpop.eup %3160  ;;  %vm4738_vm15 = vcmp.eq.f32.partialorder %v1553_v0, 8.507059e+37  ;;  %v1560_v21 = vmul.f32 %v4727_v42, %v4686_v33  ;;  %v2282_v51 = vmax.f32 %v4636_v18, 0.0  ;;  %v2459_v22 = vperm.slane %v2425_v34, %v4152_v39 }
 0x2a4   : > { %v3163_v19 = vpop.eup %3162  ;;  %v2208_v9 = vadd.f32 %v2188_v12, %v4607_v52  ;;  %v2161_v3 = vadd.f32 1.0, %v3161_v25  ;;  %3168 = vpow2.f32 %v2875_v59  ;;  %v1548_v47 = vadd.f32 %v4667_v53, %v1547_v15 }
 0x2a5   : > { %v3165_v45 = vpop.eup %3164  ;;  %vm1550_vm11 = vweird.f32 %v4667_v53  ;;  %v4750_v6 = vadd.s32 4294967192, %v4026_v2  ;;  %v2143_v50 = vmul.f32 1.442695, %v2114_v16  ;;  %v1561_v43 = vsub.f32 1.0, %v1560_v21 }
 0x2a6   : > { %v2362_v27 = vadd.f32 1.0, %v3163_v19  ;;  %v2315_v5 = vsub.f32 0.0, %v2299_v29  ;;  %v4753_v37 = vadd.f32 %v1280_v60, %v3983_v11  ;;  %v4756_v39 = vsel %vm1648_vm2, %v2025_v1, %v2024_v44  ;;  %vm4768_vm10 = vmor %vm1549_vm6, %vm1550_vm11 }
 0x2a7   : > { %vm1680_vm8 = vcmask 786112   ;;  %v1570_v52 = vand.u32 2147483648, %v4686_v33  ;;  %3170 = vlog2.f32 %v2161_v3  ;;  %v4759_v8 = vadd.f32 1.0, %v3165_v45 }
 0x2a8   : > { %v4761_v32 = vpop.eup %3166  ;;  %v4764_v0 = vsel %vm1648_vm2, %v2459_v22, %v2458_v57  ;;  %v2224_v7 = vmin.f32 %v2208_v9, 100.0  ;;  %vm1564_vm9 = vweird.f32 %v4686_v33  ;;  %v1568_v63 = vand.u32 2147483647, %v4686_v33  ;;  %v996_v57 = vpop.xlane.xlu0 %995 }
 0x2a9   : > { %v1552_v4 = vsel %vm4768_vm10, %v4667_v53, %v1548_v47  ;;  %v1825_v31 = vmul.f32 %v4761_v32, %v4720_v56  ;;  %v4781_v34 = vmax.f32 %v2066_v24, 0.0  ;;  %3172 = vpow2.f32 %v2143_v50  ;;  %v1282_v22 = vpop.xlane.xlu1 %1281 }
 0x2aa   : > { %v3169_v55 = vpop.eup %3168  ;;  %v1562_v12 = vmul.f32 %v4727_v42, %v1561_v43  ;;  %3174 = vlog2.f32 %v2362_v27  ;;  %v2336_v59 = vmul.f32 1.442695, %v2315_v5  ;;  %v2876_v44 = vmul.f32 -1.442695, %v4753_v37 }
 0x2ab   : > { %v1571_v15 = vor.u32 1.1754944e-38, %v1570_v52  ;;  %v1826_v16 = vsub.f32 1.0, %v1825_v31  ;;  %3176 = vrcp.f32 %v4759_v8  ;;  %v4786_v53 = vadd.f32 1.0, %v3169_v55 }
 0x2ac   : > { %v4790_v29 = vsel %vm4738_vm15, %v1556_v62, %v1552_v4  ;;  %v2266_v30 = vperm.slane %v2224_v7, %v4573_v14  ;;  %vm4793_vm2 = vcmp.eq.f32.partialorder %v1568_v63, 8.507059e+37  ;;  %v1833_v25 = vand.u32 2147483647, %v4720_v56 }
 0x2ad   : > { %3178 = vpow2.f32 %v2336_v59  ;;  %v3171_v1 = vpop.eup %3170  ;;  %v1835_v21 = vand.u32 2147483648, %v4720_v56  ;;  %v2283_v60 = vmax.f32 %v4705_v46, 0.0  ;;  %v2300_v62 = vand.u32 2147483647, %v4753_v37 }
 0x2ae   : > { %3180 = vrcp.f32 %v4786_v53  ;;  %v1563_v20 = vadd.f32 %v4727_v42, %v1562_v12  ;;  %vm1565_vm0 = vweird.f32 %v4727_v42  ;;  %v1827_v19 = vmul.f32 %v4761_v32, %v1826_v16 }
 0x2af   : > { %3182 = vpow2.f32 %v2876_v44  ;;  %v3173_v9 = vpop.eup %3172  ;;  %vm1829_vm3 = vweird.f32 %v4720_v56  ;;  %v1585_v45 = vand.u32 2147483648, %v4759_v8  ;;  %v4810_v47 = vadd.f32 %v3983_v11, %v996_v57  ;;  %vm4826_vm6 = vmor %vm1564_vm9, %vm1565_vm0 }
 0x2b0   : > { %v3175_v50 = vpop.eup %3174  ;;  %v4814_v43 = vsel %vm1680_vm8, %v2266_v30, %v4711_v10  ;;  %v2190_v27 = vmul.f32 0.6931472, %v3171_v1  ;;  %vm4816_vm14 = vcmp.eq.f32.partialorder %v1833_v25, 8.507059e+37  ;;  %v2162_v52 = vadd.f32 1.0, %v3173_v9 }
 0x2b1   : > { %v4820_v35 = vpop.eup %3176  ;;  %v1836_v63 = vor.u32 1.1754944e-38, %v1835_v21  ;;  %v2316_v4 = vsub.f32 0.0, %v2300_v62  ;;  %v4832_v31 = vadd.f32 %v1282_v22, %v3983_v11  ;;  %v1567_v12 = vsel %vm4826_vm6, %v4727_v42, %v1563_v20 }
 0x2b2   : > { %v1828_v59 = vadd.f32 %v4761_v32, %v1827_v19  ;;  %vm1830_vm15 = vweird.f32 %v4761_v32  ;;  %3184 = vlog2.f32 %v2162_v52  ;;  %v4841_v44 = vor.u32 1.1754944e-38, %v1585_v45 }
 0x2b3   : > { %v3179_v55 = vpop.eup %3178  ;;  %v2284_v30 = vmax.f32 %v4753_v37, 0.0  ;;  %v2868_v25 = vmul.f32 -1.442695, %v4810_v47  ;;  %v2209_v1 = vadd.f32 %v2190_v27, %v4731_v49  ;;  %v2383_v21 = vmul.f32 0.6931472, %v3175_v50  ;;  %vm4854_vm11 = vmor %vm1829_vm3, %vm1830_vm15 }
 0x2b4   : > { %v4839_v33 = vpop.eup %3180  ;;  %v2363_v16 = vadd.f32 1.0, %v3179_v55  ;;  %v2338_v62 = vmul.f32 1.442695, %v2316_v4  ;;  %v4850_v20 = vsel %vm4793_vm2, %v1571_v15, %v1567_v12  ;;  %v1575_v22 = vmul.f32 %v4820_v35, %v4759_v8 }
 0x2b5   : > { %v3183_v57 = vpop.eup %3182  ;;  %v1840_v42 = vmul.f32 %v4839_v33, %v4786_v53  ;;  %v1848_v49 = vand.u32 2147483647, %v4786_v53  ;;  %v1832_v9 = vsel %vm4854_vm11, %v4761_v32, %v1828_v59  ;;  %vm1684_vm10 = vcmask 851712  }
 0x2b6   : > { %3186 = vlog2.f32 %v2363_v16  ;;  %v4864_v24 = vadd.f32 1.0, %v3183_v57  ;;  %v1850_v56 = vand.u32 2147483648, %v4786_v53  ;;  %v2067_v15 = vsub.f32 0.0, %v4810_v47  ;;  %v1284_v57 = vpop.xlane.xlu0 %1283 }
 0x2b7   : > { %v1841_v45 = vsub.f32 1.0, %v1840_v42  ;;  %3188 = vpow2.f32 %v2338_v62  ;;  %v2877_v50 = vmul.f32 -1.442695, %v4832_v31  ;;  %v2225_v52 = vmin.f32 %v2209_v1, 100.0 }
 0x2b8   : > { %3190 = vpow2.f32 %v2868_v25  ;;  %v3185_v27 = vpop.eup %3184  ;;  %v2410_v7 = vadd.f32 %v2383_v21, %v2282_v51  ;;  %v1837_v32 = vsel %vm4816_vm14, %v1836_v63, %v1832_v9  ;;  %v1576_v55 = vsub.f32 1.0, %v1575_v22 }
 0x2b9   : > { %v1842_v4 = vmul.f32 %v4839_v33, %v1841_v45  ;;  %3192 = vrcp.f32 %v4864_v24  ;;  %v2192_v12 = vmul.f32 0.6931472, %v3185_v27  ;;  %v2099_v59 = vand.u32 2147483647, %v2067_v15 }
 0x2ba   : > { %vm1845_vm9 = vweird.f32 %v4839_v33  ;;  %3194 = vpow2.f32 %v2877_v50  ;;  %v2301_v18 = vand.u32 2147483647, %v4832_v31  ;;  %vm1844_vm2 = vweird.f32 %v4786_v53 }
 0x2bb   : > { %v1843_v16 = vadd.f32 %v4839_v33, %v1842_v4  ;;  %vm4881_vm0 = vcmp.eq.f32.partialorder %v1848_v49, 8.507059e+37  ;;  %v4886_v5 = vadd.s32 4294967184, %v4026_v2  ;;  %v2115_v63 = vsub.f32 0.0, %v2099_v59  ;;  %vm4894_vm3 = vmor %vm1844_vm2, %vm1845_vm9 }
 0x2bc   : > { %v3187_v51 = vpop.eup %3186  ;;  %v2268_v21 = vperm.slane %v2225_v52, %v4649_v36  ;;  %v2027_v42 = vperm.slane %v1837_v32, %v4167_v41  ;;  %v2426_v62 = vmin.f32 %v2410_v7, 100.0  ;;  %v2317_v19 = vsub.f32 0.0, %v2301_v18 }
 0x2bd   : > { %v3189_v1 = vpop.eup %3188  ;;  %v1577_v9 = vmul.f32 %v4820_v35, %v1576_v55  ;;  %v2210_v53 = vadd.f32 %v2192_v12, %v4781_v34  ;;  %v1851_v45 = vor.u32 1.1754944e-38, %v1850_v56  ;;  %v1847_v52 = vsel %vm4894_vm3, %v4839_v33, %v1843_v16 }
 0x2be   : > { %v3191_v22 = vpop.eup %3190  ;;  %v2364_v50 = vadd.f32 1.0, %v3189_v1  ;;  %v2145_v4 = vmul.f32 1.442695, %v2115_v63  ;;  %v4906_v32 = vadd.f32 %v1284_v57, %v3983_v11  ;;  %v2385_v34 = vmul.f32 0.6931472, %v3187_v51  ;;  %v1286_v1 = vpop.xlane.xlu2 %1285 }
 0x2bf   : > { %v4898_v27 = vpop.eup %3192  ;;  %v4903_v7 = vadd.f32 1.0, %v3191_v22  ;;  %v2340_v12 = vmul.f32 1.442695, %v2317_v19  ;;  %v2269_v59 = vsel %vm1684_vm10, %v2268_v21, %v4814_v43  ;;  %v2028_v18 = vsel %vm1652_vm7, %v2027_v42, %v4756_v39 }
 0x2c0   : > { %v1855_v55 = vmul.f32 %v4898_v27, %v4864_v24  ;;  %3196 = vlog2.f32 %v2364_v50  ;;  %v3195_v56 = vpop.eup %3194  ;;  %v2461_v33 = vperm.slane %v2426_v62, %v4167_v41  ;;  %vm5681_vm14 = vcmask 917312  }
 0x2c1   : > { %3198 = vrcp.f32 %v4903_v7  ;;  %v4917_v16 = vadd.f32 %v4820_v35, %v1577_v9  ;;  %v1852_v51 = vsel %vm4881_vm0, %v1851_v45, %v1847_v52  ;;  %v1863_v57 = vand.u32 2147483647, %v4864_v24 }
 0x2c2   : > { %v1856_v63 = vsub.f32 1.0, %v1855_v55  ;;  %v2226_v19 = vmin.f32 %v2210_v53, 100.0  ;;  %3200 = vpow2.f32 %v2145_v4  ;;  %v4922_v43 = vadd.f32 1.0, %v3195_v56 }
 0x2c3   : > { %v2878_v39 = vmul.f32 -1.442695, %v4906_v32  ;;  %v2411_v41 = vadd.f32 %v2385_v34, %v2283_v60  ;;  %v1865_v42 = vand.u32 2147483648, %v4864_v24  ;;  %3202 = vpow2.f32 %v2340_v12 }
 0x2c4   : > { %v1857_v21 = vmul.f32 %v4898_v27, %v1856_v63  ;;  %v2462_v25 = vsel %vm1652_vm7, %v2461_v33, %v4764_v0  ;;  %v2029_v62 = vperm.slane %v1852_v51, %v4194_v17  ;;  %3204 = vrcp.f32 %v4922_v43 }
 0x2c5   : > { %v4934_v22 = vadd.f32 %v1286_v1, %v3983_v11  ;;  %vm1860_vm6 = vweird.f32 %v4898_v27  ;;  %v2285_v46 = vmax.f32 %v4832_v31, 0.0  ;;  %3206 = vpow2.f32 %v2878_v39 }
 0x2c6   : > { %v3197_v9 = vpop.eup %3196  ;;  %v1858_v53 = vadd.f32 %v4898_v27, %v1857_v21  ;;  %v2270_v49 = vperm.slane %v2226_v19, %v4750_v6  ;;  %vm1859_vm7 = vweird.f32 %v4864_v24  ;;  %v2302_v45 = vand.u32 2147483647, %v4906_v32  ;;  %v1292_v1 = vpop.xlane.xlu2 %1291 }
 0x2c7   : > { %v4939_v60 = vpop.eup %3198  ;;  %v2387_v0 = vmul.f32 0.6931472, %v3197_v9  ;;  %v2427_v50 = vmin.f32 %v2411_v41, 100.0  ;;  %vm4944_vm15 = vcmp.eq.f32.partialorder %v1863_v57, 8.507059e+37  ;;  %v1866_v4 = vor.u32 1.1754944e-38, %v1865_v42  ;;  %vm4953_vm11 = vmor %vm1859_vm7, %vm1860_vm6 }
 0x2c8   : > { %v4950_v34 = vmax.f32 %v2067_v15, 0.0  ;;  %v3201_v55 = vpop.eup %3200  ;;  %v2030_v12 = vsel %vm1656_vm13, %v2029_v62, %v2028_v18  ;;  %v1590_v24 = vmul.f32 %v4939_v60, %v4903_v7  ;;  %v2318_v33 = vsub.f32 0.0, %v2302_v45 }
 0x2c9   : > { %v2879_v51 = vmul.f32 -1.442695, %v4934_v22  ;;  %v3203_v63 = vpop.eup %3202  ;;  %v1862_v47 = vsel %vm4953_vm11, %v4898_v27, %v1858_v53  ;;  %v2412_v15 = vadd.f32 %v2387_v0, %v2284_v30  ;;  %v2163_v57 = vadd.f32 1.0, %v3201_v55 }
 0x2ca   : > { %v2303_v18 = vand.u32 2147483647, %v4934_v22  ;;  %v4966_v19 = vpop.eup %3204  ;;  %v4969_v39 = vsel %vm5681_vm14, %v2270_v49, %v2269_v59  ;;  %v2365_v41 = vadd.f32 1.0, %v3203_v63  ;;  %v2342_v21 = vmul.f32 1.442695, %v2318_v33  ;;  %v1288_v59 = vpop.xlane.xlu1 %1287 }
 0x2cb   : > { %3208 = vpow2.f32 %v2879_v51  ;;  %v3207_v42 = vpop.eup %3206  ;;  %v2463_v62 = vperm.slane %v2427_v50, %v4194_v17  ;;  %v1600_v27 = vand.u32 2147483648, %v4903_v7  ;;  %v1870_v37 = vmul.f32 %v4966_v19, %v4922_v43 }
 0x2cc   : > { %3210 = vlog2.f32 %v2163_v57  ;;  %v1867_v30 = vsel %vm4944_vm15, %v1866_v4, %v1862_v47  ;;  %v1591_v9 = vsub.f32 1.0, %v1590_v24  ;;  %v4977_v53 = vadd.f32 1.0, %v3207_v42 }
 0x2cd   : > { %3212 = vlog2.f32 %v2365_v41  ;;  %v2428_v49 = vmin.f32 %v2412_v15, 100.0  ;;  %v1871_v0 = vsub.f32 1.0, %v1870_v37  ;;  %v2319_v45 = vsub.f32 0.0, %v2303_v18 }
 0x2ce   : > { %3214 = vpow2.f32 %v2342_v21  ;;  %v1878_v50 = vand.u32 2147483647, %v4922_v43  ;;  %v1880_v55 = vand.u32 2147483648, %v4922_v43  ;;  %v2031_v52 = vperm.slane %v1867_v30, %v4234_v28  ;;  %v1290_v21 = vpop.xlane.xlu0 %1289 }
 0x2cf   : > { %3216 = vrcp.f32 %v4977_v53  ;;  %v4984_v4 = vor.u32 1.1754944e-38, %v1600_v27  ;;  %v2344_v56 = vmul.f32 1.442695, %v2319_v45  ;;  %v4987_v24 = vadd.f32 %v1288_v59, %v3983_v11 }
 0x2d0   : > { %v2464_v51 = vsel %vm1656_vm13, %v2463_v62, %v2462_v25  ;;  %v1872_v63 = vmul.f32 %v4966_v19, %v1871_v0  ;;  %vm1874_vm9 = vweird.f32 %v4922_v43  ;;  %v2286_v47 = vmax.f32 %v4906_v32, 0.0 }
 0x2d1   : > { %v3209_v33 = vpop.eup %3208  ;;  %v2465_v57 = vperm.slane %v2428_v49, %v4234_v28  ;;  %v1592_v18 = vmul.f32 %v4939_v60, %v1591_v9  ;;  %3218 = vpow2.f32 %v2344_v56  ;;  %vm4997_vm2 = vcmp.eq.f32.partialorder %v1878_v50, 8.507059e+37  ;;  %v998_v9 = vpop.xlane.xlu2 %997 }
 0x2d2   : > { %v3211_v15 = vpop.eup %3210  ;;  %v4995_v41 = vadd.f32 1.0, %v3209_v33  ;;  %v1881_v25 = vor.u32 1.1754944e-38, %v1880_v55  ;;  %v1895_v62 = vand.u32 2147483648, %v4977_v53  ;;  %v2287_v37 = vmax.f32 %v4934_v22, 0.0 }
 0x2d3   : > { %v3213_v42 = vpop.eup %3212  ;;  %v5004_v59 = vsel %vm1660_vm1, %v2031_v52, %v2030_v12  ;;  %vm1875_vm13 = vweird.f32 %v4966_v19  ;;  %v2880_v28 = vmul.f32 -1.442695, %v4987_v24  ;;  %v1873_v0 = vadd.f32 %v4966_v19, %v1872_v63 }
 0x2d4   : > { %v3215_v30 = vpop.eup %3214  ;;  %3220 = vrcp.f32 %v4995_v41  ;;  %v2389_v45 = vmul.f32 0.6931472, %v3213_v42  ;;  %v5013_v55 = vadd.f32 %v1290_v21, %v3983_v11  ;;  %v5016_v56 = vsel %vm1660_vm1, %v2465_v57, %v2464_v51  ;;  %vm5036_vm1 = vmor %vm1874_vm9, %vm1875_vm13 }
 0x2d5   : > { %v5009_v49 = vpop.eup %3216  ;;  %v2366_v50 = vadd.f32 1.0, %v3215_v30  ;;  %v5019_v12 = vadd.f32 %v4939_v60, %v1592_v18  ;;  %v1893_v33 = vand.u32 2147483647, %v4977_v53  ;;  %v5024_v3 = vor.u32 1.1754944e-38, %v1895_v62 }
 0x2d6   : > { %v1885_v52 = vmul.f32 %v5009_v49, %v4977_v53  ;;  %v5027_v63 = vadd.f32 %v1292_v1, %v3983_v11  ;;  %v5030_v21 = vadd.f32 %v3983_v11, %v998_v9  ;;  %v2194_v51 = vmul.f32 0.6931472, %v3211_v15 }
 0x2d7   : > { %3222 = vlog2.f32 %v2366_v50  ;;  %v3219_v42 = vpop.eup %3218  ;;  %vm1889_vm0 = vweird.f32 %v4977_v53  ;;  %v2304_v1 = vand.u32 2147483647, %v4987_v24  ;;  %v1877_v62 = vsel %vm5036_vm1, %v4966_v19, %v1873_v0 }
 0x2d8   : > { %v1886_v18 = vsub.f32 1.0, %v1885_v52  ;;  %3224 = vpow2.f32 %v2880_v28  ;;  %v2413_v15 = vadd.f32 %v2389_v45, %v2285_v46  ;;  %v2367_v30 = vadd.f32 1.0, %v3219_v42 }
 0x2d9   : > { %v2881_v43 = vmul.f32 -1.442695, %v5013_v55  ;;  %v2288_v52 = vmax.f32 %v4987_v24, 0.0  ;;  %v2320_v58 = vsub.f32 0.0, %v2304_v1  ;;  %v2305_v28 = vand.u32 2147483647, %v5013_v55 }
 0x2da   : > { %v5048_v9 = vpop.eup %3220  ;;  %v1887_v50 = vmul.f32 %v5009_v49, %v1886_v18  ;;  %vm1904_vm3 = vweird.f32 %v4995_v41  ;;  %3226 = vlog2.f32 %v2367_v30  ;;  %v2882_v31 = vmul.f32 -1.442695, %v5027_v63 }
 0x2db   : > { %v1900_v40 = vmul.f32 %v5048_v9, %v4995_v41  ;;  %v2211_v46 = vadd.f32 %v2194_v51, %v4950_v34  ;;  %v5060_v19 = vsel %vm4997_vm2, %v1881_v25, %v1877_v62  ;;  %vm5062_vm6 = vcmp.eq.f32.partialorder %v1893_v33, 8.507059e+37 }
 0x2dc   : > { %v2346_v45 = vmul.f32 1.442695, %v2320_v58  ;;  %3228 = vpow2.f32 %v2881_v43  ;;  %v2429_v57 = vmin.f32 %v2413_v15, 100.0  ;;  %v2321_v1 = vsub.f32 0.0, %v2305_v28 }
 0x2dd   : > { %v3223_v42 = vpop.eup %3222  ;;  %v1901_v18 = vsub.f32 1.0, %v1900_v40  ;;  %3230 = vpow2.f32 %v2882_v31  ;;  %v1888_v17 = vadd.f32 %v5009_v49, %v1887_v50  ;;  %vm1890_vm7 = vweird.f32 %v5009_v49 }
 0x2de   : > { %v3225_v30 = vpop.eup %3224  ;;  %v2391_v34 = vmul.f32 0.6931472, %v3223_v42  ;;  %3232 = vpow2.f32 %v2346_v45  ;;  %v1908_v25 = vand.u32 2147483647, %v4995_v41  ;;  %v2348_v58 = vmul.f32 1.442695, %v2321_v1  ;;  %vm5079_vm11 = vmor %vm1889_vm0, %vm1890_vm7 }
 0x2df   : > { %v1902_v27 = vmul.f32 %v5048_v9, %v1901_v18  ;;  %v5070_v33 = vadd.f32 1.0, %v3225_v30  ;;  %v2227_v51 = vmin.f32 %v2211_v46, 100.0  ;;  %vm1905_vm15 = vweird.f32 %v5048_v9 }
 0x2e0   : > { %v2414_v40 = vadd.f32 %v2391_v34, %v2286_v47  ;;  %v1910_v62 = vand.u32 2147483648, %v4995_v41  ;;  %v3227_v15 = vpop.eup %3226  ;;  %v2467_v43 = vperm.slane %v2429_v57, %v4279_v13  ;;  %v2306_v32 = vand.u32 2147483647, %v5027_v63  ;;  %vm5095_vm9 = vmor %vm1904_vm3, %vm1905_vm15 }
 0x2e1   : > { %v1903_v28 = vadd.f32 %v5048_v9, %v1902_v27  ;;  %3234 = vrcp.f32 %v5070_v33  ;;  %v1892_v31 = vsel %vm5079_vm11, %v5009_v49, %v1888_v17  ;;  %v2393_v45 = vmul.f32 0.6931472, %v3227_v15 }
 0x2e2   : > { %v3229_v47 = vpop.eup %3228  ;;  %v2430_v46 = vmin.f32 %v2414_v40, 100.0  ;;  %3236 = vpow2.f32 %v2348_v58  ;;  %vm5099_vm2 = vcmp.eq.f32.partialorder %v1908_v25, 8.507059e+37  ;;  %v5107_v30 = vperm.slane %v2227_v51, %v4886_v5 }
 0x2e3   : > { %v3231_v42 = vpop.eup %3230  ;;  %v5103_v17 = vadd.f32 1.0, %v3229_v47  ;;  %v1907_v41 = vsel %vm5095_vm9, %v5048_v9, %v1903_v28  ;;  %v1911_v34 = vor.u32 1.1754944e-38, %v1910_v62  ;;  %v2415_v27 = vadd.f32 %v2393_v45, %v2287_v37  ;;  %v1294_v47 = vpop.xlane.xlu1 %1293 }
 0x2e4   : > { %v3233_v1 = vpop.eup %3232  ;;  %v5117_v25 = vsel %vm5062_vm6, %v5024_v3, %v1892_v31  ;;  %v2322_v40 = vsub.f32 0.0, %v2306_v32  ;;  %v2468_v51 = vsel %vm1664_vm12, %v2467_v43, %v5016_v56  ;;  %v2469_v15 = vperm.slane %v2430_v46, %v4344_v38 }
 0x2e5   : > { %v2368_v58 = vadd.f32 1.0, %v3233_v1  ;;  %3238 = vrcp.f32 %v5103_v17  ;;  %v1925_v9 = vand.u32 2147483648, %v5070_v33  ;;  %v5129_v37 = vsel %vm5099_vm2, %v1911_v34, %v1907_v41 }
 0x2e6   : > { %v5131_v3 = vadd.f32 1.0, %v3231_v42  ;;  %v5680_v0 = vsub.f32 0.0, %v5030_v21  ;;  %v2431_v43 = vmin.f32 %v2415_v27, 100.0  ;;  %v1923_v32 = vand.u32 2147483647, %v5070_v33 }
 0x2e7   : > { %v5125_v22 = vpop.eup %3234  ;;  %3240 = vlog2.f32 %v2368_v58  ;;  %v2350_v46 = vmul.f32 1.442695, %v2322_v40  ;;  %v2869_v45 = vmul.f32 -1.442695, %v5030_v21  ;;  %vm1919_vm13 = vweird.f32 %v5070_v33 }
 0x2e8   : > { %v3237_v50 = vpop.eup %3236  ;;  %v1915_v28 = vmul.f32 %v5125_v22, %v5070_v33  ;;  %3242 = vrcp.f32 %v5131_v3  ;;  %v1926_v18 = vor.u32 1.1754944e-38, %v1925_v9  ;;  %vm5790_vm1 = vcmask 589312  }
 0x2e9   : > { %v2369_v31 = vadd.f32 1.0, %v3237_v50  ;;  %v2470_v41 = vsel %vm5790_vm1, %v2469_v15, %v2468_v51  ;;  %v2100_v34 = vand.u32 2147483647, %v5680_v0  ;;  %v5150_v27 = vadd.f32 %v1294_v47, %v3983_v11 }
 0x2ea   : > { %v1916_v57 = vsub.f32 1.0, %v1915_v28  ;;  %v2471_v58 = vperm.slane %v2431_v43, %v4478_v23  ;;  %vm5154_vm0 = vcmp.eq.f32.partialorder %v1923_v32, 8.507059e+37  ;;  %v1940_v51 = vand.u32 2147483648, %v5103_v17 }
 0x2eb   : > { %v5144_v1 = vpop.eup %3238  ;;  %3244 = vlog2.f32 %v2369_v31  ;;  %vm1920_vm3 = vweird.f32 %v5125_v22  ;;  %v2116_v28 = vsub.f32 0.0, %v2100_v34  ;;  %v2883_v47 = vmul.f32 -1.442695, %v5150_v27 }
 0x2ec   : > { %v1917_v40 = vmul.f32 %v5125_v22, %v1916_v57  ;;  %v1930_v9 = vmul.f32 %v5144_v1, %v5103_v17  ;;  %3246 = vpow2.f32 %v2350_v46  ;;  %v1938_v42 = vand.u32 2147483647, %v5103_v17  ;;  %vm5183_vm7 = vmor %vm1919_vm13, %vm1920_vm3 }
 0x2ed   : > { %v3241_v15 = vpop.eup %3240  ;;  %3248 = vpow2.f32 %v2869_v45  ;;  %v2147_v56 = vmul.f32 1.442695, %v2116_v28  ;;  %v2307_v53 = vand.u32 2147483647, %v5150_v27  ;;  %vm1934_vm6 = vweird.f32 %v5103_v17 }
 0x2ee   : > { %v1918_v43 = vadd.f32 %v5125_v22, %v1917_v40  ;;  %v2395_v31 = vmul.f32 0.6931472, %v3241_v15  ;;  %v1931_v57 = vsub.f32 1.0, %v1930_v9  ;;  %v5164_v32 = vpop.eup %3242  ;;  %3250 = vpow2.f32 %v2883_v47  ;;  %v1296_v40 = vpop.xlane.xlu0 %1295 }
 0x2ef   : > { %v5171_v46 = vor.u32 1.1754944e-38, %v1940_v51  ;;  %v1945_v34 = vmul.f32 %v5164_v32, %v5131_v3  ;;  %v5176_v45 = vadd.s32 4294967176, %v4026_v2  ;;  %v2472_v15 = vsel %vm1672_vm5, %v2471_v58, %v2470_v41 }
 0x2f0   : > { %v2416_v10 = vadd.f32 %v2395_v31, %v2288_v52  ;;  %v1953_v52 = vand.u32 2147483647, %v5131_v3  ;;  %3252 = vpow2.f32 %v2147_v56  ;;  %v2323_v51 = vsub.f32 0.0, %v2307_v53 }
 0x2f1   : > { %v3245_v9 = vpop.eup %3244  ;;  %v1922_v2 = vsel %vm5183_vm7, %v5125_v22, %v1918_v43  ;;  %v1932_v28 = vmul.f32 %v5144_v1, %v1931_v57  ;;  %v1955_v41 = vand.u32 2147483648, %v5131_v3  ;;  %v1946_v33 = vsub.f32 1.0, %v1945_v34  ;;  %v1298_v57 = vpop.xlane.xlu1 %1297 }
 0x2f2   : > { %v2397_v47 = vmul.f32 0.6931472, %v3245_v9  ;;  %v3247_v58 = vpop.eup %3246  ;;  %v2432_v31 = vmin.f32 %v2416_v10, 100.0  ;;  %v2352_v62 = vmul.f32 1.442695, %v2323_v51  ;;  %v5194_v0 = vadd.f32 %v1296_v40, %v3983_v11 }
 0x2f3   : > { %v3249_v49 = vpop.eup %3248  ;;  %vm1935_vm15 = vweird.f32 %v5144_v1  ;;  %v5795_v53 = vmax.f32 %v5013_v55, 0.0  ;;  %v2370_v24 = vadd.f32 1.0, %v3247_v58  ;;  %v5796_v22 = vsub.f32 0.0, %v5030_v21 }
 0x2f4   : > { %v3251_v9 = vpop.eup %3250  ;;  %v5205_v10 = vsel %vm5154_vm0, %v1926_v18, %v1922_v2  ;;  %v5207_v34 = vadd.f32 1.0, %v3249_v49  ;;  %3254 = vpow2.f32 %v2352_v62  ;;  %v2884_v40 = vmul.f32 -1.442695, %v5194_v0  ;;  %vm5232_vm9 = vmor %vm1934_vm6, %vm1935_vm15 }
 0x2f5   : > { %v2417_v56 = vadd.f32 %v2397_v47, %v5795_v53  ;;  %v5201_v43 = vmax.f32 %v5796_v22, 0.0  ;;  %v5211_v51 = vadd.f32 %v5144_v1, %v1932_v28  ;;  %vm1949_vm11 = vweird.f32 %v5131_v3 }
 0x2f6   : > { %3256 = vlog2.f32 %v2370_v24  ;;  %v5214_v21 = vadd.f32 1.0, %v3251_v9  ;;  %v3253_v47 = vpop.eup %3252  ;;  %v2473_v58 = vperm.slane %v2432_v31, %v4522_v54  ;;  %v1947_v18 = vmul.f32 %v5164_v32, %v1946_v33 }
 0x2f7   : > { %v2433_v55 = vmin.f32 %v2417_v56, 100.0  ;;  %3258 = vrcp.f32 %v5207_v34  ;;  %v5220_v49 = vadd.f32 %v1298_v57, %v3983_v11  ;;  %v5222_v62 = vor.u32 1.1754944e-38, %v1955_v41 }
 0x2f8   : > { %v1615_v50 = vand.u32 2147483648, %v5207_v34  ;;  %v2164_v2 = vadd.f32 1.0, %v3253_v47  ;;  %3260 = vrcp.f32 %v5214_v21  ;;  %vm1950_vm2 = vweird.f32 %v5164_v32 }
 0x2f9   : > { %3262 = vpow2.f32 %v2884_v40  ;;  %v1937_v41 = vsel %vm5232_vm9, %v5144_v1, %v5211_v51  ;;  %v2475_v33 = vperm.slane %v2433_v55, %v4573_v14  ;;  %v2308_v53 = vand.u32 2147483647, %v5194_v0  ;;  %vm5273_vm6 = vmor %vm1949_vm11, %vm1950_vm2 }
 0x2fa   : > { %3264 = vlog2.f32 %v2164_v2  ;;  %v3255_v17 = vpop.eup %3254  ;;  %v2474_v56 = vsel %vm1676_vm4, %v2473_v58, %v2472_v15  ;;  %vm5245_vm13 = vcmp.eq.f32.partialorder %v1938_v42, 8.507059e+37  ;;  %v1948_v22 = vadd.f32 %v5164_v32, %v1947_v18 }
 0x2fb   : > { %vm5250_vm1 = vcmp.eq.f32.partialorder %v1953_v52, 8.507059e+37  ;;  %v2885_v1 = vmul.f32 -1.442695, %v5220_v49  ;;  %v2309_v9 = vand.u32 2147483647, %v5220_v49  ;;  %v5256_v51 = vor.u32 1.1754944e-38, %v1615_v50 }
 0x2fc   : > { %v3257_v40 = vpop.eup %3256  ;;  %v1968_v55 = vand.u32 2147483647, %v5214_v21  ;;  %v2371_v15 = vadd.f32 1.0, %v3255_v17  ;;  %v2324_v42 = vsub.f32 0.0, %v2308_v53  ;;  %vm1964_vm0 = vweird.f32 %v5214_v21 }
 0x2fd   : > { %v5259_v47 = vpop.eup %3258  ;;  %v2399_v58 = vmul.f32 0.6931472, %v3257_v40  ;;  %v1970_v52 = vand.u32 2147483648, %v5214_v21  ;;  %3266 = vpow2.f32 %v2885_v1  ;;  %v2325_v18 = vsub.f32 0.0, %v2309_v9 }
 0x2fe   : > { %v5263_v2 = vpop.eup %3260  ;;  %v2476_v31 = vsel %vm1680_vm8, %v2475_v33, %v2474_v56  ;;  %v1605_v50 = vmul.f32 %v5259_v47, %v5207_v34  ;;  %3268 = vlog2.f32 %v2371_v15  ;;  %v2354_v28 = vmul.f32 1.442695, %v2324_v42 }
 0x2ff   : > { %v3263_v17 = vpop.eup %3262  ;;  %vm1580_vm3 = vweird.f32 %v4820_v35  ;;  %v5805_v1 = vmax.f32 %v5027_v63, 0.0  ;;  %v1960_v33 = vmul.f32 %v5263_v2, %v5214_v21  ;;  %v2356_v40 = vmul.f32 1.442695, %v2325_v18 }
 0x300   : > { %v3265_v15 = vpop.eup %3264  ;;  %vm1595_vm7 = vweird.f32 %v4939_v60  ;;  %v1606_v42 = vsub.f32 1.0, %v1605_v50  ;;  %v5283_v11 = vadd.f32 1.0, %v3263_v17  ;;  %3270 = vpow2.f32 %v2354_v28 }
 0x301   : > { %v2418_v9 = vadd.f32 %v2399_v58, %v5805_v1  ;;  %v1952_v3 = vsel %vm5273_vm6, %v5164_v32, %v1948_v22  ;;  %vm1579_vm15 = vweird.f32 %v4759_v8  ;;  %v2196_v58 = vmul.f32 0.6931472, %v3265_v15 }
 0x302   : > { %v1961_v1 = vsub.f32 1.0, %v1960_v33  ;;  %3272 = vpow2.f32 %v2356_v40  ;;  %vm1594_vm11 = vweird.f32 %v4903_v7  ;;  %v1971_v18 = vor.u32 1.1754944e-38, %v1970_v52 }
 0x303   : > { %v2434_v63 = vmin.f32 %v2418_v9, 100.0  ;;  %3274 = vrcp.f32 %v5283_v11  ;;  %v1985_v50 = vand.u32 2147483648, %v5283_v11  ;;  %v2293_v17 = vmax.f32 %v5220_v49, 0.0  ;;  %v3267_v28 = vpop.eup %3266 }
 0x304   : > { %v2212_v32 = vadd.f32 %v2196_v58, %v5201_v43  ;;  %v1962_v22 = vmul.f32 %v5263_v2, %v1961_v1  ;;  %vm1965_vm9 = vweird.f32 %v5263_v2  ;;  %v3269_v53 = vpop.eup %3268  ;;  %v5298_v9 = vmul.f32 %v5259_v47, %v1606_v42 }
 0x305   : > { %v2477_v56 = vperm.slane %v2434_v63, %v4649_v36  ;;  %v5300_v52 = vadd.f32 1.0, %v3267_v28  ;;  %v1942_v33 = vsel %vm5245_vm13, %v5171_v46, %v1937_v41  ;;  %v1957_v40 = vsel %vm5250_vm1, %v5222_v62, %v1952_v3  ;;  %vm5324_vm1 = vmor %vm1964_vm0, %vm1965_vm9 }
 0x306   : > { %v5806_v43 = vand.u32 2147483647, %v4759_v8  ;;  %v2228_v63 = vmin.f32 %v2212_v32, 100.0  ;;  %v1963_v42 = vadd.f32 %v5263_v2, %v1962_v22  ;;  %v2401_v58 = vmul.f32 0.6931472, %v3269_v53  ;;  %v3271_v28 = vpop.eup %3270  ;;  %vm5375_vm9 = vmor %vm1579_vm15, %vm1580_vm3 }
 0x307   : > { %v1983_v1 = vand.u32 2147483647, %v5283_v11  ;;  %v5809_v24 = vand.u32 2147483647, %v4903_v7  ;;  %vm1979_vm6 = vweird.f32 %v5283_v11  ;;  %3276 = vrcp.f32 %v5300_v52  ;;  %vm5389_vm0 = vmor %vm1594_vm11, %vm1595_vm7 }
 0x308   : > { %vm5310_vm2 = vcmp.eq.f32.partialorder %v5806_v43, 8.507059e+37  ;;  %vm5330_vm14 = vcmp.eq.f32.partialorder %v1968_v55, 8.507059e+37  ;;  %v5334_v57 = vor.u32 1.1754944e-38, %v1985_v50  ;;  %v5816_v3 = vperm.slane %v5060_v19, %v4279_v13  ;;  %v3273_v32 = vpop.eup %3272 }
 0x309   : > { %vm5318_vm13 = vcmp.eq.f32.partialorder %v5809_v24, 8.507059e+37  ;;  %v5342_v22 = vsel %vm1684_vm10, %v2477_v56, %v2476_v31  ;;  %v5817_v55 = vmax.f32 %v5150_v27, 0.0  ;;  %v2372_v43 = vadd.f32 1.0, %v3271_v28  ;;  %v5350_v24 = vpop.eup %3274 }
 0x30a   : > { %v2034_v21 = vsel %vm1664_vm12, %v5816_v3, %v5004_v59  ;;  %v1967_v50 = vsel %vm5324_vm1, %v5263_v2, %v1963_v42  ;;  %v5353_v13 = vperm.slane %v2228_v63, %v5176_v45  ;;  %v2373_v59 = vadd.f32 1.0, %v3273_v32 }
 0x30b   : > { %v2419_v53 = vadd.f32 %v2401_v58, %v5817_v55  ;;  %v1998_v19 = vand.u32 2147483647, %v5300_v52  ;;  %v2000_v31 = vand.u32 2147483648, %v5300_v52  ;;  %v1975_v27 = vmul.f32 %v5350_v24, %v5283_v11 }
 0x30c   : > { %3278 = vlog2.f32 %v2372_v43  ;;  %v5361_v58 = vsel %vm5330_vm14, %v1971_v18, %v1967_v50  ;;  %vm5363_vm12 = vcmp.eq.f32.partialorder %v1983_v1, 8.507059e+37  ;;  %vm1980_vm14 = vweird.f32 %v5350_v24 }
 0x30d   : > { %v2435_v56 = vmin.f32 %v2419_v53, 100.0  ;;  %3280 = vlog2.f32 %v2373_v59  ;;  %v5822_v18 = vperm.slane %v5117_v25, %v4344_v38  ;;  %vm5823_vm1 = vcmask 589312   ;;  %v5401_v41 = vpop.eup %3276 }
 0x30e   : > { %v2041_v1 = vperm.slane %v1942_v33, %v4573_v14  ;;  %v1976_v28 = vsub.f32 1.0, %v1975_v27  ;;  %vm1994_vm3 = vweird.f32 %v5300_v52  ;;  %v5394_v62 = vor.u32 1.1754944e-38, %v2000_v31 }
 0x30f   : > { %v2036_v42 = vsel %vm5823_vm1, %v5822_v18, %v2034_v21  ;;  %v5826_v38 = vperm.slane %v5129_v37, %v4478_v23  ;;  %v2043_v33 = vperm.slane %v1957_v40, %v4649_v36  ;;  %v5404_v7 = vperm.slane %v2435_v56, %v4750_v6 }
 0x310   : > { %vm1692_vm7 = vcmask 982912   ;;  %v5827_v3 = vperm.slane %v5205_v10, %v4522_v54  ;;  %v1582_v37 = vsel %vm5375_vm9, %v4820_v35, %v4917_v16  ;;  %v1597_v40 = vsel %vm5389_vm0, %v4939_v60, %v5019_v12  ;;  %vm5447_vm0 = vmor %vm1979_vm6, %vm1980_vm14 }
 0x311   : > { %v2038_v25 = vsel %vm1672_vm5, %v5826_v38, %v2036_v42  ;;  %v1977_v10 = vmul.f32 %v5350_v24, %v1976_v28  ;;  %v1990_v32 = vmul.f32 %v5401_v41, %v5300_v52  ;;  %vm5428_vm11 = vcmp.eq.f32.partialorder %v1998_v19, 8.507059e+37 }
 0x312   : > { %v2040_v21 = vsel %vm1676_vm4, %v5827_v3, %v2038_v25  ;;  %v2045_v35 = vperm.slane %v5361_v58, %v4750_v6  ;;  %vm1995_vm9 = vweird.f32 %v5401_v41  ;;  %v1587_v60 = vsel %vm5310_vm2, %v4841_v44, %v1582_v37  ;;  %v3279_v43 = vpop.eup %3278 }
 0x313   : > { %v2042_v53 = vsel %vm1680_vm8, %v2041_v1, %v2040_v21  ;;  %v1608_v12 = vadd.f32 %v5259_v47, %v5298_v9  ;;  %v1991_v50 = vsub.f32 1.0, %v1990_v32  ;;  %v1978_v59 = vadd.f32 %v5350_v24, %v1977_v10  ;;  %v3281_v9 = vpop.eup %3280 }
 0x314   : > { %v2044_v16 = vsel %vm1684_vm10, %v2043_v33, %v2042_v53  ;;  %v1602_v44 = vsel %vm5318_vm13, %v4984_v4, %v1597_v40  ;;  %vm1610_vm2 = vweird.f32 %v5259_v47  ;;  %v2403_v15 = vmul.f32 0.6931472, %v3279_v43 }
 0x315   : > { %vm5832_vm1 = vweird.f32 %v5207_v34  ;;  %v1613_v31 = vand.u32 2147483647, %v5207_v34  ;;  %v5835_v56 = vperm.slane %v4611_v61, %v4478_v23  ;;  %v1683_v4 = vperm.slane %v4850_v20, %v4649_v36 }
 0x316   : > { %vm5459_vm15 = vmor %vm5832_vm1, %vm1610_vm2  ;;  %v2405_v27 = vmul.f32 0.6931472, %v3281_v9  ;;  %v1982_v58 = vsel %vm5447_vm0, %v5350_v24, %v1978_v59  ;;  %v1992_v63 = vmul.f32 %v5401_v41, %v1991_v50  ;;  %v5836_v23 = vmax.f32 %v5194_v0, 0.0 }
 0x317   : > { %v1673_v46 = vsel %vm1672_vm5, %v5835_v56, %v4538_v26  ;;  %v1612_v34 = vsel %vm5459_vm15, %v5259_v47, %v1608_v12  ;;  %v1987_v61 = vsel %vm5363_vm12, %v5334_v57, %v1982_v58  ;;  %vm1614_vm5 = vcmp.eq.f32.partialorder %v1613_v31, 8.507059e+37 }
 0x318   : > { %v2420_v26 = vadd.f32 %v2403_v15, %v5836_v23  ;;  %v5837_v36 = vperm.slane %v4645_v48, %v4522_v54  ;;  %v2421_v0 = vadd.f32 %v2405_v27, %v2293_v17  ;;  %v1993_v47 = vadd.f32 %v5401_v41, %v1992_v63 }
 0x319   : > { %v2047_v24 = vperm.slane %v1987_v61, %v4886_v5  ;;  %v1617_v57 = vsel %vm1614_vm5, %v5256_v51, %v1612_v34  ;;  %v5838_v48 = vperm.slane %v4790_v29, %v4573_v14  ;;  %v1687_v17 = vperm.slane %v1587_v60, %v4750_v6 }
 0x31a   : > { %v1677_v20 = vsel %vm1676_vm4, %v5837_v36, %v1673_v46  ;;  %v2436_v54 = vmin.f32 %v2420_v26, 100.0  ;;  %vm1996_vm4 = vmor %vm1994_vm3, %vm1995_vm9  ;;  %v1691_v51 = vperm.slane %v1602_v44, %v4886_v5  ;;  %v2437_v2 = vmin.f32 %v2421_v0, 100.0 }
 0x31b   : > { %v1681_v49 = vsel %vm1680_vm8, %v5838_v48, %v1677_v20  ;;  %v1997_v52 = vsel %vm1996_vm4, %v5401_v41, %v1993_v47  ;;  %vm5840_vm13 = vcmask 917312   ;;  %v1695_v1 = vperm.slane %v1617_v57, %v5176_v45 }
 0x31c   : > { %v2046_v14 = vsel %vm5840_vm13, %v2045_v35, %v2044_v16  ;;  %v1685_v29 = vsel %vm1684_vm10, %v1683_v4, %v1681_v49  ;;  %v2481_v6 = vperm.slane %v2436_v54, %v4886_v5  ;;  %v2002_v18 = vsel %vm5428_vm11, %v5394_v62, %v1997_v52  ;;  %vm5841_vm8 = vmmov %vm5840_vm13 }
 0x31d   : > { %v1689_v42 = vsel %vm5841_vm8, %v1687_v17, %v1685_v29  ;;  %v2483_v5 = vperm.slane %v2437_v2, %v5176_v45  ;;  %v2049_v8 = vperm.slane %v2002_v18, %v5176_v45  ;;  %v2273_v62 = vsel %vm1692_vm7, %v5107_v30, %v4969_v39  ;;  %vm5845_vm12 = vmmov %vm5841_vm8 }
 0x31e   : > { %v1693_v28 = vsel %vm1692_vm7, %v1691_v51, %v1689_v42  ;;  %v2048_v38 = vsel %vm1692_vm7, %v2047_v24, %v2046_v14  ;;  %vm5842_vm10 = vcmask 1048512   ;;  %v2480_v45 = vsel %vm5845_vm12, %v5404_v7, %v5342_v22 }
 0x31f   : > { %v1697_v25 = vsel %vm5842_vm10, %v1695_v1, %v1693_v28  ;;  %vm5844_vm6 = vmmov %vm5842_vm10  ;;  %v2482_v39 = vsel %vm1692_vm7, %v2481_v6, %v2480_v45 }
 0x320   : > { %v2275_v33 = vsel %vm5844_vm6, %v5353_v13, %v2273_v62  ;;  %vm5846_vm14 = vmmov %vm5844_vm6  ;;  %1699 = vst [vmem:[%s490_s4] sm:$0x1] %v1697_v25 }
 0x321   : > { %v2050_v41 = vsel %vm5846_vm14, %v2049_v8, %v2048_v38 }
 0x322   : > { %2052 = vst [vmem:[%s496_s30] sm:$0x1] %v2050_v41 }
 0x323   : > { %3429 = shalt.err (!%p3426_p9)
}
 0x324   : > { %2944 = dma.vmem_to_hbm [thread:$0]  (%p3711_p3), %s2511_s29, 16, %s2513_s26, %s2488_s27   ;;  %vm5847_vm3 = vmmov %vm5844_vm6 }
 0x325   : > { %v2484_v30 = vsel %vm5847_vm3, %v2483_v5, %v2482_v39  ;;  %s2492_s30 = scalar_lea.sflag [#allocation13], %s439_s0  ;;  %s3444_s28 = sshra.s32 %s2526_s18, 4  ;;  %s3445_s28 = int_to_ptr.hbm [resolvable:$true] %s3444_s28 }
 0x326   : > { %s3446_s2 = scalar_lea.hbm %s3445_s28, 1  ;;  %s3450_s12 = scalar_lea.hbm %s5667_s9, 2 }
 0x327   : > { %p3447_p12 = scmp.ne.s32.totalorder %s3445_s28, %s3446_s2  ;;  %p3451_p5 = scmp.lt.s32.totalorder %s3445_s28, %s5667_s9 }
 0x328   : > { %p3452_p7 = scmp.lt.s32.totalorder %s3450_s12, %s3446_s2 }
 0x329   : > { %p3448_p13 = pnand %p3447_p12, %p3711_p3 }
 0x32a   : > { %p3453_p1 = por %p3452_p7, %p3451_p5 }
 0x32b   : > { %p3449_p0 = pneg %p3448_p13 }
 0x32d   : > { %p3454_p4 = pnand %p3453_p1, %p3449_p0 }
 0x32f   : > { %3457 = shalt.err (!%p3454_p4)
}
 0x330   : > { %2945 = dma.vmem_to_hbm [thread:$0]  (%p3711_p3), %s2524_s25, 16, %s2526_s18, %s2492_s30   ;;  %2277 = vst [vmem:[%s502_s13] sm:$0x1] %v2275_v33 }
 0x331   : > { %s3472_s7 = sshra.s32 %s2539_s23, 4  ;;  %s3478_s27 = scalar_lea.hbm %s5668_s10, 2  ;;  %s3473_s7 = int_to_ptr.hbm [resolvable:$true] %s3472_s7 }
 0x332   : > { %s3474_s0 = scalar_lea.hbm %s3473_s7, 1  ;;  %p3479_p11 = scmp.lt.s32.totalorder %s3473_s7, %s5668_s10 }
 0x333   : > { %p3475_p8 = scmp.ne.s32.totalorder %s3473_s7, %s3474_s0  ;;  %p3480_p9 = scmp.lt.s32.totalorder %s3478_s27, %s3474_s0 }
 0x335   : > { %p3476_p2 = pnand %p3475_p8, %p3711_p3  ;;  %p3481_p12 = por %p3480_p9, %p3479_p11 }
 0x337   : > { %p3477_p10 = pneg %p3476_p2 }
 0x339   : > { %p3482_p13 = pnand %p3481_p12, %p3477_p10 }
 0x33b   : > { %3485 = shalt.err (!%p3482_p13)
}
 0x33c   : > { %s5848_s25 = sld [smem:[#allocation30_spill]]  ;;  %s5850_s13 = scalar_lea.vmem [#allocation15], %s3767_s19 }
 0x33d   : > { %2486 = vst [vmem:[%s5850_s13] sm:$0x1] %v2484_v30  ;;  %s2500_s16 = scalar_lea.sflag [#allocation16], %s3767_s19  ;;  %s3500_s14 = sshra.s32 %s2552_s15, 4  ;;  %s3501_s14 = int_to_ptr.hbm [resolvable:$true] %s3500_s14 }
 0x33e   : > { %s3502_s12 = scalar_lea.hbm %s3501_s14, 1  ;;  %s3506_s7 = scalar_lea.hbm %s5669_s11, 2 }
 0x33f   : > { %p3503_p0 = scmp.ne.s32.totalorder %s3501_s14, %s3502_s12  ;;  %p3507_p1 = scmp.lt.s32.totalorder %s3501_s14, %s5669_s11 }
 0x340   : > { %p3508_p4 = scmp.lt.s32.totalorder %s3506_s7, %s3502_s12 }
 0x341   : > { %p3504_p5 = pnand %p3503_p0, %p3711_p3 }
 0x342   : > { %s5849_s18 = int_to_ptr.vmem [resolvable:$true] %s5848_s25  ;;  %p3509_p8 = por %p3508_p4, %p3507_p1 }
 0x343   : > { %2946 = dma.vmem_to_hbm [thread:$0]  (%p3711_p3), %s5849_s18, 16, %s2539_s23, %s2492_s30  }
 0x344   : > { %p3505_p7 = pneg %p3504_p5 }
 0x346   : > { %p3510_p2 = pnand %p3509_p8, %p3505_p7 }
 0x348   : > { %3513 = shalt.err (!%p3510_p2)
}
 0x349   : > { %2947 = dma.vmem_to_hbm [thread:$0]  (%p3711_p3), %s2550_s17, 16, %s2552_s15, %s2500_s16  }
 0x34a PF: > { %s5851_s19 = sld [smem:[#allocation24_spill]]  ;;  %p5853_p10 = scmp.ge.s32.totalorder %s3572_s22, 2 }
 0x34c   : > { %p2967_p11 = pnand %p5853_p10, %p3680_p6 }
 0x34e   : > { %p2968_p9 = pneg %p2967_p11 }
 0x350   : > { %s2563_s30 = sand.u32 1, %s5851_s19  }
 0x351   : > { %s2564_s26 = scalar_lea.sflag [#allocation5], %s2563_s30 }
 0x352   : > { %3547 = dma.done.wait (%p2968_p9), %s2564_s26, 16  }
 0x353   : > { %3549 = vsyncadd (%p2968_p9), %s2564_s26, 4294967280  ;;  %s5854_s27 = sadd.s32 4294967294, %s3572_s22  }
 0x354   : > { %s2572_s24 = sand.u32 1, %s5854_s27  }
 0x355   : > { %s2573_s28 = scalar_lea.sflag [#allocation13], %s2572_s24 }
 0x356   : > { %3551 = dma.done.wait (%p2968_p9), %s2573_s28, 32  }
 0x357   : > { %3553 = vsyncadd (%p2968_p9), %s2573_s28, 4294967264  ;;  %s2591_s2 = scalar_lea.sflag [#allocation16], %s2563_s30 }
 0x358   : > { %3555 = dma.done.wait (%p2968_p9), %s2591_s2, 16  }
 0x359   : > { %3557 = vsyncadd (%p2968_p9), %s2591_s2, 4294967280  ;;  %s5855_s22 = sld [smem:[#allocation27_spill]]  ;;  %s5858_s19 = smov %s3564_s20 }
 0x35a   : > { %s5856_s17 = sld [smem:[#allocation25_spill]] }
 0x35b   : > { %s5857_s21 = sld [smem:[#allocation29_spill]] }
 0x35f   : > { %p36_p3 = scmp.ge.s32.totalorder %s5855_s22, 4  }
 0x360   : > { %s5859_s20 = smov %s5856_s17 }
 0x361   :  { %38 = sbr.rel (!%p36_p3) target bundleno = 17 (0x11), region = 167 }
 0x366   :  { %2596 = vsyncpa [#allocation4], 1 }
 0x367   :  { %2598 = vsyncpa [#allocation4 + $0x1], 1 }
 0x368   :  { %2599 = vsyncpa [#allocation7], 1 }
 0x369   :  { %2601 = vsyncpa [#allocation7 + $0x1], 1 }
 0x36a   :  { %2602 = vsyncpa [#allocation10], 1 }
 0x36b   :  { %2603 = vsyncpa [#allocation5], 1 }
 0x36c   :  { %2605 = vsyncpa [#allocation5 + $0x1], 1 }
 0x36d   :  { %2606 = vsyncpa [#allocation13], 1 }
 0x36e   :  { %2608 = vsyncpa [#allocation13 + $0x1], 1 }
 0x36f   :  { %2609 = vsyncpa [#allocation16], 1 }
 0x370   :  { %2611 = vsyncpa [#allocation16 + $0x1], 1 }

</bundles_post_ra>
